<compile_context>
chip_gen: v7x
topology: tpu7x:2x2x1
jax: 0.10.0
libtpu: 0.0.40
codegen_flags: <defaults>
</compile_context>

<pallas_src>
import functools

import jax
import jax.numpy as jnp
from jax.experimental import pallas as pl
from jax.experimental.pallas import tpu as pltpu

EPS = 1e-5
ROW_TILE = 512     # rows per grid step (512 amortizes ~0.35us/step pipeline cost)
LANE = 128         # channel padding multiple for lane-dense outputs


def _round_up(x, m):
    return (x + m - 1) // m * m


def _pad_rows(a, mult):
    m = a.shape[0]
    mp = _round_up(m, mult)
    if mp == m:
        return a, m
    return jnp.pad(a, ((0, mp - m), (0, 0))), m


# ---------------------------------------------------------------------------
# Kernel A: patches @ W' + b'  (BN pre-folded into W', b')  [+ ReLU]
# ---------------------------------------------------------------------------
def _matmul_bias_kernel(p_ref, w_ref, b_ref, o_ref, *, apply_relu):
    z = jnp.dot(p_ref[...], w_ref[...], preferred_element_type=jnp.float32)
    z = z + b_ref[...]
    if apply_relu:
        z = jnp.maximum(z, 0.0)
    o_ref[...] = z.astype(o_ref.dtype)


def matmul_bias(patches, w, b, *, apply_relu, out_dtype=jnp.float32, tm=ROW_TILE):
    patches, m_orig = _pad_rows(patches, tm)
    mp, k = patches.shape
    c = w.shape[1]
    out = pl.pallas_call(
        functools.partial(_matmul_bias_kernel, apply_relu=apply_relu),
        out_shape=jax.ShapeDtypeStruct((mp, c), out_dtype),
        grid=(mp // tm,),
        in_specs=[
            pl.BlockSpec((tm, k), lambda i: (i, 0)),
            pl.BlockSpec((k, c), lambda i: (0, 0)),
            pl.BlockSpec((1, c), lambda i: (0, 0)),
        ],
        out_specs=pl.BlockSpec((tm, c), lambda i: (i, 0)),
        compiler_params=pltpu.CompilerParams(
            dimension_semantics=("parallel",)),
    )(patches, w, b.reshape(1, c))
    return out[:m_orig] if m_orig != mp else out


# ---------------------------------------------------------------------------
# Kernel B: relu(ch+sp) -> 1x1 squeeze conv -> sigmoid -> gate -> concat(y, y1)
# ---------------------------------------------------------------------------
def _gate_kernel(ch_ref, sp_ref, wsq_ref, bsq_ref, o_ref):
    ch = ch_ref[...]
    sp = sp_ref[...]
    s = jnp.maximum(ch + sp, 0.0)
    logit = jnp.dot(s, wsq_ref[...], preferred_element_type=jnp.float32)
    logit = logit + bsq_ref[...]
    a = 1.0 / (1.0 + jnp.exp(-logit))          # (tm, 1) spatial attention map
    y = a * ch                                  # gate * channel_data
    y1 = (1.0 - a) * sp                         # (1 - gate) * spatial_data
    o_ref[...] = jnp.concatenate([y, y1], axis=-1).astype(o_ref.dtype)


def gate_concat(ch, sp, w_sq, b_sq, *, out_dtype=jnp.bfloat16, tm=ROW_TILE):
    ch, m_orig = _pad_rows(ch, tm)
    sp, _ = _pad_rows(sp, tm)
    mp, cp = ch.shape
    out = pl.pallas_call(
        _gate_kernel,
        out_shape=jax.ShapeDtypeStruct((mp, 2 * cp), out_dtype),
        grid=(mp // tm,),
        in_specs=[
            pl.BlockSpec((tm, cp), lambda i: (i, 0)),
            pl.BlockSpec((tm, cp), lambda i: (i, 0)),
            pl.BlockSpec((cp, 1), lambda i: (0, 0)),
            pl.BlockSpec((1, 1), lambda i: (0, 0)),
        ],
        out_specs=pl.BlockSpec((tm, 2 * cp), lambda i: (i, 0)),
        compiler_params=pltpu.CompilerParams(
            dimension_semantics=("parallel",)),
    )(ch, sp, w_sq, b_sq.reshape(1, 1))
    return out[:m_orig] if m_orig != mp else out


# ---------------------------------------------------------------------------
# Glue: im2col, parameter construction, BN fold + channel padding, forward.
# ---------------------------------------------------------------------------
def im2col(x_nhwc, ksize, padding):
    n, h, w, c = x_nhwc.shape
    xp = jnp.pad(x_nhwc, ((0, 0), (padding, padding), (padding, padding), (0, 0)))
    cols = []
    for ky in range(ksize):
        for kx in range(ksize):
            cols.append(xp[:, ky:ky + h, kx:kx + w, :])
    # K-dim order: (ky, kx, cin) — matches HWIO-flattened weights.
    return jnp.concatenate(cols, axis=-1).reshape(n * h * w, ksize * ksize * c)


def _fold_bn_into_conv(w_hwio, b, gamma, beta, mean, var):
    scale = gamma / jnp.sqrt(var + EPS)
    shift = beta - mean * scale
    return w_hwio * scale, b * scale + shift


def make_params(key, cin, cout, size):
    """PyTorch-layout parameters (HWIO conv weights, per-channel BN stats)."""
    ks = jax.random.split(key, 11)
    p = {}
    p["w_conv1"] = 0.1 * jax.random.normal(ks[0], (3, 3, cin, cout), jnp.float32)
    p["b_conv1"] = 0.05 * jax.random.normal(ks[1], (cout,), jnp.float32)
    p["w_conv2"] = 0.1 * jax.random.normal(ks[2], (5, 5, cout, cout), jnp.float32)
    p["b_conv2"] = 0.05 * jax.random.normal(ks[3], (cout,), jnp.float32)
    p["w_sq"] = 0.3 * jax.random.normal(ks[4], (cout, 1), jnp.float32)
    p["b_sq"] = 0.05 * jax.random.normal(ks[5], (1,), jnp.float32)
    p["w_conv3"] = 0.1 * jax.random.normal(ks[6], (size, size, 2 * cout, cout),
                                           jnp.float32)
    p["b_conv3"] = 0.05 * jax.random.normal(ks[7], (cout,), jnp.float32)
    for name, k in (("bn1", ks[8]), ("bn2", ks[9]), ("bn3", ks[10])):
        p[f"{name}_gamma"] = 1.0 + 0.1 * jax.random.normal(k, (cout,), jnp.float32)
        p[f"{name}_beta"] = 0.1 * jax.random.normal(
            jax.random.fold_in(k, 1), (cout,), jnp.float32)
        p[f"{name}_mean"] = 0.1 * jax.random.normal(
            jax.random.fold_in(k, 2), (cout,), jnp.float32)
        p[f"{name}_var"] = 1.0 + 0.1 * jax.random.uniform(
            jax.random.fold_in(k, 3), (cout,), jnp.float32)
    return p


def prepare_kernel_params(p, cin, cout, size):
    """One-time host-side transform: fold BN into conv weights and zero-pad the
    channel dimension to a lane-dense multiple of 128 (padded channels stay
    exactly zero through every stage)."""
    cp = _round_up(cout, LANE)
    kp = {}

    w1, b1 = _fold_bn_into_conv(p["w_conv1"], p["b_conv1"], p["bn1_gamma"],
                                p["bn1_beta"], p["bn1_mean"], p["bn1_var"])
    w1p = jnp.zeros((3, 3, cin, cp), jnp.float32).at[..., :cout].set(w1)
    kp["w1"] = w1p.reshape(9 * cin, cp)                       # small K -> keep f32
    kp["b1"] = jnp.zeros((cp,), jnp.float32).at[:cout].set(b1)

    w2, b2 = _fold_bn_into_conv(p["w_conv2"], p["b_conv2"], p["bn2_gamma"],
                                p["bn2_beta"], p["bn2_mean"], p["bn2_var"])
    w2p = jnp.zeros((5, 5, cp, cp), jnp.float32).at[:, :, :cout, :cout].set(w2)
    kp["w2"] = w2p.reshape(25 * cp, cp).astype(jnp.bfloat16)  # 25x-expanded K -> bf16
    kp["b2"] = jnp.zeros((cp,), jnp.float32).at[:cout].set(b2)

    kp["w_sq"] = jnp.zeros((cp, 1), jnp.float32).at[:cout].set(p["w_sq"])
    kp["b_sq"] = p["b_sq"].astype(jnp.float32)

    w3, b3 = _fold_bn_into_conv(p["w_conv3"], p["b_conv3"], p["bn3_gamma"],
                                p["bn3_beta"], p["bn3_mean"], p["bn3_var"])
    w3p = jnp.zeros((size, size, 2 * cp, cp), jnp.float32)
    w3p = w3p.at[:, :, :cout, :cout].set(w3[:, :, :cout, :])          # y half
    w3p = w3p.at[:, :, cp:cp + cout, :cout].set(w3[:, :, cout:, :])   # y1 half
    kp["w3"] = w3p.reshape(size * size * 2 * cp, cp).astype(jnp.bfloat16)
    kp["b3"] = jnp.zeros((cp,), jnp.float32).at[:cout].set(b3)
    return kp


@functools.partial(jax.jit, static_argnames=("cout", "size"))
def spatialblock_forward(x_nchw, channel_nchw, kp, cout, size):
    n, _, h, w = x_nchw.shape
    cp = kp["w1"].shape[1]                       # padded channel count (static)
    m = n * h * w

    x = jnp.transpose(x_nchw, (0, 2, 3, 1)).astype(jnp.float32)          # NHWC
    ch = jnp.transpose(channel_nchw, (0, 2, 3, 1)).astype(jnp.float32)
    ch = jnp.pad(ch, ((0, 0), (0, 0), (0, 0), (0, cp - cout))).reshape(m, cp)

    # conv1: 3x3, pad 1, BN folded, ReLU.  bf16 output feeds conv2's im2col.
    patches1 = im2col(x, 3, 1)
    c1 = matmul_bias(patches1, kp["w1"], kp["b1"],
                     apply_relu=True, out_dtype=jnp.bfloat16)

    # conv2: 5x5, pad 2, BN folded, ReLU (spatial branch), f32 for gating.
    patches2 = im2col(c1.reshape(n, h, w, cp), 5, 2)          # bf16 patches
    sp = matmul_bias(patches2, kp["w2"], kp["b2"],
                     apply_relu=True, out_dtype=jnp.float32)

    # relu(channel + spatial) -> 1x1 squeeze -> sigmoid -> gate -> concat.
    combined = gate_concat(ch, sp, kp["w_sq"], kp["b_sq"],
                           out_dtype=jnp.bfloat16)

    # final_conv: size x size, pad size//2, BN folded, NO ReLU.
    patches3 = im2col(combined.reshape(n, h, w, 2 * cp), size, size // 2)
    out = matmul_bias(patches3, kp["w3"], kp["b3"],
                      apply_relu=False, out_dtype=jnp.float32)

    out = out[:, :cout].reshape(n, h, w, cout)
    return jnp.transpose(out, (0, 3, 1, 2))                   # back to NCHW


# ---------------------------------------------------------------------------
# Pure-JAX f32 reference (same folded-BN inference semantics).
# ---------------------------------------------------------------------------
def reference_forward(x_nchw, channel_nchw, p, cout, size):
    x = jnp.transpose(x_nchw, (0, 2, 3, 1)).astype(jnp.float32)
    ch = jnp.transpose(channel_nchw, (0, 2, 3, 1)).astype(jnp.float32)

    def conv(xi, w, pad):
        return jax.lax.conv_general_dilated(
            xi, w, window_strides=(1, 1), padding=((pad, pad), (pad, pad)),
            dimension_numbers=("NHWC", "HWIO", "NHWC"))

    def bn(z, name):
        scale = p[f"{name}_gamma"] / jnp.sqrt(p[f"{name}_var"] + EPS)
        shift = p[f"{name}_beta"] - p[f"{name}_mean"] * scale
        return z * scale + shift

    c1 = jnp.maximum(bn(conv(x, p["w_conv1"], 1) + p["b_conv1"], "bn1"), 0.0)
    sp = jnp.maximum(bn(conv(c1, p["w_conv2"], 2) + p["b_conv2"], "bn2"), 0.0)
    s = jnp.maximum(ch + sp, 0.0)
    logit = jnp.einsum("nhwc,co->nhwo", s, p["w_sq"]) + p["b_sq"]
    a = jax.nn.sigmoid(logit)
    y = a * ch
    y1 = (1.0 - a) * sp
    combined = jnp.concatenate([y, y1], axis=-1)
    out = bn(conv(combined, p["w_conv3"], size // 2) + p["b_conv3"], "bn3")
    return jnp.transpose(out, (0, 3, 1, 2))


if __name__ == "__main__":
    N, CIN, COUT, H, W, SIZE = 2, 4, 8, 16, 16, 3

    key = jax.random.PRNGKey(0)
    kx, kc, kparam = jax.random.split(key, 3)
    x = jax.random.normal(kx, (N, CIN, H, W), jnp.float32)
    channel_data = jax.random.normal(kc, (N, COUT, H, W), jnp.float32)

    params = make_params(kparam, CIN, COUT, SIZE)
    kparams = prepare_kernel_params(params, CIN, COUT, SIZE)   # one-time fold+pad

    out = spatialblock_forward(x, channel_data, kparams, COUT, SIZE)
    out = jax.block_until_ready(out)
    assert out.shape == (N, COUT, H, W), out.shape

    ref = jax.block_until_ready(
        reference_forward(x, channel_data, params, COUT, SIZE))
    max_err = float(jnp.max(jnp.abs(out - ref)))
    # bf16 matmul inputs (f32 accumulation) give ~1e-3 relative error per conv.
    assert max_err < 5e-2, f"mismatch vs reference: {max_err}"

    print("KERNEL_OK")
</pallas_src>

<mosaic_0001>
module attributes {stable_mosaic.version = 11 : i64} {
  func.func @_matmul_bias_kernel(%arg0: i32, %arg1: memref<512x36xf32, #tpu.memory_space<vmem>>, %arg2: memref<36x128xf32, #tpu.memory_space<vmem>>, %arg3: memref<1x128xf32, #tpu.memory_space<vmem>>, %arg4: memref<512x128xbf16, #tpu.memory_space<vmem>>) attributes {dimension_semantics = [#tpu.dimension_semantics<parallel>], iteration_bounds = array<i64: 1>, scalar_prefetch = 0 : i64, scratch_operands = 0 : i64, tpu.core_type = #tpu.core_type<tc>, window_params = [{transform_indices = @transform_0, window_bounds = array<i64: 512, 36>}, {pipeline_mode = #tpu.pipeline_mode<synchronous>, transform_indices = @transform_1, window_bounds = array<i64: 36, 128>}, {pipeline_mode = #tpu.pipeline_mode<synchronous>, transform_indices = @transform_2, window_bounds = array<i64: 1, 128>}, {transform_indices = @transform_3, window_bounds = array<i64: 512, 128>}]} {
    %c0 = arith.constant 0 : index
    %c0_0 = arith.constant 0 : index
    %0 = vector.load %arg1[%c0, %c0_0] : memref<512x36xf32, #tpu.memory_space<vmem>>, vector<512x36xf32>
    %c0_1 = arith.constant 0 : index
    %c0_2 = arith.constant 0 : index
    %1 = vector.load %arg2[%c0_1, %c0_2] : memref<36x128xf32, #tpu.memory_space<vmem>>, vector<36x128xf32>
    %cst = arith.constant dense<0.000000e+00> : vector<512x128xf32>
    %2 = tpu.matmul %0, %1, %cst {dimension_numbers = #tpu.dot_dimension_numbers<[1], [0], [0], [1], [0, 0, 1, 1], [], []>} : vector<512x36xf32>, vector<36x128xf32>, vector<512x128xf32> -> vector<512x128xf32>
    %c0_3 = arith.constant 0 : index
    %c0_4 = arith.constant 0 : index
    %3 = vector.load %arg3[%c0_3, %c0_4] : memref<1x128xf32, #tpu.memory_space<vmem>>, vector<1x128xf32>
    %4 = vector.broadcast %3 : vector<1x128xf32> to vector<512x128xf32>
    %5 = arith.addf %2, %4 : vector<512x128xf32>
    %cst_5 = arith.constant 0.000000e+00 : f32
    %6 = vector.broadcast %cst_5 : f32 to vector<512x128xf32>
    %7 = arith.maximumf %5, %6 : vector<512x128xf32>
    %8 = arith.truncf %7 : vector<512x128xf32> to vector<512x128xbf16>
    %c0_6 = arith.constant 0 : index
    %c0_7 = arith.constant 0 : index
    %9 = vector.load %arg4[%c0_6, %c0_7] : memref<512x128xbf16, #tpu.memory_space<vmem>>, vector<512x128xbf16>
    tpu.vector_store %arg4[%c0_6, %c0_7], %8 {strides = array<i32>} : memref<512x128xbf16, #tpu.memory_space<vmem>>, vector<512x128xbf16>,
    return
  }
  func.func @transform_0(%arg0: i32) -> (i32, i32) {
    %c0_i32 = arith.constant 0 : i32
    %c0_i32_0 = arith.constant 0 : i32
    return %arg0, %c0_i32 : i32, i32
  }
  func.func @transform_1(%arg0: i32) -> (i32, i32) {
    %c0_i32 = arith.constant 0 : i32
    %c0_i32_0 = arith.constant 0 : i32
    %c0_i32_1 = arith.constant 0 : i32
    return %c0_i32, %c0_i32_0 : i32, i32
  }
  func.func @transform_2(%arg0: i32) -> (i32, i32) {
    %c0_i32 = arith.constant 0 : i32
    %c0_i32_0 = arith.constant 0 : i32
    %c0_i32_1 = arith.constant 0 : i32
    return %c0_i32, %c0_i32_0 : i32, i32
  }
  func.func @transform_3(%arg0: i32) -> (i32, i32) {
    %c0_i32 = arith.constant 0 : i32
    %c0_i32_0 = arith.constant 0 : i32
    return %arg0, %c0_i32 : i32, i32
  }
}

module attributes {stable_mosaic.version = 11 : i64} {
  func.func @_matmul_bias_kernel(%arg0: i32, %arg1: memref<512x3200xbf16, #tpu.memory_space<vmem>>, %arg2: memref<3200x128xbf16, #tpu.memory_space<vmem>>, %arg3: memref<1x128xf32, #tpu.memory_space<vmem>>, %arg4: memref<512x128xf32, #tpu.memory_space<vmem>>) attributes {dimension_semantics = [#tpu.dimension_semantics<parallel>], iteration_bounds = array<i64: 1>, scalar_prefetch = 0 : i64, scratch_operands = 0 : i64, tpu.core_type = #tpu.core_type<tc>, window_params = [{transform_indices = @transform_0, window_bounds = array<i64: 512, 3200>}, {pipeline_mode = #tpu.pipeline_mode<synchronous>, transform_indices = @transform_1, window_bounds = array<i64: 3200, 128>}, {pipeline_mode = #tpu.pipeline_mode<synchronous>, transform_indices = @transform_2, window_bounds = array<i64: 1, 128>}, {transform_indices = @transform_3, window_bounds = array<i64: 512, 128>}]} {
    %c0 = arith.constant 0 : index
    %c0_0 = arith.constant 0 : index
    %0 = vector.load %arg1[%c0, %c0_0] : memref<512x3200xbf16, #tpu.memory_space<vmem>>, vector<512x3200xbf16>
    %c0_1 = arith.constant 0 : index
    %c0_2 = arith.constant 0 : index
    %1 = vector.load %arg2[%c0_1, %c0_2] : memref<3200x128xbf16, #tpu.memory_space<vmem>>, vector<3200x128xbf16>
    %cst = arith.constant dense<0.000000e+00> : vector<512x128xf32>
    %2 = tpu.matmul %0, %1, %cst {dimension_numbers = #tpu.dot_dimension_numbers<[1], [0], [0], [1], [0, 0, 1, 1], [], []>} : vector<512x3200xbf16>, vector<3200x128xbf16>, vector<512x128xf32> -> vector<512x128xf32>
    %c0_3 = arith.constant 0 : index
    %c0_4 = arith.constant 0 : index
    %3 = vector.load %arg3[%c0_3, %c0_4] : memref<1x128xf32, #tpu.memory_space<vmem>>, vector<1x128xf32>
    %4 = vector.broadcast %3 : vector<1x128xf32> to vector<512x128xf32>
    %5 = arith.addf %2, %4 : vector<512x128xf32>
    %cst_5 = arith.constant 0.000000e+00 : f32
    %6 = vector.broadcast %cst_5 : f32 to vector<512x128xf32>
    %7 = arith.maximumf %5, %6 : vector<512x128xf32>
    %c0_6 = arith.constant 0 : index
    %c0_7 = arith.constant 0 : index
    %8 = vector.load %arg4[%c0_6, %c0_7] : memref<512x128xf32, #tpu.memory_space<vmem>>, vector<512x128xf32>
    tpu.vector_store %arg4[%c0_6, %c0_7], %7 {strides = array<i32>} : memref<512x128xf32, #tpu.memory_space<vmem>>, vector<512x128xf32>,
    return
  }
  func.func @transform_0(%arg0: i32) -> (i32, i32) {
    %c0_i32 = arith.constant 0 : i32
    %c0_i32_0 = arith.constant 0 : i32
    return %arg0, %c0_i32 : i32, i32
  }
  func.func @transform_1(%arg0: i32) -> (i32, i32) {
    %c0_i32 = arith.constant 0 : i32
    %c0_i32_0 = arith.constant 0 : i32
    %c0_i32_1 = arith.constant 0 : i32
    return %c0_i32, %c0_i32_0 : i32, i32
  }
  func.func @transform_2(%arg0: i32) -> (i32, i32) {
    %c0_i32 = arith.constant 0 : i32
    %c0_i32_0 = arith.constant 0 : i32
    %c0_i32_1 = arith.constant 0 : i32
    return %c0_i32, %c0_i32_0 : i32, i32
  }
  func.func @transform_3(%arg0: i32) -> (i32, i32) {
    %c0_i32 = arith.constant 0 : i32
    %c0_i32_0 = arith.constant 0 : i32
    return %arg0, %c0_i32 : i32, i32
  }
}

module attributes {stable_mosaic.version = 11 : i64} {
  func.func @_gate_kernel(%arg0: i32, %arg1: memref<512x128xf32, #tpu.memory_space<vmem>>, %arg2: memref<512x128xf32, #tpu.memory_space<vmem>>, %arg3: memref<128x1xf32, #tpu.memory_space<vmem>>, %arg4: memref<1x1xf32, #tpu.memory_space<vmem>>, %arg5: memref<512x256xbf16, #tpu.memory_space<vmem>>) attributes {dimension_semantics = [#tpu.dimension_semantics<parallel>], iteration_bounds = array<i64: 1>, scalar_prefetch = 0 : i64, scratch_operands = 0 : i64, tpu.core_type = #tpu.core_type<tc>, window_params = [{transform_indices = @transform_0, window_bounds = array<i64: 512, 128>}, {transform_indices = @transform_1, window_bounds = array<i64: 512, 128>}, {pipeline_mode = #tpu.pipeline_mode<synchronous>, transform_indices = @transform_2, window_bounds = array<i64: 128, 1>}, {pipeline_mode = #tpu.pipeline_mode<synchronous>, transform_indices = @transform_3, window_bounds = array<i64: 1, 1>}, {transform_indices = @transform_4, window_bounds = array<i64: 512, 256>}]} {
    %c0 = arith.constant 0 : index
    %c0_0 = arith.constant 0 : index
    %0 = vector.load %arg1[%c0, %c0_0] : memref<512x128xf32, #tpu.memory_space<vmem>>, vector<512x128xf32>
    %c0_1 = arith.constant 0 : index
    %c0_2 = arith.constant 0 : index
    %1 = vector.load %arg2[%c0_1, %c0_2] : memref<512x128xf32, #tpu.memory_space<vmem>>, vector<512x128xf32>
    %2 = arith.addf %0, %1 : vector<512x128xf32>
    %cst = arith.constant 0.000000e+00 : f32
    %3 = vector.broadcast %cst : f32 to vector<512x128xf32>
    %4 = arith.maximumf %2, %3 : vector<512x128xf32>
    %c0_3 = arith.constant 0 : index
    %c0_4 = arith.constant 0 : index
    %5 = vector.load %arg3[%c0_3, %c0_4] : memref<128x1xf32, #tpu.memory_space<vmem>>, vector<128x1xf32>
    %cst_5 = arith.constant dense<0.000000e+00> : vector<512x1xf32>
    %6 = tpu.matmul %4, %5, %cst_5 {dimension_numbers = #tpu.dot_dimension_numbers<[1], [0], [0], [1], [0, 0, 1, 1], [], []>} : vector<512x128xf32>, vector<128x1xf32>, vector<512x1xf32> -> vector<512x1xf32>
    %c0_6 = arith.constant 0 : index
    %c0_7 = arith.constant 0 : index
    %7 = vector.load %arg4[%c0_6, %c0_7] : memref<1x1xf32, #tpu.memory_space<vmem>>, vector<1x1xf32>
    %8 = vector.broadcast %7 : vector<1x1xf32> to vector<512x1xf32>
    %9 = arith.addf %6, %8 : vector<512x1xf32>
    %cst_8 = arith.constant 0.000000e+00 : f32
    %10 = vector.broadcast %cst_8 : f32 to vector<512x1xf32>
    %11 = arith.subf %10, %9 : vector<512x1xf32>
    %12 = math.exp %11 : vector<512x1xf32>
    %cst_9 = arith.constant 1.000000e+00 : f32
    %13 = vector.broadcast %cst_9 : f32 to vector<512x1xf32>
    %14 = arith.addf %13, %12 : vector<512x1xf32>
    %cst_10 = arith.constant 1.000000e+00 : f32
    %15 = vector.broadcast %cst_10 : f32 to vector<512x1xf32>
    %16 = arith.divf %15, %14 : vector<512x1xf32>
    %17 = vector.broadcast %16 : vector<512x1xf32> to vector<512x128xf32>
    %18 = arith.mulf %17, %0 : vector<512x128xf32>
    %cst_11 = arith.constant 1.000000e+00 : f32
    %19 = vector.broadcast %cst_11 : f32 to vector<512x1xf32>
    %20 = arith.subf %19, %16 : vector<512x1xf32>
    %21 = vector.broadcast %20 : vector<512x1xf32> to vector<512x128xf32>
    %22 = arith.mulf %21, %1 : vector<512x128xf32>
    %23 = tpu.concatenate %18, %22 in 1 : vector<512x128xf32>, vector<512x128xf32> -> vector<512x256xf32>
    %24 = arith.truncf %23 : vector<512x256xf32> to vector<512x256xbf16>
    %c0_12 = arith.constant 0 : index
    %c0_13 = arith.constant 0 : index
    %25 = vector.load %arg5[%c0_12, %c0_13] : memref<512x256xbf16, #tpu.memory_space<vmem>>, vector<512x256xbf16>
    tpu.vector_store %arg5[%c0_12, %c0_13], %24 {strides = array<i32>} : memref<512x256xbf16, #tpu.memory_space<vmem>>, vector<512x256xbf16>,
    return
  }
  func.func @transform_0(%arg0: i32) -> (i32, i32) {
    %c0_i32 = arith.constant 0 : i32
    %c0_i32_0 = arith.constant 0 : i32
    return %arg0, %c0_i32 : i32, i32
  }
  func.func @transform_1(%arg0: i32) -> (i32, i32) {
    %c0_i32 = arith.constant 0 : i32
    %c0_i32_0 = arith.constant 0 : i32
    return %arg0, %c0_i32 : i32, i32
  }
  func.func @transform_2(%arg0: i32) -> (i32, i32) {
    %c0_i32 = arith.constant 0 : i32
    %c0_i32_0 = arith.constant 0 : i32
    %c0_i32_1 = arith.constant 0 : i32
    return %c0_i32, %c0_i32_0 : i32, i32
  }
  func.func @transform_3(%arg0: i32) -> (i32, i32) {
    %c0_i32 = arith.constant 0 : i32
    %c0_i32_0 = arith.constant 0 : i32
    %c0_i32_1 = arith.constant 0 : i32
    return %c0_i32, %c0_i32_0 : i32, i32
  }
  func.func @transform_4(%arg0: i32) -> (i32, i32) {
    %c0_i32 = arith.constant 0 : i32
    %c0_i32_0 = arith.constant 0 : i32
    return %arg0, %c0_i32 : i32, i32
  }
}

module attributes {stable_mosaic.version = 11 : i64} {
  func.func @_matmul_bias_kernel(%arg0: i32, %arg1: memref<512x2304xbf16, #tpu.memory_space<vmem>>, %arg2: memref<2304x128xbf16, #tpu.memory_space<vmem>>, %arg3: memref<1x128xf32, #tpu.memory_space<vmem>>, %arg4: memref<512x128xf32, #tpu.memory_space<vmem>>) attributes {dimension_semantics = [#tpu.dimension_semantics<parallel>], iteration_bounds = array<i64: 1>, scalar_prefetch = 0 : i64, scratch_operands = 0 : i64, tpu.core_type = #tpu.core_type<tc>, window_params = [{transform_indices = @transform_0, window_bounds = array<i64: 512, 2304>}, {pipeline_mode = #tpu.pipeline_mode<synchronous>, transform_indices = @transform_1, window_bounds = array<i64: 2304, 128>}, {pipeline_mode = #tpu.pipeline_mode<synchronous>, transform_indices = @transform_2, window_bounds = array<i64: 1, 128>}, {transform_indices = @transform_3, window_bounds = array<i64: 512, 128>}]} {
    %c0 = arith.constant 0 : index
    %c0_0 = arith.constant 0 : index
    %0 = vector.load %arg1[%c0, %c0_0] : memref<512x2304xbf16, #tpu.memory_space<vmem>>, vector<512x2304xbf16>
    %c0_1 = arith.constant 0 : index
    %c0_2 = arith.constant 0 : index
    %1 = vector.load %arg2[%c0_1, %c0_2] : memref<2304x128xbf16, #tpu.memory_space<vmem>>, vector<2304x128xbf16>
    %cst = arith.constant dense<0.000000e+00> : vector<512x128xf32>
    %2 = tpu.matmul %0, %1, %cst {dimension_numbers = #tpu.dot_dimension_numbers<[1], [0], [0], [1], [0, 0, 1, 1], [], []>} : vector<512x2304xbf16>, vector<2304x128xbf16>, vector<512x128xf32> -> vector<512x128xf32>
    %c0_3 = arith.constant 0 : index
    %c0_4 = arith.constant 0 : index
    %3 = vector.load %arg3[%c0_3, %c0_4] : memref<1x128xf32, #tpu.memory_space<vmem>>, vector<1x128xf32>
    %4 = vector.broadcast %3 : vector<1x128xf32> to vector<512x128xf32>
    %5 = arith.addf %2, %4 : vector<512x128xf32>
    %c0_5 = arith.constant 0 : index
    %c0_6 = arith.constant 0 : index
    %6 = vector.load %arg4[%c0_5, %c0_6] : memref<512x128xf32, #tpu.memory_space<vmem>>, vector<512x128xf32>
    tpu.vector_store %arg4[%c0_5, %c0_6], %5 {strides = array<i32>} : memref<512x128xf32, #tpu.memory_space<vmem>>, vector<512x128xf32>,
    return
  }
  func.func @transform_0(%arg0: i32) -> (i32, i32) {
    %c0_i32 = arith.constant 0 : i32
    %c0_i32_0 = arith.constant 0 : i32
    return %arg0, %c0_i32 : i32, i32
  }
  func.func @transform_1(%arg0: i32) -> (i32, i32) {
    %c0_i32 = arith.constant 0 : i32
    %c0_i32_0 = arith.constant 0 : i32
    %c0_i32_1 = arith.constant 0 : i32
    return %c0_i32, %c0_i32_0 : i32, i32
  }
  func.func @transform_2(%arg0: i32) -> (i32, i32) {
    %c0_i32 = arith.constant 0 : i32
    %c0_i32_0 = arith.constant 0 : i32
    %c0_i32_1 = arith.constant 0 : i32
    return %c0_i32, %c0_i32_0 : i32, i32
  }
  func.func @transform_3(%arg0: i32) -> (i32, i32) {
    %c0_i32 = arith.constant 0 : i32
    %c0_i32_0 = arith.constant 0 : i32
    return %arg0, %c0_i32 : i32, i32
  }
}

</mosaic_0001>

<bundles_post_ra>
// kernel: spatialblock_forward.4
= control target key start
LH: loop header
LB: loop body
LE: loop exit
PB: predicated region body
PF: predicated region fallthrough
CT: control target
= control target key end

     0   :  { %vm90_vm0 = vcmask 293888   ;;  %vm283_vm1 = vcmask 1043456   ;;  %s2090_s1 = inlined_call_operand.vmem [shape: f32[36,128], index: 1, kind: input, shape index: {}]   ;;  %s2091_s0 = inlined_call_operand.vmem [shape: f32[512,36], index: 0, kind: input, shape index: {}]   ;;  %s2092_s2 = inlined_call_operand.vmem [shape: f32[1,128], index: 2, kind: input, shape index: {}]   ;;  %s2093_s3 = inlined_call_operand.vmem [shape: bf16[512,128], index: 3, kind: output, shape index: {}]  }
   0x1   :  { %v78_v0 = vld [vmem:[%s2090_s1] sm:$0xff]  ;;  %v79_v1 = vld [vmem:[%s2090_s1 + $0x8] sm:$0xff]  ;;  %v80_v2 = vld [vmem:[%s2090_s1 + $0x10] sm:$0xff] }
   0x2   :  { %v1620_v3 = vpack.c.bf16 %v79_v1, %v78_v0  ;;  %v81_v4 = vld [vmem:[%s2090_s1 + $0x18] sm:$0xff]  ;;  %v14_v5 = vld [vmem:[%s2091_s0] sm:$0xff]  ;;  %v15_v9 = vld [vmem:[%s2091_s0 + $0x8] sm:$0xff] }
   0x3   :  { %v1624_v6 = vpack.c.bf16 %v81_v4, %v80_v2  ;;  %1524 = vmatprep.mubr.msk.f32.mxu0 %vm90_vm0, %v14_v5  ;;  %v46_v7 = vld [vmem:[%s2091_s0 + $0x100] sm:$0xff]  ;;  %v47_v10 = vld [vmem:[%s2091_s0 + $0x108] sm:$0xff]  ;;  %v16_v11 = vld [vmem:[%s2091_s0 + $0x10] sm:$0xff] }
   0x4   :  { %1621 = vmatprep.subr.bf16.mxu0 %v1620_v3  ;;  %1628 = vmatprep.subr.bf16.mxu1 %v1620_v3  ;;  %v82_v8 = vld [vmem:[%s2090_s1 + $0x20] sm:$0xf]  ;;  %v48_v12 = vld [vmem:[%s2091_s0 + $0x110] sm:$0xff]  ;;  %v17_v13 = vld [vmem:[%s2091_s0 + $0x18] sm:$0xff] }
   0x5   :  { %1623 = vmatpush3.bf16.msra.mxu0 %v1620_v3  ;;  %1631 = vmatpush3.bf16.msra.mxu1 %v1620_v3  ;;  %v49_v14 = vld [vmem:[%s2091_s0 + $0x118] sm:$0xff]  ;;  %v18_v15 = vld [vmem:[%s2091_s0 + $0x20] sm:$0xff]  ;;  %v19_v17 = vld [vmem:[%s2091_s0 + $0x28] sm:$0xff] }
   0x6   :  { %1625 = vmatprep.subr.bf16.mxu0 %v1624_v6  ;;  %1629 = vmatprep.subr.bf16.mxu1 %v1624_v6  ;;  %v50_v16 = vld [vmem:[%s2091_s0 + $0x120] sm:$0xff]  ;;  %v51_v18 = vld [vmem:[%s2091_s0 + $0x128] sm:$0xff]  ;;  %v20_v19 = vld [vmem:[%s2091_s0 + $0x30] sm:$0xff] }
   0x7   :  { %1572 = vmatprep.mubr.msk.f32.mxu1 %vm90_vm0, %v46_v7  ;;  %v52_v20 = vld [vmem:[%s2091_s0 + $0x130] sm:$0xff]  ;;  %v21_v21 = vld [vmem:[%s2091_s0 + $0x38] sm:$0xff]  ;;  %v22_v23 = vld [vmem:[%s2091_s0 + $0x40] sm:$0xff] }
   0x8   :  { %v53_v22 = vld [vmem:[%s2091_s0 + $0x138] sm:$0xff]  ;;  %v54_v24 = vld [vmem:[%s2091_s0 + $0x140] sm:$0xff]  ;;  %v23_v25 = vld [vmem:[%s2091_s0 + $0x48] sm:$0xff] }
   0x9   :  { %1627 = vmatpush3.bf16.msra.mxu0 %v1624_v6  ;;  %1632 = vmatpush3.bf16.msra.mxu1 %v1624_v6  ;;  %v55_v26 = vld [vmem:[%s2091_s0 + $0x148] sm:$0xff]  ;;  %v24_v27 = vld [vmem:[%s2091_s0 + $0x50] sm:$0xff]  ;;  %v25_v29 = vld [vmem:[%s2091_s0 + $0x58] sm:$0xff] }
   0xa   :  { %1522 = vmatprep.subr.msk.mxu0 %vm283_vm1, %v82_v8  ;;  %1630 = vmatprep.subr.msk.mxu1 %vm283_vm1, %v82_v8  ;;  %v56_v28 = vld [vmem:[%s2091_s0 + $0x150] sm:$0xff]  ;;  %v57_v30 = vld [vmem:[%s2091_s0 + $0x158] sm:$0xff]  ;;  %v26_v31 = vld [vmem:[%s2091_s0 + $0x60] sm:$0xff] }
   0xb   :  { %v58_v32 = vld [vmem:[%s2091_s0 + $0x160] sm:$0xff]  ;;  %v27_v33 = vld [vmem:[%s2091_s0 + $0x68] sm:$0xff]  ;;  %v28_v35 = vld [vmem:[%s2091_s0 + $0x70] sm:$0xff] }
   0xc   :  { %v59_v34 = vld [vmem:[%s2091_s0 + $0x168] sm:$0xff]  ;;  %v60_v36 = vld [vmem:[%s2091_s0 + $0x170] sm:$0xff]  ;;  %v29_v37 = vld [vmem:[%s2091_s0 + $0x78] sm:$0xff] }
   0xd   :  { %1523 = vmatpush3.msk.msra.mxu0 %vm283_vm1, %v82_v8  ;;  %1633 = vmatpush3.msk.msra.mxu1 %vm283_vm1, %v82_v8  ;;  %v61_v38 = vld [vmem:[%s2091_s0 + $0x178] sm:$0xff]  ;;  %v30_v39 = vld [vmem:[%s2091_s0 + $0x80] sm:$0xff]  ;;  %v31_v41 = vld [vmem:[%s2091_s0 + $0x88] sm:$0xff] }
   0xe   :  { %1525 = vmatmul.mubr.msk.f32.vlgmr.msra.gmra.mrb[0].mxu0 %vm90_vm0, %v15_v9  ;;  %1573 = vmatmul.mubr.msk.f32.vlgmr.msra.gmra.mrb[0].mxu1 %vm90_vm0, %v47_v10  ;;  %v62_v40 = vld [vmem:[%s2091_s0 + $0x180] sm:$0xff]  ;;  %v63_v42 = vld [vmem:[%s2091_s0 + $0x188] sm:$0xff]  ;;  %v32_v43 = vld [vmem:[%s2091_s0 + $0x90] sm:$0xff] }
   0xf   :  { %1527 = vmatprep.mubr.msk.f32.mxu0 %vm90_vm0, %v16_v11  ;;  %1575 = vmatprep.mubr.msk.f32.mxu1 %vm90_vm0, %v48_v12  ;;  %v64_v44 = vld [vmem:[%s2091_s0 + $0x190] sm:$0xff]  ;;  %v33_v45 = vld [vmem:[%s2091_s0 + $0x98] sm:$0xff]  ;;  %v34_v47 = vld [vmem:[%s2091_s0 + $0xa0] sm:$0xff] }
  0x10   :  { %v65_v46 = vld [vmem:[%s2091_s0 + $0x198] sm:$0xff]  ;;  %v66_v48 = vld [vmem:[%s2091_s0 + $0x1a0] sm:$0xff]  ;;  %v35_v49 = vld [vmem:[%s2091_s0 + $0xa8] sm:$0xff] }
  0x11   :  { %v67_v50 = vld [vmem:[%s2091_s0 + $0x1a8] sm:$0xff]  ;;  %v36_v51 = vld [vmem:[%s2091_s0 + $0xb0] sm:$0xff]  ;;  %v37_v53 = vld [vmem:[%s2091_s0 + $0xb8] sm:$0xff] }
  0x12   :  { %1528 = vmatmul.mubr.msk.f32.gmra.mrb[2].mxu0 %vm90_vm0, %v17_v13  ;;  %1576 = vmatmul.mubr.msk.f32.gmra.mrb[2].mxu1 %vm90_vm0, %v49_v14  ;;  %v68_v52 = vld [vmem:[%s2091_s0 + $0x1b0] sm:$0xff]  ;;  %v69_v54 = vld [vmem:[%s2091_s0 + $0x1b8] sm:$0xff]  ;;  %v38_v55 = vld [vmem:[%s2091_s0 + $0xc0] sm:$0xff] }
  0x13   :  { %1530 = vmatprep.mubr.msk.f32.mxu0 %vm90_vm0, %v18_v15  ;;  %1578 = vmatprep.mubr.msk.f32.mxu1 %vm90_vm0, %v50_v16  ;;  %v70_v56 = vld [vmem:[%s2091_s0 + $0x1c0] sm:$0xff]  ;;  %v39_v57 = vld [vmem:[%s2091_s0 + $0xc8] sm:$0xff]  ;;  %v40_v59 = vld [vmem:[%s2091_s0 + $0xd0] sm:$0xff] }
  0x14   :  { %v71_v58 = vld [vmem:[%s2091_s0 + $0x1c8] sm:$0xff]  ;;  %v72_v60 = vld [vmem:[%s2091_s0 + $0x1d0] sm:$0xff]  ;;  %v41_v61 = vld [vmem:[%s2091_s0 + $0xd8] sm:$0xff] }
  0x15   :  { %v73_v62 = vld [vmem:[%s2091_s0 + $0x1d8] sm:$0xff]  ;;  %v42_v63 = vld [vmem:[%s2091_s0 + $0xe0] sm:$0xff]  ;;  %v43_v1 = vld [vmem:[%s2091_s0 + $0xe8] sm:$0xff] }
  0x16   :  { %1531 = vmatmul.mubr.msk.f32.gmra.mrb[4].mxu0 %vm90_vm0, %v19_v17  ;;  %1579 = vmatmul.mubr.msk.f32.gmra.mrb[4].mxu1 %vm90_vm0, %v51_v18  ;;  %v74_v0 = vld [vmem:[%s2091_s0 + $0x1e0] sm:$0xff]  ;;  %v75_v2 = vld [vmem:[%s2091_s0 + $0x1e8] sm:$0xff]  ;;  %v44_v3 = vld [vmem:[%s2091_s0 + $0xf0] sm:$0xff] }
  0x17   :  { %1533 = vmatprep.mubr.msk.f32.mxu0 %vm90_vm0, %v20_v19  ;;  %1581 = vmatprep.mubr.msk.f32.mxu1 %vm90_vm0, %v52_v20  ;;  %v76_v4 = vld [vmem:[%s2091_s0 + $0x1f0] sm:$0xff]  ;;  %v45_v5 = vld [vmem:[%s2091_s0 + $0xf8] sm:$0xff]  ;;  %v1928_v7 = vld [vmem:[%s2092_s2] ss:$0 sm:$0xff] }
  0x18   :  { %v77_v6 = vld [vmem:[%s2091_s0 + $0x1f8] sm:$0xff] }
  0x1a   :  { %1534 = vmatmul.mubr.msk.f32.gmra.mrb[6].mxu0 %vm90_vm0, %v21_v21  ;;  %1582 = vmatmul.mubr.msk.f32.gmra.mrb[6].mxu1 %vm90_vm0, %v53_v22 }
  0x1b   :  { %1536 = vmatprep.mubr.msk.f32.mxu0 %vm90_vm0, %v22_v23  ;;  %1584 = vmatprep.mubr.msk.f32.mxu1 %vm90_vm0, %v54_v24 }
  0x1e   :  { %1537 = vmatmul.mubr.msk.f32.gmra.mrb[8].mxu0 %vm90_vm0, %v23_v25  ;;  %1585 = vmatmul.mubr.msk.f32.gmra.mrb[8].mxu1 %vm90_vm0, %v55_v26 }
  0x1f   :  { %1539 = vmatprep.mubr.msk.f32.mxu0 %vm90_vm0, %v24_v27  ;;  %1587 = vmatprep.mubr.msk.f32.mxu1 %vm90_vm0, %v56_v28 }
  0x22   :  { %1540 = vmatmul.mubr.msk.f32.gmra.mrb[10].mxu0 %vm90_vm0, %v25_v29  ;;  %1588 = vmatmul.mubr.msk.f32.gmra.mrb[10].mxu1 %vm90_vm0, %v57_v30 }
  0x23   :  { %1542 = vmatprep.mubr.msk.f32.mxu0 %vm90_vm0, %v26_v31  ;;  %1590 = vmatprep.mubr.msk.f32.mxu1 %vm90_vm0, %v58_v32 }
  0x26   :  { %1543 = vmatmul.mubr.msk.f32.gmra.mrb[12].mxu0 %vm90_vm0, %v27_v33  ;;  %1591 = vmatmul.mubr.msk.f32.gmra.mrb[12].mxu1 %vm90_vm0, %v59_v34 }
  0x27   :  { %1545 = vmatprep.mubr.msk.f32.mxu0 %vm90_vm0, %v28_v35  ;;  %1593 = vmatprep.mubr.msk.f32.mxu1 %vm90_vm0, %v60_v36 }
  0x2a   :  { %1546 = vmatmul.mubr.msk.f32.gmra.mrb[14].mxu0 %vm90_vm0, %v29_v37  ;;  %1594 = vmatmul.mubr.msk.f32.gmra.mrb[14].mxu1 %vm90_vm0, %v61_v38 }
  0x2b   :  { %1548 = vmatprep.mubr.msk.f32.mxu0 %vm90_vm0, %v30_v39  ;;  %1596 = vmatprep.mubr.msk.f32.mxu1 %vm90_vm0, %v62_v40 }
  0x2e   :  { %1549 = vmatmul.mubr.msk.f32.gmra.mrb[16].mxu0 %vm90_vm0, %v31_v41  ;;  %1597 = vmatmul.mubr.msk.f32.gmra.mrb[16].mxu1 %vm90_vm0, %v63_v42 }
  0x2f   :  { %1551 = vmatprep.mubr.msk.f32.mxu0 %vm90_vm0, %v32_v43  ;;  %1599 = vmatprep.mubr.msk.f32.mxu1 %vm90_vm0, %v64_v44 }
  0x32   :  { %1552 = vmatmul.mubr.msk.f32.gmra.mrb[18].mxu0 %vm90_vm0, %v33_v45  ;;  %1600 = vmatmul.mubr.msk.f32.gmra.mrb[18].mxu1 %vm90_vm0, %v65_v46 }
  0x33   :  { %1554 = vmatprep.mubr.msk.f32.mxu0 %vm90_vm0, %v34_v47  ;;  %1602 = vmatprep.mubr.msk.f32.mxu1 %vm90_vm0, %v66_v48 }
  0x36   :  { %1555 = vmatmul.mubr.msk.f32.gmra.mrb[20].mxu0 %vm90_vm0, %v35_v49  ;;  %1603 = vmatmul.mubr.msk.f32.gmra.mrb[20].mxu1 %vm90_vm0, %v67_v50 }
  0x37   :  { %1557 = vmatprep.mubr.msk.f32.mxu0 %vm90_vm0, %v36_v51  ;;  %1605 = vmatprep.mubr.msk.f32.mxu1 %vm90_vm0, %v68_v52 }
  0x3a   :  { %1558 = vmatmul.mubr.msk.f32.gmra.mrb[22].mxu0 %vm90_vm0, %v37_v53  ;;  %1606 = vmatmul.mubr.msk.f32.gmra.mrb[22].mxu1 %vm90_vm0, %v69_v54 }
  0x3b   :  { %1560 = vmatprep.mubr.msk.f32.mxu0 %vm90_vm0, %v38_v55  ;;  %1608 = vmatprep.mubr.msk.f32.mxu1 %vm90_vm0, %v70_v56 }
  0x3e   :  { %1561 = vmatmul.mubr.msk.f32.gmra.mrb[24].mxu0 %vm90_vm0, %v39_v57  ;;  %1609 = vmatmul.mubr.msk.f32.gmra.mrb[24].mxu1 %vm90_vm0, %v71_v58 }
  0x3f   :  { %1563 = vmatprep.mubr.msk.f32.mxu0 %vm90_vm0, %v40_v59  ;;  %1611 = vmatprep.mubr.msk.f32.mxu1 %vm90_vm0, %v72_v60 }
  0x42   :  { %1564 = vmatmul.mubr.msk.f32.gmra.mrb[26].mxu0 %vm90_vm0, %v41_v61  ;;  %1612 = vmatmul.mubr.msk.f32.gmra.mrb[26].mxu1 %vm90_vm0, %v73_v62 }
  0x43   :  { %1566 = vmatprep.mubr.msk.f32.mxu0 %vm90_vm0, %v42_v63  ;;  %1614 = vmatprep.mubr.msk.f32.mxu1 %vm90_vm0, %v74_v0 }
  0x46   :  { %1567 = vmatmul.mubr.msk.f32.gmra.mrb[28].mxu0 %vm90_vm0, %v43_v1  ;;  %1615 = vmatmul.mubr.msk.f32.gmra.mrb[28].mxu1 %vm90_vm0, %v75_v2 }
  0x47   :  { %1569 = vmatprep.mubr.msk.f32.mxu0 %vm90_vm0, %v44_v3  ;;  %1617 = vmatprep.mubr.msk.f32.mxu1 %vm90_vm0, %v76_v4 }
  0x4a   :  { %1570 = vmatmul.mubr.msk.f32.gmra.mrb[30].mxu0 %vm90_vm0, %v45_v5  ;;  %1618 = vmatmul.mubr.msk.f32.gmra.mrb[30].mxu1 %vm90_vm0, %v77_v6 }
  0xe1   :  { %v1526_v8 = vpop.f32.mrb[0].mxu0  ;;  %v1574_v9 = vpop.f32.mrb[0].mxu1 }
  0xe2   :  { %v359_v10 = vadd.f32 %v1526_v8, %v1928_v7  ;;  %v519_v11 = vadd.f32 %v1574_v9, %v1928_v7  ;;  %v353_v12 = vpop.f32.mrb[1].mxu0  ;;  %v513_v13 = vpop.f32.mrb[1].mxu1 }
  0xe3   :  { %v354_v14 = vadd.f32 %v1928_v7, %v353_v12  ;;  %v514_v15 = vadd.f32 %v1928_v7, %v513_v13 }
  0xe4   :  { %v673_v16 = vmax.f32 %v359_v10, 0.0  ;;  %v705_v17 = vmax.f32 %v519_v11, 0.0 }
  0xe5   :  { %v672_v18 = vmax.f32 %v354_v14, 0.0  ;;  %v704_v19 = vmax.f32 %v514_v15, 0.0  ;;  %v1529_v20 = vpop.f32.mrb[2].mxu0  ;;  %v1577_v21 = vpop.f32.mrb[2].mxu1 }
  0xe6   :  { %v369_v22 = vadd.f32 %v1529_v20, %v1928_v7  ;;  %v529_v23 = vadd.f32 %v1577_v21, %v1928_v7  ;;  %v363_v24 = vpop.f32.mrb[3].mxu0  ;;  %v523_v25 = vpop.f32.mrb[3].mxu1 }
  0xe7   :  { %v1257_v26 = vpack.c.bf16 %v673_v16, %v672_v18  ;;  %v1337_v27 = vpack.c.bf16 %v705_v17, %v704_v19  ;;  %v364_v28 = vadd.f32 %v1928_v7, %v363_v24  ;;  %v524_v29 = vadd.f32 %v1928_v7, %v523_v25 }
  0xe8   :  { %v675_v30 = vmax.f32 %v369_v22, 0.0  ;;  %v707_v31 = vmax.f32 %v529_v23, 0.0 }
  0xe9   :  { %1258 = vst [vmem:[%s2093_s3] sm:$0xff] %v1257_v26   ;;  %1429 = vst [vmem:[%s2093_s3 + $0x80] sm:$0xff] %v1337_v27   ;;  %v674_v32 = vmax.f32 %v364_v28, 0.0  ;;  %v706_v33 = vmax.f32 %v524_v29, 0.0  ;;  %v1532_v34 = vpop.f32.mrb[4].mxu0  ;;  %v1580_v35 = vpop.f32.mrb[4].mxu1 }
  0xea   :  { %v379_v36 = vadd.f32 %v1532_v34, %v1928_v7  ;;  %v539_v37 = vadd.f32 %v1580_v35, %v1928_v7  ;;  %v373_v38 = vpop.f32.mrb[5].mxu0  ;;  %v533_v39 = vpop.f32.mrb[5].mxu1 }
  0xeb   :  { %v1262_v40 = vpack.c.bf16 %v675_v30, %v674_v32  ;;  %v1342_v41 = vpack.c.bf16 %v707_v31, %v706_v33  ;;  %v374_v42 = vadd.f32 %v1928_v7, %v373_v38  ;;  %v534_v43 = vadd.f32 %v1928_v7, %v533_v39 }
  0xec   :  { %v677_v44 = vmax.f32 %v379_v36, 0.0  ;;  %v709_v45 = vmax.f32 %v539_v37, 0.0 }
  0xed   :  { %1414 = vst [vmem:[%s2093_s3 + $0x8] sm:$0xff] %v1262_v40   ;;  %1430 = vst [vmem:[%s2093_s3 + $0x88] sm:$0xff] %v1342_v41   ;;  %v676_v46 = vmax.f32 %v374_v42, 0.0  ;;  %v708_v47 = vmax.f32 %v534_v43, 0.0  ;;  %v1535_v48 = vpop.f32.mrb[6].mxu0  ;;  %v1583_v49 = vpop.f32.mrb[6].mxu1 }
  0xee   :  { %v389_v50 = vadd.f32 %v1535_v48, %v1928_v7  ;;  %v549_v51 = vadd.f32 %v1583_v49, %v1928_v7  ;;  %v383_v52 = vpop.f32.mrb[7].mxu0  ;;  %v543_v53 = vpop.f32.mrb[7].mxu1 }
  0xef   :  { %v1267_v54 = vpack.c.bf16 %v677_v44, %v676_v46  ;;  %v1347_v55 = vpack.c.bf16 %v709_v45, %v708_v47  ;;  %v384_v56 = vadd.f32 %v1928_v7, %v383_v52  ;;  %v544_v57 = vadd.f32 %v1928_v7, %v543_v53 }
  0xf0   :  { %v679_v58 = vmax.f32 %v389_v50, 0.0  ;;  %v711_v59 = vmax.f32 %v549_v51, 0.0 }
  0xf1   :  { %1415 = vst [vmem:[%s2093_s3 + $0x10] sm:$0xff] %v1267_v54   ;;  %1431 = vst [vmem:[%s2093_s3 + $0x90] sm:$0xff] %v1347_v55   ;;  %v678_v60 = vmax.f32 %v384_v56, 0.0  ;;  %v710_v61 = vmax.f32 %v544_v57, 0.0  ;;  %v1538_v62 = vpop.f32.mrb[8].mxu0  ;;  %v1586_v63 = vpop.f32.mrb[8].mxu1 }
  0xf2   :  { %v399_v0 = vadd.f32 %v1538_v62, %v1928_v7  ;;  %v559_v1 = vadd.f32 %v1586_v63, %v1928_v7  ;;  %v393_v2 = vpop.f32.mrb[9].mxu0  ;;  %v553_v3 = vpop.f32.mrb[9].mxu1 }
  0xf3   :  { %v1272_v4 = vpack.c.bf16 %v679_v58, %v678_v60  ;;  %v1352_v5 = vpack.c.bf16 %v711_v59, %v710_v61  ;;  %v394_v6 = vadd.f32 %v1928_v7, %v393_v2  ;;  %v554_v8 = vadd.f32 %v1928_v7, %v553_v3 }
  0xf4   :  { %v681_v9 = vmax.f32 %v399_v0, 0.0  ;;  %v713_v10 = vmax.f32 %v559_v1, 0.0 }
  0xf5   :  { %1416 = vst [vmem:[%s2093_s3 + $0x18] sm:$0xff] %v1272_v4   ;;  %1432 = vst [vmem:[%s2093_s3 + $0x98] sm:$0xff] %v1352_v5   ;;  %v680_v11 = vmax.f32 %v394_v6, 0.0  ;;  %v712_v12 = vmax.f32 %v554_v8, 0.0  ;;  %v1541_v13 = vpop.f32.mrb[10].mxu0  ;;  %v1589_v14 = vpop.f32.mrb[10].mxu1 }
  0xf6   :  { %v409_v15 = vadd.f32 %v1541_v13, %v1928_v7  ;;  %v569_v16 = vadd.f32 %v1589_v14, %v1928_v7  ;;  %v403_v17 = vpop.f32.mrb[11].mxu0  ;;  %v563_v18 = vpop.f32.mrb[11].mxu1 }
  0xf7   :  { %v1277_v19 = vpack.c.bf16 %v681_v9, %v680_v11  ;;  %v1357_v20 = vpack.c.bf16 %v713_v10, %v712_v12  ;;  %v404_v21 = vadd.f32 %v1928_v7, %v403_v17  ;;  %v564_v22 = vadd.f32 %v1928_v7, %v563_v18 }
  0xf8   :  { %v683_v23 = vmax.f32 %v409_v15, 0.0  ;;  %v715_v24 = vmax.f32 %v569_v16, 0.0 }
  0xf9   :  { %1417 = vst [vmem:[%s2093_s3 + $0x20] sm:$0xff] %v1277_v19   ;;  %1433 = vst [vmem:[%s2093_s3 + $0xa0] sm:$0xff] %v1357_v20   ;;  %v682_v25 = vmax.f32 %v404_v21, 0.0  ;;  %v714_v26 = vmax.f32 %v564_v22, 0.0  ;;  %v1544_v27 = vpop.f32.mrb[12].mxu0  ;;  %v1592_v28 = vpop.f32.mrb[12].mxu1 }
  0xfa   :  { %v419_v29 = vadd.f32 %v1544_v27, %v1928_v7  ;;  %v579_v30 = vadd.f32 %v1592_v28, %v1928_v7  ;;  %v413_v31 = vpop.f32.mrb[13].mxu0  ;;  %v573_v32 = vpop.f32.mrb[13].mxu1 }
  0xfb   :  { %v1282_v33 = vpack.c.bf16 %v683_v23, %v682_v25  ;;  %v1362_v34 = vpack.c.bf16 %v715_v24, %v714_v26  ;;  %v414_v35 = vadd.f32 %v1928_v7, %v413_v31  ;;  %v574_v36 = vadd.f32 %v1928_v7, %v573_v32 }
  0xfc   :  { %v685_v37 = vmax.f32 %v419_v29, 0.0  ;;  %v717_v38 = vmax.f32 %v579_v30, 0.0 }
  0xfd   :  { %1418 = vst [vmem:[%s2093_s3 + $0x28] sm:$0xff] %v1282_v33   ;;  %1434 = vst [vmem:[%s2093_s3 + $0xa8] sm:$0xff] %v1362_v34   ;;  %v684_v39 = vmax.f32 %v414_v35, 0.0  ;;  %v716_v40 = vmax.f32 %v574_v36, 0.0  ;;  %v1547_v41 = vpop.f32.mrb[14].mxu0  ;;  %v1595_v42 = vpop.f32.mrb[14].mxu1 }
  0xfe   :  { %v429_v43 = vadd.f32 %v1547_v41, %v1928_v7  ;;  %v589_v44 = vadd.f32 %v1595_v42, %v1928_v7  ;;  %v423_v45 = vpop.f32.mrb[15].mxu0  ;;  %v583_v46 = vpop.f32.mrb[15].mxu1 }
  0xff   :  { %v1287_v47 = vpack.c.bf16 %v685_v37, %v684_v39  ;;  %v1367_v48 = vpack.c.bf16 %v717_v38, %v716_v40  ;;  %v424_v49 = vadd.f32 %v1928_v7, %v423_v45  ;;  %v584_v50 = vadd.f32 %v1928_v7, %v583_v46 }
 0x100   :  { %v687_v51 = vmax.f32 %v429_v43, 0.0  ;;  %v719_v52 = vmax.f32 %v589_v44, 0.0 }
 0x101   :  { %1419 = vst [vmem:[%s2093_s3 + $0x30] sm:$0xff] %v1287_v47   ;;  %1435 = vst [vmem:[%s2093_s3 + $0xb0] sm:$0xff] %v1367_v48   ;;  %v686_v53 = vmax.f32 %v424_v49, 0.0  ;;  %v718_v54 = vmax.f32 %v584_v50, 0.0  ;;  %v1550_v55 = vpop.f32.mrb[16].mxu0  ;;  %v1598_v56 = vpop.f32.mrb[16].mxu1 }
 0x102   :  { %v439_v57 = vadd.f32 %v1550_v55, %v1928_v7  ;;  %v599_v58 = vadd.f32 %v1598_v56, %v1928_v7  ;;  %v433_v59 = vpop.f32.mrb[17].mxu0  ;;  %v593_v60 = vpop.f32.mrb[17].mxu1 }
 0x103   :  { %v1292_v61 = vpack.c.bf16 %v687_v51, %v686_v53  ;;  %v1372_v62 = vpack.c.bf16 %v719_v52, %v718_v54  ;;  %v434_v63 = vadd.f32 %v1928_v7, %v433_v59  ;;  %v594_v0 = vadd.f32 %v1928_v7, %v593_v60 }
 0x104   :  { %v689_v1 = vmax.f32 %v439_v57, 0.0  ;;  %v721_v2 = vmax.f32 %v599_v58, 0.0 }
 0x105   :  { %1420 = vst [vmem:[%s2093_s3 + $0x38] sm:$0xff] %v1292_v61   ;;  %1436 = vst [vmem:[%s2093_s3 + $0xb8] sm:$0xff] %v1372_v62   ;;  %v688_v3 = vmax.f32 %v434_v63, 0.0  ;;  %v720_v4 = vmax.f32 %v594_v0, 0.0  ;;  %v1553_v5 = vpop.f32.mrb[18].mxu0  ;;  %v1601_v6 = vpop.f32.mrb[18].mxu1 }
 0x106   :  { %v449_v8 = vadd.f32 %v1553_v5, %v1928_v7  ;;  %v609_v9 = vadd.f32 %v1601_v6, %v1928_v7  ;;  %v443_v10 = vpop.f32.mrb[19].mxu0  ;;  %v603_v11 = vpop.f32.mrb[19].mxu1 }
 0x107   :  { %v1297_v12 = vpack.c.bf16 %v689_v1, %v688_v3  ;;  %v1377_v13 = vpack.c.bf16 %v721_v2, %v720_v4  ;;  %v444_v14 = vadd.f32 %v1928_v7, %v443_v10  ;;  %v604_v15 = vadd.f32 %v1928_v7, %v603_v11 }
 0x108   :  { %v691_v16 = vmax.f32 %v449_v8, 0.0  ;;  %v723_v17 = vmax.f32 %v609_v9, 0.0 }
 0x109   :  { %1421 = vst [vmem:[%s2093_s3 + $0x40] sm:$0xff] %v1297_v12   ;;  %1437 = vst [vmem:[%s2093_s3 + $0xc0] sm:$0xff] %v1377_v13   ;;  %v690_v18 = vmax.f32 %v444_v14, 0.0  ;;  %v722_v19 = vmax.f32 %v604_v15, 0.0  ;;  %v1556_v20 = vpop.f32.mrb[20].mxu0  ;;  %v1604_v21 = vpop.f32.mrb[20].mxu1 }
 0x10a   :  { %v459_v22 = vadd.f32 %v1556_v20, %v1928_v7  ;;  %v619_v23 = vadd.f32 %v1604_v21, %v1928_v7  ;;  %v453_v24 = vpop.f32.mrb[21].mxu0  ;;  %v613_v25 = vpop.f32.mrb[21].mxu1 }
 0x10b   :  { %v1302_v26 = vpack.c.bf16 %v691_v16, %v690_v18  ;;  %v1382_v27 = vpack.c.bf16 %v723_v17, %v722_v19  ;;  %v454_v28 = vadd.f32 %v1928_v7, %v453_v24  ;;  %v614_v29 = vadd.f32 %v1928_v7, %v613_v25 }
 0x10c   :  { %v693_v30 = vmax.f32 %v459_v22, 0.0  ;;  %v725_v31 = vmax.f32 %v619_v23, 0.0 }
 0x10d   :  { %1422 = vst [vmem:[%s2093_s3 + $0x48] sm:$0xff] %v1302_v26   ;;  %1438 = vst [vmem:[%s2093_s3 + $0xc8] sm:$0xff] %v1382_v27   ;;  %v692_v32 = vmax.f32 %v454_v28, 0.0  ;;  %v724_v33 = vmax.f32 %v614_v29, 0.0  ;;  %v1559_v34 = vpop.f32.mrb[22].mxu0  ;;  %v1607_v35 = vpop.f32.mrb[22].mxu1 }
 0x10e   :  { %v469_v36 = vadd.f32 %v1559_v34, %v1928_v7  ;;  %v629_v37 = vadd.f32 %v1607_v35, %v1928_v7  ;;  %v463_v38 = vpop.f32.mrb[23].mxu0  ;;  %v623_v39 = vpop.f32.mrb[23].mxu1 }
 0x10f   :  { %v1307_v40 = vpack.c.bf16 %v693_v30, %v692_v32  ;;  %v1387_v41 = vpack.c.bf16 %v725_v31, %v724_v33  ;;  %v464_v42 = vadd.f32 %v1928_v7, %v463_v38  ;;  %v624_v43 = vadd.f32 %v1928_v7, %v623_v39 }
 0x110   :  { %v695_v44 = vmax.f32 %v469_v36, 0.0  ;;  %v727_v45 = vmax.f32 %v629_v37, 0.0 }
 0x111   :  { %1423 = vst [vmem:[%s2093_s3 + $0x50] sm:$0xff] %v1307_v40   ;;  %1439 = vst [vmem:[%s2093_s3 + $0xd0] sm:$0xff] %v1387_v41   ;;  %v694_v46 = vmax.f32 %v464_v42, 0.0  ;;  %v726_v47 = vmax.f32 %v624_v43, 0.0  ;;  %v1562_v48 = vpop.f32.mrb[24].mxu0  ;;  %v1610_v49 = vpop.f32.mrb[24].mxu1 }
 0x112   :  { %v479_v50 = vadd.f32 %v1562_v48, %v1928_v7  ;;  %v639_v51 = vadd.f32 %v1610_v49, %v1928_v7  ;;  %v473_v52 = vpop.f32.mrb[25].mxu0  ;;  %v633_v53 = vpop.f32.mrb[25].mxu1 }
 0x113   :  { %v1312_v54 = vpack.c.bf16 %v695_v44, %v694_v46  ;;  %v1392_v55 = vpack.c.bf16 %v727_v45, %v726_v47  ;;  %v474_v56 = vadd.f32 %v1928_v7, %v473_v52  ;;  %v634_v57 = vadd.f32 %v1928_v7, %v633_v53 }
 0x114   :  { %v697_v58 = vmax.f32 %v479_v50, 0.0  ;;  %v729_v59 = vmax.f32 %v639_v51, 0.0 }
 0x115   :  { %1424 = vst [vmem:[%s2093_s3 + $0x58] sm:$0xff] %v1312_v54   ;;  %1440 = vst [vmem:[%s2093_s3 + $0xd8] sm:$0xff] %v1392_v55   ;;  %v696_v60 = vmax.f32 %v474_v56, 0.0  ;;  %v728_v61 = vmax.f32 %v634_v57, 0.0  ;;  %v1565_v62 = vpop.f32.mrb[26].mxu0  ;;  %v1613_v63 = vpop.f32.mrb[26].mxu1 }
 0x116   :  { %v489_v0 = vadd.f32 %v1565_v62, %v1928_v7  ;;  %v649_v1 = vadd.f32 %v1613_v63, %v1928_v7  ;;  %v483_v2 = vpop.f32.mrb[27].mxu0  ;;  %v643_v3 = vpop.f32.mrb[27].mxu1 }
 0x117   :  { %v1317_v4 = vpack.c.bf16 %v697_v58, %v696_v60  ;;  %v1397_v5 = vpack.c.bf16 %v729_v59, %v728_v61  ;;  %v484_v6 = vadd.f32 %v1928_v7, %v483_v2  ;;  %v644_v8 = vadd.f32 %v1928_v7, %v643_v3 }
 0x118   :  { %v699_v9 = vmax.f32 %v489_v0, 0.0  ;;  %v731_v10 = vmax.f32 %v649_v1, 0.0 }
 0x119   :  { %1425 = vst [vmem:[%s2093_s3 + $0x60] sm:$0xff] %v1317_v4   ;;  %1441 = vst [vmem:[%s2093_s3 + $0xe0] sm:$0xff] %v1397_v5   ;;  %v698_v11 = vmax.f32 %v484_v6, 0.0  ;;  %v730_v12 = vmax.f32 %v644_v8, 0.0  ;;  %v1568_v13 = vpop.f32.mrb[28].mxu0  ;;  %v1616_v14 = vpop.f32.mrb[28].mxu1 }
 0x11a   :  { %v499_v15 = vadd.f32 %v1568_v13, %v1928_v7  ;;  %v659_v16 = vadd.f32 %v1616_v14, %v1928_v7  ;;  %v493_v17 = vpop.f32.mrb[29].mxu0  ;;  %v653_v18 = vpop.f32.mrb[29].mxu1 }
 0x11b   :  { %v1322_v19 = vpack.c.bf16 %v699_v9, %v698_v11  ;;  %v1402_v20 = vpack.c.bf16 %v731_v10, %v730_v12  ;;  %v494_v21 = vadd.f32 %v1928_v7, %v493_v17  ;;  %v654_v22 = vadd.f32 %v1928_v7, %v653_v18 }
 0x11c   :  { %v701_v23 = vmax.f32 %v499_v15, 0.0  ;;  %v733_v24 = vmax.f32 %v659_v16, 0.0 }
 0x11d   :  { %1426 = vst [vmem:[%s2093_s3 + $0x68] sm:$0xff] %v1322_v19   ;;  %1442 = vst [vmem:[%s2093_s3 + $0xe8] sm:$0xff] %v1402_v20   ;;  %v700_v25 = vmax.f32 %v494_v21, 0.0  ;;  %v732_v26 = vmax.f32 %v654_v22, 0.0  ;;  %v1571_v27 = vpop.f32.mrb[30].mxu0  ;;  %v1619_v28 = vpop.f32.mrb[30].mxu1 }
 0x11e   :  { %v509_v29 = vadd.f32 %v1571_v27, %v1928_v7  ;;  %v669_v30 = vadd.f32 %v1619_v28, %v1928_v7  ;;  %v503_v31 = vpop.f32.mrb[31].mxu0  ;;  %v663_v32 = vpop.f32.mrb[31].mxu1 }
 0x11f   :  { %v1327_v33 = vpack.c.bf16 %v701_v23, %v700_v25  ;;  %v1407_v34 = vpack.c.bf16 %v733_v24, %v732_v26  ;;  %v504_v35 = vadd.f32 %v1928_v7, %v503_v31  ;;  %v664_v36 = vadd.f32 %v1928_v7, %v663_v32 }
 0x120   :  { %v703_v37 = vmax.f32 %v509_v29, 0.0  ;;  %v735_v38 = vmax.f32 %v669_v30, 0.0 }
 0x121   :  { %1427 = vst [vmem:[%s2093_s3 + $0x70] sm:$0xff] %v1327_v33   ;;  %1443 = vst [vmem:[%s2093_s3 + $0xf0] sm:$0xff] %v1407_v34   ;;  %v702_v39 = vmax.f32 %v504_v35, 0.0  ;;  %v734_v40 = vmax.f32 %v664_v36, 0.0 }
 0x123   :  { %v1332_v41 = vpack.c.bf16 %v703_v37, %v702_v39  ;;  %v1412_v42 = vpack.c.bf16 %v735_v38, %v734_v40 }
 0x125   :  { %1428 = vst [vmem:[%s2093_s3 + $0x78] sm:$0xff] %v1332_v41   ;;  %1444 = vst [vmem:[%s2093_s3 + $0xf8] sm:$0xff] %v1412_v42  }

// kernel: spatialblock_forward.6
= control target key start
LH: loop header
LB: loop body
LE: loop exit
PB: predicated region body
PF: predicated region fallthrough
CT: control target
= control target key end

     0   :  { %s4393_s2 = inlined_call_operand.vmem [shape: f32[128,1], index: 2, kind: input, shape index: {}]   ;;  %s4394_s3 = inlined_call_operand.<no memory space> [shape: f32[1,1], index: 3, kind: input, shape index: {}]   ;;  %s4395_s0 = inlined_call_operand.vmem [shape: f32[512,128], index: 0, kind: input, shape index: {}]   ;;  %s4396_s1 = inlined_call_operand.vmem [shape: f32[512,128], index: 1, kind: input, shape index: {}]   ;;  %s4397_s4 = inlined_call_operand.vmem [shape: bf16[512,256], index: 4, kind: output, shape index: {}]  }
   0x1   :  { %v275_v0 = vld [vmem:[%s4393_s2] sm:$0xff]  ;;  %v276_v1 = vld [vmem:[%s4393_s2 + $0x8] sm:$0xff]  ;;  %v277_v2 = vld [vmem:[%s4393_s2 + $0x10] sm:$0xff]  ;;  %v9_v3 = vstv %s4394_s3 }
   0x2   :  { %v2688_v4 = vpack.c.bf16 %v276_v1, %v275_v0  ;;  %v278_v5 = vld [vmem:[%s4393_s2 + $0x18] sm:$0xff]  ;;  %10 = vst [vmem:[#allocation2] sm:$0x1] %v9_v3  ;;  %v279_v7 = vld [vmem:[%s4393_s2 + $0x20] sm:$0xff]  ;;  %v280_v8 = vld [vmem:[%s4393_s2 + $0x28] sm:$0xff] }
   0x3   :  { %v2692_v6 = vpack.c.bf16 %v278_v5, %v277_v2  ;;  %v2696_v9 = vpack.c.bf16 %v280_v8, %v279_v7  ;;  %v281_v10 = vld [vmem:[%s4393_s2 + $0x30] sm:$0xff]  ;;  %v19_v11 = vld [vmem:[%s4395_s0] sm:$0xff]  ;;  %v282_v13 = vld [vmem:[%s4393_s2 + $0x38] sm:$0xff] }
   0x4   :  { %2689 = vmatprep.subr.bf16.mxu0 %v2688_v4  ;;  %2720 = vmatprep.subr.bf16.mxu1 %v2688_v4  ;;  %v83_v12 = vld [vmem:[%s4396_s1] sm:$0xff]  ;;  %v2700_v19 = vpack.c.bf16 %v282_v13, %v281_v10  ;;  %v284_v22 = vld [vmem:[%s4393_s2 + $0x48] sm:$0xff]  ;;  %v285_v24 = vld [vmem:[%s4393_s2 + $0x50] sm:$0xff] }
   0x5   :  { %2691 = vmatpush3.bf16.msra.mxu0 %v2688_v4  ;;  %2728 = vmatpush3.bf16.msra.mxu1 %v2688_v4  ;;  %v147_v14 = vadd.f32 %v83_v12, %v19_v11  ;;  %v51_v15 = vld [vmem:[%s4395_s0 + $0x100] sm:$0xff]  ;;  %v286_v25 = vld [vmem:[%s4393_s2 + $0x58] sm:$0xff]  ;;  %v288_v28 = vld [vmem:[%s4393_s2 + $0x68] sm:$0xff] }
   0x6   :  { %2693 = vmatprep.subr.bf16.mxu0 %v2692_v6  ;;  %2721 = vmatprep.subr.bf16.mxu1 %v2692_v6  ;;  %v115_v16 = vld [vmem:[%s4396_s1 + $0x100] sm:$0xff]  ;;  %v2708_v26 = vpack.c.bf16 %v286_v25, %v285_v24  ;;  %v289_v30 = vld [vmem:[%s4393_s2 + $0x70] sm:$0xff]  ;;  %v290_v31 = vld [vmem:[%s4393_s2 + $0x78] sm:$0xff] }
   0x7   :  { %v179_v17 = vadd.f32 %v115_v16, %v51_v15  ;;  %v211_v18 = vmax.f32 %v147_v14, 0.0  ;;  %v283_v21 = vld [vmem:[%s4393_s2 + $0x40] sm:$0xff]  ;;  %v20_v32 = vld [vmem:[%s4395_s0 + $0x8] sm:$0xff]  ;;  %v21_v36 = vld [vmem:[%s4395_s0 + $0x10] sm:$0xff]  ;;  %v2716_v37 = vpack.c.bf16 %v290_v31, %v289_v30 }
   0x8   :  { %v2704_v23 = vpack.c.bf16 %v284_v22, %v283_v21  ;;  %v287_v27 = vld [vmem:[%s4393_s2 + $0x60] sm:$0xff]  ;;  %v84_v33 = vld [vmem:[%s4396_s1 + $0x8] sm:$0xff]  ;;  %v85_v38 = vld [vmem:[%s4396_s1 + $0x10] sm:$0xff] }
   0x9   :  { %2695 = vmatpush3.bf16.msra.mxu0 %v2692_v6  ;;  %2729 = vmatpush3.bf16.msra.mxu1 %v2692_v6  ;;  %v243_v20 = vmax.f32 %v179_v17, 0.0  ;;  %v2712_v29 = vpack.c.bf16 %v288_v28, %v287_v27  ;;  %v52_v34 = vld [vmem:[%s4395_s0 + $0x108] sm:$0xff]  ;;  %v53_v39 = vld [vmem:[%s4395_s0 + $0x110] sm:$0xff]  ;;  %v148_v41 = vadd.f32 %v84_v33, %v20_v32  ;;  %v22_v43 = vld [vmem:[%s4395_s0 + $0x18] sm:$0xff]  ;;  %v149_v45 = vadd.f32 %v85_v38, %v21_v36 }
   0xa   :  { %2697 = vmatprep.subr.bf16.mxu0 %v2696_v9  ;;  %2722 = vmatprep.subr.bf16.mxu1 %v2696_v9  ;;  %v116_v35 = vld [vmem:[%s4396_s1 + $0x108] sm:$0xff]  ;;  %v117_v40 = vld [vmem:[%s4396_s1 + $0x110] sm:$0xff]  ;;  %v86_v44 = vld [vmem:[%s4396_s1 + $0x18] sm:$0xff] }
   0xb   :  { %2592 = vmatprep.mubr.f32.mxu0 %v211_v18  ;;  %2640 = vmatprep.mubr.f32.mxu1 %v243_v20  ;;  %v180_v42 = vadd.f32 %v116_v35, %v52_v34  ;;  %v181_v46 = vadd.f32 %v117_v40, %v53_v39  ;;  %v54_v47 = vld [vmem:[%s4395_s0 + $0x118] sm:$0xff]  ;;  %v23_v49 = vld [vmem:[%s4395_s0 + $0x20] sm:$0xff]  ;;  %v212_v53 = vmax.f32 %v148_v41, 0.0  ;;  %v150_v55 = vadd.f32 %v86_v44, %v22_v43  ;;  %v24_v57 = vld [vmem:[%s4395_s0 + $0x28] sm:$0xff] }
   0xc   :  { %v118_v48 = vld [vmem:[%s4396_s1 + $0x118] sm:$0xff]  ;;  %v87_v50 = vld [vmem:[%s4396_s1 + $0x20] sm:$0xff]  ;;  %v88_v58 = vld [vmem:[%s4396_s1 + $0x28] sm:$0xff]  ;;  %v213_v59 = vmax.f32 %v149_v45, 0.0 }
   0xd   :  { %2699 = vmatpush3.bf16.msra.mxu0 %v2696_v9  ;;  %2730 = vmatpush3.bf16.msra.mxu1 %v2696_v9  ;;  %v55_v51 = vld [vmem:[%s4395_s0 + $0x120] sm:$0xff]  ;;  %v244_v54 = vmax.f32 %v180_v42, 0.0  ;;  %v182_v56 = vadd.f32 %v118_v48, %v54_v47  ;;  %v245_v60 = vmax.f32 %v181_v46, 0.0  ;;  %v151_v61 = vadd.f32 %v87_v50, %v23_v49  ;;  %v56_v63 = vld [vmem:[%s4395_s0 + $0x128] sm:$0xff]  ;;  %v25_v1 = vld [vmem:[%s4395_s0 + $0x30] sm:$0xff] }
   0xe   :  { %2701 = vmatprep.subr.bf16.mxu0 %v2700_v19  ;;  %2723 = vmatprep.subr.bf16.mxu1 %v2700_v19  ;;  %v119_v52 = vld [vmem:[%s4396_s1 + $0x120] sm:$0xff]  ;;  %v120_v0 = vld [vmem:[%s4396_s1 + $0x128] sm:$0xff]  ;;  %v89_v2 = vld [vmem:[%s4396_s1 + $0x30] sm:$0xff]  ;;  %v214_v5 = vmax.f32 %v150_v55, 0.0  ;;  %v152_v7 = vadd.f32 %v88_v58, %v24_v57 }
   0xf   :  { %v183_v62 = vadd.f32 %v119_v52, %v55_v51  ;;  %v57_v3 = vld [vmem:[%s4395_s0 + $0x130] sm:$0xff]  ;;  %v246_v6 = vmax.f32 %v182_v56, 0.0  ;;  %v184_v8 = vadd.f32 %v120_v0, %v56_v63  ;;  %v26_v9 = vld [vmem:[%s4395_s0 + $0x38] sm:$0xff]  ;;  %v215_v11 = vmax.f32 %v151_v61, 0.0  ;;  %v27_v17 = vld [vmem:[%s4395_s0 + $0x40] sm:$0xff] }
  0x10   :  { %v121_v4 = vld [vmem:[%s4396_s1 + $0x130] sm:$0xff]  ;;  %v90_v10 = vld [vmem:[%s4396_s1 + $0x38] sm:$0xff]  ;;  %v153_v13 = vadd.f32 %v89_v2, %v25_v1  ;;  %v91_v18 = vld [vmem:[%s4396_s1 + $0x40] sm:$0xff]  ;;  %v216_v21 = vmax.f32 %v152_v7, 0.0 }
  0x11   :  { %2703 = vmatpush3.bf16.msra.mxu0 %v2700_v19  ;;  %2731 = vmatpush3.bf16.msra.mxu1 %v2700_v19  ;;  %v247_v12 = vmax.f32 %v183_v62, 0.0  ;;  %v185_v14 = vadd.f32 %v121_v4, %v57_v3  ;;  %v58_v15 = vld [vmem:[%s4395_s0 + $0x138] sm:$0xff]  ;;  %v59_v19 = vld [vmem:[%s4395_s0 + $0x140] sm:$0xff]  ;;  %v248_v22 = vmax.f32 %v184_v8, 0.0  ;;  %v28_v25 = vld [vmem:[%s4395_s0 + $0x48] sm:$0xff] }
  0x12   :  { %2705 = vmatprep.subr.bf16.mxu0 %v2704_v23  ;;  %2724 = vmatprep.subr.bf16.mxu1 %v2704_v23  ;;  %v122_v16 = vld [vmem:[%s4396_s1 + $0x138] sm:$0xff]  ;;  %v123_v20 = vld [vmem:[%s4396_s1 + $0x140] sm:$0xff]  ;;  %v217_v27 = vmax.f32 %v153_v13, 0.0  ;;  %v60_v31 = vld [vmem:[%s4395_s0 + $0x148] sm:$0xff] }
  0x13   :  { %v186_v24 = vadd.f32 %v122_v16, %v58_v15  ;;  %v249_v28 = vmax.f32 %v185_v14, 0.0  ;;  %v187_v30 = vadd.f32 %v123_v20, %v59_v19  ;;  %v124_v32 = vld [vmem:[%s4396_s1 + $0x148] sm:$0xff]  ;;  %v29_v33 = vld [vmem:[%s4395_s0 + $0x50] sm:$0xff]  ;;  %v30_v41 = vld [vmem:[%s4395_s0 + $0x58] sm:$0xff] }
  0x14   :  { %v93_v34 = vld [vmem:[%s4396_s1 + $0x50] sm:$0xff]  ;;  %v188_v40 = vadd.f32 %v124_v32, %v60_v31  ;;  %v94_v42 = vld [vmem:[%s4396_s1 + $0x58] sm:$0xff]  ;;  %v31_v49 = vld [vmem:[%s4395_s0 + $0x60] sm:$0xff] }
  0x15   :  { %2707 = vmatpush3.bf16.msra.mxu0 %v2704_v23  ;;  %2732 = vmatpush3.bf16.msra.mxu1 %v2704_v23  ;;  %v154_v23 = vadd.f32 %v90_v10, %v26_v9  ;;  %v61_v35 = vld [vmem:[%s4395_s0 + $0x150] sm:$0xff]  ;;  %v250_v38 = vmax.f32 %v186_v24, 0.0  ;;  %v251_v44 = vmax.f32 %v187_v30, 0.0  ;;  %v157_v45 = vadd.f32 %v93_v34, %v29_v33  ;;  %v62_v47 = vld [vmem:[%s4395_s0 + $0x158] sm:$0xff]  ;;  %v95_v50 = vld [vmem:[%s4396_s1 + $0x60] sm:$0xff] }
  0x16   :  { %2709 = vmatprep.subr.bf16.mxu0 %v2708_v26  ;;  %2725 = vmatprep.subr.bf16.mxu1 %v2708_v26  ;;  %v125_v36 = vld [vmem:[%s4396_s1 + $0x150] sm:$0xff]  ;;  %v126_v48 = vld [vmem:[%s4396_s1 + $0x158] sm:$0xff]  ;;  %v63_v51 = vld [vmem:[%s4395_s0 + $0x160] sm:$0xff]  ;;  %v158_v55 = vadd.f32 %v94_v42, %v30_v41  ;;  %v159_v61 = vadd.f32 %v95_v50, %v31_v49 }
  0x17   :  { %v189_v46 = vadd.f32 %v125_v36, %v61_v35  ;;  %v127_v52 = vld [vmem:[%s4396_s1 + $0x160] sm:$0xff]  ;;  %v190_v56 = vadd.f32 %v126_v48, %v62_v47  ;;  %v32_v57 = vld [vmem:[%s4395_s0 + $0x68] sm:$0xff]  ;;  %v33_v1 = vld [vmem:[%s4395_s0 + $0x70] sm:$0xff] }
  0x18   :  { %v96_v58 = vld [vmem:[%s4396_s1 + $0x68] sm:$0xff]  ;;  %v191_v62 = vadd.f32 %v127_v52, %v63_v51  ;;  %v97_v2 = vld [vmem:[%s4396_s1 + $0x70] sm:$0xff]  ;;  %v34_v9 = vld [vmem:[%s4395_s0 + $0x78] sm:$0xff] }
  0x19   :  { %2711 = vmatpush3.bf16.msra.mxu0 %v2708_v26  ;;  %2733 = vmatpush3.bf16.msra.mxu1 %v2708_v26  ;;  %v92_v26 = vld [vmem:[%s4396_s1 + $0x48] sm:$0xff]  ;;  %v65_v3 = vld [vmem:[%s4395_s0 + $0x170] sm:$0xff]  ;;  %v160_v7 = vadd.f32 %v96_v58, %v32_v57  ;;  %v98_v10 = vld [vmem:[%s4396_s1 + $0x78] sm:$0xff]  ;;  %v161_v13 = vadd.f32 %v97_v2, %v33_v1 }
  0x1a   :  { %2713 = vmatprep.subr.bf16.mxu0 %v2712_v29  ;;  %2726 = vmatprep.subr.bf16.mxu1 %v2712_v29  ;;  %v156_v39 = vadd.f32 %v92_v26, %v28_v25  ;;  %v64_v63 = vld [vmem:[%s4395_s0 + $0x168] sm:$0xff]  ;;  %v129_v4 = vld [vmem:[%s4396_s1 + $0x170] sm:$0xff]  ;;  %v66_v15 = vld [vmem:[%s4395_s0 + $0x178] sm:$0xff] }
  0x1b   :  { %v128_v0 = vld [vmem:[%s4396_s1 + $0x168] sm:$0xff]  ;;  %v193_v14 = vadd.f32 %v129_v4, %v65_v3  ;;  %v130_v16 = vld [vmem:[%s4396_s1 + $0x178] sm:$0xff]  ;;  %v67_v19 = vld [vmem:[%s4395_s0 + $0x180] sm:$0xff] }
  0x1c   :  { %v192_v8 = vadd.f32 %v128_v0, %v64_v63  ;;  %v131_v20 = vld [vmem:[%s4396_s1 + $0x180] sm:$0xff]  ;;  %v194_v24 = vadd.f32 %v130_v16, %v66_v15  ;;  %v36_v25 = vld [vmem:[%s4395_s0 + $0x88] sm:$0xff]  ;;  %v37_v33 = vld [vmem:[%s4395_s0 + $0x90] sm:$0xff] }
  0x1d   :  { %2715 = vmatpush3.bf16.msra.mxu0 %v2712_v29  ;;  %2734 = vmatpush3.bf16.msra.mxu1 %v2712_v29  ;;  %v155_v29 = vadd.f32 %v91_v18, %v27_v17  ;;  %v35_v17 = vld [vmem:[%s4395_s0 + $0x80] sm:$0xff]  ;;  %v100_v26 = vld [vmem:[%s4396_s1 + $0x88] sm:$0xff]  ;;  %v195_v30 = vadd.f32 %v131_v20, %v67_v19  ;;  %v101_v34 = vld [vmem:[%s4396_s1 + $0x90] sm:$0xff] }
  0x1e   :  { %2717 = vmatprep.subr.bf16.mxu0 %v2716_v37  ;;  %2727 = vmatprep.subr.bf16.mxu1 %v2716_v37  ;;  %v99_v18 = vld [vmem:[%s4396_s1 + $0x80] sm:$0xff]  ;;  %v68_v31 = vld [vmem:[%s4395_s0 + $0x188] sm:$0xff]  ;;  %v69_v35 = vld [vmem:[%s4395_s0 + $0x190] sm:$0xff] }
  0x1f   :  { %v219_v43 = vmax.f32 %v155_v29, 0.0  ;;  %v163_v29 = vadd.f32 %v99_v18, %v35_v17  ;;  %v132_v32 = vld [vmem:[%s4396_s1 + $0x188] sm:$0xff]  ;;  %v133_v36 = vld [vmem:[%s4396_s1 + $0x190] sm:$0xff]  ;;  %v38_v41 = vld [vmem:[%s4395_s0 + $0x98] sm:$0xff] }
  0x20   :  { %v102_v42 = vld [vmem:[%s4396_s1 + $0x98] sm:$0xff]  ;;  %v39_v49 = vld [vmem:[%s4395_s0 + $0xa0] sm:$0xff]  ;;  %v40_v57 = vld [vmem:[%s4395_s0 + $0xa8] sm:$0xff] }
  0x21   :  { %2719 = vmatpush3.bf16.msra.mxu0 %v2716_v37  ;;  %2735 = vmatpush3.bf16.msra.mxu1 %v2716_v37  ;;  %v218_v37 = vmax.f32 %v154_v23, 0.0  ;;  %v162_v23 = vadd.f32 %v98_v10, %v34_v9  ;;  %v70_v47 = vld [vmem:[%s4395_s0 + $0x198] sm:$0xff]  ;;  %v103_v50 = vld [vmem:[%s4396_s1 + $0xa0] sm:$0xff]  ;;  %v104_v58 = vld [vmem:[%s4396_s1 + $0xa8] sm:$0xff] }
  0x22   :  { %v134_v48 = vld [vmem:[%s4396_s1 + $0x198] sm:$0xff]  ;;  %v71_v51 = vld [vmem:[%s4395_s0 + $0x1a0] sm:$0xff]  ;;  %v72_v63 = vld [vmem:[%s4395_s0 + $0x1a8] sm:$0xff] }
  0x23   :  { %v135_v52 = vld [vmem:[%s4396_s1 + $0x1a0] sm:$0xff]  ;;  %v136_v0 = vld [vmem:[%s4396_s1 + $0x1a8] sm:$0xff]  ;;  %v41_v1 = vld [vmem:[%s4395_s0 + $0xb0] sm:$0xff] }
  0x24   :  { %2593 = vmatmul.mubr.f32.vlgmr.msra.gmra.mrb[0].mxu0 %v212_v53  ;;  %2641 = vmatmul.mubr.f32.vlgmr.msra.gmra.mrb[0].mxu1 %v244_v54  ;;  %v220_v53 = vmax.f32 %v156_v39, 0.0  ;;  %v252_v54 = vmax.f32 %v188_v40, 0.0  ;;  %v164_v39 = vadd.f32 %v100_v26, %v36_v25  ;;  %v196_v40 = vadd.f32 %v132_v32, %v68_v31  ;;  %v105_v2 = vld [vmem:[%s4396_s1 + $0xb0] sm:$0xff]  ;;  %v42_v9 = vld [vmem:[%s4395_s0 + $0xb8] sm:$0xff]  ;;  %v43_v17 = vld [vmem:[%s4395_s0 + $0xc0] sm:$0xff] }
  0x25   :  { %2595 = vmatprep.mubr.f32.mxu0 %v213_v59  ;;  %2643 = vmatprep.mubr.f32.mxu1 %v245_v60  ;;  %v221_v59 = vmax.f32 %v157_v45, 0.0  ;;  %v253_v60 = vmax.f32 %v189_v46, 0.0  ;;  %v165_v45 = vadd.f32 %v101_v34, %v37_v33  ;;  %v197_v46 = vadd.f32 %v133_v36, %v69_v35  ;;  %v73_v3 = vld [vmem:[%s4395_s0 + $0x1b0] sm:$0xff]  ;;  %v106_v10 = vld [vmem:[%s4396_s1 + $0xb8] sm:$0xff]  ;;  %v107_v18 = vld [vmem:[%s4396_s1 + $0xc0] sm:$0xff] }
  0x26   :  { %v137_v4 = vld [vmem:[%s4396_s1 + $0x1b0] sm:$0xff]  ;;  %v74_v15 = vld [vmem:[%s4395_s0 + $0x1b8] sm:$0xff]  ;;  %v75_v19 = vld [vmem:[%s4395_s0 + $0x1c0] sm:$0xff] }
  0x27   :  { %v138_v16 = vld [vmem:[%s4396_s1 + $0x1b8] sm:$0xff]  ;;  %v139_v20 = vld [vmem:[%s4396_s1 + $0x1c0] sm:$0xff]  ;;  %v44_v25 = vld [vmem:[%s4395_s0 + $0xc8] sm:$0xff] }
  0x28   :  { %2596 = vmatmul.mubr.f32.gmra.mrb[2].mxu0 %v214_v5  ;;  %2644 = vmatmul.mubr.f32.gmra.mrb[2].mxu1 %v246_v6  ;;  %v222_v5 = vmax.f32 %v158_v55, 0.0  ;;  %v254_v6 = vmax.f32 %v190_v56, 0.0  ;;  %v166_v55 = vadd.f32 %v102_v42, %v38_v41  ;;  %v198_v56 = vadd.f32 %v134_v48, %v70_v47  ;;  %v108_v26 = vld [vmem:[%s4396_s1 + $0xc8] sm:$0xff]  ;;  %v45_v33 = vld [vmem:[%s4395_s0 + $0xd0] sm:$0xff]  ;;  %v46_v41 = vld [vmem:[%s4395_s0 + $0xd8] sm:$0xff] }
  0x29   :  { %2598 = vmatprep.mubr.f32.mxu0 %v215_v11  ;;  %2646 = vmatprep.mubr.f32.mxu1 %v247_v12  ;;  %v223_v11 = vmax.f32 %v159_v61, 0.0  ;;  %v255_v12 = vmax.f32 %v191_v62, 0.0  ;;  %v167_v61 = vadd.f32 %v103_v50, %v39_v49  ;;  %v199_v62 = vadd.f32 %v135_v52, %v71_v51  ;;  %v76_v31 = vld [vmem:[%s4395_s0 + $0x1c8] sm:$0xff]  ;;  %v109_v34 = vld [vmem:[%s4396_s1 + $0xd0] sm:$0xff]  ;;  %v78_v47 = vld [vmem:[%s4395_s0 + $0x1d8] sm:$0xff] }
  0x2a   :  { %v140_v32 = vld [vmem:[%s4396_s1 + $0x1c8] sm:$0xff]  ;;  %v77_v35 = vld [vmem:[%s4395_s0 + $0x1d0] sm:$0xff]  ;;  %v142_v48 = vld [vmem:[%s4396_s1 + $0x1d8] sm:$0xff] }
  0x2b   :  { %v141_v36 = vld [vmem:[%s4396_s1 + $0x1d0] sm:$0xff]  ;;  %v206_v52 = vadd.f32 %v142_v48, %v78_v47 }
  0x2c   :  { %2599 = vmatmul.mubr.f32.gmra.mrb[4].mxu0 %v216_v21  ;;  %2647 = vmatmul.mubr.f32.gmra.mrb[4].mxu1 %v248_v22  ;;  %v224_v21 = vmax.f32 %v160_v7, 0.0  ;;  %v256_v22 = vmax.f32 %v192_v8, 0.0  ;;  %v168_v7 = vadd.f32 %v104_v58, %v40_v57  ;;  %v200_v8 = vadd.f32 %v136_v0, %v72_v63  ;;  %v47_v57 = vld [vmem:[%s4395_s0 + $0xe0] sm:$0xff] }
  0x2d   :  { %2601 = vmatprep.mubr.f32.mxu0 %v217_v27  ;;  %2649 = vmatprep.mubr.f32.mxu1 %v249_v28  ;;  %v225_v27 = vmax.f32 %v161_v13, 0.0  ;;  %v257_v28 = vmax.f32 %v193_v14, 0.0  ;;  %v169_v13 = vadd.f32 %v105_v2, %v41_v1  ;;  %v201_v14 = vadd.f32 %v137_v4, %v73_v3  ;;  %v111_v58 = vld [vmem:[%s4396_s1 + $0xe0] sm:$0xff]  ;;  %v80_v4 = vld [vmem:[%s4395_s0 + $0x1e8] sm:$0xff] }
  0x2e   :  { %v79_v1 = vld [vmem:[%s4395_s0 + $0x1e0] sm:$0xff] }
  0x2f   :  { %v143_v2 = vld [vmem:[%s4396_s1 + $0x1e0] sm:$0xff] }
  0x30   :  { %2602 = vmatmul.mubr.f32.gmra.mrb[6].mxu0 %v218_v37  ;;  %2650 = vmatmul.mubr.f32.gmra.mrb[6].mxu1 %v250_v38  ;;  %v226_v37 = vmax.f32 %v162_v23, 0.0  ;;  %v258_v38 = vmax.f32 %v194_v24, 0.0  ;;  %v170_v23 = vadd.f32 %v106_v10, %v42_v9  ;;  %v202_v24 = vadd.f32 %v138_v16, %v74_v15  ;;  %v49_v9 = vld [vmem:[%s4395_s0 + $0xf0] sm:$0xff] }
  0x31   :  { %2604 = vmatprep.mubr.f32.mxu0 %v219_v43  ;;  %2652 = vmatprep.mubr.f32.mxu1 %v251_v44  ;;  %v227_v43 = vmax.f32 %v163_v29, 0.0  ;;  %v259_v44 = vmax.f32 %v195_v30, 0.0  ;;  %v171_v29 = vadd.f32 %v107_v18, %v43_v17  ;;  %v203_v30 = vadd.f32 %v139_v20, %v75_v19  ;;  %v113_v10 = vld [vmem:[%s4396_s1 + $0xf0] sm:$0xff] }
  0x32   :  { %v207_v3 = vadd.f32 %v143_v2, %v79_v1  ;;  %v81_v17 = vld [vmem:[%s4395_s0 + $0x1f0] sm:$0xff]  ;;  %v3124_v19 = vmov 0  }
  0x33   :  { %v235_v42 = vmax.f32 %v171_v29, 0.0  ;;  %v145_v18 = vld [vmem:[%s4396_s1 + $0x1f0] sm:$0xff]  ;;  %2738 = vset.pattern.permute.xlu1 %v3124_v19  ;;  %2737 = vset.pattern.permute.xlu0 %v3124_v19 }
  0x34   :  { %2605 = vmatmul.mubr.f32.gmra.mrb[8].mxu0 %v220_v53  ;;  %2653 = vmatmul.mubr.f32.gmra.mrb[8].mxu1 %v252_v54  ;;  %v228_v53 = vmax.f32 %v164_v39, 0.0  ;;  %v260_v54 = vmax.f32 %v196_v40, 0.0  ;;  %v172_v39 = vadd.f32 %v108_v26, %v44_v25  ;;  %v204_v40 = vadd.f32 %v140_v32, %v76_v31  ;;  %v3585_v26 = vld [vmem:[#allocation2] ss:$0 sm:$0xff] }
  0x35   :  { %2607 = vmatprep.mubr.f32.mxu0 %v221_v59  ;;  %2655 = vmatprep.mubr.f32.mxu1 %v253_v60  ;;  %v229_v59 = vmax.f32 %v165_v45, 0.0  ;;  %v261_v60 = vmax.f32 %v197_v46, 0.0  ;;  %v110_v45 = vld [vmem:[%s4396_s1 + $0xd8] sm:$0xff]  ;;  %v205_v46 = vadd.f32 %v141_v36, %v77_v35  ;;  %v209_v20 = vadd.f32 %v145_v18, %v81_v17 }
  0x36   :  { %v236_v49 = vmax.f32 %v172_v39, 0.0  ;;  %v268_v50 = vmax.f32 %v204_v40, 0.0  ;;  %v174_v51 = vadd.f32 %v110_v45, %v46_v41 }
  0x38   :  { %2608 = vmatmul.mubr.f32.gmra.mrb[10].mxu0 %v222_v5  ;;  %2656 = vmatmul.mubr.f32.gmra.mrb[10].mxu1 %v254_v6  ;;  %v230_v5 = vmax.f32 %v166_v55, 0.0  ;;  %v262_v6 = vmax.f32 %v198_v56, 0.0  ;;  %v238_v55 = vmax.f32 %v174_v51, 0.0  ;;  %v270_v56 = vmax.f32 %v206_v52, 0.0 }
  0x39   :  { %2610 = vmatprep.mubr.f32.mxu0 %v223_v11  ;;  %2658 = vmatprep.mubr.f32.mxu1 %v255_v12  ;;  %v231_v11 = vmax.f32 %v167_v61, 0.0  ;;  %v263_v12 = vmax.f32 %v199_v62, 0.0  ;;  %v112_v61 = vld [vmem:[%s4396_s1 + $0xe8] sm:$0xff] }
  0x3c   :  { %2611 = vmatmul.mubr.f32.gmra.mrb[12].mxu0 %v224_v21  ;;  %2659 = vmatmul.mubr.f32.gmra.mrb[12].mxu1 %v256_v22  ;;  %v232_v21 = vmax.f32 %v168_v7, 0.0  ;;  %v264_v22 = vmax.f32 %v200_v8, 0.0  ;;  %v271_v7 = vmax.f32 %v207_v3, 0.0 }
  0x3d   :  { %2613 = vmatprep.mubr.f32.mxu0 %v225_v27  ;;  %2661 = vmatprep.mubr.f32.mxu1 %v257_v28  ;;  %v233_v27 = vmax.f32 %v169_v13, 0.0  ;;  %v265_v28 = vmax.f32 %v201_v14, 0.0  ;;  %v114_v13 = vld [vmem:[%s4396_s1 + $0xf8] sm:$0xff] }
  0x40   :  { %2614 = vmatmul.mubr.f32.gmra.mrb[14].mxu0 %v226_v37  ;;  %2662 = vmatmul.mubr.f32.gmra.mrb[14].mxu1 %v258_v38  ;;  %v234_v37 = vmax.f32 %v170_v23, 0.0  ;;  %v266_v38 = vmax.f32 %v202_v24, 0.0  ;;  %v273_v24 = vmax.f32 %v209_v20, 0.0 }
  0x41   :  { %2616 = vmatprep.mubr.f32.mxu0 %v227_v43  ;;  %2664 = vmatprep.mubr.f32.mxu1 %v259_v44  ;;  %v267_v43 = vmax.f32 %v203_v30, 0.0  ;;  %v173_v44 = vadd.f32 %v109_v34, %v45_v33 }
  0x44   :  { %2617 = vmatmul.mubr.f32.gmra.mrb[16].mxu0 %v228_v53  ;;  %2665 = vmatmul.mubr.f32.gmra.mrb[16].mxu1 %v260_v54  ;;  %v237_v53 = vmax.f32 %v173_v44, 0.0  ;;  %v269_v54 = vmax.f32 %v205_v46, 0.0 }
  0x45   :  { %2619 = vmatprep.mubr.f32.mxu0 %v229_v59  ;;  %2667 = vmatprep.mubr.f32.mxu1 %v261_v60  ;;  %v175_v59 = vadd.f32 %v111_v58, %v47_v57  ;;  %v48_v60 = vld [vmem:[%s4395_s0 + $0xe8] sm:$0xff] }
  0x46   :  { %v176_v62 = vadd.f32 %v112_v61, %v48_v60 }
  0x47   :  { %v239_v63 = vmax.f32 %v175_v59, 0.0 }
  0x48   :  { %2620 = vmatmul.mubr.f32.gmra.mrb[18].mxu0 %v230_v5  ;;  %2668 = vmatmul.mubr.f32.gmra.mrb[18].mxu1 %v262_v6  ;;  %v240_v0 = vmax.f32 %v176_v62, 0.0  ;;  %v144_v5 = vld [vmem:[%s4396_s1 + $0x1e8] sm:$0xff] }
  0x49   :  { %2622 = vmatprep.mubr.f32.mxu0 %v231_v11  ;;  %2670 = vmatprep.mubr.f32.mxu1 %v263_v12  ;;  %v208_v6 = vadd.f32 %v144_v5, %v80_v4  ;;  %v177_v11 = vadd.f32 %v113_v10, %v49_v9  ;;  %v50_v12 = vld [vmem:[%s4395_s0 + $0xf8] sm:$0xff] }
  0x4a   :  { %v178_v14 = vadd.f32 %v114_v13, %v50_v12 }
  0x4b   :  { %v272_v8 = vmax.f32 %v208_v6, 0.0  ;;  %v241_v15 = vmax.f32 %v177_v11, 0.0 }
  0x4c   :  { %2623 = vmatmul.mubr.f32.gmra.mrb[20].mxu0 %v232_v21  ;;  %2671 = vmatmul.mubr.f32.gmra.mrb[20].mxu1 %v264_v22  ;;  %v242_v16 = vmax.f32 %v178_v14, 0.0  ;;  %v82_v21 = vld [vmem:[%s4395_s0 + $0x1f8] sm:$0xff] }
  0x4d   :  { %2625 = vmatprep.mubr.f32.mxu0 %v233_v27  ;;  %2673 = vmatprep.mubr.f32.mxu1 %v265_v28  ;;  %v146_v22 = vld [vmem:[%s4396_s1 + $0x1f8] sm:$0xff] }
  0x4e   :  { %v210_v23 = vadd.f32 %v146_v22, %v82_v21 }
  0x50   :  { %2626 = vmatmul.mubr.f32.gmra.mrb[22].mxu0 %v234_v37  ;;  %2674 = vmatmul.mubr.f32.gmra.mrb[22].mxu1 %v266_v38  ;;  %v274_v25 = vmax.f32 %v210_v23, 0.0 }
  0x51   :  { %2628 = vmatprep.mubr.f32.mxu0 %v235_v42  ;;  %2676 = vmatprep.mubr.f32.mxu1 %v267_v43 }
  0x54   :  { %2629 = vmatmul.mubr.f32.gmra.mrb[24].mxu0 %v236_v49  ;;  %2677 = vmatmul.mubr.f32.gmra.mrb[24].mxu1 %v268_v50 }
  0x55   :  { %2631 = vmatprep.mubr.f32.mxu0 %v237_v53  ;;  %2679 = vmatprep.mubr.f32.mxu1 %v269_v54 }
  0x58   :  { %2632 = vmatmul.mubr.f32.gmra.mrb[26].mxu0 %v238_v55  ;;  %2680 = vmatmul.mubr.f32.gmra.mrb[26].mxu1 %v270_v56 }
  0x59   :  { %2634 = vmatprep.mubr.f32.mxu0 %v239_v63  ;;  %2682 = vmatprep.mubr.f32.mxu1 %v271_v7 }
  0x5c   :  { %2635 = vmatmul.mubr.f32.gmra.mrb[28].mxu0 %v240_v0  ;;  %2683 = vmatmul.mubr.f32.gmra.mrb[28].mxu1 %v272_v8 }
  0x5d   :  { %2637 = vmatprep.mubr.f32.mxu0 %v241_v15  ;;  %2685 = vmatprep.mubr.f32.mxu1 %v273_v24 }
  0x60   :  { %2638 = vmatmul.mubr.f32.gmra.mrb[30].mxu0 %v242_v16  ;;  %2686 = vmatmul.mubr.f32.gmra.mrb[30].mxu1 %v274_v25 }
  0xf7   :  { %v2594_v27 = vpop.f32.mrb[0].mxu0  ;;  %v2642_v28 = vpop.f32.mrb[0].mxu1 }
  0xf8   :  { %v370_v29 = vadd.f32 %v2594_v27, %v3585_v26  ;;  %v530_v30 = vadd.f32 %v2642_v28, %v3585_v26  ;;  %v364_v31 = vpop.f32.mrb[1].mxu0  ;;  %v524_v32 = vpop.f32.mrb[1].mxu1 }
  0xf9   :  { %v365_v33 = vadd.f32 %v3585_v26, %v364_v31  ;;  %v525_v34 = vadd.f32 %v3585_v26, %v524_v32 }
  0xfa   :  { %v684_v35 = vsub.f32 0.0, %v370_v29  ;;  %v716_v36 = vsub.f32 0.0, %v530_v30 }
  0xfb   :  { %v683_v37 = vsub.f32 0.0, %v365_v33  ;;  %v715_v38 = vsub.f32 0.0, %v525_v34  ;;  %v2597_v39 = vpop.f32.mrb[2].mxu0  ;;  %v2645_v40 = vpop.f32.mrb[2].mxu1 }
  0xfc   :  { %v749_v41 = vmul.f32 1.442695, %v684_v35  ;;  %v813_v42 = vmul.f32 1.442695, %v716_v36  ;;  %v380_v43 = vadd.f32 %v2597_v39, %v3585_v26  ;;  %v374_v44 = vpop.f32.mrb[3].mxu0  ;;  %v534_v45 = vpop.f32.mrb[3].mxu1  ;;  %v540_v47 = vadd.f32 %v2645_v40, %v3585_v26 }
  0xfd   :  { %v747_v46 = vmul.f32 1.442695, %v683_v37  ;;  %v811_v48 = vmul.f32 1.442695, %v715_v38  ;;  %v375_v55 = vadd.f32 %v3585_v26, %v374_v44  ;;  %v535_v57 = vadd.f32 %v3585_v26, %v534_v45 }
  0xfe   :  { %2739 = vpow2.f32 %v749_v41  ;;  %v686_v49 = vsub.f32 0.0, %v380_v43  ;;  %v718_v56 = vsub.f32 0.0, %v540_v47 }
  0xff   :  { %2741 = vpow2.f32 %v813_v42  ;;  %v2600_v50 = vpop.f32.mrb[4].mxu0  ;;  %v2648_v51 = vpop.f32.mrb[4].mxu1  ;;  %v685_v62 = vsub.f32 0.0, %v375_v55  ;;  %v717_v0 = vsub.f32 0.0, %v535_v57 }
 0x100   :  { %2743 = vpow2.f32 %v747_v46  ;;  %v384_v52 = vpop.f32.mrb[5].mxu0  ;;  %v544_v53 = vpop.f32.mrb[5].mxu1  ;;  %v753_v54 = vmul.f32 1.442695, %v686_v49  ;;  %v817_v63 = vmul.f32 1.442695, %v718_v56  ;;  %v390_v17 = vadd.f32 %v2600_v50, %v3585_v26 }
 0x101   :  { %2745 = vpow2.f32 %v811_v48  ;;  %v751_v8 = vmul.f32 1.442695, %v685_v62  ;;  %v385_v9 = vadd.f32 %v3585_v26, %v384_v52  ;;  %v815_v12 = vmul.f32 1.442695, %v717_v0 }
 0x102   :  { %2747 = vpow2.f32 %v753_v54  ;;  %v545_v20 = vadd.f32 %v3585_v26, %v544_v53  ;;  %v688_v27 = vsub.f32 0.0, %v390_v17  ;;  %v550_v31 = vadd.f32 %v2648_v51, %v3585_v26 }
 0x103   :  { %v3595_v58 = vpop.f32.mrb[6].mxu0  ;;  %v3597_v59 = vpop.f32.mrb[6].mxu1  ;;  %2749 = vpow2.f32 %v817_v63  ;;  %v687_v19 = vsub.f32 0.0, %v385_v9 }
 0x104   :  { %v3599_v60 = vpop.f32.mrb[7].mxu0  ;;  %v3601_v61 = vpop.f32.mrb[7].mxu1  ;;  %v719_v32 = vsub.f32 0.0, %v545_v20  ;;  %v757_v37 = vmul.f32 1.442695, %v688_v27  ;;  %v720_v41 = vsub.f32 0.0, %v550_v31 }
 0x105   :  { %v755_v30 = vmul.f32 1.442695, %v687_v19  ;;  %v395_v62 = vadd.f32 %v3585_v26, %v3599_v60 }
 0x106   :  { %v819_v42 = vmul.f32 1.442695, %v719_v32  ;;  %v821_v51 = vmul.f32 1.442695, %v720_v41 }
 0x107   :  { %v3603_v1 = vpop.f32.mrb[8].mxu0  ;;  %v3605_v2 = vpop.f32.mrb[8].mxu1  ;;  %v689_v60 = vsub.f32 0.0, %v395_v62 }
 0x108   :  { %v2740_v3 = vpop.eup %2739  ;;  %v3607_v4 = vpop.f32.mrb[9].mxu0 }
 0x109   :  { %v3609_v5 = vpop.f32.mrb[9].mxu1  ;;  %v2742_v6 = vpop.eup %2741  ;;  %v876_v7 = vadd.f32 1.0, %v2740_v3 }
 0x10a   :  { %v2744_v10 = vpop.eup %2743  ;;  %v908_v11 = vadd.f32 1.0, %v2742_v6 }
 0x10b   :  { %2751 = vrcp.f32 %v876_v7  ;;  %v875_v13 = vadd.f32 1.0, %v2744_v10  ;;  %v3612_v14 = vpop.f32.mrb[10].mxu0  ;;  %v3614_v15 = vpop.f32.mrb[10].mxu1  ;;  %v400_v7 = vadd.f32 %v3595_v58, %v3585_v26  ;;  %v560_v58 = vadd.f32 %v3597_v59, %v3585_v26 }
 0x10c   :  { %v2746_v16 = vpop.eup %2745  ;;  %2753 = vrcp.f32 %v908_v11  ;;  %v3617_v18 = vpop.f32.mrb[11].mxu0 }
 0x10d   :  { %2755 = vpow2.f32 %v751_v8  ;;  %v3620_v21 = vpop.f32.mrb[11].mxu1  ;;  %v2748_v22 = vpop.eup %2747  ;;  %v907_v23 = vadd.f32 1.0, %v2746_v16  ;;  %v690_v17 = vsub.f32 0.0, %v400_v7 }
 0x10e   :  { %2757 = vpow2.f32 %v815_v12  ;;  %v878_v33 = vadd.f32 1.0, %v2748_v22  ;;  %v2750_v34 = vpop.eup %2749  ;;  %v555_v12 = vadd.f32 %v3585_v26, %v3601_v61 }
 0x10f   :  { %2759 = vrcp.f32 %v875_v13  ;;  %v3622_v24 = vpop.f32.mrb[12].mxu0  ;;  %v3624_v25 = vpop.f32.mrb[12].mxu1  ;;  %v910_v44 = vadd.f32 1.0, %v2750_v34  ;;  %v761_v61 = vmul.f32 1.442695, %v690_v17 }
 0x110   :  { %v3626_v28 = vpop.f32.mrb[13].mxu0  ;;  %v3628_v29 = vpop.f32.mrb[13].mxu1  ;;  %2761 = vrcp.f32 %v907_v23  ;;  %v721_v32 = vsub.f32 0.0, %v555_v12 }
 0x111   :  { %2763 = vpow2.f32 %v755_v30  ;;  %v759_v30 = vmul.f32 1.442695, %v689_v60 }
 0x112   :  { %2765 = vrcp.f32 %v878_v33  ;;  %v722_v33 = vsub.f32 0.0, %v560_v58 }
 0x113   :  { %v3631_v35 = vpop.f32.mrb[14].mxu0  ;;  %v3633_v36 = vpop.f32.mrb[14].mxu1  ;;  %2767 = vpow2.f32 %v757_v37 }
 0x114   :  { %v3635_v38 = vpop.f32.mrb[15].mxu0  ;;  %v3637_v39 = vpop.f32.mrb[15].mxu1  ;;  %2769 = vpow2.f32 %v819_v42  ;;  %v823_v42 = vmul.f32 1.442695, %v721_v32 }
 0x115   :  { %v2752_v40 = vpop.eup %2751  ;;  %2771 = vrcp.f32 %v910_v44 }
 0x116   :  { %v2754_v43 = vpop.eup %2753  ;;  %1074 = vperm.xlu0 %2737, %v2752_v40   ;;  %v1452_v52 = vsub.f32 1.0, %v2752_v40  ;;  %2773 = vpow2.f32 %v821_v51  ;;  %v410_v51 = vadd.f32 %v3603_v1, %v3585_v26  ;;  %v565_v1 = vadd.f32 %v3585_v26, %v3609_v5 }
 0x117   :  { %v2756_v45 = vpop.eup %2755  ;;  %1234 = vperm.xlu1 %2738, %v2754_v43   ;;  %v3639_v46 = vpop.f32.mrb[16].mxu0  ;;  %v1484_v6 = vsub.f32 1.0, %v2754_v43 }
 0x118   :  { %v3641_v47 = vpop.f32.mrb[16].mxu1  ;;  %v2758_v48 = vpop.eup %2757  ;;  %v877_v54 = vadd.f32 1.0, %v2756_v45  ;;  %v825_v45 = vmul.f32 1.442695, %v722_v33 }
 0x119   :  { %v3643_v49 = vpop.f32.mrb[17].mxu0  ;;  %v2760_v50 = vpop.eup %2759  ;;  %v909_v55 = vadd.f32 1.0, %v2758_v48 }
 0x11a   :  { %v3645_v53 = vpop.f32.mrb[17].mxu1  ;;  %1069 = vperm.xlu0 %2737, %v2760_v50   ;;  %v2762_v3 = vpop.eup %2761  ;;  %2775 = vrcp.f32 %v877_v54  ;;  %v1451_v11 = vsub.f32 1.0, %v2760_v50 }
 0x11b   :  { %1522 = vperm.xlu1 %2738, %v1452_v52   ;;  %v3647_v56 = vpop.f32.mrb[18].mxu0  ;;  %v3649_v57 = vpop.f32.mrb[18].mxu1  ;;  %2777 = vrcp.f32 %v909_v55  ;;  %v1483_v31 = vsub.f32 1.0, %v2762_v3  ;;  %v405_v55 = vadd.f32 %v3585_v26, %v3607_v4 }
 0x11c   :  { %v3653_v63 = vpop.f32.mrb[19].mxu0  ;;  %v3655_v0 = vpop.f32.mrb[19].mxu1 }
 0x11d   :  { %v2764_v8 = vpop.eup %2763 }
 0x11e   :  { %1229 = vperm.xlu0 %2737, %v2762_v3   ;;  %v2766_v10 = vpop.eup %2765  ;;  %v879_v23 = vadd.f32 1.0, %v2764_v8  ;;  %v692_v3 = vsub.f32 0.0, %v410_v51  ;;  %v691_v8 = vsub.f32 0.0, %v405_v55  ;;  %v575_v51 = vadd.f32 %v3585_v26, %v3620_v21 }
 0x11f   :  { %1682 = vperm.xlu1 %2738, %v1484_v6   ;;  %v3659_v9 = vpop.f32.mrb[20].mxu0  ;;  %v3665_v16 = vpop.f32.mrb[20].mxu1  ;;  %v1454_v62 = vsub.f32 1.0, %v2766_v10  ;;  %v570_v6 = vadd.f32 %v3605_v2, %v3585_v26 }
 0x120   :  { %v3663_v13 = vpop.f32.mrb[21].mxu0  ;;  %v3669_v19 = vpop.f32.mrb[21].mxu1  ;;  %2779 = vrcp.f32 %v879_v23  ;;  %v765_v4 = vmul.f32 1.442695, %v692_v3  ;;  %v580_v3 = vadd.f32 %v3614_v15, %v3585_v26 }
 0x121   :  { %v2768_v20 = vpop.eup %2767  ;;  %2781 = vpow2.f32 %v759_v30 }
 0x122   :  { %1517 = vperm.xlu0 %2737, %v1451_v11   ;;  %v2770_v22 = vpop.eup %2769  ;;  %v880_v34 = vadd.f32 1.0, %v2768_v20  ;;  %2783 = vpow2.f32 %v761_v61  ;;  %v763_v20 = vmul.f32 1.442695, %v691_v8 }
 0x123   :  { %1084 = vperm.xlu1 %2738, %v2766_v10   ;;  %v2772_v27 = vpop.eup %2771  ;;  %v911_v40 = vadd.f32 1.0, %v2770_v22  ;;  %v3671_v59 = vpop.f32.mrb[22].mxu0  ;;  %v724_v10 = vsub.f32 0.0, %v570_v6  ;;  %v723_v22 = vsub.f32 0.0, %v565_v1  ;;  %v725_v6 = vsub.f32 0.0, %v575_v51 }
 0x124   :  { %v2774_v37 = vpop.eup %2773  ;;  %v3673_v43 = vpop.f32.mrb[23].mxu0  ;;  %2785 = vrcp.f32 %v880_v34  ;;  %v1486_v60 = vsub.f32 1.0, %v2772_v27 }
 0x125   :  { %v2776_v41 = vpop.eup %2775  ;;  %v912_v48 = vadd.f32 1.0, %v2774_v37  ;;  %v3675_v50 = vpop.f32.mrb[22].mxu1  ;;  %2787 = vrcp.f32 %v911_v40  ;;  %v829_v5 = vmul.f32 1.442695, %v724_v10  ;;  %v827_v33 = vmul.f32 1.442695, %v723_v22 }
 0x126   :  { %1677 = vperm.xlu0 %2737, %v1483_v31   ;;  %v2778_v44 = vpop.eup %2777  ;;  %v3679_v52 = vpop.f32.mrb[23].mxu1  ;;  %2789 = vpow2.f32 %v823_v42  ;;  %v1453_v54 = vsub.f32 1.0, %v2776_v41  ;;  %v420_v42 = vadd.f32 %v3612_v14, %v3585_v26 }
 0x127   :  { %1244 = vperm.xlu1 %2738, %v2772_v27   ;;  %2791 = vpow2.f32 %v825_v45  ;;  %v1485_v7 = vsub.f32 1.0, %v2778_v44  ;;  %v3687_v61 = vpop.f32.mrb[24].mxu0  ;;  %v3691_v37 = vpop.f32.mrb[24].mxu1 }
 0x128   :  { %2793 = vrcp.f32 %v912_v48  ;;  %v3689_v34 = vpop.f32.mrb[25].mxu0  ;;  %v3697_v45 = vpop.f32.mrb[25].mxu1  ;;  %v694_v55 = vsub.f32 0.0, %v420_v42 }
 0x129   :  { %2795 = vpow2.f32 %v765_v4 }
 0x12a   :  { %1239 = vperm.xlu0 %2737, %v2778_v44   ;;  %v2780_v11 = vpop.eup %2779  ;;  %2797 = vpow2.f32 %v763_v20  ;;  %v415_v44 = vadd.f32 %v3585_v26, %v3617_v18  ;;  %v769_v1 = vmul.f32 1.442695, %v694_v55  ;;  %v585_v55 = vadd.f32 %v3585_v26, %v3628_v29 }
 0x12b   :  { %1079 = vperm.xlu1 %2738, %v2776_v41   ;;  %v2782_v12 = vpop.eup %2781  ;;  %v1455_v48 = vsub.f32 1.0, %v2780_v11  ;;  %v3703_v15 = vpop.f32.mrb[26].mxu0 }
 0x12c   :  { %v2784_v17 = vpop.eup %2783  ;;  %v881_v30 = vadd.f32 1.0, %v2782_v12  ;;  %v726_v12 = vsub.f32 0.0, %v580_v3 }
 0x12d   :  { %v882_v2 = vadd.f32 1.0, %v2784_v17  ;;  %v831_v17 = vmul.f32 1.442695, %v725_v6 }
 0x12e   :  { %1527 = vperm.xlu0 %2737, %v1453_v54   ;;  %v2786_v58 = vpop.eup %2785  ;;  %2799 = vrcp.f32 %v881_v30 }
 0x12f   :  { %1532 = vperm.xlu1 %2738, %v1454_v62   ;;  %v2788_v23 = vpop.eup %2787  ;;  %2801 = vrcp.f32 %v882_v2  ;;  %v1456_v54 = vsub.f32 1.0, %v2786_v58  ;;  %v693_v62 = vsub.f32 0.0, %v415_v44  ;;  %v3707_v2 = vpop.f32.mrb[27].mxu0 }
 0x130   :  { %v2790_v31 = vpop.eup %2789  ;;  %2803 = vpow2.f32 %v829_v5  ;;  %v1487_v14 = vsub.f32 1.0, %v2788_v23 }
 0x131   :  { %v2792_v32 = vpop.eup %2791  ;;  %v913_v40 = vadd.f32 1.0, %v2790_v31  ;;  %2805 = vpow2.f32 %v827_v33  ;;  %v767_v21 = vmul.f32 1.442695, %v693_v62  ;;  %v833_v31 = vmul.f32 1.442695, %v726_v12 }
 0x132   :  { %1687 = vperm.xlu0 %2737, %v1485_v7   ;;  %v2794_v27 = vpop.eup %2793  ;;  %v914_v41 = vadd.f32 1.0, %v2792_v32 }
 0x133   :  { %1692 = vperm.xlu1 %2738, %v1486_v60   ;;  %2807 = vrcp.f32 %v913_v40  ;;  %v2796_v18 = vpop.eup %2795  ;;  %v1488_v7 = vsub.f32 1.0, %v2794_v27 }
 0x134   :  { %2809 = vrcp.f32 %v914_v41  ;;  %v2798_v8 = vpop.eup %2797  ;;  %v884_v20 = vadd.f32 1.0, %v2796_v18  ;;  %v425_v41 = vadd.f32 %v3585_v26, %v3626_v28 }
 0x135   :  { %v883_v10 = vadd.f32 1.0, %v2798_v8  ;;  %2811 = vpow2.f32 %v769_v1  ;;  %v727_v8 = vsub.f32 0.0, %v585_v55 }
 0x136   :  { %1089 = vperm.xlu0 %2737, %v2780_v11   ;;  %2813 = vpow2.f32 %v767_v21 }
 0x137   :  { %1094 = vperm.xlu1 %2738, %v2786_v58   ;;  %2815 = vpow2.f32 %v831_v17  ;;  %v3719_v17 = vpop.f32.mrb[28].mxu0 }
 0x138   :  { %v2800_v11 = vpop.eup %2799  ;;  %2817 = vrcp.f32 %v883_v10  ;;  %v3721_v10 = vpop.f32.mrb[29].mxu0 }
 0x139   :  { %v2802_v60 = vpop.eup %2801  ;;  %2819 = vrcp.f32 %v884_v20  ;;  %v1457_v40 = vsub.f32 1.0, %v2800_v11 }
 0x13a   :  { %1249 = vperm.xlu0 %2737, %v2788_v23   ;;  %v2804_v4 = vpop.eup %2803  ;;  %v3705_v23 = vpop.f32.mrb[26].mxu1  ;;  %2821 = vpow2.f32 %v833_v31  ;;  %v1458_v42 = vsub.f32 1.0, %v2802_v60 }
 0x13b   :  { %1254 = vperm.xlu1 %2738, %v2794_v27   ;;  %v2806_v58 = vpop.eup %2805  ;;  %v916_v5 = vadd.f32 1.0, %v2804_v4  ;;  %v430_v27 = vadd.f32 %v3622_v24, %v3585_v26  ;;  %v3711_v33 = vpop.f32.mrb[27].mxu1  ;;  %v835_v4 = vmul.f32 1.442695, %v727_v8 }
 0x13c   :  { %v915_v32 = vadd.f32 1.0, %v2806_v58  ;;  %v3735_v8 = vpop.f32.mrb[30].mxu0 }
 0x13d   :  { %v2808_v22 = vpop.eup %2807  ;;  %v696_v44 = vsub.f32 0.0, %v430_v27 }
 0x13e   :  { %1537 = vperm.xlu0 %2737, %v1455_v48   ;;  %v2810_v30 = vpop.eup %2809  ;;  %2823 = vrcp.f32 %v915_v32  ;;  %v1489_v51 = vsub.f32 1.0, %v2808_v22  ;;  %v435_v32 = vadd.f32 %v3585_v26, %v3635_v38 }
 0x13f   :  { %1542 = vperm.xlu1 %2738, %v1456_v54   ;;  %2825 = vrcp.f32 %v916_v5  ;;  %v2812_v48 = vpop.eup %2811  ;;  %v695_v54 = vsub.f32 0.0, %v425_v41  ;;  %v1490_v62 = vsub.f32 1.0, %v2810_v30  ;;  %v773_v6 = vmul.f32 1.442695, %v696_v44 }
 0x140   :  { %v2814_v24 = vpop.eup %2813  ;;  %v600_v41 = vadd.f32 %v3633_v36, %v3585_v26  ;;  %v595_v44 = vadd.f32 %v3585_v26, %v3637_v39 }
 0x141   :  { %v2816_v3 = vpop.eup %2815  ;;  %v885_v1 = vadd.f32 1.0, %v2814_v24  ;;  %2827 = vpow2.f32 %v773_v6 }
 0x142   :  { %1697 = vperm.xlu0 %2737, %v1487_v14   ;;  %v590_v14 = vadd.f32 %v3624_v25, %v3585_v26  ;;  %v2818_v28 = vpop.eup %2817  ;;  %v917_v29 = vadd.f32 1.0, %v2816_v3  ;;  %v730_v24 = vsub.f32 0.0, %v600_v41  ;;  %v729_v3 = vsub.f32 0.0, %v595_v44 }
 0x143   :  { %1702 = vperm.xlu1 %2738, %v1488_v7   ;;  %v2820_v18 = vpop.eup %2819  ;;  %v771_v7 = vmul.f32 1.442695, %v695_v54  ;;  %v1459_v31 = vsub.f32 1.0, %v2818_v28 }
 0x144   :  { %v2822_v21 = vpop.eup %2821  ;;  %v1460_v27 = vsub.f32 1.0, %v2820_v18  ;;  %v841_v39 = vmul.f32 1.442695, %v730_v24 }
 0x145   :  { %2829 = vpow2.f32 %v771_v7  ;;  %v918_v20 = vadd.f32 1.0, %v2822_v21  ;;  %v3737_v21 = vpop.f32.mrb[31].mxu0 }
 0x146   :  { %1099 = vperm.xlu0 %2737, %v2800_v11   ;;  %v728_v11 = vsub.f32 0.0, %v590_v14  ;;  %2831 = vrcp.f32 %v885_v1 }
 0x147   :  { %1104 = vperm.xlu1 %2738, %v2802_v60   ;;  %v886_v60 = vadd.f32 1.0, %v2812_v48 }
 0x148   :  { %v2824_v12 = vpop.eup %2823  ;;  %v837_v58 = vmul.f32 1.442695, %v728_v11  ;;  %v839_v11 = vmul.f32 1.442695, %v729_v3 }
 0x149   :  { %v2826_v25 = vpop.eup %2825  ;;  %2833 = vrcp.f32 %v886_v60 }
 0x14a   :  { %1259 = vperm.xlu0 %2737, %v2808_v22   ;;  %2835 = vrcp.f32 %v917_v29  ;;  %v440_v22 = vadd.f32 %v3631_v35, %v3585_v26  ;;  %v697_v35 = vsub.f32 0.0, %v435_v32  ;;  %v450_v29 = vadd.f32 %v3639_v46, %v3585_v26 }
 0x14b   :  { %1264 = vperm.xlu1 %2738, %v2810_v30   ;;  %v3725_v30 = vpop.f32.mrb[28].mxu1  ;;  %2837 = vpow2.f32 %v835_v4  ;;  %v2828_v48 = vpop.eup %2827 }
 0x14c   :  { %v3729_v5 = vpop.f32.mrb[29].mxu1  ;;  %2839 = vpow2.f32 %v837_v58  ;;  %v775_v14 = vmul.f32 1.442695, %v697_v35  ;;  %v888_v36 = vadd.f32 1.0, %v2828_v48  ;;  %v700_v32 = vsub.f32 0.0, %v450_v29 }
 0x14d   :  { %2841 = vrcp.f32 %v918_v20  ;;  %v3743_v4 = vpop.f32.mrb[30].mxu1  ;;  %v605_v20 = vadd.f32 %v3585_v26, %v3645_v53 }
 0x14e   :  { %1547 = vperm.xlu0 %2737, %v1457_v40   ;;  %v698_v40 = vsub.f32 0.0, %v440_v22  ;;  %v3747_v22 = vpop.f32.mrb[31].mxu1  ;;  %v781_v44 = vmul.f32 1.442695, %v700_v32 }
 0x14f   :  { %1552 = vperm.xlu1 %2738, %v1458_v42   ;;  %v1491_v42 = vsub.f32 1.0, %v2824_v12  ;;  %v2830_v54 = vpop.eup %2829 }
 0x150   :  { %v2832_v38 = vpop.eup %2831  ;;  %v777_v55 = vmul.f32 1.442695, %v698_v40  ;;  %v887_v6 = vadd.f32 1.0, %v2830_v54  ;;  %v731_v40 = vsub.f32 0.0, %v605_v20  ;;  %v620_v20 = vadd.f32 %v3649_v57, %v3585_v26 }
 0x151   :  { %v1461_v58 = vsub.f32 1.0, %v2832_v38 }
 0x152   :  { %1707 = vperm.xlu0 %2737, %v1489_v51   ;;  %v1492_v51 = vsub.f32 1.0, %v2826_v25  ;;  %2843 = vpow2.f32 %v777_v55 }
 0x153   :  { %1712 = vperm.xlu1 %2738, %v1490_v62   ;;  %v2834_v62 = vpop.eup %2833  ;;  %2845 = vpow2.f32 %v775_v14 }
 0x154   :  { %2847 = vrcp.f32 %v887_v6 }
 0x155   :  { %2849 = vrcp.f32 %v888_v36  ;;  %v455_v36 = vadd.f32 %v3585_v26, %v3653_v63 }
 0x156   :  { %1109 = vperm.xlu0 %2737, %v2818_v28   ;;  %v2836_v28 = vpop.eup %2835  ;;  %2851 = vpow2.f32 %v841_v39  ;;  %v460_v39 = vadd.f32 %v3647_v56, %v3585_v26 }
 0x157   :  { %1114 = vperm.xlu1 %2738, %v2820_v18   ;;  %v2838_v18 = vpop.eup %2837  ;;  %2853 = vpow2.f32 %v839_v11  ;;  %v701_v11 = vsub.f32 0.0, %v455_v36 }
 0x158   :  { %v2840_v7 = vpop.eup %2839  ;;  %v919_v60 = vadd.f32 1.0, %v2838_v18  ;;  %v702_v29 = vsub.f32 0.0, %v460_v39 }
 0x159   :  { %v2842_v1 = vpop.eup %2841  ;;  %v783_v56 = vmul.f32 1.442695, %v701_v11 }
 0x15a   :  { %1269 = vperm.xlu0 %2737, %v2824_v12   ;;  %v920_v12 = vadd.f32 1.0, %v2840_v7  ;;  %2855 = vrcp.f32 %v919_v60 }
 0x15b   :  { %1274 = vperm.xlu1 %2738, %v2826_v25   ;;  %v445_v25 = vadd.f32 %v3585_v26, %v3643_v49  ;;  %v610_v49 = vadd.f32 %v3641_v47, %v3585_v26 }
 0x15c   :  { %2857 = vrcp.f32 %v920_v12  ;;  %v2844_v41 = vpop.eup %2843 }
 0x15d   :  { %v699_v46 = vsub.f32 0.0, %v445_v25  ;;  %v2846_v35 = vpop.eup %2845  ;;  %v732_v54 = vsub.f32 0.0, %v610_v49  ;;  %v890_v14 = vadd.f32 1.0, %v2844_v41  ;;  %2859 = vpow2.f32 %v781_v44 }
 0x15e   :  { %1557 = vperm.xlu0 %2737, %v1459_v31   ;;  %v1462_v31 = vsub.f32 1.0, %v2834_v62  ;;  %v2848_v53 = vpop.eup %2847  ;;  %v889_v24 = vadd.f32 1.0, %v2846_v35  ;;  %v615_v25 = vadd.f32 %v3585_v26, %v3655_v0  ;;  %v734_v41 = vsub.f32 0.0, %v620_v20 }
 0x15f   :  { %1562 = vperm.xlu1 %2738, %v1460_v27   ;;  %v1493_v27 = vsub.f32 1.0, %v2836_v28  ;;  %v779_v48 = vmul.f32 1.442695, %v699_v46  ;;  %v1463_v7 = vsub.f32 1.0, %v2848_v53 }
 0x160   :  { %v733_v49 = vsub.f32 0.0, %v615_v25 }
 0x161   :  { %2861 = vpow2.f32 %v779_v48  ;;  %v849_v48 = vmul.f32 1.442695, %v734_v41  ;;  %v2996_v41 = vld [vmem:[%s4396_s1 + $0x8] sm:$0xff] }
 0x162   :  { %1717 = vperm.xlu0 %2737, %v1491_v42   ;;  %v1494_v42 = vsub.f32 1.0, %v2842_v1  ;;  %v847_v57 = vmul.f32 1.442695, %v733_v49  ;;  %v2995_v49 = vld [vmem:[%s4395_s0 + $0x8] sm:$0xff] }
 0x163   :  { %1722 = vperm.xlu1 %2738, %v1492_v51   ;;  %v2850_v51 = vpop.eup %2849 }
 0x164   :  { %v2852_v55 = vpop.eup %2851 }
 0x165   :  { %v922_v18 = vadd.f32 1.0, %v2852_v55 }
 0x166   :  { %1119 = vperm.xlu0 %2737, %v2832_v38   ;;  %v843_v38 = vmul.f32 1.442695, %v731_v40 }
 0x167   :  { %1124 = vperm.xlu1 %2738, %v2834_v62   ;;  %v2854_v62 = vpop.eup %2853 }
 0x168   :  { %v2856_v3 = vpop.eup %2855  ;;  %2863 = vpow2.f32 %v843_v38  ;;  %v921_v6 = vadd.f32 1.0, %v2854_v62  ;;  %v465_v38 = vadd.f32 %v3585_v26, %v3663_v13  ;;  %v630_v62 = vadd.f32 %v3665_v16, %v3585_v26 }
 0x169   :  { %v2858_v47 = vpop.eup %2857  ;;  %2865 = vrcp.f32 %v889_v24  ;;  %v1495_v12 = vsub.f32 1.0, %v2856_v3  ;;  %v470_v24 = vadd.f32 %v3659_v9, %v3585_v26 }
 0x16a   :  { %1279 = vperm.xlu0 %2737, %v2836_v28   ;;  %v845_v28 = vmul.f32 1.442695, %v732_v54  ;;  %2867 = vrcp.f32 %v890_v14  ;;  %v2860_v60 = vpop.eup %2859  ;;  %v1496_v63 = vsub.f32 1.0, %v2858_v47  ;;  %v736_v9 = vsub.f32 0.0, %v630_v62 }
 0x16b   :  { %1284 = vperm.xlu1 %2738, %v2842_v1   ;;  %v1464_v1 = vsub.f32 1.0, %v2850_v51  ;;  %v892_v35 = vadd.f32 1.0, %v2860_v60 }
 0x16c   :  { %2869 = vpow2.f32 %v845_v28  ;;  %v625_v28 = vadd.f32 %v3585_v26, %v3669_v19  ;;  %v853_v19 = vmul.f32 1.442695, %v736_v9 }
 0x16d   :  { %2871 = vrcp.f32 %v921_v6 }
 0x16e   :  { %1567 = vperm.xlu0 %2737, %v1461_v58   ;;  %2873 = vrcp.f32 %v922_v18  ;;  %v2862_v58 = vpop.eup %2861  ;;  %v704_v18 = vsub.f32 0.0, %v470_v24  ;;  %v735_v11 = vsub.f32 0.0, %v625_v28 }
 0x16f   :  { %1572 = vperm.xlu1 %2738, %v1462_v31   ;;  %v891_v40 = vadd.f32 1.0, %v2862_v58  ;;  %2875 = vpow2.f32 %v783_v56 }
 0x170   :  { %v789_v16 = vmul.f32 1.442695, %v704_v18 }
 0x172   :  { %1727 = vperm.xlu0 %2737, %v1493_v27   ;;  %v2864_v31 = vpop.eup %2863  ;;  %v785_v27 = vmul.f32 1.442695, %v702_v29 }
 0x173   :  { %1732 = vperm.xlu1 %2738, %v1494_v42   ;;  %v2866_v32 = vpop.eup %2865  ;;  %v923_v44 = vadd.f32 1.0, %v2864_v31  ;;  %v851_v31 = vmul.f32 1.442695, %v735_v11 }
 0x174   :  { %v2868_v46 = vpop.eup %2867  ;;  %2877 = vpow2.f32 %v785_v27  ;;  %v1465_v54 = vsub.f32 1.0, %v2866_v32 }
 0x175   :  { %2879 = vrcp.f32 %v891_v40  ;;  %v1466_v55 = vsub.f32 1.0, %v2868_v46 }
 0x176   :  { %1129 = vperm.xlu0 %2737, %v2848_v53   ;;  %v2870_v42 = vpop.eup %2869  ;;  %2881 = vrcp.f32 %v892_v35  ;;  %v480_v35 = vadd.f32 %v3671_v59, %v3585_v26 }
 0x177   :  { %1134 = vperm.xlu1 %2738, %v2850_v51   ;;  %v2872_v0 = vpop.eup %2871  ;;  %v924_v51 = vadd.f32 1.0, %v2870_v42  ;;  %2883 = vrcp.f32 %v923_v44  ;;  %v475_v44 = vadd.f32 %v3585_v26, %v3673_v43  ;;  %v2998_v26 = vld [vmem:[%s4396_s1 + $0x108] sm:$0xff] }
 0x178   :  { %v2874_v53 = vpop.eup %2873  ;;  %2885 = vpow2.f32 %v847_v57  ;;  %v706_v43 = vsub.f32 0.0, %v480_v35 }
 0x179   :  { %2887 = vpow2.f32 %v849_v48  ;;  %v2876_v14 = vpop.eup %2875  ;;  %v1498_v6 = vsub.f32 1.0, %v2874_v53 }
 0x17a   :  { %1289 = vperm.xlu0 %2737, %v2856_v3   ;;  %2889 = vrcp.f32 %v924_v51  ;;  %v1497_v3 = vsub.f32 1.0, %v2872_v0 }
 0x17b   :  { %1294 = vperm.xlu1 %2738, %v2858_v47   ;;  %v703_v47 = vsub.f32 0.0, %v465_v38 }
 0x17e   :  { %1577 = vperm.xlu0 %2737, %v1463_v7   ;;  %v2878_v13 = vpop.eup %2877  ;;  %v893_v7 = vadd.f32 1.0, %v2876_v14  ;;  %v705_v14 = vsub.f32 0.0, %v475_v44 }
 0x17f   :  { %1582 = vperm.xlu1 %2738, %v1464_v1   ;;  %v2880_v36 = vpop.eup %2879  ;;  %v787_v1 = vmul.f32 1.442695, %v703_v47  ;;  %v894_v25 = vadd.f32 1.0, %v2878_v13 }
 0x180   :  { %v2882_v39 = vpop.eup %2881  ;;  %2891 = vrcp.f32 %v893_v7 }
 0x181   :  { %v2884_v60 = vpop.eup %2883  ;;  %2893 = vpow2.f32 %v787_v1  ;;  %v1468_v48 = vsub.f32 1.0, %v2882_v39 }
 0x182   :  { %1737 = vperm.xlu0 %2737, %v1495_v12   ;;  %v2886_v29 = vpop.eup %2885  ;;  %2895 = vpow2.f32 %v789_v16  ;;  %v1499_v62 = vsub.f32 1.0, %v2884_v60  ;;  %v791_v16 = vmul.f32 1.442695, %v705_v14 }
 0x183   :  { %1742 = vperm.xlu1 %2738, %v1496_v63   ;;  %v2888_v63 = vpop.eup %2887  ;;  %v925_v56 = vadd.f32 1.0, %v2886_v29  ;;  %2897 = vrcp.f32 %v894_v25 }
 0x184   :  { %v2890_v20 = vpop.eup %2889  ;;  %2899 = vpow2.f32 %v853_v19 }
 0x185   :  { %2901 = vpow2.f32 %v851_v31  ;;  %v1500_v18 = vsub.f32 1.0, %v2890_v20  ;;  %v3002_v31 = vld [vmem:[%s4395_s0 + $0x100] sm:$0xff] }
 0x186   :  { %1139 = vperm.xlu0 %2737, %v2866_v32   ;;  %2903 = vrcp.f32 %v925_v56 }
 0x187   :  { %1144 = vperm.xlu1 %2738, %v2868_v46   ;;  %v926_v46 = vadd.f32 1.0, %v2888_v63 }
 0x189   :  { %2905 = vrcp.f32 %v926_v46  ;;  %v3003_v46 = vld [vmem:[%s4396_s1 + $0x100] sm:$0xff] }
 0x18a   :  { %1299 = vperm.xlu0 %2737, %v2872_v0   ;;  %v1467_v0 = vsub.f32 1.0, %v2880_v36  ;;  %v3792_v47 = vpop.eup %2891 }
 0x18b   :  { %1304 = vperm.xlu1 %2738, %v2874_v53   ;;  %v2894_v13 = vpop.eup %2893 }
 0x18c   :  { %v2896_v1 = vpop.eup %2895 }
 0x18e   :  { %1587 = vperm.xlu0 %2737, %v1465_v54   ;;  %v2997_v54 = vld [vmem:[%s4395_s0 + $0x108] sm:$0xff] }
 0x18f   :  { %1592 = vperm.xlu1 %2738, %v1466_v55   ;;  %v3786_v55 = vld [vmem:[#allocation2] ss:$0 sm:$0xff] }
 0x190   :  { %v640_v24 = vadd.f32 %v3786_v55, %v3675_v50  ;;  %v3001_v50 = vld [vmem:[%s4396_s1] sm:$0xff] }
 0x192   :  { %1747 = vperm.xlu0 %2737, %v1497_v3   ;;  %v635_v3 = vadd.f32 %v3786_v55, %v3679_v52  ;;  %v793_v52 = vmul.f32 1.442695, %v706_v43  ;;  %v738_v11 = vsub.f32 0.0, %v640_v24 }
 0x193   :  { %1752 = vperm.xlu1 %2738, %v1498_v6  }
 0x194   :  { %v737_v29 = vsub.f32 0.0, %v635_v3  ;;  %2907 = vpow2.f32 %v793_v52 }
 0x195   :  { %v1075_v12 = vpop.permute.xlu0 %1074  ;;  %2909 = vpow2.f32 %v791_v16 }
 0x196   :  { %v1235_v58 = vpop.permute.xlu1 %1234  ;;  %1149 = vperm.xlu0 %2737, %v2880_v36   ;;  %v1388_v40 = vmul.f32 %v2995_v49, %v1075_v12  ;;  %v3000_v36 = vld [vmem:[%s4395_s0] sm:$0xff]  ;;  %v855_v35 = vmul.f32 1.442695, %v737_v29 }
 0x197   :  { %1154 = vperm.xlu1 %2738, %v2882_v39   ;;  %v1420_v38 = vmul.f32 %v2997_v54, %v1235_v58  ;;  %v895_v58 = vadd.f32 1.0, %v2894_v13  ;;  %v490_v54 = vadd.f32 %v3786_v55, %v3687_v61  ;;  %v3006_v61 = vld [vmem:[%s4395_s0 + $0x18] sm:$0xff] }
 0x199   :  { %v1070_v32 = vpop.permute.xlu0 %1069  ;;  %2911 = vrcp.f32 %v895_v58 }
 0x19a   :  { %v1523_v27 = vpop.permute.xlu1 %1522  ;;  %1309 = vperm.xlu0 %2737, %v2884_v60   ;;  %v1387_v7 = vmul.f32 %v3000_v36, %v1070_v32  ;;  %v2898_v60 = vpop.eup %2897  ;;  %v708_v36 = vsub.f32 0.0, %v490_v54 }
 0x19b   :  { %v1836_v42 = vmul.f32 %v2996_v41, %v1523_v27  ;;  %1314 = vperm.xlu1 %2738, %v2890_v20   ;;  %v2900_v25 = vpop.eup %2899  ;;  %v896_v20 = vadd.f32 1.0, %v2896_v1 }
 0x19c   :  { %v2902_v19 = vpop.eup %2901 }
 0x19d   :  { %v2417_v53 = vpack.c.bf16 %v1836_v42, %v1388_v40  ;;  %v1230_v57 = vpop.permute.xlu0 %1229  ;;  %v2904_v49 = vpop.eup %2903  ;;  %v857_v40 = vmul.f32 1.442695, %v738_v11  ;;  %2913 = vrcp.f32 %v896_v20  ;;  %v3008_v11 = vld [vmem:[%s4395_s0 + $0x110] sm:$0xff] }
 0x19e   :  { %v1683_v51 = vpop.permute.xlu1 %1682  ;;  %1597 = vperm.xlu0 %2737, %v1467_v0   ;;  %v1419_v56 = vmul.f32 %v3002_v31, %v1230_v57  ;;  %v2906_v41 = vpop.eup %2905  ;;  %v927_v0 = vadd.f32 1.0, %v2902_v19  ;;  %v1501_v13 = vsub.f32 1.0, %v2904_v49 }
 0x19f   :  { %2284 = vst [vmem:[%s4397_s4 + $0x8] sm:$0xff] %v2417_v53  ;;  %v1868_v59 = vmul.f32 %v2998_v26, %v1683_v51  ;;  %1602 = vperm.xlu1 %2738, %v1468_v48   ;;  %v928_v53 = vadd.f32 1.0, %v2900_v25  ;;  %v485_v48 = vadd.f32 %v3786_v55, %v3689_v34  ;;  %2915 = vpow2.f32 %v857_v40  ;;  %v3005_v34 = vld [vmem:[%s4396_s1 + $0x10] sm:$0xff]  ;;  %v3010_v25 = vld [vmem:[%s4395_s0 + $0x118] sm:$0xff] }
 0x1a0   :  { %2917 = vpow2.f32 %v855_v35  ;;  %v1469_v51 = vsub.f32 1.0, %v3792_v47  ;;  %v1470_v26 = vsub.f32 1.0, %v2898_v60  ;;  %v1502_v52 = vsub.f32 1.0, %v2906_v41 }
 0x1a1   :  { %v2449_v28 = vpack.c.bf16 %v1868_v59, %v1420_v38  ;;  %v1518_v6 = vpop.permute.xlu0 %1517  ;;  %2919 = vrcp.f32 %v927_v0  ;;  %v3004_v59 = vld [vmem:[%s4395_s0 + $0x10] sm:$0xff]  ;;  %v707_v14 = vsub.f32 0.0, %v485_v48 }
 0x1a2   :  { %v1085_v9 = vpop.permute.xlu1 %1084  ;;  %v1835_v39 = vmul.f32 %v3001_v50, %v1518_v6  ;;  %1757 = vperm.xlu0 %2737, %v1499_v62   ;;  %2921 = vrcp.f32 %v928_v53  ;;  %v650_v6 = vadd.f32 %v3786_v55, %v3691_v37  ;;  %v2908_v50 = vpop.eup %2907 }
 0x1a3   :  { %2316 = vst [vmem:[%s4397_s4 + $0x108] sm:$0xff] %v2449_v28  ;;  %1762 = vperm.xlu1 %2738, %v1500_v18   ;;  %v1390_v3 = vmul.f32 %v3006_v61, %v1085_v9  ;;  %v2910_v9 = vpop.eup %2909  ;;  %v795_v16 = vmul.f32 1.442695, %v707_v14  ;;  %v898_v35 = vadd.f32 1.0, %v2908_v50  ;;  %v3012_v14 = vld [vmem:[%s4395_s0 + $0x20] sm:$0xff] }
 0x1a4   :  { %v2416_v12 = vpack.c.bf16 %v1835_v39, %v1387_v7  ;;  %v645_v7 = vadd.f32 %v3786_v55, %v3697_v45  ;;  %v2912_v29 = vpop.eup %2911  ;;  %v740_v20 = vsub.f32 0.0, %v650_v6  ;;  %v897_v40 = vadd.f32 1.0, %v2910_v9 }
 0x1a5   :  { %v1678_v63 = vpop.permute.xlu0 %1677  ;;  %2923 = vpow2.f32 %v795_v16  ;;  %v3017_v16 = vld [vmem:[%s4396_s1 + $0x120] sm:$0xff] }
 0x1a6   :  { %2283 = vst [vmem:[%s4397_s4] sm:$0xff] %v2416_v12  ;;  %v1245_v32 = vpop.permute.xlu1 %1244  ;;  %v1867_v27 = vmul.f32 %v3003_v46, %v1678_v63  ;;  %1159 = vperm.xlu0 %2737, %v3792_v47   ;;  %v3007_v47 = vld [vmem:[%s4396_s1 + $0x18] sm:$0xff]  ;;  %v3009_v12 = vld [vmem:[%s4396_s1 + $0x110] sm:$0xff]  ;;  %v797_v46 = vmul.f32 1.442695, %v708_v36  ;;  %v861_v53 = vmul.f32 1.442695, %v740_v20 }
 0x1a7   :  { %1164 = vperm.xlu1 %2738, %v2898_v60   ;;  %v1422_v58 = vmul.f32 %v3010_v25, %v1245_v32  ;;  %v3011_v63 = vld [vmem:[%s4396_s1 + $0x118] sm:$0xff]  ;;  %v2914_v31 = vpop.eup %2913 }
 0x1a8   :  { %v2448_v42 = vpack.c.bf16 %v1867_v27, %v1419_v56  ;;  %v739_v27 = vsub.f32 0.0, %v645_v7  ;;  %2925 = vpow2.f32 %v797_v46 }
 0x1a9   :  { %v1240_v44 = vpop.permute.xlu0 %1239  ;;  %2927 = vrcp.f32 %v897_v40 }
 0x1aa   :  { %2315 = vst [vmem:[%s4397_s4 + $0x100] sm:$0xff] %v2448_v42  ;;  %v1080_v57 = vpop.permute.xlu1 %1079  ;;  %1319 = vperm.xlu0 %2737, %v2904_v49   ;;  %v1421_v60 = vmul.f32 %v3008_v11, %v1240_v44  ;;  %v2916_v49 = vpop.eup %2915  ;;  %v859_v48 = vmul.f32 1.442695, %v739_v27  ;;  %2929 = vrcp.f32 %v898_v35 }
 0x1ab   :  { %1324 = vperm.xlu1 %2738, %v2906_v41   ;;  %v1389_v43 = vmul.f32 %v3004_v59, %v1080_v57  ;;  %v2918_v32 = vpop.eup %2917  ;;  %2931 = vpow2.f32 %v861_v53  ;;  %v1471_v59 = vsub.f32 1.0, %v2912_v29 }
 0x1ac   :  { %v2920_v44 = vpop.eup %2919  ;;  %2933 = vpow2.f32 %v859_v48 }
 0x1ad   :  { %v1528_v38 = vpop.permute.xlu0 %1527  ;;  %v2922_v57 = vpop.eup %2921  ;;  %v1503_v50 = vsub.f32 1.0, %v2920_v44 }
 0x1ae   :  { %v1533_v24 = vpop.permute.xlu1 %1532  ;;  %v1837_v62 = vmul.f32 %v3005_v34, %v1528_v38  ;;  %1607 = vperm.xlu0 %2737, %v1469_v51   ;;  %v929_v51 = vadd.f32 1.0, %v2918_v32  ;;  %v930_v38 = vadd.f32 1.0, %v2916_v49  ;;  %v1472_v34 = vsub.f32 1.0, %v2914_v31 }
 0x1af   :  { %v1838_v28 = vmul.f32 %v3007_v47, %v1533_v24  ;;  %1612 = vperm.xlu1 %2738, %v1470_v26   ;;  %v3013_v47 = vld [vmem:[%s4396_s1 + $0x20] sm:$0xff]  ;;  %v2924_v36 = vpop.eup %2923  ;;  %v1504_v11 = vsub.f32 1.0, %v2922_v57 }
 0x1b0   :  { %v2418_v18 = vpack.c.bf16 %v1837_v62, %v1389_v43  ;;  %v495_v43 = vadd.f32 %v3786_v55, %v3707_v2  ;;  %2935 = vrcp.f32 %v929_v51  ;;  %v500_v62 = vadd.f32 %v3786_v55, %v3703_v15  ;;  %v3014_v2 = vld [vmem:[%s4395_s0 + $0x28] sm:$0xff] }
 0x1b1   :  { %v2419_v39 = vpack.c.bf16 %v1838_v28, %v1390_v3  ;;  %v1688_v1 = vpop.permute.xlu0 %1687  ;;  %2937 = vrcp.f32 %v930_v38  ;;  %v3015_v15 = vld [vmem:[%s4396_s1 + $0x28] sm:$0xff]  ;;  %v899_v25 = vadd.f32 1.0, %v2924_v36 }
 0x1b2   :  { %2285 = vst [vmem:[%s4397_s4 + $0x10] sm:$0xff] %v2418_v18  ;;  %v1693_v37 = vpop.permute.xlu1 %1692  ;;  %v1869_v45 = vmul.f32 %v3009_v12, %v1688_v1  ;;  %1767 = vperm.xlu0 %2737, %v1501_v13   ;;  %v660_v13 = vadd.f32 %v3786_v55, %v3705_v23  ;;  %v655_v1 = vadd.f32 %v3786_v55, %v3711_v33  ;;  %v3016_v12 = vld [vmem:[%s4395_s0 + $0x120] sm:$0xff] }
 0x1b3   :  { %2286 = vst [vmem:[%s4397_s4 + $0x18] sm:$0xff] %v2419_v39  ;;  %v1870_v19 = vmul.f32 %v3011_v63, %v1693_v37  ;;  %1772 = vperm.xlu1 %2738, %v1502_v52   ;;  %v709_v39 = vsub.f32 0.0, %v495_v43  ;;  %v2926_v37 = vpop.eup %2925  ;;  %2939 = vrcp.f32 %v899_v25  ;;  %v510_v43 = vadd.f32 %v3786_v55, %v3719_v17 }
 0x1b4   :  { %v2450_v56 = vpack.c.bf16 %v1869_v45, %v1421_v60  ;;  %v710_v60 = vsub.f32 0.0, %v500_v62  ;;  %v741_v49 = vsub.f32 0.0, %v655_v1  ;;  %v665_v62 = vadd.f32 %v3786_v55, %v3729_v5  ;;  %v3022_v5 = vld [vmem:[%s4395_s0 + $0x38] sm:$0xff] }
 0x1b5   :  { %v2451_v41 = vpack.c.bf16 %v1870_v19, %v1422_v58  ;;  %v1090_v42 = vpop.permute.xlu0 %1089  ;;  %v3018_v58 = vld [vmem:[%s4395_s0 + $0x128] sm:$0xff]  ;;  %v799_v27 = vmul.f32 1.442695, %v709_v39 }
 0x1b6   :  { %2317 = vst [vmem:[%s4397_s4 + $0x110] sm:$0xff] %v2450_v56  ;;  %v1095_v0 = vpop.permute.xlu1 %1094  ;;  %1169 = vperm.xlu0 %2737, %v2912_v29   ;;  %v1391_v61 = vmul.f32 %v3012_v14, %v1090_v42  ;;  %v2928_v29 = vpop.eup %2927  ;;  %v3019_v19 = vld [vmem:[%s4396_s1 + $0x128] sm:$0xff]  ;;  %v801_v42 = vmul.f32 1.442695, %v710_v60  ;;  %v863_v51 = vmul.f32 1.442695, %v741_v49 }
 0x1b7   :  { %2318 = vst [vmem:[%s4397_s4 + $0x118] sm:$0xff] %v2451_v41  ;;  %1174 = vperm.xlu1 %2738, %v2914_v31   ;;  %v1392_v6 = vmul.f32 %v3014_v2, %v1095_v0  ;;  %v742_v31 = vsub.f32 0.0, %v660_v13  ;;  %v2930_v56 = vpop.eup %2929  ;;  %v900_v0 = vadd.f32 1.0, %v2926_v37  ;;  %2941 = vpow2.f32 %v799_v27  ;;  %v3024_v37 = vld [vmem:[%s4395_s0 + $0x130] sm:$0xff] }
 0x1b8   :  { %v2932_v40 = vpop.eup %2931  ;;  %2943 = vpow2.f32 %v801_v42  ;;  %v712_v2 = vsub.f32 0.0, %v510_v43  ;;  %v743_v39 = vsub.f32 0.0, %v665_v62 }
 0x1b9   :  { %v1250_v54 = vpop.permute.xlu0 %1249  ;;  %v2934_v35 = vpop.eup %2933  ;;  %2945 = vrcp.f32 %v900_v0 }
 0x1ba   :  { %v1255_v26 = vpop.permute.xlu1 %1254  ;;  %1329 = vperm.xlu0 %2737, %v2920_v44   ;;  %v1423_v45 = vmul.f32 %v3016_v12, %v1250_v54  ;;  %v2936_v53 = vpop.eup %2935  ;;  %v931_v54 = vadd.f32 1.0, %v2934_v35 }
 0x1bb   :  { %1334 = vperm.xlu1 %2738, %v2922_v57   ;;  %v1424_v63 = vmul.f32 %v3018_v58, %v1255_v26  ;;  %v865_v57 = vmul.f32 1.442695, %v742_v31  ;;  %v2938_v48 = vpop.eup %2937  ;;  %v932_v26 = vadd.f32 1.0, %v2932_v40  ;;  %v3027_v58 = vld [vmem:[%s4396_s1 + $0x138] sm:$0xff] }
 0x1bd   :  { %v1538_v24 = vpop.permute.xlu0 %1537  ;;  %2947 = vpow2.f32 %v865_v57  ;;  %v3925_v1 = vpop.eup %2939 }
 0x1be   :  { %v1543_v3 = vpop.permute.xlu1 %1542  ;;  %v1839_v28 = vmul.f32 %v3013_v47, %v1538_v24  ;;  %1617 = vperm.xlu0 %2737, %v1471_v59   ;;  %v505_v24 = vadd.f32 %v3786_v55, %v3721_v10  ;;  %2949 = vpow2.f32 %v863_v51 }
 0x1bf   :  { %v1840_v18 = vmul.f32 %v3015_v15, %v1543_v3  ;;  %1622 = vperm.xlu1 %2738, %v1472_v34   ;;  %v1473_v34 = vsub.f32 1.0, %v2928_v29  ;;  %2951 = vrcp.f32 %v931_v54  ;;  %v3020_v3 = vld [vmem:[%s4395_s0 + $0x30] sm:$0xff]  ;;  %v3023_v15 = vld [vmem:[%s4396_s1 + $0x38] sm:$0xff] }
 0x1c0   :  { %v2420_v7 = vpack.c.bf16 %v1839_v28, %v1391_v61  ;;  %v1474_v61 = vsub.f32 1.0, %v2930_v56  ;;  %2953 = vrcp.f32 %v932_v26  ;;  %v3021_v28 = vld [vmem:[%s4396_s1 + $0x30] sm:$0xff]  ;;  %v711_v13 = vsub.f32 0.0, %v505_v24 }
 0x1c1   :  { %v2421_v52 = vpack.c.bf16 %v1840_v18, %v1392_v6  ;;  %v1698_v9 = vpop.permute.xlu0 %1697  ;;  %v2942_v60 = vpop.eup %2941  ;;  %v1475_v26 = vsub.f32 1.0, %v3925_v1 }
 0x1c2   :  { %2287 = vst [vmem:[%s4397_s4 + $0x20] sm:$0xff] %v2420_v7  ;;  %v1703_v23 = vpop.permute.xlu1 %1702  ;;  %v1871_v33 = vmul.f32 %v3017_v16, %v1698_v9  ;;  %1777 = vperm.xlu0 %2737, %v1503_v50   ;;  %v1505_v7 = vsub.f32 1.0, %v2936_v53  ;;  %v670_v50 = vadd.f32 %v3786_v55, %v3725_v30  ;;  %v3025_v30 = vld [vmem:[%s4396_s1 + $0x130] sm:$0xff]  ;;  %v805_v16 = vmul.f32 1.442695, %v712_v2 }
 0x1c3   :  { %2288 = vst [vmem:[%s4397_s4 + $0x28] sm:$0xff] %v2421_v52  ;;  %v1872_v20 = vmul.f32 %v3019_v19, %v1703_v23  ;;  %1782 = vperm.xlu1 %2738, %v1504_v11   ;;  %v1506_v11 = vsub.f32 1.0, %v2938_v48  ;;  %v803_v19 = vmul.f32 1.442695, %v711_v13  ;;  %v901_v49 = vadd.f32 1.0, %v2942_v60 }
 0x1c4   :  { %v2452_v46 = vpack.c.bf16 %v1871_v33, %v1423_v45  ;;  %v2944_v33 = vpop.eup %2943  ;;  %2955 = vpow2.f32 %v805_v16 }
 0x1c5   :  { %v2453_v41 = vpack.c.bf16 %v1872_v20, %v1424_v63  ;;  %v1100_v32 = vpop.permute.xlu0 %1099  ;;  %v2946_v20 = vpop.eup %2945  ;;  %2957 = vpow2.f32 %v803_v19 }
 0x1c6   :  { %2319 = vst [vmem:[%s4397_s4 + $0x120] sm:$0xff] %v2452_v46  ;;  %v1105_v44 = vpop.permute.xlu1 %1104  ;;  %1179 = vperm.xlu0 %2737, %v2928_v29   ;;  %v1393_v47 = vmul.f32 %v3020_v3, %v1100_v32  ;;  %v3026_v29 = vld [vmem:[%s4395_s0 + $0x138] sm:$0xff]  ;;  %v867_v46 = vmul.f32 1.442695, %v743_v39  ;;  %v902_v32 = vadd.f32 1.0, %v2944_v33  ;;  %v1476_v24 = vsub.f32 1.0, %v2946_v20 }
 0x1c7   :  { %2320 = vst [vmem:[%s4397_s4 + $0x128] sm:$0xff] %v2453_v41  ;;  %1184 = vperm.xlu1 %2738, %v2930_v56   ;;  %v1394_v6 = vmul.f32 %v3022_v5, %v1105_v44  ;;  %v744_v56 = vsub.f32 0.0, %v670_v50  ;;  %v2948_v27 = vpop.eup %2947  ;;  %v680_v50 = vadd.f32 %v3786_v55, %v3743_v4  ;;  %v3034_v4 = vld [vmem:[%s4395_s0 + $0x148] sm:$0xff] }
 0x1c8   :  { %v2950_v42 = vpop.eup %2949  ;;  %2959 = vpow2.f32 %v867_v46  ;;  %v934_v51 = vadd.f32 1.0, %v2948_v27 }
 0x1c9   :  { %v1260_v38 = vpop.permute.xlu0 %1259  ;;  %v2952_v0 = vpop.eup %2951  ;;  %2961 = vrcp.f32 %v901_v49  ;;  %v933_v57 = vadd.f32 1.0, %v2950_v42 }
 0x1ca   :  { %v1265_v59 = vpop.permute.xlu1 %1264  ;;  %1339 = vperm.xlu0 %2737, %v2936_v53   ;;  %v1425_v12 = vmul.f32 %v3024_v37, %v1260_v38  ;;  %v2954_v44 = vpop.eup %2953  ;;  %v869_v53 = vmul.f32 1.442695, %v744_v56  ;;  %2963 = vrcp.f32 %v902_v32  ;;  %v520_v38 = vadd.f32 %v3786_v55, %v3735_v8  ;;  %v3029_v8 = vld [vmem:[%s4396_s1 + $0x40] sm:$0xff]  ;;  %v3035_v37 = vld [vmem:[%s4396_s1 + $0x148] sm:$0xff] }
 0x1cb   :  { %1344 = vperm.xlu1 %2738, %v2938_v48   ;;  %v1426_v25 = vmul.f32 %v3026_v29, %v1265_v59  ;;  %v515_v59 = vadd.f32 %v3786_v55, %v3737_v21  ;;  %v3030_v21 = vld [vmem:[%s4395_s0 + $0x48] sm:$0xff]  ;;  %v1507_v5 = vsub.f32 1.0, %v2952_v0 }
 0x1cc   :  { %2965 = vpow2.f32 %v869_v53  ;;  %v3036_v53 = vld [vmem:[%s4395_s0 + $0x50] sm:$0xff] }
 0x1cd   :  { %v1548_v14 = vpop.permute.xlu0 %1547  ;;  %2967 = vrcp.f32 %v933_v57 }
 0x1ce   :  { %v1553_v17 = vpop.permute.xlu1 %1552  ;;  %v1841_v10 = vmul.f32 %v3021_v28, %v1548_v14  ;;  %1627 = vperm.xlu0 %2737, %v1473_v34   ;;  %2969 = vrcp.f32 %v934_v51  ;;  %v3028_v34 = vld [vmem:[%s4395_s0 + $0x40] sm:$0xff]  ;;  %v714_v28 = vsub.f32 0.0, %v520_v38  ;;  %v3037_v51 = vld [vmem:[%s4396_s1 + $0x50] sm:$0xff]  ;;  %v3038_v38 = vld [vmem:[%s4395_s0 + $0x58] sm:$0xff] }
 0x1cf   :  { %v1842_v18 = vmul.f32 %v3023_v15, %v1553_v17  ;;  %1632 = vperm.xlu1 %2738, %v1474_v61   ;;  %v675_v15 = vadd.f32 %v3786_v55, %v3747_v22  ;;  %v3033_v22 = vld [vmem:[%s4396_s1 + $0x140] sm:$0xff] }
 0x1d0   :  { %v2422_v36 = vpack.c.bf16 %v1841_v10, %v1393_v47  ;;  %v3031_v47 = vld [vmem:[%s4396_s1 + $0x48] sm:$0xff]  ;;  %v2956_v10 = vpop.eup %2955 }
 0x1d1   :  { %v2423_v52 = vpack.c.bf16 %v1842_v18, %v1394_v6  ;;  %v1708_v9 = vpop.permute.xlu0 %1707  ;;  %v713_v6 = vsub.f32 0.0, %v515_v59  ;;  %v2958_v18 = vpop.eup %2957  ;;  %v745_v33 = vsub.f32 0.0, %v675_v15  ;;  %v3039_v59 = vld [vmem:[%s4396_s1 + $0x58] sm:$0xff] }
 0x1d2   :  { %2289 = vst [vmem:[%s4397_s4 + $0x30] sm:$0xff] %v2422_v36  ;;  %v1713_v45 = vpop.permute.xlu1 %1712  ;;  %v1873_v23 = vmul.f32 %v3025_v30, %v1708_v9  ;;  %1787 = vperm.xlu0 %2737, %v1505_v7   ;;  %v1508_v7 = vsub.f32 1.0, %v2954_v44  ;;  %v2960_v39 = vpop.eup %2959  ;;  %v903_v29 = vadd.f32 1.0, %v2958_v18  ;;  %v3043_v15 = vld [vmem:[%s4396_s1 + $0x158] sm:$0xff] }
 0x1d3   :  { %2290 = vst [vmem:[%s4397_s4 + $0x38] sm:$0xff] %v2423_v52  ;;  %v1874_v63 = vmul.f32 %v3027_v58, %v1713_v45  ;;  %1792 = vperm.xlu1 %2738, %v1506_v11   ;;  %v2962_v60 = vpop.eup %2961  ;;  %v809_v45 = vmul.f32 1.442695, %v714_v28  ;;  %v807_v16 = vmul.f32 1.442695, %v713_v6  ;;  %v935_v46 = vadd.f32 1.0, %v2960_v39 }
 0x1d4   :  { %v2454_v31 = vpack.c.bf16 %v1873_v23, %v1425_v12  ;;  %v2964_v30 = vpop.eup %2963  ;;  %v871_v49 = vmul.f32 1.442695, %v745_v33  ;;  %v3041_v28 = vld [vmem:[%s4396_s1 + $0x150] sm:$0xff] }
 0x1d5   :  { %v2455_v40 = vpack.c.bf16 %v1874_v63, %v1426_v25  ;;  %v1110_v41 = vpop.permute.xlu0 %1109  ;;  %v746_v63 = vsub.f32 0.0, %v680_v50  ;;  %2971 = vpow2.f32 %v809_v45 }
 0x1d6   :  { %2321 = vst [vmem:[%s4397_s4 + $0x130] sm:$0xff] %v2454_v31  ;;  %v1115_v35 = vpop.permute.xlu1 %1114  ;;  %1189 = vperm.xlu0 %2737, %v3925_v1   ;;  %v1395_v62 = vmul.f32 %v3028_v34, %v1110_v41  ;;  %v3032_v1 = vld [vmem:[%s4395_s0 + $0x140] sm:$0xff]  ;;  %v2966_v19 = vpop.eup %2965  ;;  %2973 = vpow2.f32 %v807_v16 }
 0x1d7   :  { %2322 = vst [vmem:[%s4397_s4 + $0x138] sm:$0xff] %v2455_v40  ;;  %1194 = vperm.xlu1 %2738, %v2946_v20   ;;  %v1396_v3 = vmul.f32 %v3030_v21, %v1115_v35  ;;  %v904_v20 = vadd.f32 1.0, %v2956_v10  ;;  %v2968_v56 = vpop.eup %2967  ;;  %2975 = vrcp.f32 %v903_v29  ;;  %v873_v40 = vmul.f32 1.442695, %v746_v63  ;;  %v3044_v16 = vld [vmem:[%s4395_s0 + $0x60] sm:$0xff]  ;;  %v3046_v63 = vld [vmem:[%s4395_s0 + $0x68] sm:$0xff] }
 0x1d8   :  { %v2970_v27 = vpop.eup %2969  ;;  %v936_v42 = vadd.f32 1.0, %v2966_v19  ;;  %v1477_v35 = vsub.f32 1.0, %v2962_v60  ;;  %v1509_v34 = vsub.f32 1.0, %v2968_v56 }
 0x1d9   :  { %v1270_v48 = vpop.permute.xlu0 %1269  ;;  %2977 = vrcp.f32 %v904_v20  ;;  %v3047_v20 = vld [vmem:[%s4396_s1 + $0x68] sm:$0xff] }
 0x1da   :  { %v1275_v54 = vpop.permute.xlu1 %1274  ;;  %1349 = vperm.xlu0 %2737, %v2952_v0   ;;  %v1427_v52 = vmul.f32 %v3032_v1, %v1270_v48  ;;  %2979 = vrcp.f32 %v935_v46 }
 0x1db   :  { %1354 = vperm.xlu1 %2738, %v2954_v44   ;;  %v1428_v55 = vmul.f32 %v3034_v4, %v1275_v54  ;;  %2981 = vpow2.f32 %v871_v49  ;;  %v1478_v44 = vsub.f32 1.0, %v2964_v30 }
 0x1dc   :  { %2983 = vpow2.f32 %v873_v40 }
 0x1dd   :  { %v1558_v43 = vpop.permute.xlu0 %1557  ;;  %2985 = vrcp.f32 %v936_v42 }
 0x1de   :  { %v1563_v14 = vpop.permute.xlu1 %1562  ;;  %v1843_v61 = vmul.f32 %v3029_v8, %v1558_v43  ;;  %1637 = vperm.xlu0 %2737, %v1475_v26  }
 0x1df   :  { %v1844_v17 = vmul.f32 %v3031_v47, %v1563_v14  ;;  %1642 = vperm.xlu1 %2738, %v1476_v24  }
 0x1e0   :  { %v2424_v2 = vpack.c.bf16 %v1843_v61, %v1395_v62  ;;  %v2972_v62 = vpop.eup %2971  ;;  %v1510_v61 = vsub.f32 1.0, %v2970_v27 }
 0x1e1   :  { %v2425_v13 = vpack.c.bf16 %v1844_v17, %v1396_v3  ;;  %v1718_v36 = vpop.permute.xlu0 %1717  ;;  %v2974_v21 = vpop.eup %2973  ;;  %v3040_v3 = vld [vmem:[%s4395_s0 + $0x150] sm:$0xff] }
 0x1e2   :  { %2291 = vst [vmem:[%s4397_s4 + $0x40] sm:$0xff] %v2424_v2  ;;  %v1723_v9 = vpop.permute.xlu1 %1722  ;;  %v1875_v11 = vmul.f32 %v3033_v22, %v1718_v36  ;;  %1797 = vperm.xlu0 %2737, %v1507_v5   ;;  %v2976_v2 = vpop.eup %2975  ;;  %v3042_v5 = vld [vmem:[%s4395_s0 + $0x158] sm:$0xff]  ;;  %v905_v50 = vadd.f32 1.0, %v2974_v21 }
 0x1e3   :  { %2292 = vst [vmem:[%s4397_s4 + $0x48] sm:$0xff] %v2425_v13  ;;  %v1876_v12 = vmul.f32 %v3035_v37, %v1723_v9  ;;  %1802 = vperm.xlu1 %2738, %v1508_v7   ;;  %v2978_v13 = vpop.eup %2977  ;;  %v906_v9 = vadd.f32 1.0, %v2972_v62  ;;  %v1479_v45 = vsub.f32 1.0, %v2976_v2 }
 0x1e4   :  { %v2456_v23 = vpack.c.bf16 %v1875_v11, %v1427_v52  ;;  %v2980_v7 = vpop.eup %2979  ;;  %2987 = vrcp.f32 %v905_v50 }
 0x1e5   :  { %v2457_v25 = vpack.c.bf16 %v1876_v12, %v1428_v55  ;;  %v1120_v58 = vpop.permute.xlu0 %1119  ;;  %v2982_v52 = vpop.eup %2981  ;;  %2989 = vrcp.f32 %v906_v9  ;;  %v1511_v46 = vsub.f32 1.0, %v2980_v7  ;;  %v3057_v9 = vld [vmem:[%s4396_s1 + $0x170] sm:$0xff] }
 0x1e6   :  { %2323 = vst [vmem:[%s4397_s4 + $0x140] sm:$0xff] %v2456_v23  ;;  %v1125_v31 = vpop.permute.xlu1 %1124  ;;  %1199 = vperm.xlu0 %2737, %v2962_v60   ;;  %v1397_v57 = vmul.f32 %v3036_v53, %v1120_v58  ;;  %v2984_v11 = vpop.eup %2983  ;;  %v937_v4 = vadd.f32 1.0, %v2982_v52  ;;  %v1480_v23 = vsub.f32 1.0, %v2978_v13  ;;  %v3050_v53 = vld [vmem:[%s4395_s0 + $0x168] sm:$0xff] }
 0x1e7   :  { %2324 = vst [vmem:[%s4397_s4 + $0x148] sm:$0xff] %v2457_v25  ;;  %1204 = vperm.xlu1 %2738, %v2964_v30   ;;  %v1398_v26 = vmul.f32 %v3038_v38, %v1125_v31  ;;  %v2986_v60 = vpop.eup %2985  ;;  %v938_v37 = vadd.f32 1.0, %v2984_v11  ;;  %v3045_v25 = vld [vmem:[%s4396_s1 + $0x60] sm:$0xff]  ;;  %v3058_v11 = vld [vmem:[%s4395_s0 + $0x178] sm:$0xff] }
 0x1e8   :  { %2991 = vrcp.f32 %v937_v4  ;;  %v1512_v40 = vsub.f32 1.0, %v2986_v60  ;;  %v3059_v4 = vld [vmem:[%s4396_s1 + $0x178] sm:$0xff] }
 0x1e9   :  { %v1280_v41 = vpop.permute.xlu0 %1279  ;;  %2993 = vrcp.f32 %v938_v37 }
 0x1ea   :  { %v1285_v32 = vpop.permute.xlu1 %1284  ;;  %1359 = vperm.xlu0 %2737, %v2968_v56   ;;  %v1429_v47 = vmul.f32 %v3040_v3, %v1280_v41  ;;  %v3048_v41 = vld [vmem:[%s4395_s0 + $0x160] sm:$0xff]  ;;  %v3052_v3 = vld [vmem:[%s4395_s0 + $0x70] sm:$0xff] }
 0x1eb   :  { %1364 = vperm.xlu1 %2738, %v2970_v27   ;;  %v1430_v6 = vmul.f32 %v3042_v5, %v1285_v32 }
 0x1ed   :  { %v1568_v0 = vpop.permute.xlu0 %1567 }
 0x1ee   :  { %v1573_v48 = vpop.permute.xlu1 %1572  ;;  %v1845_v54 = vmul.f32 %v3037_v51, %v1568_v0  ;;  %1647 = vperm.xlu0 %2737, %v1477_v35   ;;  %v3049_v35 = vld [vmem:[%s4396_s1 + $0x160] sm:$0xff] }
 0x1ef   :  { %v1846_v43 = vmul.f32 %v3039_v59, %v1573_v48  ;;  %1652 = vperm.xlu1 %2738, %v1478_v44   ;;  %v2988_v44 = vpop.eup %2987  ;;  %v3051_v48 = vld [vmem:[%s4396_s1 + $0x168] sm:$0xff] }
 0x1f0   :  { %v2426_v24 = vpack.c.bf16 %v1845_v54, %v1397_v57  ;;  %v2990_v54 = vpop.eup %2989 }
 0x1f1   :  { %v2427_v14 = vpack.c.bf16 %v1846_v43, %v1398_v26  ;;  %v1728_v8 = vpop.permute.xlu0 %1727  ;;  %v1482_v21 = vsub.f32 1.0, %v2990_v54 }
 0x1f2   :  { %2293 = vst [vmem:[%s4397_s4 + $0x50] sm:$0xff] %v2426_v24  ;;  %v1733_v17 = vpop.permute.xlu1 %1732  ;;  %v1877_v10 = vmul.f32 %v3041_v28, %v1728_v8  ;;  %1807 = vperm.xlu0 %2737, %v1509_v34   ;;  %v2992_v24 = vpop.eup %2991  ;;  %v1481_v8 = vsub.f32 1.0, %v2988_v44  ;;  %v3053_v28 = vld [vmem:[%s4396_s1 + $0x70] sm:$0xff] }
 0x1f3   :  { %2294 = vst [vmem:[%s4397_s4 + $0x58] sm:$0xff] %v2427_v14  ;;  %v1878_v18 = vmul.f32 %v3043_v15, %v1733_v17  ;;  %1812 = vperm.xlu1 %2738, %v1510_v61   ;;  %v2994_v34 = vpop.eup %2993 }
 0x1f4   :  { %v2458_v36 = vpack.c.bf16 %v1877_v10, %v1429_v47  ;;  %v1514_v50 = vsub.f32 1.0, %v2994_v34 }
 0x1f5   :  { %v2459_v39 = vpack.c.bf16 %v1878_v18, %v1430_v6  ;;  %v1130_v1 = vpop.permute.xlu0 %1129  ;;  %v3055_v6 = vld [vmem:[%s4396_s1 + $0x78] sm:$0xff] }
 0x1f6   :  { %2325 = vst [vmem:[%s4397_s4 + $0x150] sm:$0xff] %v2458_v36  ;;  %v1135_v22 = vpop.permute.xlu1 %1134  ;;  %1209 = vperm.xlu0 %2737, %v2976_v2   ;;  %v1399_v33 = vmul.f32 %v3044_v16, %v1130_v1  ;;  %v3054_v2 = vld [vmem:[%s4395_s0 + $0x78] sm:$0xff] }
 0x1f7   :  { %2326 = vst [vmem:[%s4397_s4 + $0x158] sm:$0xff] %v2459_v39  ;;  %1214 = vperm.xlu1 %2738, %v2978_v13   ;;  %v1400_v19 = vmul.f32 %v3046_v63, %v1135_v22  ;;  %v1513_v13 = vsub.f32 1.0, %v2992_v24  ;;  %v3056_v39 = vld [vmem:[%s4395_s0 + $0x170] sm:$0xff]  ;;  %v3061_v63 = vld [vmem:[%s4396_s1 + $0x80] sm:$0xff] }
 0x1f9   :  { %v1290_v55 = vpop.permute.xlu0 %1289 }
 0x1fa   :  { %v1295_v12 = vpop.permute.xlu1 %1294  ;;  %1369 = vperm.xlu0 %2737, %v2980_v7   ;;  %v1431_v42 = vmul.f32 %v3048_v41, %v1290_v55  ;;  %v3064_v41 = vld [vmem:[%s4395_s0 + $0x180] sm:$0xff] }
 0x1fb   :  { %1374 = vperm.xlu1 %2738, %v2986_v60   ;;  %v1432_v57 = vmul.f32 %v3050_v53, %v1295_v12 }
 0x1fd   :  { %v1578_v30 = vpop.permute.xlu0 %1577 }
 0x1fe   :  { %v1583_v29 = vpop.permute.xlu1 %1582  ;;  %v1847_v58 = vmul.f32 %v3045_v25, %v1578_v30  ;;  %1657 = vperm.xlu0 %2737, %v1479_v45  }
 0x1ff   :  { %v1848_v31 = vmul.f32 %v3047_v20, %v1583_v29  ;;  %1662 = vperm.xlu1 %2738, %v1480_v23   ;;  %v3060_v29 = vld [vmem:[%s4395_s0 + $0x80] sm:$0xff]  ;;  %v3062_v20 = vld [vmem:[%s4395_s0 + $0x88] sm:$0xff] }
 0x200   :  { %v2428_v56 = vpack.c.bf16 %v1847_v58, %v1399_v33 }
 0x201   :  { %v2429_v27 = vpack.c.bf16 %v1848_v31, %v1400_v19  ;;  %v1738_v49 = vpop.permute.xlu0 %1737 }
 0x202   :  { %2295 = vst [vmem:[%s4397_s4 + $0x60] sm:$0xff] %v2428_v56  ;;  %v1743_v32 = vpop.permute.xlu1 %1742  ;;  %v1879_v0 = vmul.f32 %v3049_v35, %v1738_v49  ;;  %1817 = vperm.xlu0 %2737, %v1511_v46   ;;  %v3063_v56 = vld [vmem:[%s4396_s1 + $0x88] sm:$0xff]  ;;  %v3065_v35 = vld [vmem:[%s4396_s1 + $0x180] sm:$0xff] }
 0x203   :  { %2296 = vst [vmem:[%s4397_s4 + $0x68] sm:$0xff] %v2429_v27  ;;  %v1880_v51 = vmul.f32 %v3051_v48, %v1743_v32  ;;  %1822 = vperm.xlu1 %2738, %v1512_v40  }
 0x204   :  { %v2460_v38 = vpack.c.bf16 %v1879_v0, %v1431_v42 }
 0x205   :  { %v2461_v26 = vpack.c.bf16 %v1880_v51, %v1432_v57  ;;  %v1140_v59 = vpop.permute.xlu0 %1139  ;;  %v3067_v57 = vld [vmem:[%s4396_s1 + $0x188] sm:$0xff] }
 0x206   :  { %2327 = vst [vmem:[%s4397_s4 + $0x160] sm:$0xff] %v2460_v38  ;;  %v1145_v43 = vpop.permute.xlu1 %1144  ;;  %1219 = vperm.xlu0 %2737, %v2988_v44   ;;  %v1401_v47 = vmul.f32 %v3052_v3, %v1140_v59  ;;  %v3066_v44 = vld [vmem:[%s4395_s0 + $0x188] sm:$0xff] }
 0x207   :  { %2328 = vst [vmem:[%s4397_s4 + $0x168] sm:$0xff] %v2461_v26  ;;  %1224 = vperm.xlu1 %2738, %v2990_v54   ;;  %v1402_v5 = vmul.f32 %v3054_v2, %v1145_v43 }
 0x209   :  { %v1300_v62 = vpop.permute.xlu0 %1299 }
 0x20a   :  { %v1305_v14 = vpop.permute.xlu1 %1304  ;;  %1379 = vperm.xlu0 %2737, %v2992_v24   ;;  %v1433_v1 = vmul.f32 %v3056_v39, %v1300_v62 }
 0x20b   :  { %1384 = vperm.xlu1 %2738, %v2994_v34   ;;  %v1434_v60 = vmul.f32 %v3058_v11, %v1305_v14  ;;  %v3068_v34 = vld [vmem:[%s4395_s0 + $0x90] sm:$0xff] }
 0x20d   :  { %v1588_v61 = vpop.permute.xlu0 %1587 }
 0x20e   :  { %v1593_v17 = vpop.permute.xlu1 %1592  ;;  %v1849_v10 = vmul.f32 %v3053_v28, %v1588_v61  ;;  %1667 = vperm.xlu0 %2737, %v1481_v8   ;;  %v3069_v8 = vld [vmem:[%s4396_s1 + $0x90] sm:$0xff] }
 0x20f   :  { %v1850_v15 = vmul.f32 %v3055_v6, %v1593_v17  ;;  %1672 = vperm.xlu1 %2738, %v1482_v21   ;;  %v3070_v21 = vld [vmem:[%s4395_s0 + $0x98] sm:$0xff] }
 0x210   :  { %v2430_v18 = vpack.c.bf16 %v1849_v10, %v1401_v47  ;;  %v3071_v47 = vld [vmem:[%s4396_s1 + $0x98] sm:$0xff] }
 0x211   :  { %v2431_v36 = vpack.c.bf16 %v1850_v15, %v1402_v5  ;;  %v1748_v7 = vpop.permute.xlu0 %1747  ;;  %v3072_v5 = vld [vmem:[%s4395_s0 + $0x190] sm:$0xff] }
 0x212   :  { %2297 = vst [vmem:[%s4397_s4 + $0x70] sm:$0xff] %v2430_v18  ;;  %v1753_v52 = vpop.permute.xlu1 %1752  ;;  %v1881_v22 = vmul.f32 %v3057_v9, %v1748_v7  ;;  %1827 = vperm.xlu0 %2737, %v1513_v13   ;;  %v3073_v18 = vld [vmem:[%s4396_s1 + $0x190] sm:$0xff] }
 0x213   :  { %2298 = vst [vmem:[%s4397_s4 + $0x78] sm:$0xff] %v2431_v36  ;;  %v1882_v55 = vmul.f32 %v3059_v4, %v1753_v52  ;;  %1832 = vperm.xlu1 %2738, %v1514_v50   ;;  %v3074_v36 = vld [vmem:[%s4395_s0 + $0x198] sm:$0xff] }
 0x214   :  { %v2462_v37 = vpack.c.bf16 %v1881_v22, %v1433_v1  ;;  %v3075_v50 = vld [vmem:[%s4396_s1 + $0x198] sm:$0xff] }
 0x215   :  { %v2463_v12 = vpack.c.bf16 %v1882_v55, %v1434_v60  ;;  %v1150_v45 = vpop.permute.xlu0 %1149  ;;  %v3076_v55 = vld [vmem:[%s4395_s0 + $0xa0] sm:$0xff] }
 0x216   :  { %2329 = vst [vmem:[%s4397_s4 + $0x170] sm:$0xff] %v2462_v37  ;;  %v1155_v30 = vpop.permute.xlu1 %1154  ;;  %v1403_v25 = vmul.f32 %v3060_v29, %v1150_v45  ;;  %v3077_v45 = vld [vmem:[%s4396_s1 + $0xa0] sm:$0xff] }
 0x217   :  { %2330 = vst [vmem:[%s4397_s4 + $0x178] sm:$0xff] %v2463_v12  ;;  %v1404_v31 = vmul.f32 %v3062_v20, %v1155_v30 }
 0x219   :  { %v1310_v23 = vpop.permute.xlu0 %1309 }
 0x21a   :  { %v1315_v16 = vpop.permute.xlu1 %1314  ;;  %v1435_v42 = vmul.f32 %v3064_v41, %v1310_v23  ;;  %v3078_v23 = vld [vmem:[%s4395_s0 + $0xa8] sm:$0xff] }
 0x21b   :  { %v1436_v53 = vmul.f32 %v3066_v44, %v1315_v16 }
 0x21d   :  { %v1598_v33 = vpop.permute.xlu0 %1597 }
 0x21e   :  { %v1603_v58 = vpop.permute.xlu1 %1602  ;;  %v1851_v19 = vmul.f32 %v3061_v63, %v1598_v33  ;;  %v3079_v33 = vld [vmem:[%s4396_s1 + $0xa8] sm:$0xff] }
 0x21f   :  { %v1852_v46 = vmul.f32 %v3063_v56, %v1603_v58  ;;  %v3081_v56 = vld [vmem:[%s4396_s1 + $0x1a0] sm:$0xff] }
 0x220   :  { %v2432_v27 = vpack.c.bf16 %v1851_v19, %v1403_v25  ;;  %v3080_v19 = vld [vmem:[%s4395_s0 + $0x1a0] sm:$0xff] }
 0x221   :  { %v2433_v49 = vpack.c.bf16 %v1852_v46, %v1404_v31  ;;  %v1758_v40 = vpop.permute.xlu0 %1757 }
 0x222   :  { %2299 = vst [vmem:[%s4397_s4 + $0x80] sm:$0xff] %v2432_v27  ;;  %v1763_v32 = vpop.permute.xlu1 %1762  ;;  %v1883_v0 = vmul.f32 %v3065_v35, %v1758_v40  ;;  %v3082_v27 = vld [vmem:[%s4395_s0 + $0x1a8] sm:$0xff] }
 0x223   :  { %2300 = vst [vmem:[%s4397_s4 + $0x88] sm:$0xff] %v2433_v49  ;;  %v1884_v48 = vmul.f32 %v3067_v57, %v1763_v32  ;;  %v3083_v40 = vld [vmem:[%s4396_s1 + $0x1a8] sm:$0xff] }
 0x224   :  { %v2464_v51 = vpack.c.bf16 %v1883_v0, %v1435_v42 }
 0x225   :  { %v2465_v54 = vpack.c.bf16 %v1884_v48, %v1436_v53  ;;  %v1160_v38 = vpop.permute.xlu0 %1159  ;;  %v3084_v48 = vld [vmem:[%s4395_s0 + $0xb0] sm:$0xff] }
 0x226   :  { %2331 = vst [vmem:[%s4397_s4 + $0x180] sm:$0xff] %v2464_v51  ;;  %v1165_v26 = vpop.permute.xlu1 %1164  ;;  %v1405_v62 = vmul.f32 %v3068_v34, %v1160_v38  ;;  %v3085_v38 = vld [vmem:[%s4396_s1 + $0xb0] sm:$0xff] }
 0x227   :  { %2332 = vst [vmem:[%s4397_s4 + $0x188] sm:$0xff] %v2465_v54  ;;  %v1406_v3 = vmul.f32 %v3070_v21, %v1165_v26 }
 0x229   :  { %v1320_v59 = vpop.permute.xlu0 %1319 }
 0x22a   :  { %v1325_v43 = vpop.permute.xlu1 %1324  ;;  %v1437_v6 = vmul.f32 %v3072_v5, %v1320_v59  ;;  %v3086_v59 = vld [vmem:[%s4395_s0 + $0xb8] sm:$0xff] }
 0x22b   :  { %v1438_v7 = vmul.f32 %v3074_v36, %v1325_v43 }
 0x22d   :  { %v1608_v24 = vpop.permute.xlu0 %1607 }
 0x22e   :  { %v1613_v14 = vpop.permute.xlu1 %1612  ;;  %v1853_v61 = vmul.f32 %v3069_v8, %v1608_v24  ;;  %v3087_v24 = vld [vmem:[%s4396_s1 + $0xb8] sm:$0xff] }
 0x22f   :  { %v1854_v17 = vmul.f32 %v3071_v47, %v1613_v14  ;;  %v3089_v47 = vld [vmem:[%s4396_s1 + $0x1b0] sm:$0xff] }
 0x230   :  { %v2434_v28 = vpack.c.bf16 %v1853_v61, %v1405_v62  ;;  %v3088_v61 = vld [vmem:[%s4395_s0 + $0x1b0] sm:$0xff] }
 0x231   :  { %v2435_v10 = vpack.c.bf16 %v1854_v17, %v1406_v3  ;;  %v1768_v2 = vpop.permute.xlu0 %1767 }
 0x232   :  { %2301 = vst [vmem:[%s4397_s4 + $0x90] sm:$0xff] %v2434_v28  ;;  %v1773_v15 = vpop.permute.xlu1 %1772  ;;  %v1885_v13 = vmul.f32 %v3073_v18, %v1768_v2  ;;  %v3090_v28 = vld [vmem:[%s4395_s0 + $0x1b8] sm:$0xff] }
 0x233   :  { %2302 = vst [vmem:[%s4397_s4 + $0x98] sm:$0xff] %v2435_v10  ;;  %v1886_v39 = vmul.f32 %v3075_v50, %v1773_v15  ;;  %v3091_v2 = vld [vmem:[%s4396_s1 + $0x1b8] sm:$0xff] }
 0x234   :  { %v2466_v1 = vpack.c.bf16 %v1885_v13, %v1437_v6 }
 0x235   :  { %v2467_v52 = vpack.c.bf16 %v1886_v39, %v1438_v7  ;;  %v1170_v9 = vpop.permute.xlu0 %1169  ;;  %v3092_v39 = vld [vmem:[%s4395_s0 + $0xc0] sm:$0xff] }
 0x236   :  { %2333 = vst [vmem:[%s4397_s4 + $0x190] sm:$0xff] %v2466_v1  ;;  %v1175_v22 = vpop.permute.xlu1 %1174  ;;  %v1407_v37 = vmul.f32 %v3076_v55, %v1170_v9  ;;  %v3093_v9 = vld [vmem:[%s4396_s1 + $0xc0] sm:$0xff] }
 0x237   :  { %2334 = vst [vmem:[%s4397_s4 + $0x198] sm:$0xff] %v2467_v52  ;;  %v1408_v16 = vmul.f32 %v3078_v23, %v1175_v22 }
 0x239   :  { %v1330_v11 = vpop.permute.xlu0 %1329 }
 0x23a   :  { %v1335_v60 = vpop.permute.xlu1 %1334  ;;  %v1439_v20 = vmul.f32 %v3080_v19, %v1330_v11  ;;  %v3094_v11 = vld [vmem:[%s4395_s0 + $0xc8] sm:$0xff] }
 0x23b   :  { %v1440_v49 = vmul.f32 %v3082_v27, %v1335_v60 }
 0x23d   :  { %v1618_v4 = vpop.permute.xlu0 %1617 }
 0x23e   :  { %v1623_v12 = vpop.permute.xlu1 %1622  ;;  %v1855_v30 = vmul.f32 %v3077_v45, %v1618_v4  ;;  %v3095_v4 = vld [vmem:[%s4396_s1 + $0xc8] sm:$0xff] }
 0x23f   :  { %v1856_v29 = vmul.f32 %v3079_v33, %v1623_v12  ;;  %v3097_v33 = vld [vmem:[%s4396_s1 + $0x1c0] sm:$0xff] }
 0x240   :  { %v2436_v25 = vpack.c.bf16 %v1855_v30, %v1407_v37  ;;  %v3096_v30 = vld [vmem:[%s4395_s0 + $0x1c0] sm:$0xff] }
 0x241   :  { %v2437_v58 = vpack.c.bf16 %v1856_v29, %v1408_v16  ;;  %v1778_v63 = vpop.permute.xlu0 %1777 }
 0x242   :  { %2303 = vst [vmem:[%s4397_s4 + $0xa0] sm:$0xff] %v2436_v25  ;;  %v1783_v31 = vpop.permute.xlu1 %1782  ;;  %v1887_v46 = vmul.f32 %v3081_v56, %v1778_v63  ;;  %v3098_v25 = vld [vmem:[%s4395_s0 + $0x1c8] sm:$0xff] }
 0x243   :  { %2304 = vst [vmem:[%s4397_s4 + $0xa8] sm:$0xff] %v2437_v58  ;;  %v1888_v41 = vmul.f32 %v3083_v40, %v1783_v31  ;;  %v3099_v63 = vld [vmem:[%s4396_s1 + $0x1c8] sm:$0xff] }
 0x244   :  { %v2468_v42 = vpack.c.bf16 %v1887_v46, %v1439_v20 }
 0x245   :  { %v2469_v32 = vpack.c.bf16 %v1888_v41, %v1440_v49  ;;  %v1180_v35 = vpop.permute.xlu0 %1179  ;;  %v3100_v41 = vld [vmem:[%s4395_s0 + $0xd0] sm:$0xff] }
 0x246   :  { %2335 = vst [vmem:[%s4397_s4 + $0x1a0] sm:$0xff] %v2468_v42  ;;  %v1185_v0 = vpop.permute.xlu1 %1184  ;;  %v1409_v51 = vmul.f32 %v3084_v48, %v1180_v35  ;;  %v3101_v35 = vld [vmem:[%s4396_s1 + $0xd0] sm:$0xff] }
 0x247   :  { %2336 = vst [vmem:[%s4397_s4 + $0x1a8] sm:$0xff] %v2469_v32  ;;  %v1410_v43 = vmul.f32 %v3086_v59, %v1185_v0 }
 0x249   :  { %v1340_v44 = vpop.permute.xlu0 %1339 }
 0x24a   :  { %v1345_v53 = vpop.permute.xlu1 %1344  ;;  %v1441_v21 = vmul.f32 %v3088_v61, %v1340_v44  ;;  %v3102_v44 = vld [vmem:[%s4395_s0 + $0xd8] sm:$0xff] }
 0x24b   :  { %v1442_v10 = vmul.f32 %v3090_v28, %v1345_v53 }
 0x24d   :  { %v1628_v57 = vpop.permute.xlu0 %1627 }
 0x24e   :  { %v1633_v54 = vpop.permute.xlu1 %1632  ;;  %v1857_v26 = vmul.f32 %v3085_v38, %v1628_v57  ;;  %v3103_v57 = vld [vmem:[%s4396_s1 + $0xd8] sm:$0xff] }
 0x24f   :  { %v1858_v34 = vmul.f32 %v3087_v24, %v1633_v54  ;;  %v3105_v24 = vld [vmem:[%s4396_s1 + $0x1d0] sm:$0xff] }
 0x250   :  { %v2438_v62 = vpack.c.bf16 %v1857_v26, %v1409_v51  ;;  %v3104_v26 = vld [vmem:[%s4395_s0 + $0x1d0] sm:$0xff] }
 0x251   :  { %v2439_v14 = vpack.c.bf16 %v1858_v34, %v1410_v43  ;;  %v1788_v8 = vpop.permute.xlu0 %1787 }
 0x252   :  { %2305 = vst [vmem:[%s4397_s4 + $0xb0] sm:$0xff] %v2438_v62  ;;  %v1793_v3 = vpop.permute.xlu1 %1792  ;;  %v1889_v17 = vmul.f32 %v3089_v47, %v1788_v8  ;;  %v3106_v62 = vld [vmem:[%s4395_s0 + $0x1d8] sm:$0xff] }
 0x253   :  { %2306 = vst [vmem:[%s4397_s4 + $0xb8] sm:$0xff] %v2439_v14  ;;  %v1890_v5 = vmul.f32 %v3091_v2, %v1793_v3  ;;  %v3107_v8 = vld [vmem:[%s4396_s1 + $0x1d8] sm:$0xff] }
 0x254   :  { %v2470_v6 = vpack.c.bf16 %v1889_v17, %v1441_v21 }
 0x255   :  { %v2471_v15 = vpack.c.bf16 %v1890_v5, %v1442_v10  ;;  %v1190_v18 = vpop.permute.xlu0 %1189  ;;  %v3108_v5 = vld [vmem:[%s4395_s0 + $0xe0] sm:$0xff] }
 0x256   :  { %2337 = vst [vmem:[%s4397_s4 + $0x1b0] sm:$0xff] %v2470_v6  ;;  %v1195_v13 = vpop.permute.xlu1 %1194  ;;  %v1411_v1 = vmul.f32 %v3092_v39, %v1190_v18  ;;  %v3109_v18 = vld [vmem:[%s4396_s1 + $0xe0] sm:$0xff] }
 0x257   :  { %2338 = vst [vmem:[%s4397_s4 + $0x1b8] sm:$0xff] %v2471_v15  ;;  %v1412_v60 = vmul.f32 %v3094_v11, %v1195_v13 }
 0x259   :  { %v1350_v36 = vpop.permute.xlu0 %1349 }
 0x25a   :  { %v1355_v7 = vpop.permute.xlu1 %1354  ;;  %v1443_v23 = vmul.f32 %v3096_v30, %v1350_v36  ;;  %v3110_v36 = vld [vmem:[%s4395_s0 + $0xe8] sm:$0xff] }
 0x25b   :  { %v1444_v58 = vmul.f32 %v3098_v25, %v1355_v7 }
 0x25d   :  { %v1638_v50 = vpop.permute.xlu0 %1637 }
 0x25e   :  { %v1643_v52 = vpop.permute.xlu1 %1642  ;;  %v1859_v22 = vmul.f32 %v3093_v9, %v1638_v50  ;;  %v3111_v50 = vld [vmem:[%s4396_s1 + $0xe8] sm:$0xff] }
 0x25f   :  { %v1860_v55 = vmul.f32 %v3095_v4, %v1643_v52  ;;  %v3113_v4 = vld [vmem:[%s4396_s1 + $0x1e0] sm:$0xff] }
 0x260   :  { %v2440_v37 = vpack.c.bf16 %v1859_v22, %v1411_v1  ;;  %v3112_v22 = vld [vmem:[%s4395_s0 + $0x1e0] sm:$0xff] }
 0x261   :  { %v2441_v12 = vpack.c.bf16 %v1860_v55, %v1412_v60  ;;  %v1798_v45 = vpop.permute.xlu0 %1797 }
 0x262   :  { %2307 = vst [vmem:[%s4397_s4 + $0xc0] sm:$0xff] %v2440_v37  ;;  %v1803_v16 = vpop.permute.xlu1 %1802  ;;  %v1891_v29 = vmul.f32 %v3097_v33, %v1798_v45  ;;  %v3114_v37 = vld [vmem:[%s4395_s0 + $0x1e8] sm:$0xff] }
 0x263   :  { %2308 = vst [vmem:[%s4397_s4 + $0xc8] sm:$0xff] %v2441_v12  ;;  %v1892_v19 = vmul.f32 %v3099_v63, %v1803_v16  ;;  %v3115_v45 = vld [vmem:[%s4396_s1 + $0x1e8] sm:$0xff] }
 0x264   :  { %v2472_v20 = vpack.c.bf16 %v1891_v29, %v1443_v23 }
 0x265   :  { %v2473_v31 = vpack.c.bf16 %v1892_v19, %v1444_v58  ;;  %v1200_v56 = vpop.permute.xlu0 %1199  ;;  %v3116_v19 = vld [vmem:[%s4395_s0 + $0xf0] sm:$0xff] }
 0x266   :  { %2339 = vst [vmem:[%s4397_s4 + $0x1c0] sm:$0xff] %v2472_v20  ;;  %v1205_v46 = vpop.permute.xlu1 %1204  ;;  %v1413_v42 = vmul.f32 %v3100_v41, %v1200_v56  ;;  %v3117_v56 = vld [vmem:[%s4396_s1 + $0xf0] sm:$0xff] }
 0x267   :  { %2340 = vst [vmem:[%s4397_s4 + $0x1c8] sm:$0xff] %v2473_v31  ;;  %v1414_v53 = vmul.f32 %v3102_v44, %v1205_v46 }
 0x269   :  { %v1360_v27 = vpop.permute.xlu0 %1359 }
 0x26a   :  { %v1365_v49 = vpop.permute.xlu1 %1364  ;;  %v1445_v59 = vmul.f32 %v3104_v26, %v1360_v27  ;;  %v3118_v27 = vld [vmem:[%s4395_s0 + $0xf8] sm:$0xff] }
 0x26b   :  { %v1446_v14 = vmul.f32 %v3106_v62, %v1365_v49 }
 0x26d   :  { %v1648_v40 = vpop.permute.xlu0 %1647 }
 0x26e   :  { %v1653_v32 = vpop.permute.xlu1 %1652  ;;  %v1861_v0 = vmul.f32 %v3101_v35, %v1648_v40  ;;  %v3119_v40 = vld [vmem:[%s4396_s1 + $0xf8] sm:$0xff] }
 0x26f   :  { %v1862_v48 = vmul.f32 %v3103_v57, %v1653_v32  ;;  %v3121_v57 = vld [vmem:[%s4396_s1 + $0x1f0] sm:$0xff] }
 0x270   :  { %v2442_v51 = vpack.c.bf16 %v1861_v0, %v1413_v42  ;;  %v3120_v0 = vld [vmem:[%s4395_s0 + $0x1f0] sm:$0xff] }
 0x271   :  { %v2443_v54 = vpack.c.bf16 %v1862_v48, %v1414_v53  ;;  %v1808_v38 = vpop.permute.xlu0 %1807 }
 0x272   :  { %2309 = vst [vmem:[%s4397_s4 + $0xd0] sm:$0xff] %v2442_v51  ;;  %v1813_v43 = vpop.permute.xlu1 %1812  ;;  %v1893_v34 = vmul.f32 %v3105_v24, %v1808_v38  ;;  %v3122_v51 = vld [vmem:[%s4395_s0 + $0x1f8] sm:$0xff] }
 0x273   :  { %2310 = vst [vmem:[%s4397_s4 + $0xd8] sm:$0xff] %v2443_v54  ;;  %v1894_v61 = vmul.f32 %v3107_v8, %v1813_v43  ;;  %v3123_v38 = vld [vmem:[%s4396_s1 + $0x1f8] sm:$0xff] }
 0x274   :  { %v2474_v21 = vpack.c.bf16 %v1893_v34, %v1445_v59 }
 0x275   :  { %v2475_v3 = vpack.c.bf16 %v1894_v61, %v1446_v14  ;;  %v1210_v47 = vpop.permute.xlu0 %1209 }
 0x276   :  { %2341 = vst [vmem:[%s4397_s4 + $0x1d0] sm:$0xff] %v2474_v21  ;;  %v1215_v17 = vpop.permute.xlu1 %1214  ;;  %v1415_v6 = vmul.f32 %v3108_v5, %v1210_v47 }
 0x277   :  { %2342 = vst [vmem:[%s4397_s4 + $0x1d8] sm:$0xff] %v2475_v3  ;;  %v1416_v7 = vmul.f32 %v3110_v36, %v1215_v17 }
 0x279   :  { %v1370_v28 = vpop.permute.xlu0 %1369 }
 0x27a   :  { %v1375_v10 = vpop.permute.xlu1 %1374  ;;  %v1447_v11 = vmul.f32 %v3112_v22, %v1370_v28 }
 0x27b   :  { %v1448_v12 = vmul.f32 %v3114_v37, %v1375_v10 }
 0x27d   :  { %v1658_v2 = vpop.permute.xlu0 %1657 }
 0x27e   :  { %v1663_v15 = vpop.permute.xlu1 %1662  ;;  %v1863_v13 = vmul.f32 %v3109_v18, %v1658_v2 }
 0x27f   :  { %v1864_v39 = vmul.f32 %v3111_v50, %v1663_v15 }
 0x280   :  { %v2444_v1 = vpack.c.bf16 %v1863_v13, %v1415_v6 }
 0x281   :  { %v2445_v52 = vpack.c.bf16 %v1864_v39, %v1416_v7  ;;  %v1818_v9 = vpop.permute.xlu0 %1817 }
 0x282   :  { %2311 = vst [vmem:[%s4397_s4 + $0xe0] sm:$0xff] %v2444_v1  ;;  %v1823_v60 = vpop.permute.xlu1 %1822  ;;  %v1895_v55 = vmul.f32 %v3113_v4, %v1818_v9 }
 0x283   :  { %2312 = vst [vmem:[%s4397_s4 + $0xe8] sm:$0xff] %v2445_v52  ;;  %v1896_v30 = vmul.f32 %v3115_v45, %v1823_v60 }
 0x284   :  { %v2476_v23 = vpack.c.bf16 %v1895_v55, %v1447_v11 }
 0x285   :  { %v2477_v16 = vpack.c.bf16 %v1896_v30, %v1448_v12  ;;  %v1220_v33 = vpop.permute.xlu0 %1219 }
 0x286   :  { %2343 = vst [vmem:[%s4397_s4 + $0x1e0] sm:$0xff] %v2476_v23  ;;  %v1225_v29 = vpop.permute.xlu1 %1224  ;;  %v1417_v20 = vmul.f32 %v3116_v19, %v1220_v33 }
 0x287   :  { %2344 = vst [vmem:[%s4397_s4 + $0x1e8] sm:$0xff] %v2477_v16  ;;  %v1418_v49 = vmul.f32 %v3118_v27, %v1225_v29 }
 0x289   :  { %v1380_v25 = vpop.permute.xlu0 %1379 }
 0x28a   :  { %v1385_v58 = vpop.permute.xlu1 %1384  ;;  %v1449_v44 = vmul.f32 %v3120_v0, %v1380_v25 }
 0x28b   :  { %v1450_v54 = vmul.f32 %v3122_v51, %v1385_v58 }
 0x28d   :  { %v1668_v63 = vpop.permute.xlu0 %1667 }
 0x28e   :  { %v1673_v31 = vpop.permute.xlu1 %1672  ;;  %v1865_v46 = vmul.f32 %v3117_v56, %v1668_v63 }
 0x28f   :  { %v1866_v41 = vmul.f32 %v3119_v40, %v1673_v31 }
 0x290   :  { %v2446_v42 = vpack.c.bf16 %v1865_v46, %v1417_v20 }
 0x291   :  { %v2447_v32 = vpack.c.bf16 %v1866_v41, %v1418_v49  ;;  %v1828_v35 = vpop.permute.xlu0 %1827 }
 0x292   :  { %2313 = vst [vmem:[%s4397_s4 + $0xf0] sm:$0xff] %v2446_v42  ;;  %v1833_v53 = vpop.permute.xlu1 %1832  ;;  %v1897_v48 = vmul.f32 %v3121_v57, %v1828_v35 }
 0x293   :  { %2314 = vst [vmem:[%s4397_s4 + $0xf8] sm:$0xff] %v2447_v32  ;;  %v1898_v26 = vmul.f32 %v3123_v38, %v1833_v53 }
 0x294   :  { %v2478_v59 = vpack.c.bf16 %v1897_v48, %v1449_v44 }
 0x295   :  { %v2479_v43 = vpack.c.bf16 %v1898_v26, %v1450_v54 }
 0x296   :  { %2345 = vst [vmem:[%s4397_s4 + $0x1f0] sm:$0xff] %v2478_v59 }
 0x297   :  { %2346 = vst [vmem:[%s4397_s4 + $0x1f8] sm:$0xff] %v2479_v43 }

// kernel: spatialblock_forward.5
= control target key start
LH: loop header
LB: loop body
LE: loop exit
PB: predicated region body
PF: predicated region fallthrough
CT: control target
= control target key end

     0   :  { %v14338_v0 = vmov 0   ;;  %s18239_s1 = inlined_call_operand.vmem [shape: bf16[3200,128], index: 1, kind: input, shape index: {}]   ;;  %s18240_s0 = inlined_call_operand.vmem [shape: bf16[512,3200], index: 0, kind: input, shape index: {}]   ;;  %s18241_s2 = inlined_call_operand.vmem [shape: f32[1,128], index: 2, kind: input, shape index: {}]   ;;  %s18242_s3 = inlined_call_operand.vmem [shape: f32[512,128], index: 3, kind: output, shape index: {}]  }
   0x1   :  { %6486 = vmatprep.subr.bf16.mxu1 %v14338_v0  ;;  %7931 = vmatprep.subr.bf16.mxu0 %v14338_v0  ;;  %v12937_v1 = vld [vmem:[%s18239_s1] sm:$0xff]   ;;  %v12939_v3 = vld [vmem:[%s18239_s1 + $0x8] sm:$0xff]   ;;  %v12941_v5 = vld [vmem:[%s18239_s1 + $0x10] sm:$0xff]  }
   0x2   :  { %v12938_v2 = vld [vmem:[%s18239_s1 + $0x280] sm:$0xff]   ;;  %6487 = vmatpush1.bf16.msra.mxu1 %v12937_v1  ;;  %v12940_v4 = vld [vmem:[%s18239_s1 + $0x288] sm:$0xff]   ;;  %v12942_v6 = vld [vmem:[%s18239_s1 + $0x290] sm:$0xff]  }
   0x3   :  { %7932 = vmatpush1.bf16.msra.mxu0 %v12938_v2  ;;  %6488 = vmatprep.subr.bf16.mxu1 %v14338_v0  ;;  %v12943_v7 = vld [vmem:[%s18239_s1 + $0x18] sm:$0xff]   ;;  %v12945_v9 = vld [vmem:[%s18239_s1 + $0x20] sm:$0xff]   ;;  %v12947_v11 = vld [vmem:[%s18239_s1 + $0x28] sm:$0xff]  }
   0x4   :  { %7933 = vmatprep.subr.bf16.mxu0 %v14338_v0  ;;  %v12944_v8 = vld [vmem:[%s18239_s1 + $0x298] sm:$0xff]   ;;  %v12946_v10 = vld [vmem:[%s18239_s1 + $0x2a0] sm:$0xff]   ;;  %v12948_v12 = vld [vmem:[%s18239_s1 + $0x2a8] sm:$0xff]  }
   0x5   :  { %v12949_v13 = vld [vmem:[%s18239_s1 + $0x30] sm:$0xff]   ;;  %v12951_v15 = vld [vmem:[%s18239_s1 + $0x38] sm:$0xff]   ;;  %v12953_v17 = vld [vmem:[%s18239_s1 + $0x40] sm:$0xff]  }
   0x6   :  { %6489 = vmatpush1.bf16.msra.mxu1 %v12939_v3  ;;  %v12950_v14 = vld [vmem:[%s18239_s1 + $0x2b0] sm:$0xff]   ;;  %v12952_v16 = vld [vmem:[%s18239_s1 + $0x2b8] sm:$0xff]   ;;  %v12954_v18 = vld [vmem:[%s18239_s1 + $0x2c0] sm:$0xff]  }
   0x7   :  { %7934 = vmatpush1.bf16.msra.mxu0 %v12940_v4  ;;  %6490 = vmatprep.subr.bf16.mxu1 %v14338_v0  ;;  %v12971_v19 = vld [vmem:[%s18240_s0 + $0x4] ss:$100 sps:$4 sm:$0xff]   ;;  %v12974_v21 = vld [vmem:[%s18240_s0 + $0x2c] ss:$100 sps:$4 sm:$0xff]   ;;  %v12959_v25 = vld [vmem:[%s18239_s1 + $0x58] sm:$0xff]  }
   0x8   :  { %7935 = vmatprep.subr.bf16.mxu0 %v14338_v0  ;;  %v12955_v20 = vld [vmem:[%s18239_s1 + $0x48] sm:$0xff]   ;;  %6518 = vmatprep.mubr.bf16.mxu1 %v12971_v19  ;;  %v12957_v23 = vld [vmem:[%s18239_s1 + $0x50] sm:$0xff]   ;;  %v12960_v26 = vld [vmem:[%s18239_s1 + $0x2d8] sm:$0xff]  }
   0x9   :  { %v12956_v22 = vld [vmem:[%s18239_s1 + $0x2c8] sm:$0xff]   ;;  %7963 = vmatprep.mubr.bf16.mxu0 %v12974_v21  ;;  %v12958_v24 = vld [vmem:[%s18239_s1 + $0x2d0] sm:$0xff]   ;;  %v12961_v27 = vld [vmem:[%s18239_s1 + $0x60] sm:$0xff]  }
   0xa   :  { %6491 = vmatpush1.bf16.msra.mxu1 %v12941_v5  ;;  %v12962_v28 = vld [vmem:[%s18239_s1 + $0x2e0] sm:$0xff]   ;;  %v12963_v29 = vld [vmem:[%s18239_s1 + $0x68] sm:$0xff]   ;;  %v12965_v31 = vld [vmem:[%s18239_s1 + $0x70] sm:$0xff]  }
   0xb   :  { %7936 = vmatpush1.bf16.msra.mxu0 %v12942_v6  ;;  %6492 = vmatprep.subr.bf16.mxu1 %v14338_v0  ;;  %v12964_v30 = vld [vmem:[%s18239_s1 + $0x2e8] sm:$0xff]   ;;  %v12966_v32 = vld [vmem:[%s18239_s1 + $0x2f0] sm:$0xff]   ;;  %v12967_v33 = vld [vmem:[%s18239_s1 + $0x78] sm:$0xff]  }
   0xc   :  { %7937 = vmatprep.subr.bf16.mxu0 %v14338_v0  ;;  %v12968_v34 = vld [vmem:[%s18239_s1 + $0x2f8] sm:$0xff]   ;;  %v12969_v35 = vld [vmem:[%s18240_s0] ss:$100 sps:$4 sm:$0xff]   ;;  %v12972_v36 = vld [vmem:[%s18240_s0 + $0x28] ss:$100 sps:$4 sm:$0xff]  }
   0xd   :  { %v12975_v37 = vld [vmem:[%s18239_s1 + $0x300] sm:$0xff]   ;;  %v12978_v39 = vld [vmem:[%s18240_s0 + $0xcc] ss:$100 sps:$4 sm:$0xff]   ;;  %v12980_v40 = vld [vmem:[%s18240_s0 + $0xf4] ss:$100 sps:$4 sm:$0xff]  }
   0xe   :  { %6493 = vmatpush1.bf16.msra.mxu1 %v12943_v7  ;;  %v12976_v38 = vld [vmem:[%s18239_s1 + $0x80] sm:$0xff]   ;;  %v12993_v41 = vld [vmem:[%s18239_s1 + $0x88] sm:$0xff]   ;;  %v12983_v44 = vld [vmem:[%s18240_s0 + $0xf0] ss:$100 sps:$4 sm:$0xff]  }
   0xf   :  { %7938 = vmatpush1.bf16.msra.mxu0 %v12944_v8  ;;  %6494 = vmatprep.subr.bf16.mxu1 %v14338_v0  ;;  %v12977_v42 = vld [vmem:[%s18239_s1 + $0x308] sm:$0xff]   ;;  %v12984_v45 = vld [vmem:[%s18239_s1 + $0x310] sm:$0xff]   ;;  %v12988_v47 = vld [vmem:[%s18240_s0 + $0x1bc] ss:$100 sps:$4 sm:$0xff]  }
  0x10   :  { %7939 = vmatprep.subr.bf16.mxu0 %v14338_v0  ;;  %v12982_v43 = vld [vmem:[%s18240_s0 + $0xc8] ss:$100 sps:$4 sm:$0xff]   ;;  %v12986_v46 = vld [vmem:[%s18240_s0 + $0x194] ss:$100 sps:$4 sm:$0xff]   ;;  %v12992_v53 = vld [vmem:[%s18239_s1 + $0x320] sm:$0xff]  }
  0x11   :  { %v13010_v48 = vld [vmem:[%s18239_s1 + $0x90] sm:$0xff]   ;;  %v12985_v49 = vld [vmem:[%s18239_s1 + $0x318] sm:$0xff]   ;;  %v12997_v55 = vld [vmem:[%s18240_s0 + $0x284] ss:$100 sps:$4 sm:$0xff]  }
  0x12   :  { %6495 = vmatpush1.bf16.msra.mxu1 %v12945_v9  ;;  %v12990_v50 = vld [vmem:[%s18240_s0 + $0x190] ss:$100 sps:$4 sm:$0xff]   ;;  %v12991_v51 = vld [vmem:[%s18240_s0 + $0x1b8] ss:$100 sps:$4 sm:$0xff]   ;;  %v13044_v56 = vld [vmem:[%s18239_s1 + $0xa0] sm:$0xff]  }
  0x13   :  { %7940 = vmatpush1.bf16.msra.mxu0 %v12946_v10  ;;  %6496 = vmatprep.subr.bf16.mxu1 %v14338_v0  ;;  %v13027_v52 = vld [vmem:[%s18239_s1 + $0x98] sm:$0xff]   ;;  %v12994_v57 = vld [vmem:[%s18239_s1 + $0x328] sm:$0xff]   ;;  %v13000_v59 = vld [vmem:[%s18240_s0 + $0x280] ss:$100 sps:$4 sm:$0xff]  }
  0x14   :  { %7941 = vmatprep.subr.bf16.mxu0 %v14338_v0  ;;  %v12995_v54 = vld [vmem:[%s18240_s0 + $0x25c] ss:$100 sps:$4 sm:$0xff]   ;;  %v13058_v60 = vld [vmem:[%s18239_s1 + $0xa8] sm:$0xff]   ;;  %v13001_v62 = vld [vmem:[%s18239_s1 + $0x330] sm:$0xff]  }
  0x15   :  { %v12999_v58 = vld [vmem:[%s18240_s0 + $0x258] ss:$100 sps:$4 sm:$0xff]   ;;  %v13003_v61 = vld [vmem:[%s18240_s0 + $0x324] ss:$100 sps:$4 sm:$0xff]   ;;  %v13005_v63 = vld [vmem:[%s18240_s0 + $0x34c] ss:$100 sps:$4 sm:$0xff]  }
  0x16   :  { %6497 = vmatpush1.bf16.msra.mxu1 %v12947_v11  ;;  %v13002_v1 = vld [vmem:[%s18239_s1 + $0x338] sm:$0xff]   ;;  %v13007_v2 = vld [vmem:[%s18240_s0 + $0x320] ss:$100 sps:$4 sm:$0xff]   ;;  %v13072_v3 = vld [vmem:[%s18239_s1 + $0xb0] sm:$0xff]  }
  0x17   :  { %7942 = vmatpush1.bf16.msra.mxu0 %v12948_v12  ;;  %6498 = vmatprep.subr.bf16.mxu1 %v14338_v0  ;;  %v13008_v4 = vld [vmem:[%s18240_s0 + $0x348] ss:$100 sps:$4 sm:$0xff]   ;;  %v13009_v5 = vld [vmem:[%s18239_s1 + $0x340] sm:$0xff]   ;;  %v13014_v7 = vld [vmem:[%s18240_s0 + $0x414] ss:$100 sps:$4 sm:$0xff]  }
  0x18   :  { %7943 = vmatprep.subr.bf16.mxu0 %v14338_v0  ;;  %v13012_v6 = vld [vmem:[%s18240_s0 + $0x3ec] ss:$100 sps:$4 sm:$0xff]   ;;  %v13086_v9 = vld [vmem:[%s18239_s1 + $0xb8] sm:$0xff]   ;;  %v13026_v19 = vld [vmem:[%s18239_s1 + $0x360] sm:$0xff]  }
  0x19   :  { %v13011_v8 = vld [vmem:[%s18239_s1 + $0x348] sm:$0xff]   ;;  %v13017_v11 = vld [vmem:[%s18240_s0 + $0x410] ss:$100 sps:$4 sm:$0xff]  }
  0x1a   :  { %6499 = vmatpush1.bf16.msra.mxu1 %v12949_v13  ;;  %v13016_v10 = vld [vmem:[%s18240_s0 + $0x3e8] ss:$100 sps:$4 sm:$0xff]   ;;  %v13018_v12 = vld [vmem:[%s18239_s1 + $0x350] sm:$0xff]  }
  0x1b   :  { %7944 = vmatpush1.bf16.msra.mxu0 %v12950_v14  ;;  %6500 = vmatprep.subr.bf16.mxu1 %v14338_v0  ;;  %v13020_v13 = vld [vmem:[%s18240_s0 + $0x4b4] ss:$100 sps:$4 sm:$0xff]   ;;  %v13022_v14 = vld [vmem:[%s18240_s0 + $0x4dc] ss:$100 sps:$4 sm:$0xff]   ;;  %v13031_v21 = vld [vmem:[%s18240_s0 + $0x5a4] ss:$100 sps:$4 sm:$0xff]  }
  0x1c   :  { %7945 = vmatprep.subr.bf16.mxu0 %v14338_v0 }
  0x1e   :  { %6501 = vmatpush1.bf16.msra.mxu1 %v12951_v15  ;;  %v13019_v15 = vld [vmem:[%s18239_s1 + $0x358] sm:$0xff]  }
  0x1f   :  { %7946 = vmatpush1.bf16.msra.mxu0 %v12952_v16  ;;  %6502 = vmatprep.subr.bf16.mxu1 %v14338_v0  ;;  %v13100_v16 = vld [vmem:[%s18239_s1 + $0xc0] sm:$0xff]  }
  0x20   :  { %7947 = vmatprep.subr.bf16.mxu0 %v14338_v0 }
  0x22   :  { %6503 = vmatpush1.bf16.msra.mxu1 %v12953_v17  ;;  %v13024_v17 = vld [vmem:[%s18240_s0 + $0x4b0] ss:$100 sps:$4 sm:$0xff]  }
  0x23   :  { %7948 = vmatpush1.bf16.msra.mxu0 %v12954_v18  ;;  %6504 = vmatprep.subr.bf16.mxu1 %v14338_v0  ;;  %v13025_v18 = vld [vmem:[%s18240_s0 + $0x4d8] ss:$100 sps:$4 sm:$0xff]  }
  0x24   :  { %7949 = vmatprep.subr.bf16.mxu0 %v14338_v0 }
  0x26   :  { %6505 = vmatpush1.bf16.msra.mxu1 %v12955_v20  ;;  %v13029_v20 = vld [vmem:[%s18240_s0 + $0x57c] ss:$100 sps:$4 sm:$0xff]  }
  0x27   :  { %7950 = vmatpush1.bf16.msra.mxu0 %v12956_v22  ;;  %6506 = vmatprep.subr.bf16.mxu1 %v14338_v0  ;;  %v13114_v22 = vld [vmem:[%s18239_s1 + $0xc8] sm:$0xff]  }
  0x28   :  { %7951 = vmatprep.subr.bf16.mxu0 %v14338_v0 }
  0x2a   :  { %6507 = vmatpush1.bf16.msra.mxu1 %v12957_v23  ;;  %v13028_v23 = vld [vmem:[%s18239_s1 + $0x368] sm:$0xff]  }
  0x2b   :  { %7952 = vmatpush1.bf16.msra.mxu0 %v12958_v24  ;;  %6508 = vmatprep.subr.bf16.mxu1 %v14338_v0  ;;  %v13033_v24 = vld [vmem:[%s18240_s0 + $0x578] ss:$100 sps:$4 sm:$0xff]  }
  0x2c   :  { %7953 = vmatprep.subr.bf16.mxu0 %v14338_v0 }
  0x2e   :  { %6509 = vmatpush1.bf16.msra.mxu1 %v12959_v25  ;;  %v13034_v25 = vld [vmem:[%s18240_s0 + $0x5a0] ss:$100 sps:$4 sm:$0xff]  }
  0x2f   :  { %7954 = vmatpush1.bf16.msra.mxu0 %v12960_v26  ;;  %6510 = vmatprep.subr.bf16.mxu1 %v14338_v0  ;;  %v13037_v26 = vld [vmem:[%s18240_s0 + $0x644] ss:$100 sps:$4 sm:$0xff]  }
  0x30   :  { %7955 = vmatprep.subr.bf16.mxu0 %v14338_v0 }
  0x32   :  { %6511 = vmatpush1.bf16.msra.mxu1 %v12961_v27  ;;  %v13035_v27 = vld [vmem:[%s18239_s1 + $0x370] sm:$0xff]  }
  0x33   :  { %7956 = vmatpush1.bf16.msra.mxu0 %v12962_v28  ;;  %6512 = vmatprep.subr.bf16.mxu1 %v14338_v0  ;;  %v13041_v28 = vld [vmem:[%s18240_s0 + $0x34] ss:$100 sps:$4 sm:$0xff]  }
  0x34   :  { %7957 = vmatprep.subr.bf16.mxu0 %v14338_v0 }
  0x36   :  { %6513 = vmatpush1.bf16.msra.mxu1 %v12963_v29  ;;  %v13128_v29 = vld [vmem:[%s18239_s1 + $0xd0] sm:$0xff]  }
  0x37   :  { %7958 = vmatpush1.bf16.msra.mxu0 %v12964_v30  ;;  %6514 = vmatprep.subr.bf16.mxu1 %v14338_v0  ;;  %v13036_v30 = vld [vmem:[%s18239_s1 + $0x378] sm:$0xff]  }
  0x38   :  { %7959 = vmatprep.subr.bf16.mxu0 %v14338_v0 }
  0x3a   :  { %6515 = vmatpush1.bf16.msra.mxu1 %v12965_v31  ;;  %v13039_v31 = vld [vmem:[%s18240_s0 + $0x30] ss:$100 sps:$4 sm:$0xff]  }
  0x3b   :  { %7960 = vmatpush1.bf16.msra.mxu0 %v12966_v32  ;;  %6516 = vmatprep.subr.bf16.mxu1 %v14338_v0  ;;  %v13042_v32 = vld [vmem:[%s18240_s0 + $0x640] ss:$100 sps:$4 sm:$0xff]  }
  0x3c   :  { %7961 = vmatprep.subr.bf16.mxu0 %v14338_v0 }
  0x3e   :  { %6517 = vmatpush1.bf16.msra.mxu1 %v12967_v33  ;;  %v13043_v33 = vld [vmem:[%s18239_s1 + $0x380] sm:$0xff]  }
  0x3f   :  { %7962 = vmatpush1.bf16.msra.mxu0 %v12968_v34  ;;  %6775 = vmatprep.subr.bf16.mxu1 %v14338_v0  ;;  %v13045_v34 = vld [vmem:[%s18240_s0 + $0x70c] ss:$100 sps:$4 sm:$0xff]  }
  0x40   :  { %8220 = vmatprep.subr.bf16.mxu0 %v14338_v0 }
  0x41   :  { %6519 = vmatmul.mubr.bf16.vlgmr.msra.gmra.mrb[0].mxu1 %v12969_v35  ;;  %v13047_v35 = vld [vmem:[%s18240_s0 + $0xfc] ss:$100 sps:$4 sm:$0xff]  }
  0x42   :  { %7964 = vmatmul.mubr.bf16.vlgmr.msra.gmra.mrb[0].mxu0 %v12972_v36  ;;  %6776 = vmatpush1.bf16.msra.mxu1 %v12976_v38  ;;  %v13142_v36 = vld [vmem:[%s18239_s1 + $0xd8] sm:$0xff]   ;;  %v13049_v38 = vld [vmem:[%s18240_s0 + $0x708] ss:$100 sps:$4 sm:$0xff]  }
  0x43   :  { %8221 = vmatpush1.bf16.msra.mxu0 %v12975_v37  ;;  %6526 = vmatprep.mubr.bf16.mxu1 %v12978_v39  ;;  %v13057_v37 = vld [vmem:[%s18239_s1 + $0x388] sm:$0xff]   ;;  %v13050_v39 = vld [vmem:[%s18240_s0 + $0xf8] ss:$100 sps:$4 sm:$0xff]  }
  0x44   :  { %8222 = vmatprep.subr.bf16.mxu0 %v14338_v0  ;;  %7971 = vmatprep.mubr.bf16.mxu0 %v12980_v40  ;;  %v13051_v40 = vld [vmem:[%s18240_s0 + $0x7d4] ss:$100 sps:$4 sm:$0xff]  }
  0x45   :  { %6777 = vmatprep.subr.bf16.mxu1 %v14338_v0 }
  0x46   :  { %6778 = vmatpush1.bf16.msra.mxu1 %v12993_v41  ;;  %v13053_v41 = vld [vmem:[%s18240_s0 + $0x1c4] ss:$100 sps:$4 sm:$0xff]  }
  0x47   :  { %8223 = vmatpush1.bf16.msra.mxu0 %v12977_v42  ;;  %6779 = vmatprep.subr.bf16.mxu1 %v14338_v0  ;;  %v13071_v42 = vld [vmem:[%s18239_s1 + $0x390] sm:$0xff]  }
  0x48   :  { %8224 = vmatprep.subr.bf16.mxu0 %v14338_v0 }
  0x49   :  { %6527 = vmatmul.mubr.bf16.gmra.mrb[4].mxu1 %v12982_v43  ;;  %v13156_v43 = vld [vmem:[%s18239_s1 + $0xe0] sm:$0xff]  }
  0x4a   :  { %7972 = vmatmul.mubr.bf16.gmra.mrb[4].mxu0 %v12983_v44  ;;  %6534 = vmatprep.mubr.bf16.mxu1 %v12986_v46  ;;  %v13055_v44 = vld [vmem:[%s18240_s0 + $0x7d0] ss:$100 sps:$4 sm:$0xff]   ;;  %v13056_v46 = vld [vmem:[%s18240_s0 + $0x1c0] ss:$100 sps:$4 sm:$0xff]  }
  0x4b   :  { %8225 = vmatpush1.bf16.msra.mxu0 %v12984_v45  ;;  %7979 = vmatprep.mubr.bf16.mxu0 %v12988_v47  ;;  %v13085_v45 = vld [vmem:[%s18239_s1 + $0x398] sm:$0xff]  }
  0x4c   :  { %8226 = vmatprep.subr.bf16.mxu0 %v14338_v0  ;;  %6780 = vmatpush1.bf16.msra.mxu1 %v13010_v48  ;;  %v13059_v47 = vld [vmem:[%s18240_s0 + $0x89c] ss:$100 sps:$4 sm:$0xff]   ;;  %v13061_v48 = vld [vmem:[%s18240_s0 + $0x28c] ss:$100 sps:$4 sm:$0xff]  }
  0x4d   :  { %6781 = vmatprep.subr.bf16.mxu1 %v14338_v0 }
  0x4f   :  { %8227 = vmatpush1.bf16.msra.mxu0 %v12985_v49  ;;  %v13099_v49 = vld [vmem:[%s18239_s1 + $0x3a0] sm:$0xff]  }
  0x50   :  { %8228 = vmatprep.subr.bf16.mxu0 %v14338_v0  ;;  %6782 = vmatpush1.bf16.msra.mxu1 %v13027_v52  ;;  %v13113_v52 = vld [vmem:[%s18239_s1 + $0x3a8] sm:$0xff]  }
  0x51   :  { %6535 = vmatmul.mubr.bf16.gmra.mrb[8].mxu1 %v12990_v50  ;;  %6783 = vmatprep.subr.bf16.mxu1 %v14338_v0  ;;  %v13170_v50 = vld [vmem:[%s18239_s1 + $0xe8] sm:$0xff]  }
  0x52   :  { %7980 = vmatmul.mubr.bf16.gmra.mrb[8].mxu0 %v12991_v51  ;;  %6542 = vmatprep.mubr.bf16.mxu1 %v12995_v54  ;;  %v13063_v51 = vld [vmem:[%s18240_s0 + $0x898] ss:$100 sps:$4 sm:$0xff]   ;;  %v13065_v54 = vld [vmem:[%s18240_s0 + $0x964] ss:$100 sps:$4 sm:$0xff]  }
  0x53   :  { %8229 = vmatpush1.bf16.msra.mxu0 %v12992_v53  ;;  %7987 = vmatprep.mubr.bf16.mxu0 %v12997_v55  ;;  %v13064_v53 = vld [vmem:[%s18240_s0 + $0x288] ss:$100 sps:$4 sm:$0xff]   ;;  %v13067_v55 = vld [vmem:[%s18240_s0 + $0x354] ss:$100 sps:$4 sm:$0xff]  }
  0x54   :  { %8230 = vmatprep.subr.bf16.mxu0 %v14338_v0  ;;  %6784 = vmatpush1.bf16.msra.mxu1 %v13044_v56  ;;  %v13127_v56 = vld [vmem:[%s18239_s1 + $0x3b0] sm:$0xff]  }
  0x55   :  { %6785 = vmatprep.subr.bf16.mxu1 %v14338_v0 }
  0x57   :  { %8231 = vmatpush1.bf16.msra.mxu0 %v12994_v57  ;;  %v13069_v57 = vld [vmem:[%s18240_s0 + $0x960] ss:$100 sps:$4 sm:$0xff]  }
  0x58   :  { %8232 = vmatprep.subr.bf16.mxu0 %v14338_v0  ;;  %6786 = vmatpush1.bf16.msra.mxu1 %v13058_v60  ;;  %v13073_v60 = vld [vmem:[%s18240_s0 + $0xa2c] ss:$100 sps:$4 sm:$0xff]  }
  0x59   :  { %6543 = vmatmul.mubr.bf16.gmra.mrb[12].mxu1 %v12999_v58  ;;  %6787 = vmatprep.subr.bf16.mxu1 %v14338_v0  ;;  %v13141_v58 = vld [vmem:[%s18239_s1 + $0x3b8] sm:$0xff]  }
  0x5a   :  { %7988 = vmatmul.mubr.bf16.gmra.mrb[12].mxu0 %v13000_v59  ;;  %6550 = vmatprep.mubr.bf16.mxu1 %v13003_v61  ;;  %v13070_v59 = vld [vmem:[%s18240_s0 + $0x350] ss:$100 sps:$4 sm:$0xff]   ;;  %v13075_v61 = vld [vmem:[%s18240_s0 + $0x41c] ss:$100 sps:$4 sm:$0xff]  }
  0x5b   :  { %8233 = vmatpush1.bf16.msra.mxu0 %v13001_v62  ;;  %7995 = vmatprep.mubr.bf16.mxu0 %v13005_v63  ;;  %v13155_v62 = vld [vmem:[%s18239_s1 + $0x3c0] sm:$0xff]   ;;  %v13184_v63 = vld [vmem:[%s18239_s1 + $0xf0] sm:$0xff]  }
  0x5c   :  { %8234 = vmatprep.subr.bf16.mxu0 %v14338_v0  ;;  %6788 = vmatpush1.bf16.msra.mxu1 %v13072_v3  ;;  %v13078_v3 = vld [vmem:[%s18240_s0 + $0x418] ss:$100 sps:$4 sm:$0xff]  }
  0x5d   :  { %6789 = vmatprep.subr.bf16.mxu1 %v14338_v0 }
  0x5f   :  { %8235 = vmatpush1.bf16.msra.mxu0 %v13002_v1  ;;  %v13077_v1 = vld [vmem:[%s18240_s0 + $0xa28] ss:$100 sps:$4 sm:$0xff]  }
  0x60   :  { %8236 = vmatprep.subr.bf16.mxu0 %v14338_v0  ;;  %6790 = vmatpush1.bf16.msra.mxu1 %v13086_v9  ;;  %v13087_v9 = vld [vmem:[%s18240_s0 + $0xbbc] ss:$100 sps:$4 sm:$0xff]  }
  0x61   :  { %6551 = vmatmul.mubr.bf16.gmra.mrb[16].mxu1 %v13007_v2  ;;  %6791 = vmatprep.subr.bf16.mxu1 %v14338_v0  ;;  %v13169_v2 = vld [vmem:[%s18239_s1 + $0x3c8] sm:$0xff]  }
  0x62   :  { %7996 = vmatmul.mubr.bf16.gmra.mrb[16].mxu0 %v13008_v4  ;;  %6558 = vmatprep.mubr.bf16.mxu1 %v13012_v6  ;;  %v13079_v4 = vld [vmem:[%s18240_s0 + $0xaf4] ss:$100 sps:$4 sm:$0xff]  }
  0x63   :  { %8237 = vmatpush1.bf16.msra.mxu0 %v13009_v5  ;;  %8003 = vmatprep.mubr.bf16.mxu0 %v13014_v7  ;;  %v13081_v5 = vld [vmem:[%s18240_s0 + $0x4e4] ss:$100 sps:$4 sm:$0xff]   ;;  %v13183_v6 = vld [vmem:[%s18239_s1 + $0x3d0] sm:$0xff]  }
  0x64   :  { %8238 = vmatprep.subr.bf16.mxu0 %v14338_v0  ;;  %6792 = vmatpush1.bf16.msra.mxu1 %v13100_v16  ;;  %v13083_v7 = vld [vmem:[%s18240_s0 + $0xaf0] ss:$100 sps:$4 sm:$0xff]  }
  0x65   :  { %6793 = vmatprep.subr.bf16.mxu1 %v14338_v0  ;;  %v13095_v16 = vld [vmem:[%s18240_s0 + $0x674] ss:$100 sps:$4 sm:$0xff]  }
  0x67   :  { %8239 = vmatpush1.bf16.msra.mxu0 %v13011_v8  ;;  %v13084_v8 = vld [vmem:[%s18240_s0 + $0x4e0] ss:$100 sps:$4 sm:$0xff]  }
  0x68   :  { %8240 = vmatprep.subr.bf16.mxu0 %v14338_v0  ;;  %6794 = vmatpush1.bf16.msra.mxu1 %v13114_v22  ;;  %v13105_v22 = vld [vmem:[%s18240_s0 + $0xd48] ss:$100 sps:$4 sm:$0xff]  }
  0x69   :  { %6559 = vmatmul.mubr.bf16.gmra.mrb[20].mxu1 %v13016_v10  ;;  %6795 = vmatprep.subr.bf16.mxu1 %v14338_v0  ;;  %v13089_v10 = vld [vmem:[%s18240_s0 + $0x5ac] ss:$100 sps:$4 sm:$0xff]  }
  0x6a   :  { %8004 = vmatmul.mubr.bf16.gmra.mrb[20].mxu0 %v13017_v11  ;;  %6566 = vmatprep.mubr.bf16.mxu1 %v13020_v13  ;;  %v13197_v11 = vld [vmem:[%s18239_s1 + $0x3d8] sm:$0xff]  }
  0x6b   :  { %8241 = vmatpush1.bf16.msra.mxu0 %v13018_v12  ;;  %8011 = vmatprep.mubr.bf16.mxu0 %v13022_v14  ;;  %v13198_v12 = vld [vmem:[%s18239_s1 + $0xf8] sm:$0xff]   ;;  %v13092_v14 = vld [vmem:[%s18240_s0 + $0x5a8] ss:$100 sps:$4 sm:$0xff]  }
  0x6c   :  { %8242 = vmatprep.subr.bf16.mxu0 %v14338_v0  ;;  %6796 = vmatpush1.bf16.msra.mxu1 %v13128_v29  ;;  %v13091_v13 = vld [vmem:[%s18240_s0 + $0xbb8] ss:$100 sps:$4 sm:$0xff]   ;;  %v13117_v29 = vld [vmem:[%s18240_s0 + $0x8cc] ss:$100 sps:$4 sm:$0xff]  }
  0x6d   :  { %6797 = vmatprep.subr.bf16.mxu1 %v14338_v0 }
  0x6f   :  { %8243 = vmatpush1.bf16.msra.mxu0 %v13019_v15  ;;  %v13093_v15 = vld [vmem:[%s18240_s0 + $0xc84] ss:$100 sps:$4 sm:$0xff]  }
  0x70   :  { %8244 = vmatprep.subr.bf16.mxu0 %v14338_v0  ;;  %6798 = vmatpush1.bf16.msra.mxu1 %v13142_v36  ;;  %v13126_v36 = vld [vmem:[%s18240_s0 + $0x990] ss:$100 sps:$4 sm:$0xff]  }
  0x71   :  { %6567 = vmatmul.mubr.bf16.gmra.mrb[24].mxu1 %v13024_v17  ;;  %6799 = vmatprep.subr.bf16.mxu1 %v14338_v0  ;;  %v13097_v17 = vld [vmem:[%s18240_s0 + $0xc80] ss:$100 sps:$4 sm:$0xff]  }
  0x72   :  { %8012 = vmatmul.mubr.bf16.gmra.mrb[24].mxu0 %v13025_v18  ;;  %6574 = vmatprep.mubr.bf16.mxu1 %v13029_v20  ;;  %v13098_v18 = vld [vmem:[%s18240_s0 + $0x670] ss:$100 sps:$4 sm:$0xff]   ;;  %v13103_v20 = vld [vmem:[%s18240_s0 + $0x73c] ss:$100 sps:$4 sm:$0xff]  }
  0x73   :  { %8245 = vmatpush1.bf16.msra.mxu0 %v13026_v19  ;;  %8019 = vmatprep.mubr.bf16.mxu0 %v13031_v21  ;;  %v13101_v19 = vld [vmem:[%s18240_s0 + $0xd4c] ss:$100 sps:$4 sm:$0xff]   ;;  %v13211_v21 = vld [vmem:[%s18239_s1 + $0x3e0] sm:$0xff]  }
  0x74   :  { %8246 = vmatprep.subr.bf16.mxu0 %v14338_v0  ;;  %6800 = vmatpush1.bf16.msra.mxu1 %v13156_v43  ;;  %v13137_v43 = vld [vmem:[%s18240_s0 + $0xb24] ss:$100 sps:$4 sm:$0xff]  }
  0x75   :  { %6801 = vmatprep.subr.bf16.mxu1 %v14338_v0 }
  0x77   :  { %8247 = vmatpush1.bf16.msra.mxu0 %v13028_v23  ;;  %v13106_v23 = vld [vmem:[%s18240_s0 + $0x738] ss:$100 sps:$4 sm:$0xff]  }
  0x78   :  { %8248 = vmatprep.subr.bf16.mxu0 %v14338_v0  ;;  %6802 = vmatpush1.bf16.msra.mxu1 %v13170_v50  ;;  %v13148_v50 = vld [vmem:[%s18240_s0 + $0xbe8] ss:$100 sps:$4 sm:$0xff]  }
  0x79   :  { %6575 = vmatmul.mubr.bf16.gmra.mrb[28].mxu1 %v13033_v24  ;;  %6803 = vmatprep.subr.bf16.mxu1 %v14338_v0  ;;  %v13107_v24 = vld [vmem:[%s18240_s0 + $0xe14] ss:$100 sps:$4 sm:$0xff]  }
  0x7a   :  { %8020 = vmatmul.mubr.bf16.gmra.mrb[28].mxu0 %v13034_v25  ;;  %6582 = vmatprep.mubr.bf16.mxu1 %v13037_v26  ;;  %v13109_v25 = vld [vmem:[%s18240_s0 + $0x804] ss:$100 sps:$4 sm:$0xff]   ;;  %v13111_v26 = vld [vmem:[%s18240_s0 + $0xe10] ss:$100 sps:$4 sm:$0xff]  }
  0x7b   :  { %8249 = vmatpush1.bf16.msra.mxu0 %v13035_v27  ;;  %8252 = vmatprep.mubr.bf16.mxu0 %v13041_v28  ;;  %v13112_v27 = vld [vmem:[%s18240_s0 + $0x800] ss:$100 sps:$4 sm:$0xff]  }
  0x7c   :  { %8250 = vmatprep.subr.bf16.mxu0 %v14338_v0  ;;  %6804 = vmatpush1.bf16.msra.mxu1 %v13184_v63  ;;  %v13115_v28 = vld [vmem:[%s18240_s0 + $0xedc] ss:$100 sps:$4 sm:$0xff]  }
  0x7d   :  { %6805 = vmatprep.subr.bf16.mxu1 %v14338_v0  ;;  %v13171_v63 = vld [vmem:[%s18240_s0 + $0x151c] ss:$100 sps:$4 sm:$0xff]  }
  0x7f   :  { %8251 = vmatpush1.bf16.msra.mxu0 %v13036_v30  ;;  %v13225_v30 = vld [vmem:[%s18239_s1 + $0x3e8] sm:$0xff]  }
  0x80   :  { %8509 = vmatprep.subr.bf16.mxu0 %v14338_v0  ;;  %6806 = vmatpush1.bf16.msra.mxu1 %v13198_v12  ;;  %v13191_v12 = vld [vmem:[%s18240_s0 + $0x1774] ss:$100 sps:$4 sm:$0xff]  }
  0x81   :  { %6583 = vmatmul.mubr.bf16.gmra.mrb[32].mxu1 %v13042_v32  ;;  %7064 = vmatprep.subr.bf16.mxu1 %v14338_v0  ;;  %v13120_v32 = vld [vmem:[%s18240_s0 + $0x8c8] ss:$100 sps:$4 sm:$0xff]  }
  0x82   :  { %8253 = vmatmul.mubr.bf16.vlgmr.msra.gmra.mrb[0].mxu0 %v13039_v31  ;;  %6590 = vmatprep.mubr.bf16.mxu1 %v13045_v34  ;;  %v13119_v31 = vld [vmem:[%s18240_s0 + $0xed8] ss:$100 sps:$4 sm:$0xff]  }
  0x83   :  { %8510 = vmatpush1.bf16.msra.mxu0 %v13043_v33  ;;  %8260 = vmatprep.mubr.bf16.mxu0 %v13047_v35  ;;  %v13121_v33 = vld [vmem:[%s18240_s0 + $0xfa4] ss:$100 sps:$4 sm:$0xff]   ;;  %v13123_v34 = vld [vmem:[%s18240_s0 + $0x994] ss:$100 sps:$4 sm:$0xff]  }
  0x84   :  { %8511 = vmatprep.subr.bf16.mxu0 %v14338_v0  ;;  %v13125_v35 = vld [vmem:[%s18240_s0 + $0xfa0] ss:$100 sps:$4 sm:$0xff]  }
  0x87   :  { %8512 = vmatpush1.bf16.msra.mxu0 %v13057_v37  ;;  %v13129_v37 = vld [vmem:[%s18240_s0 + $0x106c] ss:$100 sps:$4 sm:$0xff]  }
  0x88   :  { %8513 = vmatprep.subr.bf16.mxu0 %v14338_v0 }
  0x89   :  { %6591 = vmatmul.mubr.bf16.gmra.mrb[36].mxu1 %v13049_v38  ;;  %v13131_v38 = vld [vmem:[%s18240_s0 + $0xa5c] ss:$100 sps:$4 sm:$0xff]  }
  0x8a   :  { %8261 = vmatmul.mubr.bf16.gmra.mrb[4].mxu0 %v13050_v39  ;;  %6598 = vmatprep.mubr.bf16.mxu1 %v13051_v40  ;;  %v13239_v39 = vld [vmem:[%s18239_s1 + $0x3f0] sm:$0xff]   ;;  %v13133_v40 = vld [vmem:[%s18240_s0 + $0x1068] ss:$100 sps:$4 sm:$0xff]  }
  0x8b   :  { %8268 = vmatprep.mubr.bf16.mxu0 %v13053_v41  ;;  %8514 = vmatpush1.bf16.msra.mxu0 %v13071_v42  ;;  %v13134_v41 = vld [vmem:[%s18240_s0 + $0xa58] ss:$100 sps:$4 sm:$0xff]  }
  0x8c   :  { %8515 = vmatprep.subr.bf16.mxu0 %v14338_v0  ;;  %v13135_v42 = vld [vmem:[%s18240_s0 + $0x1134] ss:$100 sps:$4 sm:$0xff]  }
  0x8f   :  { %8516 = vmatpush1.bf16.msra.mxu0 %v13085_v45  ;;  %v13140_v45 = vld [vmem:[%s18240_s0 + $0xb20] ss:$100 sps:$4 sm:$0xff]  }
  0x90   :  { %8517 = vmatprep.subr.bf16.mxu0 %v14338_v0 }
  0x91   :  { %6599 = vmatmul.mubr.bf16.gmra.mrb[40].mxu1 %v13055_v44  ;;  %v13139_v44 = vld [vmem:[%s18240_s0 + $0x1130] ss:$100 sps:$4 sm:$0xff]  }
  0x92   :  { %8269 = vmatmul.mubr.bf16.gmra.mrb[8].mxu0 %v13056_v46  ;;  %6606 = vmatprep.mubr.bf16.mxu1 %v13059_v47  ;;  %v13143_v46 = vld [vmem:[%s18240_s0 + $0x11fc] ss:$100 sps:$4 sm:$0xff]   ;;  %v13145_v47 = vld [vmem:[%s18240_s0 + $0xbec] ss:$100 sps:$4 sm:$0xff]  }
  0x93   :  { %8276 = vmatprep.mubr.bf16.mxu0 %v13061_v48  ;;  %8518 = vmatpush1.bf16.msra.mxu0 %v13099_v49  ;;  %v13253_v48 = vld [vmem:[%s18239_s1 + $0x3f8] sm:$0xff]  }
  0x94   :  { %8519 = vmatprep.subr.bf16.mxu0 %v14338_v0  ;;  %v13147_v49 = vld [vmem:[%s18240_s0 + $0x11f8] ss:$100 sps:$4 sm:$0xff]  }
  0x97   :  { %8520 = vmatpush1.bf16.msra.mxu0 %v13113_v52  ;;  %v13151_v52 = vld [vmem:[%s18240_s0 + $0xcb4] ss:$100 sps:$4 sm:$0xff]  }
  0x98   :  { %8521 = vmatprep.subr.bf16.mxu0 %v14338_v0 }
  0x99   :  { %6607 = vmatmul.mubr.bf16.gmra.mrb[44].mxu1 %v13063_v51  ;;  %v13149_v51 = vld [vmem:[%s18240_s0 + $0x12c4] ss:$100 sps:$4 sm:$0xff]  }
  0x9a   :  { %8277 = vmatmul.mubr.bf16.gmra.mrb[12].mxu0 %v13064_v53  ;;  %6614 = vmatprep.mubr.bf16.mxu1 %v13065_v54  ;;  %v13153_v53 = vld [vmem:[%s18240_s0 + $0x12c0] ss:$100 sps:$4 sm:$0xff]   ;;  %v13154_v54 = vld [vmem:[%s18240_s0 + $0xcb0] ss:$100 sps:$4 sm:$0xff]  }
  0x9b   :  { %8284 = vmatprep.mubr.bf16.mxu0 %v13067_v55  ;;  %8522 = vmatpush1.bf16.msra.mxu0 %v13127_v56  ;;  %v13157_v55 = vld [vmem:[%s18240_s0 + $0x138c] ss:$100 sps:$4 sm:$0xff]   ;;  %v13159_v56 = vld [vmem:[%s18240_s0 + $0xd7c] ss:$100 sps:$4 sm:$0xff]  }
  0x9c   :  { %8523 = vmatprep.subr.bf16.mxu0 %v14338_v0 }
  0x9f   :  { %8524 = vmatpush1.bf16.msra.mxu0 %v13141_v58  ;;  %v13162_v58 = vld [vmem:[%s18240_s0 + $0xd78] ss:$100 sps:$4 sm:$0xff]  }
  0xa0   :  { %8525 = vmatprep.subr.bf16.mxu0 %v14338_v0 }
  0xa1   :  { %6615 = vmatmul.mubr.bf16.gmra.mrb[48].mxu1 %v13069_v57  ;;  %v13161_v57 = vld [vmem:[%s18240_s0 + $0x1388] ss:$100 sps:$4 sm:$0xff]  }
  0xa2   :  { %8285 = vmatmul.mubr.bf16.gmra.mrb[16].mxu0 %v13070_v59  ;;  %6622 = vmatprep.mubr.bf16.mxu1 %v13073_v60  ;;  %v13163_v59 = vld [vmem:[%s18240_s0 + $0x1454] ss:$100 sps:$4 sm:$0xff]   ;;  %v13165_v60 = vld [vmem:[%s18240_s0 + $0xe44] ss:$100 sps:$4 sm:$0xff]  }
  0xa3   :  { %8292 = vmatprep.mubr.bf16.mxu0 %v13075_v61  ;;  %8526 = vmatpush1.bf16.msra.mxu0 %v13155_v62  ;;  %v13167_v61 = vld [vmem:[%s18240_s0 + $0x1450] ss:$100 sps:$4 sm:$0xff]   ;;  %v13168_v62 = vld [vmem:[%s18240_s0 + $0xe40] ss:$100 sps:$4 sm:$0xff]  }
  0xa4   :  { %8527 = vmatprep.subr.bf16.mxu0 %v14338_v0 }
  0xa7   :  { %8528 = vmatpush1.bf16.msra.mxu0 %v13169_v2  ;;  %v13175_v2 = vld [vmem:[%s18240_s0 + $0x1518] ss:$100 sps:$4 sm:$0xff]  }
  0xa8   :  { %8529 = vmatprep.subr.bf16.mxu0 %v14338_v0 }
  0xa9   :  { %6623 = vmatmul.mubr.bf16.gmra.mrb[52].mxu1 %v13077_v1  ;;  %v13173_v1 = vld [vmem:[%s18240_s0 + $0xf0c] ss:$100 sps:$4 sm:$0xff]  }
  0xaa   :  { %8293 = vmatmul.mubr.bf16.gmra.mrb[20].mxu0 %v13078_v3  ;;  %6630 = vmatprep.mubr.bf16.mxu1 %v13079_v4  ;;  %v13176_v3 = vld [vmem:[%s18240_s0 + $0xf08] ss:$100 sps:$4 sm:$0xff]  }
  0xab   :  { %8300 = vmatprep.mubr.bf16.mxu0 %v13081_v5  ;;  %8530 = vmatpush1.bf16.msra.mxu0 %v13183_v6  ;;  %v13177_v4 = vld [vmem:[%s18240_s0 + $0x15e4] ss:$100 sps:$4 sm:$0xff]   ;;  %v13179_v5 = vld [vmem:[%s18240_s0 + $0xfd4] ss:$100 sps:$4 sm:$0xff]  }
  0xac   :  { %8531 = vmatprep.subr.bf16.mxu0 %v14338_v0  ;;  %v13181_v6 = vld [vmem:[%s18240_s0 + $0x15e0] ss:$100 sps:$4 sm:$0xff]  }
  0xaf   :  { %8532 = vmatpush1.bf16.msra.mxu0 %v13197_v11  ;;  %v13190_v11 = vld [vmem:[%s18240_s0 + $0x1098] ss:$100 sps:$4 sm:$0xff]  }
  0xb0   :  { %8533 = vmatprep.subr.bf16.mxu0 %v14338_v0 }
  0xb1   :  { %6631 = vmatmul.mubr.bf16.gmra.mrb[56].mxu1 %v13083_v7  ;;  %v13182_v7 = vld [vmem:[%s18240_s0 + $0xfd0] ss:$100 sps:$4 sm:$0xff]  }
  0xb2   :  { %8301 = vmatmul.mubr.bf16.gmra.mrb[24].mxu0 %v13084_v8  ;;  %6638 = vmatprep.mubr.bf16.mxu1 %v13087_v9  ;;  %v13185_v8 = vld [vmem:[%s18240_s0 + $0x16ac] ss:$100 sps:$4 sm:$0xff]   ;;  %v13187_v9 = vld [vmem:[%s18240_s0 + $0x109c] ss:$100 sps:$4 sm:$0xff]  }
  0xb3   :  { %8308 = vmatprep.mubr.bf16.mxu0 %v13089_v10  ;;  %8534 = vmatpush1.bf16.msra.mxu0 %v13211_v21  ;;  %v13189_v10 = vld [vmem:[%s18240_s0 + $0x16a8] ss:$100 sps:$4 sm:$0xff]   ;;  %v13208_v21 = vld [vmem:[%s18240_s0 + $0x12f4] ss:$100 sps:$4 sm:$0xff]  }
  0xb4   :  { %8535 = vmatprep.subr.bf16.mxu0 %v14338_v0 }
  0xb7   :  { %8536 = vmatpush1.bf16.msra.mxu0 %v13225_v30  ;;  %v13219_v30 = vld [vmem:[%s18240_s0 + $0x19c] ss:$100 sps:$4 sm:$0xff]  }
  0xb8   :  { %8537 = vmatprep.subr.bf16.mxu0 %v14338_v0 }
  0xb9   :  { %6639 = vmatmul.mubr.bf16.gmra.mrb[60].mxu1 %v13091_v13  ;;  %v13193_v13 = vld [vmem:[%s18240_s0 + $0x1164] ss:$100 sps:$4 sm:$0xff]  }
  0xba   :  { %8309 = vmatmul.mubr.bf16.gmra.mrb[28].mxu0 %v13092_v14  ;;  %6646 = vmatprep.mubr.bf16.mxu1 %v13093_v15  ;;  %v13195_v14 = vld [vmem:[%s18240_s0 + $0x1770] ss:$100 sps:$4 sm:$0xff]   ;;  %v13196_v15 = vld [vmem:[%s18240_s0 + $0x1160] ss:$100 sps:$4 sm:$0xff]  }
  0xbb   :  { %8316 = vmatprep.mubr.bf16.mxu0 %v13095_v16  ;;  %8538 = vmatpush1.bf16.msra.mxu0 %v13239_v39  ;;  %v13199_v16 = vld [vmem:[%s18240_s0 + $0x183c] ss:$100 sps:$4 sm:$0xff]  }
  0xbc   :  { %8539 = vmatprep.subr.bf16.mxu0 %v14338_v0  ;;  %v13231_v39 = vld [vmem:[%s18240_s0 + $0x260] ss:$100 sps:$4 sm:$0xff]  }
  0xbf   :  { %8540 = vmatpush1.bf16.msra.mxu0 %v13253_v48  ;;  %v13241_v48 = vld [vmem:[%s18240_s0 + $0x3f4] ss:$100 sps:$4 sm:$0xff]  }
  0xc0   :  { %8798 = vmatprep.subr.bf16.mxu0 %v14338_v0 }
  0xc1   :  { %6647 = vmatmul.mubr.bf16.gmra.mrb[64].mxu1 %v13097_v17  ;;  %v13201_v17 = vld [vmem:[%s18240_s0 + $0x122c] ss:$100 sps:$4 sm:$0xff]  }
  0xc2   :  { %8317 = vmatmul.mubr.bf16.gmra.mrb[32].mxu0 %v13098_v18  ;;  %6654 = vmatprep.mubr.bf16.mxu1 %v13101_v19  ;;  %v13203_v18 = vld [vmem:[%s18240_s0 + $0x1838] ss:$100 sps:$4 sm:$0xff]   ;;  %v13204_v19 = vld [vmem:[%s18240_s0 + $0x1228] ss:$100 sps:$4 sm:$0xff]  }
  0xc3   :  { %8324 = vmatprep.mubr.bf16.mxu0 %v13103_v20  ;;  %v13207_v20 = vld [vmem:[%s18240_s0 + $0xc] ss:$100 sps:$4 sm:$0xff]  }
  0xc9   :  { %6655 = vmatmul.mubr.bf16.gmra.mrb[68].mxu1 %v13105_v22  ;;  %v13205_v22 = vld [vmem:[%s18240_s0 + $0x8] ss:$100 sps:$4 sm:$0xff]  }
  0xca   :  { %8325 = vmatmul.mubr.bf16.gmra.mrb[36].mxu0 %v13106_v23  ;;  %6662 = vmatprep.mubr.bf16.mxu1 %v13107_v24  ;;  %v13210_v23 = vld [vmem:[%s18240_s0 + $0x12f0] ss:$100 sps:$4 sm:$0xff]   ;;  %v13212_v24 = vld [vmem:[%s18239_s1 + $0x100] sm:$0xff]  }
  0xcb   :  { %8332 = vmatprep.mubr.bf16.mxu0 %v13109_v25  ;;  %v13213_v25 = vld [vmem:[%s18240_s0 + $0xd4] ss:$100 sps:$4 sm:$0xff]  }
  0xd1   :  { %6663 = vmatmul.mubr.bf16.gmra.mrb[72].mxu1 %v13111_v26  ;;  %v13215_v26 = vld [vmem:[%s18240_s0 + $0x13bc] ss:$100 sps:$4 sm:$0xff]  }
  0xd2   :  { %8333 = vmatmul.mubr.bf16.gmra.mrb[40].mxu0 %v13112_v27  ;;  %6670 = vmatprep.mubr.bf16.mxu1 %v13115_v28  ;;  %v13226_v27 = vld [vmem:[%s18239_s1 + $0x108] sm:$0xff]   ;;  %v13217_v28 = vld [vmem:[%s18240_s0 + $0xd0] ss:$100 sps:$4 sm:$0xff]  }
  0xd3   :  { %8340 = vmatprep.mubr.bf16.mxu0 %v13117_v29  ;;  %v13218_v29 = vld [vmem:[%s18240_s0 + $0x13b8] ss:$100 sps:$4 sm:$0xff]  }
  0xd9   :  { %6671 = vmatmul.mubr.bf16.gmra.mrb[76].mxu1 %v13119_v31  ;;  %v13221_v31 = vld [vmem:[%s18240_s0 + $0x1484] ss:$100 sps:$4 sm:$0xff]  }
  0xda   :  { %8341 = vmatmul.mubr.bf16.gmra.mrb[44].mxu0 %v13120_v32  ;;  %6678 = vmatprep.mubr.bf16.mxu1 %v13121_v33  ;;  %v13240_v32 = vld [vmem:[%s18239_s1 + $0x110] sm:$0xff]   ;;  %v13223_v33 = vld [vmem:[%s18240_s0 + $0x198] ss:$100 sps:$4 sm:$0xff]  }
  0xdb   :  { %8348 = vmatprep.mubr.bf16.mxu0 %v13123_v34  ;;  %v13254_v34 = vld [vmem:[%s18239_s1 + $0x118] sm:$0xff]  }
  0xe1   :  { %6679 = vmatmul.mubr.bf16.gmra.mrb[80].mxu1 %v13125_v35  ;;  %v13224_v35 = vld [vmem:[%s18240_s0 + $0x1480] ss:$100 sps:$4 sm:$0xff]  }
  0xe2   :  { %8349 = vmatmul.mubr.bf16.gmra.mrb[48].mxu0 %v13126_v36  ;;  %6686 = vmatprep.mubr.bf16.mxu1 %v13129_v37  ;;  %v13227_v36 = vld [vmem:[%s18240_s0 + $0x264] ss:$100 sps:$4 sm:$0xff]   ;;  %v13229_v37 = vld [vmem:[%s18240_s0 + $0x154c] ss:$100 sps:$4 sm:$0xff]  }
  0xe3   :  { %8356 = vmatprep.mubr.bf16.mxu0 %v13131_v38  ;;  %v13268_v38 = vld [vmem:[%s18239_s1 + $0x120] sm:$0xff]  }
  0xe9   :  { %6687 = vmatmul.mubr.bf16.gmra.mrb[84].mxu1 %v13133_v40  ;;  %v13282_v40 = vld [vmem:[%s18239_s1 + $0x128] sm:$0xff]  }
  0xea   :  { %8357 = vmatmul.mubr.bf16.gmra.mrb[52].mxu0 %v13134_v41  ;;  %6694 = vmatprep.mubr.bf16.mxu1 %v13135_v42  ;;  %v13232_v41 = vld [vmem:[%s18240_s0 + $0x1548] ss:$100 sps:$4 sm:$0xff]  }
  0xeb   :  { %8364 = vmatprep.mubr.bf16.mxu0 %v13137_v43  ;;  %v13233_v42 = vld [vmem:[%s18240_s0 + $0x32c] ss:$100 sps:$4 sm:$0xff]   ;;  %v13235_v43 = vld [vmem:[%s18240_s0 + $0x1614] ss:$100 sps:$4 sm:$0xff]  }
  0xf1   :  { %6695 = vmatmul.mubr.bf16.gmra.mrb[88].mxu1 %v13139_v44  ;;  %v13296_v44 = vld [vmem:[%s18239_s1 + $0x130] sm:$0xff]  }
  0xf2   :  { %8365 = vmatmul.mubr.bf16.gmra.mrb[56].mxu0 %v13140_v45  ;;  %6702 = vmatprep.mubr.bf16.mxu1 %v13143_v46  ;;  %v13237_v45 = vld [vmem:[%s18240_s0 + $0x328] ss:$100 sps:$4 sm:$0xff]   ;;  %v13310_v46 = vld [vmem:[%s18239_s1 + $0x138] sm:$0xff]  }
  0xf3   :  { %8372 = vmatprep.mubr.bf16.mxu0 %v13145_v47  ;;  %v13238_v47 = vld [vmem:[%s18240_s0 + $0x1610] ss:$100 sps:$4 sm:$0xff]  }
  0xf9   :  { %6703 = vmatmul.mubr.bf16.gmra.mrb[92].mxu1 %v13147_v49  ;;  %v13243_v49 = vld [vmem:[%s18240_s0 + $0x16dc] ss:$100 sps:$4 sm:$0xff]  }
  0xfa   :  { %8373 = vmatmul.mubr.bf16.gmra.mrb[60].mxu0 %v13148_v50  ;;  %6710 = vmatprep.mubr.bf16.mxu1 %v13149_v51  ;;  %v13324_v50 = vld [vmem:[%s18239_s1 + $0x140] sm:$0xff]   ;;  %v13245_v51 = vld [vmem:[%s18240_s0 + $0x3f0] ss:$100 sps:$4 sm:$0xff]  }
  0xfb   :  { %8380 = vmatprep.mubr.bf16.mxu0 %v13151_v52  ;;  %v13338_v52 = vld [vmem:[%s18239_s1 + $0x148] sm:$0xff]  }
 0x101   :  { %6711 = vmatmul.mubr.bf16.gmra.mrb[96].mxu1 %v13153_v53  ;;  %v13246_v53 = vld [vmem:[%s18240_s0 + $0x16d8] ss:$100 sps:$4 sm:$0xff]  }
 0x102   :  { %8381 = vmatmul.mubr.bf16.gmra.mrb[64].mxu0 %v13154_v54  ;;  %6718 = vmatprep.mubr.bf16.mxu1 %v13157_v55  ;;  %v13247_v54 = vld [vmem:[%s18240_s0 + $0x4bc] ss:$100 sps:$4 sm:$0xff]   ;;  %v13249_v55 = vld [vmem:[%s18240_s0 + $0x17a4] ss:$100 sps:$4 sm:$0xff]  }
 0x103   :  { %8388 = vmatprep.mubr.bf16.mxu0 %v13159_v56  ;;  %v13352_v56 = vld [vmem:[%s18239_s1 + $0x150] sm:$0xff]  }
 0x109   :  { %6719 = vmatmul.mubr.bf16.gmra.mrb[100].mxu1 %v13161_v57  ;;  %v13251_v57 = vld [vmem:[%s18240_s0 + $0x4b8] ss:$100 sps:$4 sm:$0xff]  }
 0x10a   :  { %8389 = vmatmul.mubr.bf16.gmra.mrb[68].mxu0 %v13162_v58  ;;  %6726 = vmatprep.mubr.bf16.mxu1 %v13163_v59  ;;  %v13252_v58 = vld [vmem:[%s18240_s0 + $0x17a0] ss:$100 sps:$4 sm:$0xff]  }
 0x10b   :  { %8396 = vmatprep.mubr.bf16.mxu0 %v13165_v60  ;;  %v13255_v59 = vld [vmem:[%s18240_s0 + $0x584] ss:$100 sps:$4 sm:$0xff]   ;;  %v13257_v60 = vld [vmem:[%s18240_s0 + $0x186c] ss:$100 sps:$4 sm:$0xff]  }
 0x111   :  { %6727 = vmatmul.mubr.bf16.gmra.mrb[104].mxu1 %v13167_v61  ;;  %v13366_v61 = vld [vmem:[%s18239_s1 + $0x158] sm:$0xff]  }
 0x112   :  { %8397 = vmatmul.mubr.bf16.gmra.mrb[72].mxu0 %v13168_v62  ;;  %6734 = vmatprep.mubr.bf16.mxu1 %v13171_v63  ;;  %v13259_v62 = vld [vmem:[%s18240_s0 + $0x580] ss:$100 sps:$4 sm:$0xff]   ;;  %v13260_v63 = vld [vmem:[%s18240_s0 + $0x1868] ss:$100 sps:$4 sm:$0xff]  }
 0x113   :  { %8404 = vmatprep.mubr.bf16.mxu0 %v13173_v1  ;;  %v13261_v1 = vld [vmem:[%s18240_s0 + $0x64c] ss:$100 sps:$4 sm:$0xff]  }
 0x119   :  { %6735 = vmatmul.mubr.bf16.gmra.mrb[108].mxu1 %v13175_v2  ;;  %v13265_v2 = vld [vmem:[%s18240_s0 + $0x3c] ss:$100 sps:$4 sm:$0xff]  }
 0x11a   :  { %8405 = vmatmul.mubr.bf16.gmra.mrb[76].mxu0 %v13176_v3  ;;  %6742 = vmatprep.mubr.bf16.mxu1 %v13177_v4  ;;  %v13266_v3 = vld [vmem:[%s18240_s0 + $0x648] ss:$100 sps:$4 sm:$0xff]   ;;  %v13263_v4 = vld [vmem:[%s18240_s0 + $0x38] ss:$100 sps:$4 sm:$0xff]  }
 0x11b   :  { %8412 = vmatprep.mubr.bf16.mxu0 %v13179_v5  ;;  %v13269_v5 = vld [vmem:[%s18240_s0 + $0x714] ss:$100 sps:$4 sm:$0xff]  }
 0x121   :  { %6743 = vmatmul.mubr.bf16.gmra.mrb[112].mxu1 %v13181_v6  ;;  %v13267_v6 = vld [vmem:[%s18239_s1 + $0x400] sm:$0xff]  }
 0x122   :  { %8413 = vmatmul.mubr.bf16.gmra.mrb[80].mxu0 %v13182_v7  ;;  %6750 = vmatprep.mubr.bf16.mxu1 %v13185_v8  ;;  %v13271_v7 = vld [vmem:[%s18240_s0 + $0x104] ss:$100 sps:$4 sm:$0xff]  }
 0x123   :  { %8420 = vmatprep.mubr.bf16.mxu0 %v13187_v9  ;;  %v13380_v8 = vld [vmem:[%s18239_s1 + $0x160] sm:$0xff]   ;;  %v13273_v9 = vld [vmem:[%s18240_s0 + $0x710] ss:$100 sps:$4 sm:$0xff]  }
 0x129   :  { %6751 = vmatmul.mubr.bf16.gmra.mrb[116].mxu1 %v13189_v10  ;;  %v13281_v10 = vld [vmem:[%s18239_s1 + $0x408] sm:$0xff]  }
 0x12a   :  { %8421 = vmatmul.mubr.bf16.gmra.mrb[84].mxu0 %v13190_v11  ;;  %6758 = vmatprep.mubr.bf16.mxu1 %v13191_v12  ;;  %v13274_v11 = vld [vmem:[%s18240_s0 + $0x100] ss:$100 sps:$4 sm:$0xff]  }
 0x12b   :  { %8428 = vmatprep.mubr.bf16.mxu0 %v13193_v13  ;;  %v13275_v12 = vld [vmem:[%s18240_s0 + $0x7dc] ss:$100 sps:$4 sm:$0xff]   ;;  %v13277_v13 = vld [vmem:[%s18240_s0 + $0x1cc] ss:$100 sps:$4 sm:$0xff]  }
 0x131   :  { %6759 = vmatmul.mubr.bf16.gmra.mrb[120].mxu1 %v13195_v14  ;;  %v13295_v14 = vld [vmem:[%s18239_s1 + $0x410] sm:$0xff]  }
 0x132   :  { %8429 = vmatmul.mubr.bf16.gmra.mrb[88].mxu0 %v13196_v15  ;;  %6766 = vmatprep.mubr.bf16.mxu1 %v13199_v16  ;;  %v13279_v15 = vld [vmem:[%s18240_s0 + $0x7d8] ss:$100 sps:$4 sm:$0xff]  }
 0x133   :  { %8436 = vmatprep.mubr.bf16.mxu0 %v13201_v17  ;;  %v13309_v16 = vld [vmem:[%s18239_s1 + $0x418] sm:$0xff]   ;;  %v13280_v17 = vld [vmem:[%s18240_s0 + $0x1c8] ss:$100 sps:$4 sm:$0xff]  }
 0x139   :  { %6767 = vmatmul.mubr.bf16.gmra.mrb[124].mxu1 %v13203_v18  ;;  %v13283_v18 = vld [vmem:[%s18240_s0 + $0x8a4] ss:$100 sps:$4 sm:$0xff]  }
 0x13a   :  { %8437 = vmatmul.mubr.bf16.gmra.mrb[92].mxu0 %v13204_v19  ;;  %6807 = vmatprep.mubr.bf16.mxu1 %v13207_v20  ;;  %v13285_v19 = vld [vmem:[%s18240_s0 + $0x294] ss:$100 sps:$4 sm:$0xff]   ;;  %v13323_v20 = vld [vmem:[%s18239_s1 + $0x420] sm:$0xff]  }
 0x13b   :  { %8444 = vmatprep.mubr.bf16.mxu0 %v13208_v21  ;;  %v13394_v21 = vld [vmem:[%s18239_s1 + $0x168] sm:$0xff]  }
 0x141   :  { %6808 = vmatmul.mubr.bf16.vlgmr.msra.gmra.mrb[0].mxu1 %v13205_v22  ;;  %v13287_v22 = vld [vmem:[%s18240_s0 + $0x8a0] ss:$100 sps:$4 sm:$0xff]  }
 0x142   :  { %8445 = vmatmul.mubr.bf16.gmra.mrb[96].mxu0 %v13210_v23  ;;  %7065 = vmatpush1.bf16.msra.mxu1 %v13212_v24  ;;  %v13337_v23 = vld [vmem:[%s18239_s1 + $0x428] sm:$0xff]   ;;  %v13288_v24 = vld [vmem:[%s18240_s0 + $0x290] ss:$100 sps:$4 sm:$0xff]  }
 0x143   :  { %6815 = vmatprep.mubr.bf16.mxu1 %v13213_v25  ;;  %8452 = vmatprep.mubr.bf16.mxu0 %v13215_v26  ;;  %v13289_v25 = vld [vmem:[%s18240_s0 + $0x96c] ss:$100 sps:$4 sm:$0xff]   ;;  %v13291_v26 = vld [vmem:[%s18240_s0 + $0x35c] ss:$100 sps:$4 sm:$0xff]  }
 0x144   :  { %7066 = vmatprep.subr.bf16.mxu1 %v14338_v0 }
 0x146   :  { %7067 = vmatpush1.bf16.msra.mxu1 %v13226_v27  ;;  %v13351_v27 = vld [vmem:[%s18239_s1 + $0x430] sm:$0xff]  }
 0x147   :  { %7068 = vmatprep.subr.bf16.mxu1 %v14338_v0 }
 0x149   :  { %6816 = vmatmul.mubr.bf16.gmra.mrb[4].mxu1 %v13217_v28  ;;  %v13293_v28 = vld [vmem:[%s18240_s0 + $0x968] ss:$100 sps:$4 sm:$0xff]  }
 0x14a   :  { %8453 = vmatmul.mubr.bf16.gmra.mrb[100].mxu0 %v13218_v29  ;;  %6823 = vmatprep.mubr.bf16.mxu1 %v13219_v30  ;;  %v13365_v29 = vld [vmem:[%s18239_s1 + $0x438] sm:$0xff]  }
 0x14b   :  { %8460 = vmatprep.mubr.bf16.mxu0 %v13221_v31  ;;  %7069 = vmatpush1.bf16.msra.mxu1 %v13240_v32  ;;  %v13294_v30 = vld [vmem:[%s18240_s0 + $0x358] ss:$100 sps:$4 sm:$0xff]   ;;  %v13299_v32 = vld [vmem:[%s18240_s0 + $0x424] ss:$100 sps:$4 sm:$0xff]  }
 0x14c   :  { %7070 = vmatprep.subr.bf16.mxu1 %v14338_v0  ;;  %v13297_v31 = vld [vmem:[%s18240_s0 + $0xa34] ss:$100 sps:$4 sm:$0xff]  }
 0x14f   :  { %7071 = vmatpush1.bf16.msra.mxu1 %v13254_v34  ;;  %v13408_v34 = vld [vmem:[%s18239_s1 + $0x170] sm:$0xff]  }
 0x150   :  { %7072 = vmatprep.subr.bf16.mxu1 %v14338_v0 }
 0x151   :  { %6824 = vmatmul.mubr.bf16.gmra.mrb[8].mxu1 %v13223_v33  ;;  %v13379_v33 = vld [vmem:[%s18239_s1 + $0x440] sm:$0xff]  }
 0x152   :  { %8461 = vmatmul.mubr.bf16.gmra.mrb[104].mxu0 %v13224_v35  ;;  %6831 = vmatprep.mubr.bf16.mxu1 %v13227_v36  ;;  %v13301_v35 = vld [vmem:[%s18240_s0 + $0xa30] ss:$100 sps:$4 sm:$0xff]   ;;  %v13393_v36 = vld [vmem:[%s18239_s1 + $0x448] sm:$0xff]  }
 0x153   :  { %8468 = vmatprep.mubr.bf16.mxu0 %v13229_v37  ;;  %7073 = vmatpush1.bf16.msra.mxu1 %v13268_v38  ;;  %v13302_v37 = vld [vmem:[%s18240_s0 + $0x420] ss:$100 sps:$4 sm:$0xff]  }
 0x154   :  { %7074 = vmatprep.subr.bf16.mxu1 %v14338_v0  ;;  %v13303_v38 = vld [vmem:[%s18240_s0 + $0xafc] ss:$100 sps:$4 sm:$0xff]  }
 0x157   :  { %7075 = vmatpush1.bf16.msra.mxu1 %v13282_v40  ;;  %v13407_v40 = vld [vmem:[%s18239_s1 + $0x450] sm:$0xff]  }
 0x158   :  { %7076 = vmatprep.subr.bf16.mxu1 %v14338_v0 }
 0x159   :  { %6832 = vmatmul.mubr.bf16.gmra.mrb[12].mxu1 %v13231_v39  ;;  %v13305_v39 = vld [vmem:[%s18240_s0 + $0x4ec] ss:$100 sps:$4 sm:$0xff]  }
 0x15a   :  { %8469 = vmatmul.mubr.bf16.gmra.mrb[108].mxu0 %v13232_v41  ;;  %6839 = vmatprep.mubr.bf16.mxu1 %v13233_v42  ;;  %v13307_v41 = vld [vmem:[%s18240_s0 + $0xaf8] ss:$100 sps:$4 sm:$0xff]   ;;  %v13308_v42 = vld [vmem:[%s18240_s0 + $0x4e8] ss:$100 sps:$4 sm:$0xff]  }
 0x15b   :  { %8476 = vmatprep.mubr.bf16.mxu0 %v13235_v43  ;;  %7077 = vmatpush1.bf16.msra.mxu1 %v13296_v44  ;;  %v13311_v43 = vld [vmem:[%s18240_s0 + $0xbc4] ss:$100 sps:$4 sm:$0xff]   ;;  %v13313_v44 = vld [vmem:[%s18240_s0 + $0x5b4] ss:$100 sps:$4 sm:$0xff]  }
 0x15c   :  { %7078 = vmatprep.subr.bf16.mxu1 %v14338_v0 }
 0x15f   :  { %7079 = vmatpush1.bf16.msra.mxu1 %v13310_v46  ;;  %v13422_v46 = vld [vmem:[%s18239_s1 + $0x178] sm:$0xff]  }
 0x160   :  { %7080 = vmatprep.subr.bf16.mxu1 %v14338_v0 }
 0x161   :  { %6840 = vmatmul.mubr.bf16.gmra.mrb[16].mxu1 %v13237_v45  ;;  %v13421_v45 = vld [vmem:[%s18239_s1 + $0x458] sm:$0xff]  }
 0x162   :  { %8477 = vmatmul.mubr.bf16.gmra.mrb[112].mxu0 %v13238_v47  ;;  %6847 = vmatprep.mubr.bf16.mxu1 %v13241_v48  ;;  %v13315_v47 = vld [vmem:[%s18240_s0 + $0xbc0] ss:$100 sps:$4 sm:$0xff]   ;;  %v13316_v48 = vld [vmem:[%s18240_s0 + $0x5b0] ss:$100 sps:$4 sm:$0xff]  }
 0x163   :  { %8484 = vmatprep.mubr.bf16.mxu0 %v13243_v49  ;;  %7081 = vmatpush1.bf16.msra.mxu1 %v13324_v50  ;;  %v13317_v49 = vld [vmem:[%s18240_s0 + $0xc8c] ss:$100 sps:$4 sm:$0xff]   ;;  %v13319_v50 = vld [vmem:[%s18240_s0 + $0x67c] ss:$100 sps:$4 sm:$0xff]  }
 0x164   :  { %7082 = vmatprep.subr.bf16.mxu1 %v14338_v0 }
 0x167   :  { %7083 = vmatpush1.bf16.msra.mxu1 %v13338_v52  ;;  %v13322_v52 = vld [vmem:[%s18240_s0 + $0x678] ss:$100 sps:$4 sm:$0xff]  }
 0x168   :  { %7084 = vmatprep.subr.bf16.mxu1 %v14338_v0 }
 0x169   :  { %6848 = vmatmul.mubr.bf16.gmra.mrb[20].mxu1 %v13245_v51  ;;  %v13321_v51 = vld [vmem:[%s18240_s0 + $0xc88] ss:$100 sps:$4 sm:$0xff]  }
 0x16a   :  { %8485 = vmatmul.mubr.bf16.gmra.mrb[116].mxu0 %v13246_v53  ;;  %6855 = vmatprep.mubr.bf16.mxu1 %v13247_v54  ;;  %v13325_v53 = vld [vmem:[%s18240_s0 + $0xd54] ss:$100 sps:$4 sm:$0xff]   ;;  %v13327_v54 = vld [vmem:[%s18240_s0 + $0x744] ss:$100 sps:$4 sm:$0xff]  }
 0x16b   :  { %8492 = vmatprep.mubr.bf16.mxu0 %v13249_v55  ;;  %7085 = vmatpush1.bf16.msra.mxu1 %v13352_v56  ;;  %v13435_v55 = vld [vmem:[%s18239_s1 + $0x460] sm:$0xff]   ;;  %v13329_v56 = vld [vmem:[%s18240_s0 + $0xd50] ss:$100 sps:$4 sm:$0xff]  }
 0x16c   :  { %7086 = vmatprep.subr.bf16.mxu1 %v14338_v0 }
 0x16f   :  { %7087 = vmatpush1.bf16.msra.mxu1 %v13366_v61  ;;  %v13336_v61 = vld [vmem:[%s18240_s0 + $0x808] ss:$100 sps:$4 sm:$0xff]  }
 0x170   :  { %7088 = vmatprep.subr.bf16.mxu1 %v14338_v0 }
 0x171   :  { %6856 = vmatmul.mubr.bf16.gmra.mrb[24].mxu1 %v13251_v57  ;;  %v13330_v57 = vld [vmem:[%s18240_s0 + $0x740] ss:$100 sps:$4 sm:$0xff]  }
 0x172   :  { %8493 = vmatmul.mubr.bf16.gmra.mrb[120].mxu0 %v13252_v58  ;;  %6863 = vmatprep.mubr.bf16.mxu1 %v13255_v59  ;;  %v13331_v58 = vld [vmem:[%s18240_s0 + $0xe1c] ss:$100 sps:$4 sm:$0xff]   ;;  %v13333_v59 = vld [vmem:[%s18240_s0 + $0x80c] ss:$100 sps:$4 sm:$0xff]  }
 0x173   :  { %8500 = vmatprep.mubr.bf16.mxu0 %v13257_v60  ;;  %7089 = vmatpush1.bf16.msra.mxu1 %v13380_v8  ;;  %v13335_v60 = vld [vmem:[%s18240_s0 + $0xe18] ss:$100 sps:$4 sm:$0xff]  }
 0x174   :  { %7090 = vmatprep.subr.bf16.mxu1 %v14338_v0  ;;  %v13353_v8 = vld [vmem:[%s18240_s0 + $0x1074] ss:$100 sps:$4 sm:$0xff]  }
 0x177   :  { %7091 = vmatpush1.bf16.msra.mxu1 %v13394_v21  ;;  %v13372_v21 = vld [vmem:[%s18240_s0 + $0xbf0] ss:$100 sps:$4 sm:$0xff]  }
 0x178   :  { %7092 = vmatprep.subr.bf16.mxu1 %v14338_v0 }
 0x179   :  { %6864 = vmatmul.mubr.bf16.gmra.mrb[28].mxu1 %v13259_v62  ;;  %v13339_v62 = vld [vmem:[%s18240_s0 + $0xee4] ss:$100 sps:$4 sm:$0xff]  }
 0x17a   :  { %8501 = vmatmul.mubr.bf16.gmra.mrb[124].mxu0 %v13260_v63  ;;  %6871 = vmatprep.mubr.bf16.mxu1 %v13261_v1  ;;  %v13341_v63 = vld [vmem:[%s18240_s0 + $0x8d4] ss:$100 sps:$4 sm:$0xff]   ;;  %v13449_v1 = vld [vmem:[%s18239_s1 + $0x468] sm:$0xff]  }
 0x17b   :  { %8541 = vmatprep.mubr.bf16.mxu0 %v13265_v2  ;;  %7093 = vmatpush1.bf16.msra.mxu1 %v13408_v34  ;;  %v13343_v2 = vld [vmem:[%s18240_s0 + $0xee0] ss:$100 sps:$4 sm:$0xff]  }
 0x17c   :  { %7094 = vmatprep.subr.bf16.mxu1 %v14338_v0  ;;  %v13395_v34 = vld [vmem:[%s18240_s0 + $0x1524] ss:$100 sps:$4 sm:$0xff]  }
 0x17f   :  { %7095 = vmatpush1.bf16.msra.mxu1 %v13422_v46  ;;  %v13415_v46 = vld [vmem:[%s18240_s0 + $0x177c] ss:$100 sps:$4 sm:$0xff]  }
 0x180   :  { %7353 = vmatprep.subr.bf16.mxu1 %v14338_v0 }
 0x181   :  { %6872 = vmatmul.mubr.bf16.gmra.mrb[32].mxu1 %v13266_v3  ;;  %v13344_v3 = vld [vmem:[%s18240_s0 + $0x8d0] ss:$100 sps:$4 sm:$0xff]  }
 0x182   :  { %8542 = vmatmul.mubr.bf16.vlgmr.msra.gmra.mrb[0].mxu0 %v13263_v4  ;;  %6879 = vmatprep.mubr.bf16.mxu1 %v13269_v5  ;;  %v13345_v4 = vld [vmem:[%s18240_s0 + $0xfac] ss:$100 sps:$4 sm:$0xff]   ;;  %v13347_v5 = vld [vmem:[%s18240_s0 + $0x99c] ss:$100 sps:$4 sm:$0xff]  }
 0x183   :  { %8799 = vmatpush1.bf16.msra.mxu0 %v13267_v6  ;;  %8549 = vmatprep.mubr.bf16.mxu0 %v13271_v7  ;;  %v13349_v6 = vld [vmem:[%s18240_s0 + $0xfa8] ss:$100 sps:$4 sm:$0xff]   ;;  %v13350_v7 = vld [vmem:[%s18240_s0 + $0x998] ss:$100 sps:$4 sm:$0xff]  }
 0x184   :  { %8800 = vmatprep.subr.bf16.mxu0 %v14338_v0 }
 0x187   :  { %8801 = vmatpush1.bf16.msra.mxu0 %v13281_v10  ;;  %v13463_v10 = vld [vmem:[%s18239_s1 + $0x470] sm:$0xff]  }
 0x188   :  { %8802 = vmatprep.subr.bf16.mxu0 %v14338_v0 }
 0x189   :  { %6880 = vmatmul.mubr.bf16.gmra.mrb[36].mxu1 %v13273_v9  ;;  %v13355_v9 = vld [vmem:[%s18240_s0 + $0xa64] ss:$100 sps:$4 sm:$0xff]  }
 0x18a   :  { %8550 = vmatmul.mubr.bf16.gmra.mrb[4].mxu0 %v13274_v11  ;;  %6887 = vmatprep.mubr.bf16.mxu1 %v13275_v12  ;;  %v13357_v11 = vld [vmem:[%s18240_s0 + $0x1070] ss:$100 sps:$4 sm:$0xff]   ;;  %v13358_v12 = vld [vmem:[%s18240_s0 + $0xa60] ss:$100 sps:$4 sm:$0xff]  }
 0x18b   :  { %8557 = vmatprep.mubr.bf16.mxu0 %v13277_v13  ;;  %8803 = vmatpush1.bf16.msra.mxu0 %v13295_v14  ;;  %v13359_v13 = vld [vmem:[%s18240_s0 + $0x113c] ss:$100 sps:$4 sm:$0xff]   ;;  %v13361_v14 = vld [vmem:[%s18240_s0 + $0xb2c] ss:$100 sps:$4 sm:$0xff]  }
 0x18c   :  { %8804 = vmatprep.subr.bf16.mxu0 %v14338_v0 }
 0x18f   :  { %8805 = vmatpush1.bf16.msra.mxu0 %v13309_v16  ;;  %v13364_v16 = vld [vmem:[%s18240_s0 + $0xb28] ss:$100 sps:$4 sm:$0xff]  }
 0x190   :  { %8806 = vmatprep.subr.bf16.mxu0 %v14338_v0 }
 0x191   :  { %6888 = vmatmul.mubr.bf16.gmra.mrb[40].mxu1 %v13279_v15  ;;  %v13363_v15 = vld [vmem:[%s18240_s0 + $0x1138] ss:$100 sps:$4 sm:$0xff]  }
 0x192   :  { %8558 = vmatmul.mubr.bf16.gmra.mrb[8].mxu0 %v13280_v17  ;;  %6895 = vmatprep.mubr.bf16.mxu1 %v13283_v18  ;;  %v13367_v17 = vld [vmem:[%s18240_s0 + $0x1204] ss:$100 sps:$4 sm:$0xff]   ;;  %v13369_v18 = vld [vmem:[%s18240_s0 + $0xbf4] ss:$100 sps:$4 sm:$0xff]  }
 0x193   :  { %8565 = vmatprep.mubr.bf16.mxu0 %v13285_v19  ;;  %8807 = vmatpush1.bf16.msra.mxu0 %v13323_v20  ;;  %v13477_v19 = vld [vmem:[%s18239_s1 + $0x478] sm:$0xff]   ;;  %v13371_v20 = vld [vmem:[%s18240_s0 + $0x1200] ss:$100 sps:$4 sm:$0xff]  }
 0x194   :  { %8808 = vmatprep.subr.bf16.mxu0 %v14338_v0 }
 0x197   :  { %8809 = vmatpush1.bf16.msra.mxu0 %v13337_v23  ;;  %v13375_v23 = vld [vmem:[%s18240_s0 + $0xcbc] ss:$100 sps:$4 sm:$0xff]  }
 0x198   :  { %8810 = vmatprep.subr.bf16.mxu0 %v14338_v0 }
 0x199   :  { %6896 = vmatmul.mubr.bf16.gmra.mrb[44].mxu1 %v13287_v22  ;;  %v13373_v22 = vld [vmem:[%s18240_s0 + $0x12cc] ss:$100 sps:$4 sm:$0xff]  }
 0x19a   :  { %8566 = vmatmul.mubr.bf16.gmra.mrb[12].mxu0 %v13288_v24  ;;  %6903 = vmatprep.mubr.bf16.mxu1 %v13289_v25  ;;  %v13377_v24 = vld [vmem:[%s18240_s0 + $0x12c8] ss:$100 sps:$4 sm:$0xff]   ;;  %v13378_v25 = vld [vmem:[%s18240_s0 + $0xcb8] ss:$100 sps:$4 sm:$0xff]  }
 0x19b   :  { %8573 = vmatprep.mubr.bf16.mxu0 %v13291_v26  ;;  %8811 = vmatpush1.bf16.msra.mxu0 %v13351_v27  ;;  %v13381_v26 = vld [vmem:[%s18240_s0 + $0x1394] ss:$100 sps:$4 sm:$0xff]   ;;  %v13383_v27 = vld [vmem:[%s18240_s0 + $0xd84] ss:$100 sps:$4 sm:$0xff]  }
 0x19c   :  { %8812 = vmatprep.subr.bf16.mxu0 %v14338_v0 }
 0x19f   :  { %8813 = vmatpush1.bf16.msra.mxu0 %v13365_v29  ;;  %v13386_v29 = vld [vmem:[%s18240_s0 + $0xd80] ss:$100 sps:$4 sm:$0xff]  }
 0x1a0   :  { %8814 = vmatprep.subr.bf16.mxu0 %v14338_v0 }
 0x1a1   :  { %6904 = vmatmul.mubr.bf16.gmra.mrb[48].mxu1 %v13293_v28  ;;  %v13385_v28 = vld [vmem:[%s18240_s0 + $0x1390] ss:$100 sps:$4 sm:$0xff]  }
 0x1a2   :  { %8574 = vmatmul.mubr.bf16.gmra.mrb[16].mxu0 %v13294_v30  ;;  %6911 = vmatprep.mubr.bf16.mxu1 %v13297_v31  ;;  %v13387_v30 = vld [vmem:[%s18240_s0 + $0x145c] ss:$100 sps:$4 sm:$0xff]   ;;  %v13389_v31 = vld [vmem:[%s18240_s0 + $0xe4c] ss:$100 sps:$4 sm:$0xff]  }
 0x1a3   :  { %8581 = vmatprep.mubr.bf16.mxu0 %v13299_v32  ;;  %8815 = vmatpush1.bf16.msra.mxu0 %v13379_v33  ;;  %v13391_v32 = vld [vmem:[%s18240_s0 + $0x1458] ss:$100 sps:$4 sm:$0xff]   ;;  %v13392_v33 = vld [vmem:[%s18240_s0 + $0xe48] ss:$100 sps:$4 sm:$0xff]  }
 0x1a4   :  { %8816 = vmatprep.subr.bf16.mxu0 %v14338_v0 }
 0x1a7   :  { %8817 = vmatpush1.bf16.msra.mxu0 %v13393_v36  ;;  %v13399_v36 = vld [vmem:[%s18240_s0 + $0x1520] ss:$100 sps:$4 sm:$0xff]  }
 0x1a8   :  { %8818 = vmatprep.subr.bf16.mxu0 %v14338_v0 }
 0x1a9   :  { %6912 = vmatmul.mubr.bf16.gmra.mrb[52].mxu1 %v13301_v35  ;;  %v13397_v35 = vld [vmem:[%s18240_s0 + $0xf14] ss:$100 sps:$4 sm:$0xff]  }
 0x1aa   :  { %8582 = vmatmul.mubr.bf16.gmra.mrb[20].mxu0 %v13302_v37  ;;  %6919 = vmatprep.mubr.bf16.mxu1 %v13303_v38  ;;  %v13400_v37 = vld [vmem:[%s18240_s0 + $0xf10] ss:$100 sps:$4 sm:$0xff]  }
 0x1ab   :  { %8589 = vmatprep.mubr.bf16.mxu0 %v13305_v39  ;;  %8819 = vmatpush1.bf16.msra.mxu0 %v13407_v40  ;;  %v13401_v38 = vld [vmem:[%s18240_s0 + $0x15ec] ss:$100 sps:$4 sm:$0xff]   ;;  %v13403_v39 = vld [vmem:[%s18240_s0 + $0xfdc] ss:$100 sps:$4 sm:$0xff]  }
 0x1ac   :  { %8820 = vmatprep.subr.bf16.mxu0 %v14338_v0  ;;  %v13405_v40 = vld [vmem:[%s18240_s0 + $0x15e8] ss:$100 sps:$4 sm:$0xff]  }
 0x1af   :  { %8821 = vmatpush1.bf16.msra.mxu0 %v13421_v45  ;;  %v13414_v45 = vld [vmem:[%s18240_s0 + $0x10a0] ss:$100 sps:$4 sm:$0xff]  }
 0x1b0   :  { %8822 = vmatprep.subr.bf16.mxu0 %v14338_v0 }
 0x1b1   :  { %6920 = vmatmul.mubr.bf16.gmra.mrb[56].mxu1 %v13307_v41  ;;  %v13406_v41 = vld [vmem:[%s18240_s0 + $0xfd8] ss:$100 sps:$4 sm:$0xff]  }
 0x1b2   :  { %8590 = vmatmul.mubr.bf16.gmra.mrb[24].mxu0 %v13308_v42  ;;  %6927 = vmatprep.mubr.bf16.mxu1 %v13311_v43  ;;  %v13409_v42 = vld [vmem:[%s18240_s0 + $0x16b4] ss:$100 sps:$4 sm:$0xff]   ;;  %v13411_v43 = vld [vmem:[%s18240_s0 + $0x10a4] ss:$100 sps:$4 sm:$0xff]  }
 0x1b3   :  { %8597 = vmatprep.mubr.bf16.mxu0 %v13313_v44  ;;  %8823 = vmatpush1.bf16.msra.mxu0 %v13435_v55  ;;  %v13413_v44 = vld [vmem:[%s18240_s0 + $0x16b0] ss:$100 sps:$4 sm:$0xff]   ;;  %v13432_v55 = vld [vmem:[%s18240_s0 + $0x12fc] ss:$100 sps:$4 sm:$0xff]  }
 0x1b4   :  { %8824 = vmatprep.subr.bf16.mxu0 %v14338_v0 }
 0x1b7   :  { %8825 = vmatpush1.bf16.msra.mxu0 %v13449_v1  ;;  %v13443_v1 = vld [vmem:[%s18240_s0 + $0x1a4] ss:$100 sps:$4 sm:$0xff]  }
 0x1b8   :  { %8826 = vmatprep.subr.bf16.mxu0 %v14338_v0 }
 0x1b9   :  { %6928 = vmatmul.mubr.bf16.gmra.mrb[60].mxu1 %v13315_v47  ;;  %v13417_v47 = vld [vmem:[%s18240_s0 + $0x116c] ss:$100 sps:$4 sm:$0xff]  }
 0x1ba   :  { %8598 = vmatmul.mubr.bf16.gmra.mrb[28].mxu0 %v13316_v48  ;;  %6935 = vmatprep.mubr.bf16.mxu1 %v13317_v49  ;;  %v13419_v48 = vld [vmem:[%s18240_s0 + $0x1778] ss:$100 sps:$4 sm:$0xff]   ;;  %v13420_v49 = vld [vmem:[%s18240_s0 + $0x1168] ss:$100 sps:$4 sm:$0xff]  }
 0x1bb   :  { %8605 = vmatprep.mubr.bf16.mxu0 %v13319_v50  ;;  %8827 = vmatpush1.bf16.msra.mxu0 %v13463_v10  ;;  %v13423_v50 = vld [vmem:[%s18240_s0 + $0x1844] ss:$100 sps:$4 sm:$0xff]  }
 0x1bc   :  { %8828 = vmatprep.subr.bf16.mxu0 %v14338_v0  ;;  %v13506_v10 = vld [vmem:[%s18239_s1 + $0x1a8] sm:$0xff]  }
 0x1bf   :  { %8829 = vmatpush1.bf16.msra.mxu0 %v13477_v19  ;;  %v13465_v19 = vld [vmem:[%s18240_s0 + $0x3fc] ss:$100 sps:$4 sm:$0xff]  }
 0x1c0   :  { %9087 = vmatprep.subr.bf16.mxu0 %v14338_v0 }
 0x1c1   :  { %6936 = vmatmul.mubr.bf16.gmra.mrb[64].mxu1 %v13321_v51  ;;  %v13425_v51 = vld [vmem:[%s18240_s0 + $0x1234] ss:$100 sps:$4 sm:$0xff]  }
 0x1c2   :  { %8606 = vmatmul.mubr.bf16.gmra.mrb[32].mxu0 %v13322_v52  ;;  %6943 = vmatprep.mubr.bf16.mxu1 %v13325_v53  ;;  %v13427_v52 = vld [vmem:[%s18240_s0 + $0x1840] ss:$100 sps:$4 sm:$0xff]   ;;  %v13428_v53 = vld [vmem:[%s18240_s0 + $0x1230] ss:$100 sps:$4 sm:$0xff]  }
 0x1c3   :  { %8613 = vmatprep.mubr.bf16.mxu0 %v13327_v54  ;;  %v13431_v54 = vld [vmem:[%s18240_s0 + $0x14] ss:$100 sps:$4 sm:$0xff]  }
 0x1c9   :  { %6944 = vmatmul.mubr.bf16.gmra.mrb[68].mxu1 %v13329_v56  ;;  %v13429_v56 = vld [vmem:[%s18240_s0 + $0x10] ss:$100 sps:$4 sm:$0xff]  }
 0x1ca   :  { %8614 = vmatmul.mubr.bf16.gmra.mrb[36].mxu0 %v13330_v57  ;;  %6951 = vmatprep.mubr.bf16.mxu1 %v13331_v58  ;;  %v13434_v57 = vld [vmem:[%s18240_s0 + $0x12f8] ss:$100 sps:$4 sm:$0xff]   ;;  %v13436_v58 = vld [vmem:[%s18239_s1 + $0x180] sm:$0xff]  }
 0x1cb   :  { %8621 = vmatprep.mubr.bf16.mxu0 %v13333_v59  ;;  %v13437_v59 = vld [vmem:[%s18240_s0 + $0xdc] ss:$100 sps:$4 sm:$0xff]  }
 0x1d1   :  { %6952 = vmatmul.mubr.bf16.gmra.mrb[72].mxu1 %v13335_v60  ;;  %v13439_v60 = vld [vmem:[%s18240_s0 + $0x13c4] ss:$100 sps:$4 sm:$0xff]  }
 0x1d2   :  { %8622 = vmatmul.mubr.bf16.gmra.mrb[40].mxu0 %v13336_v61  ;;  %6959 = vmatprep.mubr.bf16.mxu1 %v13339_v62  ;;  %v13450_v61 = vld [vmem:[%s18239_s1 + $0x188] sm:$0xff]   ;;  %v13441_v62 = vld [vmem:[%s18240_s0 + $0xd8] ss:$100 sps:$4 sm:$0xff]  }
 0x1d3   :  { %8629 = vmatprep.mubr.bf16.mxu0 %v13341_v63  ;;  %v13442_v63 = vld [vmem:[%s18240_s0 + $0x13c0] ss:$100 sps:$4 sm:$0xff]  }
 0x1d9   :  { %6960 = vmatmul.mubr.bf16.gmra.mrb[76].mxu1 %v13343_v2  ;;  %v13445_v2 = vld [vmem:[%s18240_s0 + $0x148c] ss:$100 sps:$4 sm:$0xff]  }
 0x1da   :  { %8630 = vmatmul.mubr.bf16.gmra.mrb[44].mxu0 %v13344_v3  ;;  %6967 = vmatprep.mubr.bf16.mxu1 %v13345_v4  ;;  %v13464_v3 = vld [vmem:[%s18239_s1 + $0x190] sm:$0xff]   ;;  %v13478_v4 = vld [vmem:[%s18239_s1 + $0x198] sm:$0xff]  }
 0x1db   :  { %8637 = vmatprep.mubr.bf16.mxu0 %v13347_v5  ;;  %v13447_v5 = vld [vmem:[%s18240_s0 + $0x1a0] ss:$100 sps:$4 sm:$0xff]  }
 0x1e1   :  { %6968 = vmatmul.mubr.bf16.gmra.mrb[80].mxu1 %v13349_v6  ;;  %v13448_v6 = vld [vmem:[%s18240_s0 + $0x1488] ss:$100 sps:$4 sm:$0xff]  }
 0x1e2   :  { %8638 = vmatmul.mubr.bf16.gmra.mrb[48].mxu0 %v13350_v7  ;;  %6975 = vmatprep.mubr.bf16.mxu1 %v13353_v8  ;;  %v13451_v7 = vld [vmem:[%s18240_s0 + $0x26c] ss:$100 sps:$4 sm:$0xff]   ;;  %v13453_v8 = vld [vmem:[%s18240_s0 + $0x1554] ss:$100 sps:$4 sm:$0xff]  }
 0x1e3   :  { %8645 = vmatprep.mubr.bf16.mxu0 %v13355_v9  ;;  %v13492_v9 = vld [vmem:[%s18239_s1 + $0x1a0] sm:$0xff]  }
 0x1e9   :  { %6976 = vmatmul.mubr.bf16.gmra.mrb[84].mxu1 %v13357_v11  ;;  %v13455_v11 = vld [vmem:[%s18240_s0 + $0x268] ss:$100 sps:$4 sm:$0xff]  }
 0x1ea   :  { %8646 = vmatmul.mubr.bf16.gmra.mrb[52].mxu0 %v13358_v12  ;;  %6983 = vmatprep.mubr.bf16.mxu1 %v13359_v13  ;;  %v13456_v12 = vld [vmem:[%s18240_s0 + $0x1550] ss:$100 sps:$4 sm:$0xff]  }
 0x1eb   :  { %8653 = vmatprep.mubr.bf16.mxu0 %v13361_v14  ;;  %v13457_v13 = vld [vmem:[%s18240_s0 + $0x334] ss:$100 sps:$4 sm:$0xff]   ;;  %v13459_v14 = vld [vmem:[%s18240_s0 + $0x161c] ss:$100 sps:$4 sm:$0xff]  }
 0x1f1   :  { %6984 = vmatmul.mubr.bf16.gmra.mrb[88].mxu1 %v13363_v15  ;;  %v13520_v15 = vld [vmem:[%s18239_s1 + $0x1b0] sm:$0xff]  }
 0x1f2   :  { %8654 = vmatmul.mubr.bf16.gmra.mrb[56].mxu0 %v13364_v16  ;;  %6991 = vmatprep.mubr.bf16.mxu1 %v13367_v17  ;;  %v13534_v16 = vld [vmem:[%s18239_s1 + $0x1b8] sm:$0xff]   ;;  %v13461_v17 = vld [vmem:[%s18240_s0 + $0x330] ss:$100 sps:$4 sm:$0xff]  }
 0x1f3   :  { %8661 = vmatprep.mubr.bf16.mxu0 %v13369_v18  ;;  %v13462_v18 = vld [vmem:[%s18240_s0 + $0x1618] ss:$100 sps:$4 sm:$0xff]  }
 0x1f9   :  { %6992 = vmatmul.mubr.bf16.gmra.mrb[92].mxu1 %v13371_v20  ;;  %v13467_v20 = vld [vmem:[%s18240_s0 + $0x16e4] ss:$100 sps:$4 sm:$0xff]  }
 0x1fa   :  { %8662 = vmatmul.mubr.bf16.gmra.mrb[60].mxu0 %v13372_v21  ;;  %6999 = vmatprep.mubr.bf16.mxu1 %v13373_v22  ;;  %v13548_v21 = vld [vmem:[%s18239_s1 + $0x1c0] sm:$0xff]   ;;  %v13562_v22 = vld [vmem:[%s18239_s1 + $0x1c8] sm:$0xff]  }
 0x1fb   :  { %8669 = vmatprep.mubr.bf16.mxu0 %v13375_v23  ;;  %v13469_v23 = vld [vmem:[%s18240_s0 + $0x3f8] ss:$100 sps:$4 sm:$0xff]  }
 0x201   :  { %7000 = vmatmul.mubr.bf16.gmra.mrb[96].mxu1 %v13377_v24  ;;  %v13470_v24 = vld [vmem:[%s18240_s0 + $0x16e0] ss:$100 sps:$4 sm:$0xff]  }
 0x202   :  { %8670 = vmatmul.mubr.bf16.gmra.mrb[64].mxu0 %v13378_v25  ;;  %7007 = vmatprep.mubr.bf16.mxu1 %v13381_v26  ;;  %v13471_v25 = vld [vmem:[%s18240_s0 + $0x4c4] ss:$100 sps:$4 sm:$0xff]   ;;  %v13473_v26 = vld [vmem:[%s18240_s0 + $0x17ac] ss:$100 sps:$4 sm:$0xff]  }
 0x203   :  { %8677 = vmatprep.mubr.bf16.mxu0 %v13383_v27  ;;  %v13576_v27 = vld [vmem:[%s18239_s1 + $0x1d0] sm:$0xff]  }
 0x209   :  { %7008 = vmatmul.mubr.bf16.gmra.mrb[100].mxu1 %v13385_v28  ;;  %v13475_v28 = vld [vmem:[%s18240_s0 + $0x4c0] ss:$100 sps:$4 sm:$0xff]  }
 0x20a   :  { %8678 = vmatmul.mubr.bf16.gmra.mrb[68].mxu0 %v13386_v29  ;;  %7015 = vmatprep.mubr.bf16.mxu1 %v13387_v30  ;;  %v13476_v29 = vld [vmem:[%s18240_s0 + $0x17a8] ss:$100 sps:$4 sm:$0xff]  }
 0x20b   :  { %8685 = vmatprep.mubr.bf16.mxu0 %v13389_v31  ;;  %v13479_v30 = vld [vmem:[%s18240_s0 + $0x58c] ss:$100 sps:$4 sm:$0xff]   ;;  %v13481_v31 = vld [vmem:[%s18240_s0 + $0x1874] ss:$100 sps:$4 sm:$0xff]  }
 0x211   :  { %7016 = vmatmul.mubr.bf16.gmra.mrb[104].mxu1 %v13391_v32  ;;  %v13590_v32 = vld [vmem:[%s18239_s1 + $0x1d8] sm:$0xff]  }
 0x212   :  { %8686 = vmatmul.mubr.bf16.gmra.mrb[72].mxu0 %v13392_v33  ;;  %7023 = vmatprep.mubr.bf16.mxu1 %v13395_v34  ;;  %v13483_v33 = vld [vmem:[%s18240_s0 + $0x588] ss:$100 sps:$4 sm:$0xff]   ;;  %v13484_v34 = vld [vmem:[%s18240_s0 + $0x1870] ss:$100 sps:$4 sm:$0xff]  }
 0x213   :  { %8693 = vmatprep.mubr.bf16.mxu0 %v13397_v35  ;;  %v13485_v35 = vld [vmem:[%s18240_s0 + $0x654] ss:$100 sps:$4 sm:$0xff]  }
 0x219   :  { %7024 = vmatmul.mubr.bf16.gmra.mrb[108].mxu1 %v13399_v36  ;;  %v13489_v36 = vld [vmem:[%s18240_s0 + $0x44] ss:$100 sps:$4 sm:$0xff]  }
 0x21a   :  { %8694 = vmatmul.mubr.bf16.gmra.mrb[76].mxu0 %v13400_v37  ;;  %7031 = vmatprep.mubr.bf16.mxu1 %v13401_v38  ;;  %v13490_v37 = vld [vmem:[%s18240_s0 + $0x650] ss:$100 sps:$4 sm:$0xff]   ;;  %v13487_v38 = vld [vmem:[%s18240_s0 + $0x40] ss:$100 sps:$4 sm:$0xff]  }
 0x21b   :  { %8701 = vmatprep.mubr.bf16.mxu0 %v13403_v39  ;;  %v13493_v39 = vld [vmem:[%s18240_s0 + $0x71c] ss:$100 sps:$4 sm:$0xff]  }
 0x221   :  { %7032 = vmatmul.mubr.bf16.gmra.mrb[112].mxu1 %v13405_v40  ;;  %v13491_v40 = vld [vmem:[%s18239_s1 + $0x480] sm:$0xff]  }
 0x222   :  { %8702 = vmatmul.mubr.bf16.gmra.mrb[80].mxu0 %v13406_v41  ;;  %7039 = vmatprep.mubr.bf16.mxu1 %v13409_v42  ;;  %v13495_v41 = vld [vmem:[%s18240_s0 + $0x10c] ss:$100 sps:$4 sm:$0xff]   ;;  %v13604_v42 = vld [vmem:[%s18239_s1 + $0x1e0] sm:$0xff]  }
 0x223   :  { %8709 = vmatprep.mubr.bf16.mxu0 %v13411_v43  ;;  %v13505_v43 = vld [vmem:[%s18239_s1 + $0x488] sm:$0xff]  }
 0x229   :  { %7040 = vmatmul.mubr.bf16.gmra.mrb[116].mxu1 %v13413_v44  ;;  %v13497_v44 = vld [vmem:[%s18240_s0 + $0x718] ss:$100 sps:$4 sm:$0xff]  }
 0x22a   :  { %8710 = vmatmul.mubr.bf16.gmra.mrb[84].mxu0 %v13414_v45  ;;  %7047 = vmatprep.mubr.bf16.mxu1 %v13415_v46  ;;  %v13498_v45 = vld [vmem:[%s18240_s0 + $0x108] ss:$100 sps:$4 sm:$0xff]  }
 0x22b   :  { %8717 = vmatprep.mubr.bf16.mxu0 %v13417_v47  ;;  %v13499_v46 = vld [vmem:[%s18240_s0 + $0x7e4] ss:$100 sps:$4 sm:$0xff]   ;;  %v13501_v47 = vld [vmem:[%s18240_s0 + $0x1d4] ss:$100 sps:$4 sm:$0xff]  }
 0x231   :  { %7048 = vmatmul.mubr.bf16.gmra.mrb[120].mxu1 %v13419_v48  ;;  %v13519_v48 = vld [vmem:[%s18239_s1 + $0x490] sm:$0xff]  }
 0x232   :  { %8718 = vmatmul.mubr.bf16.gmra.mrb[88].mxu0 %v13420_v49  ;;  %7055 = vmatprep.mubr.bf16.mxu1 %v13423_v50  ;;  %v13533_v49 = vld [vmem:[%s18239_s1 + $0x498] sm:$0xff]   ;;  %v13503_v50 = vld [vmem:[%s18240_s0 + $0x7e0] ss:$100 sps:$4 sm:$0xff]  }
 0x233   :  { %8725 = vmatprep.mubr.bf16.mxu0 %v13425_v51  ;;  %v13504_v51 = vld [vmem:[%s18240_s0 + $0x1d0] ss:$100 sps:$4 sm:$0xff]  }
 0x239   :  { %7056 = vmatmul.mubr.bf16.gmra.mrb[124].mxu1 %v13427_v52  ;;  %v13507_v52 = vld [vmem:[%s18240_s0 + $0x8ac] ss:$100 sps:$4 sm:$0xff]  }
 0x23a   :  { %8726 = vmatmul.mubr.bf16.gmra.mrb[92].mxu0 %v13428_v53  ;;  %7096 = vmatprep.mubr.bf16.mxu1 %v13431_v54  ;;  %v13509_v53 = vld [vmem:[%s18240_s0 + $0x29c] ss:$100 sps:$4 sm:$0xff]  }
 0x23b   :  { %8733 = vmatprep.mubr.bf16.mxu0 %v13432_v55  ;;  %v13547_v54 = vld [vmem:[%s18239_s1 + $0x4a0] sm:$0xff]   ;;  %v13618_v55 = vld [vmem:[%s18239_s1 + $0x1e8] sm:$0xff]  }
 0x241   :  { %7097 = vmatmul.mubr.bf16.vlgmr.msra.gmra.mrb[0].mxu1 %v13429_v56  ;;  %v13561_v56 = vld [vmem:[%s18239_s1 + $0x4a8] sm:$0xff]  }
 0x242   :  { %8734 = vmatmul.mubr.bf16.gmra.mrb[96].mxu0 %v13434_v57  ;;  %7354 = vmatpush1.bf16.msra.mxu1 %v13436_v58  ;;  %v13511_v57 = vld [vmem:[%s18240_s0 + $0x8a8] ss:$100 sps:$4 sm:$0xff]   ;;  %v13512_v58 = vld [vmem:[%s18240_s0 + $0x298] ss:$100 sps:$4 sm:$0xff]  }
 0x243   :  { %7104 = vmatprep.mubr.bf16.mxu1 %v13437_v59  ;;  %8741 = vmatprep.mubr.bf16.mxu0 %v13439_v60  ;;  %v13513_v59 = vld [vmem:[%s18240_s0 + $0x974] ss:$100 sps:$4 sm:$0xff]   ;;  %v13515_v60 = vld [vmem:[%s18240_s0 + $0x364] ss:$100 sps:$4 sm:$0xff]  }
 0x244   :  { %7355 = vmatprep.subr.bf16.mxu1 %v14338_v0 }
 0x246   :  { %7356 = vmatpush1.bf16.msra.mxu1 %v13450_v61  ;;  %v13575_v61 = vld [vmem:[%s18239_s1 + $0x4b0] sm:$0xff]  }
 0x247   :  { %7357 = vmatprep.subr.bf16.mxu1 %v14338_v0 }
 0x249   :  { %7105 = vmatmul.mubr.bf16.gmra.mrb[4].mxu1 %v13441_v62  ;;  %v13589_v62 = vld [vmem:[%s18239_s1 + $0x4b8] sm:$0xff]  }
 0x24a   :  { %8742 = vmatmul.mubr.bf16.gmra.mrb[100].mxu0 %v13442_v63  ;;  %7112 = vmatprep.mubr.bf16.mxu1 %v13443_v1  ;;  %v13517_v63 = vld [vmem:[%s18240_s0 + $0x970] ss:$100 sps:$4 sm:$0xff]   ;;  %v13518_v1 = vld [vmem:[%s18240_s0 + $0x360] ss:$100 sps:$4 sm:$0xff]  }
 0x24b   :  { %8749 = vmatprep.mubr.bf16.mxu0 %v13445_v2  ;;  %7358 = vmatpush1.bf16.msra.mxu1 %v13464_v3  ;;  %v13521_v2 = vld [vmem:[%s18240_s0 + $0xa3c] ss:$100 sps:$4 sm:$0xff]   ;;  %v13523_v3 = vld [vmem:[%s18240_s0 + $0x42c] ss:$100 sps:$4 sm:$0xff]  }
 0x24c   :  { %7359 = vmatprep.subr.bf16.mxu1 %v14338_v0 }
 0x24f   :  { %7360 = vmatpush1.bf16.msra.mxu1 %v13478_v4  ;;  %v13603_v4 = vld [vmem:[%s18239_s1 + $0x4c0] sm:$0xff]  }
 0x250   :  { %7361 = vmatprep.subr.bf16.mxu1 %v14338_v0 }
 0x251   :  { %7113 = vmatmul.mubr.bf16.gmra.mrb[8].mxu1 %v13447_v5  ;;  %v13632_v5 = vld [vmem:[%s18239_s1 + $0x1f0] sm:$0xff]  }
 0x252   :  { %8750 = vmatmul.mubr.bf16.gmra.mrb[104].mxu0 %v13448_v6  ;;  %7120 = vmatprep.mubr.bf16.mxu1 %v13451_v7  ;;  %v13617_v6 = vld [vmem:[%s18239_s1 + $0x4c8] sm:$0xff]   ;;  %v13525_v7 = vld [vmem:[%s18240_s0 + $0xa38] ss:$100 sps:$4 sm:$0xff]  }
 0x253   :  { %8757 = vmatprep.mubr.bf16.mxu0 %v13453_v8  ;;  %7362 = vmatpush1.bf16.msra.mxu1 %v13492_v9  ;;  %v13526_v8 = vld [vmem:[%s18240_s0 + $0x428] ss:$100 sps:$4 sm:$0xff]  }
 0x254   :  { %7363 = vmatprep.subr.bf16.mxu1 %v14338_v0  ;;  %v13527_v9 = vld [vmem:[%s18240_s0 + $0xb04] ss:$100 sps:$4 sm:$0xff]  }
 0x257   :  { %7364 = vmatpush1.bf16.msra.mxu1 %v13506_v10  ;;  %v13529_v10 = vld [vmem:[%s18240_s0 + $0x4f4] ss:$100 sps:$4 sm:$0xff]  }
 0x258   :  { %7365 = vmatprep.subr.bf16.mxu1 %v14338_v0 }
 0x259   :  { %7121 = vmatmul.mubr.bf16.gmra.mrb[12].mxu1 %v13455_v11  ;;  %v13631_v11 = vld [vmem:[%s18239_s1 + $0x4d0] sm:$0xff]  }
 0x25a   :  { %8758 = vmatmul.mubr.bf16.gmra.mrb[108].mxu0 %v13456_v12  ;;  %7128 = vmatprep.mubr.bf16.mxu1 %v13457_v13  ;;  %v13531_v12 = vld [vmem:[%s18240_s0 + $0xb00] ss:$100 sps:$4 sm:$0xff]   ;;  %v13532_v13 = vld [vmem:[%s18240_s0 + $0x4f0] ss:$100 sps:$4 sm:$0xff]  }
 0x25b   :  { %8765 = vmatprep.mubr.bf16.mxu0 %v13459_v14  ;;  %7366 = vmatpush1.bf16.msra.mxu1 %v13520_v15  ;;  %v13535_v14 = vld [vmem:[%s18240_s0 + $0xbcc] ss:$100 sps:$4 sm:$0xff]   ;;  %v13537_v15 = vld [vmem:[%s18240_s0 + $0x5bc] ss:$100 sps:$4 sm:$0xff]  }
 0x25c   :  { %7367 = vmatprep.subr.bf16.mxu1 %v14338_v0 }
 0x25f   :  { %7368 = vmatpush1.bf16.msra.mxu1 %v13534_v16  ;;  %v13645_v16 = vld [vmem:[%s18239_s1 + $0x4d8] sm:$0xff]  }
 0x260   :  { %7369 = vmatprep.subr.bf16.mxu1 %v14338_v0 }
 0x261   :  { %7129 = vmatmul.mubr.bf16.gmra.mrb[16].mxu1 %v13461_v17  ;;  %v13646_v17 = vld [vmem:[%s18239_s1 + $0x1f8] sm:$0xff]  }
 0x262   :  { %8766 = vmatmul.mubr.bf16.gmra.mrb[112].mxu0 %v13462_v18  ;;  %7136 = vmatprep.mubr.bf16.mxu1 %v13465_v19  ;;  %v13539_v18 = vld [vmem:[%s18240_s0 + $0xbc8] ss:$100 sps:$4 sm:$0xff]   ;;  %v13540_v19 = vld [vmem:[%s18240_s0 + $0x5b8] ss:$100 sps:$4 sm:$0xff]  }
 0x263   :  { %8773 = vmatprep.mubr.bf16.mxu0 %v13467_v20  ;;  %7370 = vmatpush1.bf16.msra.mxu1 %v13548_v21  ;;  %v13541_v20 = vld [vmem:[%s18240_s0 + $0xc94] ss:$100 sps:$4 sm:$0xff]   ;;  %v13543_v21 = vld [vmem:[%s18240_s0 + $0x684] ss:$100 sps:$4 sm:$0xff]  }
 0x264   :  { %7371 = vmatprep.subr.bf16.mxu1 %v14338_v0 }
 0x267   :  { %7372 = vmatpush1.bf16.msra.mxu1 %v13562_v22  ;;  %v13545_v22 = vld [vmem:[%s18240_s0 + $0xc90] ss:$100 sps:$4 sm:$0xff]  }
 0x268   :  { %7373 = vmatprep.subr.bf16.mxu1 %v14338_v0 }
 0x269   :  { %7137 = vmatmul.mubr.bf16.gmra.mrb[20].mxu1 %v13469_v23  ;;  %v13546_v23 = vld [vmem:[%s18240_s0 + $0x680] ss:$100 sps:$4 sm:$0xff]  }
 0x26a   :  { %8774 = vmatmul.mubr.bf16.gmra.mrb[116].mxu0 %v13470_v24  ;;  %7144 = vmatprep.mubr.bf16.mxu1 %v13471_v25  ;;  %v13549_v24 = vld [vmem:[%s18240_s0 + $0xd5c] ss:$100 sps:$4 sm:$0xff]   ;;  %v13551_v25 = vld [vmem:[%s18240_s0 + $0x74c] ss:$100 sps:$4 sm:$0xff]  }
 0x26b   :  { %8781 = vmatprep.mubr.bf16.mxu0 %v13473_v26  ;;  %7374 = vmatpush1.bf16.msra.mxu1 %v13576_v27  ;;  %v13659_v26 = vld [vmem:[%s18239_s1 + $0x4e0] sm:$0xff]   ;;  %v13553_v27 = vld [vmem:[%s18240_s0 + $0xd58] ss:$100 sps:$4 sm:$0xff]  }
 0x26c   :  { %7375 = vmatprep.subr.bf16.mxu1 %v14338_v0 }
 0x26f   :  { %7376 = vmatpush1.bf16.msra.mxu1 %v13590_v32  ;;  %v13560_v32 = vld [vmem:[%s18240_s0 + $0x810] ss:$100 sps:$4 sm:$0xff]  }
 0x270   :  { %7377 = vmatprep.subr.bf16.mxu1 %v14338_v0 }
 0x271   :  { %7145 = vmatmul.mubr.bf16.gmra.mrb[24].mxu1 %v13475_v28  ;;  %v13554_v28 = vld [vmem:[%s18240_s0 + $0x748] ss:$100 sps:$4 sm:$0xff]  }
 0x272   :  { %8782 = vmatmul.mubr.bf16.gmra.mrb[120].mxu0 %v13476_v29  ;;  %7152 = vmatprep.mubr.bf16.mxu1 %v13479_v30  ;;  %v13555_v29 = vld [vmem:[%s18240_s0 + $0xe24] ss:$100 sps:$4 sm:$0xff]   ;;  %v13557_v30 = vld [vmem:[%s18240_s0 + $0x814] ss:$100 sps:$4 sm:$0xff]  }
 0x273   :  { %8789 = vmatprep.mubr.bf16.mxu0 %v13481_v31  ;;  %7378 = vmatpush1.bf16.msra.mxu1 %v13604_v42  ;;  %v13559_v31 = vld [vmem:[%s18240_s0 + $0xe20] ss:$100 sps:$4 sm:$0xff]  }
 0x274   :  { %7379 = vmatprep.subr.bf16.mxu1 %v14338_v0  ;;  %v13577_v42 = vld [vmem:[%s18240_s0 + $0x107c] ss:$100 sps:$4 sm:$0xff]  }
 0x277   :  { %7380 = vmatpush1.bf16.msra.mxu1 %v13618_v55  ;;  %v13596_v55 = vld [vmem:[%s18240_s0 + $0xbf8] ss:$100 sps:$4 sm:$0xff]  }
 0x278   :  { %7381 = vmatprep.subr.bf16.mxu1 %v14338_v0 }
 0x279   :  { %7153 = vmatmul.mubr.bf16.gmra.mrb[28].mxu1 %v13483_v33  ;;  %v13563_v33 = vld [vmem:[%s18240_s0 + $0xeec] ss:$100 sps:$4 sm:$0xff]  }
 0x27a   :  { %8790 = vmatmul.mubr.bf16.gmra.mrb[124].mxu0 %v13484_v34  ;;  %7160 = vmatprep.mubr.bf16.mxu1 %v13485_v35  ;;  %v13565_v34 = vld [vmem:[%s18240_s0 + $0x8dc] ss:$100 sps:$4 sm:$0xff]   ;;  %v13673_v35 = vld [vmem:[%s18239_s1 + $0x4e8] sm:$0xff]  }
 0x27b   :  { %8830 = vmatprep.mubr.bf16.mxu0 %v13489_v36  ;;  %7382 = vmatpush1.bf16.msra.mxu1 %v13632_v5  ;;  %v13567_v36 = vld [vmem:[%s18240_s0 + $0xee8] ss:$100 sps:$4 sm:$0xff]  }
 0x27c   :  { %7383 = vmatprep.subr.bf16.mxu1 %v14338_v0  ;;  %v13619_v5 = vld [vmem:[%s18240_s0 + $0x152c] ss:$100 sps:$4 sm:$0xff]  }
 0x27f   :  { %7384 = vmatpush1.bf16.msra.mxu1 %v13646_v17  ;;  %v13639_v17 = vld [vmem:[%s18240_s0 + $0x1784] ss:$100 sps:$4 sm:$0xff]  }
 0x280   :  { %7642 = vmatprep.subr.bf16.mxu1 %v14338_v0 }
 0x281   :  { %7161 = vmatmul.mubr.bf16.gmra.mrb[32].mxu1 %v13490_v37  ;;  %v13568_v37 = vld [vmem:[%s18240_s0 + $0x8d8] ss:$100 sps:$4 sm:$0xff]  }
 0x282   :  { %8831 = vmatmul.mubr.bf16.vlgmr.msra.gmra.mrb[0].mxu0 %v13487_v38  ;;  %7168 = vmatprep.mubr.bf16.mxu1 %v13493_v39  ;;  %v13569_v38 = vld [vmem:[%s18240_s0 + $0xfb4] ss:$100 sps:$4 sm:$0xff]   ;;  %v13571_v39 = vld [vmem:[%s18240_s0 + $0x9a4] ss:$100 sps:$4 sm:$0xff]  }
 0x283   :  { %9088 = vmatpush1.bf16.msra.mxu0 %v13491_v40  ;;  %8838 = vmatprep.mubr.bf16.mxu0 %v13495_v41  ;;  %v13573_v40 = vld [vmem:[%s18240_s0 + $0xfb0] ss:$100 sps:$4 sm:$0xff]   ;;  %v13574_v41 = vld [vmem:[%s18240_s0 + $0x9a0] ss:$100 sps:$4 sm:$0xff]  }
 0x284   :  { %9089 = vmatprep.subr.bf16.mxu0 %v14338_v0 }
 0x287   :  { %9090 = vmatpush1.bf16.msra.mxu0 %v13505_v43  ;;  %v13579_v43 = vld [vmem:[%s18240_s0 + $0xa6c] ss:$100 sps:$4 sm:$0xff]  }
 0x288   :  { %9091 = vmatprep.subr.bf16.mxu0 %v14338_v0 }
 0x289   :  { %7169 = vmatmul.mubr.bf16.gmra.mrb[36].mxu1 %v13497_v44  ;;  %v13687_v44 = vld [vmem:[%s18239_s1 + $0x4f0] sm:$0xff]  }
 0x28a   :  { %8839 = vmatmul.mubr.bf16.gmra.mrb[4].mxu0 %v13498_v45  ;;  %7176 = vmatprep.mubr.bf16.mxu1 %v13499_v46  ;;  %v13581_v45 = vld [vmem:[%s18240_s0 + $0x1078] ss:$100 sps:$4 sm:$0xff]   ;;  %v13582_v46 = vld [vmem:[%s18240_s0 + $0xa68] ss:$100 sps:$4 sm:$0xff]  }
 0x28b   :  { %8846 = vmatprep.mubr.bf16.mxu0 %v13501_v47  ;;  %9092 = vmatpush1.bf16.msra.mxu0 %v13519_v48  ;;  %v13583_v47 = vld [vmem:[%s18240_s0 + $0x1144] ss:$100 sps:$4 sm:$0xff]   ;;  %v13585_v48 = vld [vmem:[%s18240_s0 + $0xb34] ss:$100 sps:$4 sm:$0xff]  }
 0x28c   :  { %9093 = vmatprep.subr.bf16.mxu0 %v14338_v0 }
 0x28f   :  { %9094 = vmatpush1.bf16.msra.mxu0 %v13533_v49  ;;  %v13587_v49 = vld [vmem:[%s18240_s0 + $0x1140] ss:$100 sps:$4 sm:$0xff]  }
 0x290   :  { %9095 = vmatprep.subr.bf16.mxu0 %v14338_v0 }
 0x291   :  { %7177 = vmatmul.mubr.bf16.gmra.mrb[40].mxu1 %v13503_v50  ;;  %v13588_v50 = vld [vmem:[%s18240_s0 + $0xb30] ss:$100 sps:$4 sm:$0xff]  }
 0x292   :  { %8847 = vmatmul.mubr.bf16.gmra.mrb[8].mxu0 %v13504_v51  ;;  %7184 = vmatprep.mubr.bf16.mxu1 %v13507_v52  ;;  %v13591_v51 = vld [vmem:[%s18240_s0 + $0x120c] ss:$100 sps:$4 sm:$0xff]   ;;  %v13593_v52 = vld [vmem:[%s18240_s0 + $0xbfc] ss:$100 sps:$4 sm:$0xff]  }
 0x293   :  { %8854 = vmatprep.mubr.bf16.mxu0 %v13509_v53  ;;  %9096 = vmatpush1.bf16.msra.mxu0 %v13547_v54  ;;  %v13701_v53 = vld [vmem:[%s18239_s1 + $0x4f8] sm:$0xff]   ;;  %v13595_v54 = vld [vmem:[%s18240_s0 + $0x1208] ss:$100 sps:$4 sm:$0xff]  }
 0x294   :  { %9097 = vmatprep.subr.bf16.mxu0 %v14338_v0 }
 0x297   :  { %9098 = vmatpush1.bf16.msra.mxu0 %v13561_v56  ;;  %v13597_v56 = vld [vmem:[%s18240_s0 + $0x12d4] ss:$100 sps:$4 sm:$0xff]  }
 0x298   :  { %9099 = vmatprep.subr.bf16.mxu0 %v14338_v0 }
 0x299   :  { %7185 = vmatmul.mubr.bf16.gmra.mrb[44].mxu1 %v13511_v57  ;;  %v13599_v57 = vld [vmem:[%s18240_s0 + $0xcc4] ss:$100 sps:$4 sm:$0xff]  }
 0x29a   :  { %8855 = vmatmul.mubr.bf16.gmra.mrb[12].mxu0 %v13512_v58  ;;  %7192 = vmatprep.mubr.bf16.mxu1 %v13513_v59  ;;  %v13601_v58 = vld [vmem:[%s18240_s0 + $0x12d0] ss:$100 sps:$4 sm:$0xff]   ;;  %v13602_v59 = vld [vmem:[%s18240_s0 + $0xcc0] ss:$100 sps:$4 sm:$0xff]  }
 0x29b   :  { %8862 = vmatprep.mubr.bf16.mxu0 %v13515_v60  ;;  %9100 = vmatpush1.bf16.msra.mxu0 %v13575_v61  ;;  %v13605_v60 = vld [vmem:[%s18240_s0 + $0x139c] ss:$100 sps:$4 sm:$0xff]   ;;  %v13607_v61 = vld [vmem:[%s18240_s0 + $0xd8c] ss:$100 sps:$4 sm:$0xff]  }
 0x29c   :  { %9101 = vmatprep.subr.bf16.mxu0 %v14338_v0 }
 0x29f   :  { %9102 = vmatpush1.bf16.msra.mxu0 %v13589_v62  ;;  %v13609_v62 = vld [vmem:[%s18240_s0 + $0x1398] ss:$100 sps:$4 sm:$0xff]  }
 0x2a0   :  { %9103 = vmatprep.subr.bf16.mxu0 %v14338_v0 }
 0x2a1   :  { %7193 = vmatmul.mubr.bf16.gmra.mrb[48].mxu1 %v13517_v63  ;;  %v13610_v63 = vld [vmem:[%s18240_s0 + $0xd88] ss:$100 sps:$4 sm:$0xff]  }
 0x2a2   :  { %8863 = vmatmul.mubr.bf16.gmra.mrb[16].mxu0 %v13518_v1  ;;  %7200 = vmatprep.mubr.bf16.mxu1 %v13521_v2  ;;  %v13611_v1 = vld [vmem:[%s18240_s0 + $0x1464] ss:$100 sps:$4 sm:$0xff]   ;;  %v13613_v2 = vld [vmem:[%s18240_s0 + $0xe54] ss:$100 sps:$4 sm:$0xff]  }
 0x2a3   :  { %8870 = vmatprep.mubr.bf16.mxu0 %v13523_v3  ;;  %9104 = vmatpush1.bf16.msra.mxu0 %v13603_v4  ;;  %v13615_v3 = vld [vmem:[%s18240_s0 + $0x1460] ss:$100 sps:$4 sm:$0xff]   ;;  %v13616_v4 = vld [vmem:[%s18240_s0 + $0xe50] ss:$100 sps:$4 sm:$0xff]  }
 0x2a4   :  { %9105 = vmatprep.subr.bf16.mxu0 %v14338_v0 }
 0x2a7   :  { %9106 = vmatpush1.bf16.msra.mxu0 %v13617_v6  ;;  %v13621_v6 = vld [vmem:[%s18240_s0 + $0xf1c] ss:$100 sps:$4 sm:$0xff]  }
 0x2a8   :  { %9107 = vmatprep.subr.bf16.mxu0 %v14338_v0 }
 0x2a9   :  { %7201 = vmatmul.mubr.bf16.gmra.mrb[52].mxu1 %v13525_v7  ;;  %v13623_v7 = vld [vmem:[%s18240_s0 + $0x1528] ss:$100 sps:$4 sm:$0xff]  }
 0x2aa   :  { %8871 = vmatmul.mubr.bf16.gmra.mrb[20].mxu0 %v13526_v8  ;;  %7208 = vmatprep.mubr.bf16.mxu1 %v13527_v9  ;;  %v13624_v8 = vld [vmem:[%s18240_s0 + $0xf18] ss:$100 sps:$4 sm:$0xff]  }
 0x2ab   :  { %8878 = vmatprep.mubr.bf16.mxu0 %v13529_v10  ;;  %9108 = vmatpush1.bf16.msra.mxu0 %v13631_v11  ;;  %v13625_v9 = vld [vmem:[%s18240_s0 + $0x15f4] ss:$100 sps:$4 sm:$0xff]   ;;  %v13627_v10 = vld [vmem:[%s18240_s0 + $0xfe4] ss:$100 sps:$4 sm:$0xff]  }
 0x2ac   :  { %9109 = vmatprep.subr.bf16.mxu0 %v14338_v0  ;;  %v13629_v11 = vld [vmem:[%s18240_s0 + $0x15f0] ss:$100 sps:$4 sm:$0xff]  }
 0x2af   :  { %9110 = vmatpush1.bf16.msra.mxu0 %v13645_v16  ;;  %v13638_v16 = vld [vmem:[%s18240_s0 + $0x10a8] ss:$100 sps:$4 sm:$0xff]  }
 0x2b0   :  { %9111 = vmatprep.subr.bf16.mxu0 %v14338_v0 }
 0x2b1   :  { %7209 = vmatmul.mubr.bf16.gmra.mrb[56].mxu1 %v13531_v12  ;;  %v13630_v12 = vld [vmem:[%s18240_s0 + $0xfe0] ss:$100 sps:$4 sm:$0xff]  }
 0x2b2   :  { %8879 = vmatmul.mubr.bf16.gmra.mrb[24].mxu0 %v13532_v13  ;;  %7216 = vmatprep.mubr.bf16.mxu1 %v13535_v14  ;;  %v13633_v13 = vld [vmem:[%s18240_s0 + $0x16bc] ss:$100 sps:$4 sm:$0xff]   ;;  %v13635_v14 = vld [vmem:[%s18240_s0 + $0x10ac] ss:$100 sps:$4 sm:$0xff]  }
 0x2b3   :  { %8886 = vmatprep.mubr.bf16.mxu0 %v13537_v15  ;;  %9112 = vmatpush1.bf16.msra.mxu0 %v13659_v26  ;;  %v13637_v15 = vld [vmem:[%s18240_s0 + $0x16b8] ss:$100 sps:$4 sm:$0xff]   ;;  %v13656_v26 = vld [vmem:[%s18240_s0 + $0x1304] ss:$100 sps:$4 sm:$0xff]  }
 0x2b4   :  { %9113 = vmatprep.subr.bf16.mxu0 %v14338_v0 }
 0x2b7   :  { %9114 = vmatpush1.bf16.msra.mxu0 %v13673_v35  ;;  %v13667_v35 = vld [vmem:[%s18240_s0 + $0x1ac] ss:$100 sps:$4 sm:$0xff]  }
 0x2b8   :  { %9115 = vmatprep.subr.bf16.mxu0 %v14338_v0 }
 0x2b9   :  { %7217 = vmatmul.mubr.bf16.gmra.mrb[60].mxu1 %v13539_v18  ;;  %v13641_v18 = vld [vmem:[%s18240_s0 + $0x1174] ss:$100 sps:$4 sm:$0xff]  }
 0x2ba   :  { %8887 = vmatmul.mubr.bf16.gmra.mrb[28].mxu0 %v13540_v19  ;;  %7224 = vmatprep.mubr.bf16.mxu1 %v13541_v20  ;;  %v13643_v19 = vld [vmem:[%s18240_s0 + $0x1780] ss:$100 sps:$4 sm:$0xff]   ;;  %v13644_v20 = vld [vmem:[%s18240_s0 + $0x1170] ss:$100 sps:$4 sm:$0xff]  }
 0x2bb   :  { %8894 = vmatprep.mubr.bf16.mxu0 %v13543_v21  ;;  %9116 = vmatpush1.bf16.msra.mxu0 %v13687_v44  ;;  %v13647_v21 = vld [vmem:[%s18240_s0 + $0x184c] ss:$100 sps:$4 sm:$0xff]  }
 0x2bc   :  { %9117 = vmatprep.subr.bf16.mxu0 %v14338_v0  ;;  %v13730_v44 = vld [vmem:[%s18239_s1 + $0x228] sm:$0xff]  }
 0x2bf   :  { %9118 = vmatpush1.bf16.msra.mxu0 %v13701_v53  ;;  %v13689_v53 = vld [vmem:[%s18240_s0 + $0x404] ss:$100 sps:$4 sm:$0xff]  }
 0x2c0   :  { %9376 = vmatprep.subr.bf16.mxu0 %v14338_v0 }
 0x2c1   :  { %7225 = vmatmul.mubr.bf16.gmra.mrb[64].mxu1 %v13545_v22  ;;  %v13649_v22 = vld [vmem:[%s18240_s0 + $0x123c] ss:$100 sps:$4 sm:$0xff]  }
 0x2c2   :  { %8895 = vmatmul.mubr.bf16.gmra.mrb[32].mxu0 %v13546_v23  ;;  %7232 = vmatprep.mubr.bf16.mxu1 %v13549_v24  ;;  %v13651_v23 = vld [vmem:[%s18240_s0 + $0x1848] ss:$100 sps:$4 sm:$0xff]   ;;  %v13652_v24 = vld [vmem:[%s18240_s0 + $0x1238] ss:$100 sps:$4 sm:$0xff]  }
 0x2c3   :  { %8902 = vmatprep.mubr.bf16.mxu0 %v13551_v25  ;;  %v13655_v25 = vld [vmem:[%s18240_s0 + $0x1c] ss:$100 sps:$4 sm:$0xff]  }
 0x2c9   :  { %7233 = vmatmul.mubr.bf16.gmra.mrb[68].mxu1 %v13553_v27  ;;  %v13653_v27 = vld [vmem:[%s18240_s0 + $0x18] ss:$100 sps:$4 sm:$0xff]  }
 0x2ca   :  { %8903 = vmatmul.mubr.bf16.gmra.mrb[36].mxu0 %v13554_v28  ;;  %7240 = vmatprep.mubr.bf16.mxu1 %v13555_v29  ;;  %v13658_v28 = vld [vmem:[%s18240_s0 + $0x1300] ss:$100 sps:$4 sm:$0xff]  }
 0x2cb   :  { %8910 = vmatprep.mubr.bf16.mxu0 %v13557_v30  ;;  %v13660_v29 = vld [vmem:[%s18239_s1 + $0x200] sm:$0xff]  }
 0x2cc   :  { %v13661_v30 = vld [vmem:[%s18240_s0 + $0xe4] ss:$100 sps:$4 sm:$0xff]  }
 0x2d1   :  { %7241 = vmatmul.mubr.bf16.gmra.mrb[72].mxu1 %v13559_v31  ;;  %v13663_v31 = vld [vmem:[%s18240_s0 + $0x13cc] ss:$100 sps:$4 sm:$0xff]  }
 0x2d2   :  { %8911 = vmatmul.mubr.bf16.gmra.mrb[40].mxu0 %v13560_v32  ;;  %7248 = vmatprep.mubr.bf16.mxu1 %v13563_v33  ;;  %v13674_v32 = vld [vmem:[%s18239_s1 + $0x208] sm:$0xff]   ;;  %v13665_v33 = vld [vmem:[%s18240_s0 + $0xe0] ss:$100 sps:$4 sm:$0xff]  }
 0x2d3   :  { %8918 = vmatprep.mubr.bf16.mxu0 %v13565_v34  ;;  %v13666_v34 = vld [vmem:[%s18240_s0 + $0x13c8] ss:$100 sps:$4 sm:$0xff]  }
 0x2d9   :  { %7249 = vmatmul.mubr.bf16.gmra.mrb[76].mxu1 %v13567_v36  ;;  %v13669_v36 = vld [vmem:[%s18240_s0 + $0x1494] ss:$100 sps:$4 sm:$0xff]  }
 0x2da   :  { %8919 = vmatmul.mubr.bf16.gmra.mrb[44].mxu0 %v13568_v37  ;;  %7256 = vmatprep.mubr.bf16.mxu1 %v13569_v38  ;;  %v13688_v37 = vld [vmem:[%s18239_s1 + $0x210] sm:$0xff]   ;;  %v13702_v38 = vld [vmem:[%s18239_s1 + $0x218] sm:$0xff]  }
 0x2db   :  { %8926 = vmatprep.mubr.bf16.mxu0 %v13571_v39  ;;  %v13671_v39 = vld [vmem:[%s18240_s0 + $0x1a8] ss:$100 sps:$4 sm:$0xff]  }
 0x2e1   :  { %7257 = vmatmul.mubr.bf16.gmra.mrb[80].mxu1 %v13573_v40  ;;  %v13672_v40 = vld [vmem:[%s18240_s0 + $0x1490] ss:$100 sps:$4 sm:$0xff]  }
 0x2e2   :  { %8927 = vmatmul.mubr.bf16.gmra.mrb[48].mxu0 %v13574_v41  ;;  %7264 = vmatprep.mubr.bf16.mxu1 %v13577_v42  ;;  %v13675_v41 = vld [vmem:[%s18240_s0 + $0x274] ss:$100 sps:$4 sm:$0xff]   ;;  %v13677_v42 = vld [vmem:[%s18240_s0 + $0x155c] ss:$100 sps:$4 sm:$0xff]  }
 0x2e3   :  { %8934 = vmatprep.mubr.bf16.mxu0 %v13579_v43  ;;  %v13716_v43 = vld [vmem:[%s18239_s1 + $0x220] sm:$0xff]  }
 0x2e9   :  { %7265 = vmatmul.mubr.bf16.gmra.mrb[84].mxu1 %v13581_v45  ;;  %v13679_v45 = vld [vmem:[%s18240_s0 + $0x270] ss:$100 sps:$4 sm:$0xff]  }
 0x2ea   :  { %8935 = vmatmul.mubr.bf16.gmra.mrb[52].mxu0 %v13582_v46  ;;  %7272 = vmatprep.mubr.bf16.mxu1 %v13583_v47  ;;  %v13680_v46 = vld [vmem:[%s18240_s0 + $0x1558] ss:$100 sps:$4 sm:$0xff]  }
 0x2eb   :  { %8942 = vmatprep.mubr.bf16.mxu0 %v13585_v48  ;;  %v13681_v47 = vld [vmem:[%s18240_s0 + $0x33c] ss:$100 sps:$4 sm:$0xff]   ;;  %v13683_v48 = vld [vmem:[%s18240_s0 + $0x1624] ss:$100 sps:$4 sm:$0xff]  }
 0x2f1   :  { %7273 = vmatmul.mubr.bf16.gmra.mrb[88].mxu1 %v13587_v49  ;;  %v13744_v49 = vld [vmem:[%s18239_s1 + $0x230] sm:$0xff]  }
 0x2f2   :  { %8943 = vmatmul.mubr.bf16.gmra.mrb[56].mxu0 %v13588_v50  ;;  %7280 = vmatprep.mubr.bf16.mxu1 %v13591_v51  ;;  %v13758_v50 = vld [vmem:[%s18239_s1 + $0x238] sm:$0xff]  }
 0x2f3   :  { %8950 = vmatprep.mubr.bf16.mxu0 %v13593_v52  ;;  %v13685_v51 = vld [vmem:[%s18240_s0 + $0x338] ss:$100 sps:$4 sm:$0xff]   ;;  %v13686_v52 = vld [vmem:[%s18240_s0 + $0x1620] ss:$100 sps:$4 sm:$0xff]  }
 0x2f9   :  { %7281 = vmatmul.mubr.bf16.gmra.mrb[92].mxu1 %v13595_v54  ;;  %v13691_v54 = vld [vmem:[%s18240_s0 + $0x16ec] ss:$100 sps:$4 sm:$0xff]  }
 0x2fa   :  { %8951 = vmatmul.mubr.bf16.gmra.mrb[60].mxu0 %v13596_v55  ;;  %7288 = vmatprep.mubr.bf16.mxu1 %v13597_v56  ;;  %v13772_v55 = vld [vmem:[%s18239_s1 + $0x240] sm:$0xff]   ;;  %v13786_v56 = vld [vmem:[%s18239_s1 + $0x248] sm:$0xff]  }
 0x2fb   :  { %8958 = vmatprep.mubr.bf16.mxu0 %v13599_v57  ;;  %v13693_v57 = vld [vmem:[%s18240_s0 + $0x400] ss:$100 sps:$4 sm:$0xff]  }
 0x301   :  { %7289 = vmatmul.mubr.bf16.gmra.mrb[96].mxu1 %v13601_v58  ;;  %v13694_v58 = vld [vmem:[%s18240_s0 + $0x16e8] ss:$100 sps:$4 sm:$0xff]  }
 0x302   :  { %8959 = vmatmul.mubr.bf16.gmra.mrb[64].mxu0 %v13602_v59  ;;  %7296 = vmatprep.mubr.bf16.mxu1 %v13605_v60  ;;  %v13695_v59 = vld [vmem:[%s18240_s0 + $0x4cc] ss:$100 sps:$4 sm:$0xff]   ;;  %v13697_v60 = vld [vmem:[%s18240_s0 + $0x17b4] ss:$100 sps:$4 sm:$0xff]  }
 0x303   :  { %8966 = vmatprep.mubr.bf16.mxu0 %v13607_v61  ;;  %v13800_v61 = vld [vmem:[%s18239_s1 + $0x250] sm:$0xff]  }
 0x309   :  { %7297 = vmatmul.mubr.bf16.gmra.mrb[100].mxu1 %v13609_v62  ;;  %v13699_v62 = vld [vmem:[%s18240_s0 + $0x4c8] ss:$100 sps:$4 sm:$0xff]  }
 0x30a   :  { %8967 = vmatmul.mubr.bf16.gmra.mrb[68].mxu0 %v13610_v63  ;;  %7304 = vmatprep.mubr.bf16.mxu1 %v13611_v1  ;;  %v13700_v63 = vld [vmem:[%s18240_s0 + $0x17b0] ss:$100 sps:$4 sm:$0xff]  }
 0x30b   :  { %8974 = vmatprep.mubr.bf16.mxu0 %v13613_v2  ;;  %v13703_v1 = vld [vmem:[%s18240_s0 + $0x594] ss:$100 sps:$4 sm:$0xff]   ;;  %v13705_v2 = vld [vmem:[%s18240_s0 + $0x187c] ss:$100 sps:$4 sm:$0xff]  }
 0x311   :  { %7305 = vmatmul.mubr.bf16.gmra.mrb[104].mxu1 %v13615_v3  ;;  %v13814_v3 = vld [vmem:[%s18239_s1 + $0x258] sm:$0xff]  }
 0x312   :  { %8975 = vmatmul.mubr.bf16.gmra.mrb[72].mxu0 %v13616_v4  ;;  %7312 = vmatprep.mubr.bf16.mxu1 %v13619_v5  ;;  %v13707_v4 = vld [vmem:[%s18240_s0 + $0x590] ss:$100 sps:$4 sm:$0xff]   ;;  %v13708_v5 = vld [vmem:[%s18240_s0 + $0x1878] ss:$100 sps:$4 sm:$0xff]  }
 0x313   :  { %8982 = vmatprep.mubr.bf16.mxu0 %v13621_v6  ;;  %v13709_v6 = vld [vmem:[%s18240_s0 + $0x65c] ss:$100 sps:$4 sm:$0xff]  }
 0x319   :  { %7313 = vmatmul.mubr.bf16.gmra.mrb[108].mxu1 %v13623_v7  ;;  %v13713_v7 = vld [vmem:[%s18240_s0 + $0x4c] ss:$100 sps:$4 sm:$0xff]  }
 0x31a   :  { %8983 = vmatmul.mubr.bf16.gmra.mrb[76].mxu0 %v13624_v8  ;;  %7320 = vmatprep.mubr.bf16.mxu1 %v13625_v9  ;;  %v13714_v8 = vld [vmem:[%s18240_s0 + $0x658] ss:$100 sps:$4 sm:$0xff]   ;;  %v13711_v9 = vld [vmem:[%s18240_s0 + $0x48] ss:$100 sps:$4 sm:$0xff]  }
 0x31b   :  { %8990 = vmatprep.mubr.bf16.mxu0 %v13627_v10  ;;  %v13717_v10 = vld [vmem:[%s18240_s0 + $0x724] ss:$100 sps:$4 sm:$0xff]  }
 0x321   :  { %7321 = vmatmul.mubr.bf16.gmra.mrb[112].mxu1 %v13629_v11  ;;  %v13715_v11 = vld [vmem:[%s18239_s1 + $0x500] sm:$0xff]  }
 0x322   :  { %8991 = vmatmul.mubr.bf16.gmra.mrb[80].mxu0 %v13630_v12  ;;  %7328 = vmatprep.mubr.bf16.mxu1 %v13633_v13  ;;  %v13719_v12 = vld [vmem:[%s18240_s0 + $0x114] ss:$100 sps:$4 sm:$0xff]   ;;  %v13828_v13 = vld [vmem:[%s18239_s1 + $0x260] sm:$0xff]  }
 0x323   :  { %8998 = vmatprep.mubr.bf16.mxu0 %v13635_v14  ;;  %v13729_v14 = vld [vmem:[%s18239_s1 + $0x508] sm:$0xff]  }
 0x329   :  { %7329 = vmatmul.mubr.bf16.gmra.mrb[116].mxu1 %v13637_v15  ;;  %v13721_v15 = vld [vmem:[%s18240_s0 + $0x720] ss:$100 sps:$4 sm:$0xff]  }
 0x32a   :  { %8999 = vmatmul.mubr.bf16.gmra.mrb[84].mxu0 %v13638_v16  ;;  %7336 = vmatprep.mubr.bf16.mxu1 %v13639_v17  ;;  %v13722_v16 = vld [vmem:[%s18240_s0 + $0x110] ss:$100 sps:$4 sm:$0xff]  }
 0x32b   :  { %9006 = vmatprep.mubr.bf16.mxu0 %v13641_v18  ;;  %v13723_v17 = vld [vmem:[%s18240_s0 + $0x7ec] ss:$100 sps:$4 sm:$0xff]   ;;  %v13725_v18 = vld [vmem:[%s18240_s0 + $0x1dc] ss:$100 sps:$4 sm:$0xff]  }
 0x331   :  { %7337 = vmatmul.mubr.bf16.gmra.mrb[120].mxu1 %v13643_v19  ;;  %v13743_v19 = vld [vmem:[%s18239_s1 + $0x510] sm:$0xff]  }
 0x332   :  { %9007 = vmatmul.mubr.bf16.gmra.mrb[88].mxu0 %v13644_v20  ;;  %7344 = vmatprep.mubr.bf16.mxu1 %v13647_v21  ;;  %v13757_v20 = vld [vmem:[%s18239_s1 + $0x518] sm:$0xff]   ;;  %v13727_v21 = vld [vmem:[%s18240_s0 + $0x7e8] ss:$100 sps:$4 sm:$0xff]  }
 0x333   :  { %9014 = vmatprep.mubr.bf16.mxu0 %v13649_v22  ;;  %v13728_v22 = vld [vmem:[%s18240_s0 + $0x1d8] ss:$100 sps:$4 sm:$0xff]  }
 0x339   :  { %7345 = vmatmul.mubr.bf16.gmra.mrb[124].mxu1 %v13651_v23  ;;  %v13731_v23 = vld [vmem:[%s18240_s0 + $0x8b4] ss:$100 sps:$4 sm:$0xff]  }
 0x33a   :  { %9015 = vmatmul.mubr.bf16.gmra.mrb[92].mxu0 %v13652_v24  ;;  %7385 = vmatprep.mubr.bf16.mxu1 %v13655_v25  ;;  %v13733_v24 = vld [vmem:[%s18240_s0 + $0x2a4] ss:$100 sps:$4 sm:$0xff]  }
 0x33b   :  { %9022 = vmatprep.mubr.bf16.mxu0 %v13656_v26  ;;  %v13771_v25 = vld [vmem:[%s18239_s1 + $0x520] sm:$0xff]   ;;  %v13842_v26 = vld [vmem:[%s18239_s1 + $0x268] sm:$0xff]  }
 0x341   :  { %7386 = vmatmul.mubr.bf16.vlgmr.msra.gmra.mrb[0].mxu1 %v13653_v27  ;;  %v13785_v27 = vld [vmem:[%s18239_s1 + $0x528] sm:$0xff]  }
 0x342   :  { %9023 = vmatmul.mubr.bf16.gmra.mrb[96].mxu0 %v13658_v28  ;;  %7643 = vmatpush1.bf16.msra.mxu1 %v13660_v29  ;;  %v13735_v28 = vld [vmem:[%s18240_s0 + $0x8b0] ss:$100 sps:$4 sm:$0xff]   ;;  %v13736_v29 = vld [vmem:[%s18240_s0 + $0x2a0] ss:$100 sps:$4 sm:$0xff]  }
 0x343   :  { %7393 = vmatprep.mubr.bf16.mxu1 %v13661_v30  ;;  %9030 = vmatprep.mubr.bf16.mxu0 %v13663_v31  ;;  %v13737_v30 = vld [vmem:[%s18240_s0 + $0x97c] ss:$100 sps:$4 sm:$0xff]   ;;  %v13739_v31 = vld [vmem:[%s18240_s0 + $0x36c] ss:$100 sps:$4 sm:$0xff]  }
 0x344   :  { %7644 = vmatprep.subr.bf16.mxu1 %v14338_v0 }
 0x346   :  { %7645 = vmatpush1.bf16.msra.mxu1 %v13674_v32  ;;  %v13799_v32 = vld [vmem:[%s18239_s1 + $0x530] sm:$0xff]  }
 0x347   :  { %7646 = vmatprep.subr.bf16.mxu1 %v14338_v0 }
 0x349   :  { %7394 = vmatmul.mubr.bf16.gmra.mrb[4].mxu1 %v13665_v33  ;;  %v13813_v33 = vld [vmem:[%s18239_s1 + $0x538] sm:$0xff]  }
 0x34a   :  { %9031 = vmatmul.mubr.bf16.gmra.mrb[100].mxu0 %v13666_v34  ;;  %7401 = vmatprep.mubr.bf16.mxu1 %v13667_v35  ;;  %v13741_v34 = vld [vmem:[%s18240_s0 + $0x978] ss:$100 sps:$4 sm:$0xff]   ;;  %v13742_v35 = vld [vmem:[%s18240_s0 + $0x368] ss:$100 sps:$4 sm:$0xff]  }
 0x34b   :  { %9038 = vmatprep.mubr.bf16.mxu0 %v13669_v36  ;;  %7647 = vmatpush1.bf16.msra.mxu1 %v13688_v37  ;;  %v13745_v36 = vld [vmem:[%s18240_s0 + $0xa44] ss:$100 sps:$4 sm:$0xff]   ;;  %v13747_v37 = vld [vmem:[%s18240_s0 + $0x434] ss:$100 sps:$4 sm:$0xff]  }
 0x34c   :  { %7648 = vmatprep.subr.bf16.mxu1 %v14338_v0 }
 0x34f   :  { %7649 = vmatpush1.bf16.msra.mxu1 %v13702_v38  ;;  %v13827_v38 = vld [vmem:[%s18239_s1 + $0x540] sm:$0xff]  }
 0x350   :  { %7650 = vmatprep.subr.bf16.mxu1 %v14338_v0 }
 0x351   :  { %7402 = vmatmul.mubr.bf16.gmra.mrb[8].mxu1 %v13671_v39  ;;  %v13856_v39 = vld [vmem:[%s18239_s1 + $0x270] sm:$0xff]  }
 0x352   :  { %9039 = vmatmul.mubr.bf16.gmra.mrb[104].mxu0 %v13672_v40  ;;  %7409 = vmatprep.mubr.bf16.mxu1 %v13675_v41  ;;  %v13841_v40 = vld [vmem:[%s18239_s1 + $0x548] sm:$0xff]   ;;  %v13749_v41 = vld [vmem:[%s18240_s0 + $0xa40] ss:$100 sps:$4 sm:$0xff]  }
 0x353   :  { %9046 = vmatprep.mubr.bf16.mxu0 %v13677_v42  ;;  %7651 = vmatpush1.bf16.msra.mxu1 %v13716_v43  ;;  %v13750_v42 = vld [vmem:[%s18240_s0 + $0x430] ss:$100 sps:$4 sm:$0xff]  }
 0x354   :  { %7652 = vmatprep.subr.bf16.mxu1 %v14338_v0  ;;  %v13751_v43 = vld [vmem:[%s18240_s0 + $0xb0c] ss:$100 sps:$4 sm:$0xff]  }
 0x357   :  { %7653 = vmatpush1.bf16.msra.mxu1 %v13730_v44  ;;  %v13753_v44 = vld [vmem:[%s18240_s0 + $0x4fc] ss:$100 sps:$4 sm:$0xff]  }
 0x358   :  { %7654 = vmatprep.subr.bf16.mxu1 %v14338_v0 }
 0x359   :  { %7410 = vmatmul.mubr.bf16.gmra.mrb[12].mxu1 %v13679_v45  ;;  %v13855_v45 = vld [vmem:[%s18239_s1 + $0x550] sm:$0xff]  }
 0x35a   :  { %9047 = vmatmul.mubr.bf16.gmra.mrb[108].mxu0 %v13680_v46  ;;  %7417 = vmatprep.mubr.bf16.mxu1 %v13681_v47  ;;  %v13755_v46 = vld [vmem:[%s18240_s0 + $0xb08] ss:$100 sps:$4 sm:$0xff]   ;;  %v13756_v47 = vld [vmem:[%s18240_s0 + $0x4f8] ss:$100 sps:$4 sm:$0xff]  }
 0x35b   :  { %9054 = vmatprep.mubr.bf16.mxu0 %v13683_v48  ;;  %7655 = vmatpush1.bf16.msra.mxu1 %v13744_v49  ;;  %v13759_v48 = vld [vmem:[%s18240_s0 + $0xbd4] ss:$100 sps:$4 sm:$0xff]   ;;  %v13761_v49 = vld [vmem:[%s18240_s0 + $0x5c4] ss:$100 sps:$4 sm:$0xff]  }
 0x35c   :  { %7656 = vmatprep.subr.bf16.mxu1 %v14338_v0 }
 0x35f   :  { %7657 = vmatpush1.bf16.msra.mxu1 %v13758_v50  ;;  %v13869_v50 = vld [vmem:[%s18239_s1 + $0x558] sm:$0xff]  }
 0x360   :  { %7658 = vmatprep.subr.bf16.mxu1 %v14338_v0 }
 0x361   :  { %7418 = vmatmul.mubr.bf16.gmra.mrb[16].mxu1 %v13685_v51  ;;  %v13870_v51 = vld [vmem:[%s18239_s1 + $0x278] sm:$0xff]  }
 0x362   :  { %9055 = vmatmul.mubr.bf16.gmra.mrb[112].mxu0 %v13686_v52  ;;  %7425 = vmatprep.mubr.bf16.mxu1 %v13689_v53  ;;  %v13763_v52 = vld [vmem:[%s18240_s0 + $0xbd0] ss:$100 sps:$4 sm:$0xff]   ;;  %v13764_v53 = vld [vmem:[%s18240_s0 + $0x5c0] ss:$100 sps:$4 sm:$0xff]  }
 0x363   :  { %9062 = vmatprep.mubr.bf16.mxu0 %v13691_v54  ;;  %7659 = vmatpush1.bf16.msra.mxu1 %v13772_v55  ;;  %v13765_v54 = vld [vmem:[%s18240_s0 + $0xc9c] ss:$100 sps:$4 sm:$0xff]   ;;  %v13767_v55 = vld [vmem:[%s18240_s0 + $0x68c] ss:$100 sps:$4 sm:$0xff]  }
 0x364   :  { %7660 = vmatprep.subr.bf16.mxu1 %v14338_v0 }
 0x367   :  { %7661 = vmatpush1.bf16.msra.mxu1 %v13786_v56  ;;  %v13769_v56 = vld [vmem:[%s18240_s0 + $0xc98] ss:$100 sps:$4 sm:$0xff]  }
 0x368   :  { %7662 = vmatprep.subr.bf16.mxu1 %v14338_v0 }
 0x369   :  { %7426 = vmatmul.mubr.bf16.gmra.mrb[20].mxu1 %v13693_v57  ;;  %v13770_v57 = vld [vmem:[%s18240_s0 + $0x688] ss:$100 sps:$4 sm:$0xff]  }
 0x36a   :  { %9063 = vmatmul.mubr.bf16.gmra.mrb[116].mxu0 %v13694_v58  ;;  %7433 = vmatprep.mubr.bf16.mxu1 %v13695_v59  ;;  %v13773_v58 = vld [vmem:[%s18240_s0 + $0xd64] ss:$100 sps:$4 sm:$0xff]   ;;  %v13775_v59 = vld [vmem:[%s18240_s0 + $0x754] ss:$100 sps:$4 sm:$0xff]  }
 0x36b   :  { %9070 = vmatprep.mubr.bf16.mxu0 %v13697_v60  ;;  %7663 = vmatpush1.bf16.msra.mxu1 %v13800_v61  ;;  %v13883_v60 = vld [vmem:[%s18239_s1 + $0x560] sm:$0xff]  }
 0x36c   :  { %7664 = vmatprep.subr.bf16.mxu1 %v14338_v0  ;;  %v13777_v61 = vld [vmem:[%s18240_s0 + $0xd60] ss:$100 sps:$4 sm:$0xff]  }
 0x36f   :  { %7665 = vmatpush1.bf16.msra.mxu1 %v13814_v3  ;;  %v13784_v3 = vld [vmem:[%s18240_s0 + $0x818] ss:$100 sps:$4 sm:$0xff]  }
 0x370   :  { %7666 = vmatprep.subr.bf16.mxu1 %v14338_v0 }
 0x371   :  { %7434 = vmatmul.mubr.bf16.gmra.mrb[24].mxu1 %v13699_v62  ;;  %v13778_v62 = vld [vmem:[%s18240_s0 + $0x750] ss:$100 sps:$4 sm:$0xff]  }
 0x372   :  { %9071 = vmatmul.mubr.bf16.gmra.mrb[120].mxu0 %v13700_v63  ;;  %7441 = vmatprep.mubr.bf16.mxu1 %v13703_v1  ;;  %v13779_v63 = vld [vmem:[%s18240_s0 + $0xe2c] ss:$100 sps:$4 sm:$0xff]   ;;  %v13781_v1 = vld [vmem:[%s18240_s0 + $0x81c] ss:$100 sps:$4 sm:$0xff]  }
 0x373   :  { %9078 = vmatprep.mubr.bf16.mxu0 %v13705_v2  ;;  %7667 = vmatpush1.bf16.msra.mxu1 %v13828_v13  ;;  %v13783_v2 = vld [vmem:[%s18240_s0 + $0xe28] ss:$100 sps:$4 sm:$0xff]  }
 0x374   :  { %7668 = vmatprep.subr.bf16.mxu1 %v14338_v0  ;;  %v13801_v13 = vld [vmem:[%s18240_s0 + $0x1084] ss:$100 sps:$4 sm:$0xff]  }
 0x377   :  { %7669 = vmatpush1.bf16.msra.mxu1 %v13842_v26  ;;  %v13820_v26 = vld [vmem:[%s18240_s0 + $0xc00] ss:$100 sps:$4 sm:$0xff]  }
 0x378   :  { %7670 = vmatprep.subr.bf16.mxu1 %v14338_v0 }
 0x379   :  { %7442 = vmatmul.mubr.bf16.gmra.mrb[28].mxu1 %v13707_v4  ;;  %v13787_v4 = vld [vmem:[%s18240_s0 + $0xef4] ss:$100 sps:$4 sm:$0xff]  }
 0x37a   :  { %9079 = vmatmul.mubr.bf16.gmra.mrb[124].mxu0 %v13708_v5  ;;  %7449 = vmatprep.mubr.bf16.mxu1 %v13709_v6  ;;  %v13789_v5 = vld [vmem:[%s18240_s0 + $0x8e4] ss:$100 sps:$4 sm:$0xff]  }
 0x37b   :  { %9119 = vmatprep.mubr.bf16.mxu0 %v13713_v7  ;;  %7671 = vmatpush1.bf16.msra.mxu1 %v13856_v39  ;;  %v13896_v6 = vld [vmem:[%s18239_s1 + $0x568] sm:$0xff]   ;;  %v13791_v7 = vld [vmem:[%s18240_s0 + $0xef0] ss:$100 sps:$4 sm:$0xff]  }
 0x37c   :  { %7672 = vmatprep.subr.bf16.mxu1 %v14338_v0  ;;  %v13843_v39 = vld [vmem:[%s18240_s0 + $0x1534] ss:$100 sps:$4 sm:$0xff]  }
 0x37f   :  { %7673 = vmatpush1.bf16.msra.mxu1 %v13870_v51  ;;  %v13863_v51 = vld [vmem:[%s18240_s0 + $0x178c] ss:$100 sps:$4 sm:$0xff]  }
 0x380   :  { %11496 = vmatprep.subr.bf16.mxu1 %v14338_v0 }
 0x381   :  { %7450 = vmatmul.mubr.bf16.gmra.mrb[32].mxu1 %v13714_v8  ;;  %v13792_v8 = vld [vmem:[%s18240_s0 + $0x8e0] ss:$100 sps:$4 sm:$0xff]  }
 0x382   :  { %9120 = vmatmul.mubr.bf16.vlgmr.msra.gmra.mrb[0].mxu0 %v13711_v9  ;;  %7457 = vmatprep.mubr.bf16.mxu1 %v13717_v10  ;;  %v13793_v9 = vld [vmem:[%s18240_s0 + $0xfbc] ss:$100 sps:$4 sm:$0xff]   ;;  %v13795_v10 = vld [vmem:[%s18240_s0 + $0x9ac] ss:$100 sps:$4 sm:$0xff]  }
 0x383   :  { %9377 = vmatpush1.bf16.msra.mxu0 %v13715_v11  ;;  %9127 = vmatprep.mubr.bf16.mxu0 %v13719_v12  ;;  %v13797_v11 = vld [vmem:[%s18240_s0 + $0xfb8] ss:$100 sps:$4 sm:$0xff]   ;;  %v13798_v12 = vld [vmem:[%s18240_s0 + $0x9a8] ss:$100 sps:$4 sm:$0xff]  }
 0x384   :  { %9378 = vmatprep.subr.bf16.mxu0 %v14338_v0 }
 0x387   :  { %9379 = vmatpush1.bf16.msra.mxu0 %v13729_v14  ;;  %v13803_v14 = vld [vmem:[%s18240_s0 + $0xa74] ss:$100 sps:$4 sm:$0xff]  }
 0x388   :  { %9380 = vmatprep.subr.bf16.mxu0 %v14338_v0 }
 0x389   :  { %7458 = vmatmul.mubr.bf16.gmra.mrb[36].mxu1 %v13721_v15  ;;  %v13909_v15 = vld [vmem:[%s18239_s1 + $0x570] sm:$0xff]  }
 0x38a   :  { %9128 = vmatmul.mubr.bf16.gmra.mrb[4].mxu0 %v13722_v16  ;;  %7465 = vmatprep.mubr.bf16.mxu1 %v13723_v17  ;;  %v13805_v16 = vld [vmem:[%s18240_s0 + $0x1080] ss:$100 sps:$4 sm:$0xff]   ;;  %v13806_v17 = vld [vmem:[%s18240_s0 + $0xa70] ss:$100 sps:$4 sm:$0xff]  }
 0x38b   :  { %9135 = vmatprep.mubr.bf16.mxu0 %v13725_v18  ;;  %9381 = vmatpush1.bf16.msra.mxu0 %v13743_v19  ;;  %v13807_v18 = vld [vmem:[%s18240_s0 + $0x114c] ss:$100 sps:$4 sm:$0xff]   ;;  %v13809_v19 = vld [vmem:[%s18240_s0 + $0xb3c] ss:$100 sps:$4 sm:$0xff]  }
 0x38c   :  { %9382 = vmatprep.subr.bf16.mxu0 %v14338_v0 }
 0x38f   :  { %9383 = vmatpush1.bf16.msra.mxu0 %v13757_v20  ;;  %v13811_v20 = vld [vmem:[%s18240_s0 + $0x1148] ss:$100 sps:$4 sm:$0xff]  }
 0x390   :  { %9384 = vmatprep.subr.bf16.mxu0 %v14338_v0 }
 0x391   :  { %7466 = vmatmul.mubr.bf16.gmra.mrb[40].mxu1 %v13727_v21  ;;  %v13812_v21 = vld [vmem:[%s18240_s0 + $0xb38] ss:$100 sps:$4 sm:$0xff]  }
 0x392   :  { %9136 = vmatmul.mubr.bf16.gmra.mrb[8].mxu0 %v13728_v22  ;;  %7473 = vmatprep.mubr.bf16.mxu1 %v13731_v23  ;;  %v13815_v22 = vld [vmem:[%s18240_s0 + $0x1214] ss:$100 sps:$4 sm:$0xff]   ;;  %v13817_v23 = vld [vmem:[%s18240_s0 + $0xc04] ss:$100 sps:$4 sm:$0xff]  }
 0x393   :  { %9143 = vmatprep.mubr.bf16.mxu0 %v13733_v24  ;;  %9385 = vmatpush1.bf16.msra.mxu0 %v13771_v25  ;;  %v13922_v24 = vld [vmem:[%s18239_s1 + $0x578] sm:$0xff]   ;;  %v13819_v25 = vld [vmem:[%s18240_s0 + $0x1210] ss:$100 sps:$4 sm:$0xff]  }
 0x394   :  { %9386 = vmatprep.subr.bf16.mxu0 %v14338_v0 }
 0x397   :  { %9387 = vmatpush1.bf16.msra.mxu0 %v13785_v27  ;;  %v13821_v27 = vld [vmem:[%s18240_s0 + $0x12dc] ss:$100 sps:$4 sm:$0xff]  }
 0x398   :  { %9388 = vmatprep.subr.bf16.mxu0 %v14338_v0 }
 0x399   :  { %7474 = vmatmul.mubr.bf16.gmra.mrb[44].mxu1 %v13735_v28  ;;  %v13823_v28 = vld [vmem:[%s18240_s0 + $0xccc] ss:$100 sps:$4 sm:$0xff]  }
 0x39a   :  { %9144 = vmatmul.mubr.bf16.gmra.mrb[12].mxu0 %v13736_v29  ;;  %7481 = vmatprep.mubr.bf16.mxu1 %v13737_v30  ;;  %v13825_v29 = vld [vmem:[%s18240_s0 + $0x12d8] ss:$100 sps:$4 sm:$0xff]   ;;  %v13826_v30 = vld [vmem:[%s18240_s0 + $0xcc8] ss:$100 sps:$4 sm:$0xff]  }
 0x39b   :  { %9151 = vmatprep.mubr.bf16.mxu0 %v13739_v31  ;;  %9389 = vmatpush1.bf16.msra.mxu0 %v13799_v32  ;;  %v13829_v31 = vld [vmem:[%s18240_s0 + $0x13a4] ss:$100 sps:$4 sm:$0xff]   ;;  %v13831_v32 = vld [vmem:[%s18240_s0 + $0xd94] ss:$100 sps:$4 sm:$0xff]  }
 0x39c   :  { %9390 = vmatprep.subr.bf16.mxu0 %v14338_v0 }
 0x39f   :  { %9391 = vmatpush1.bf16.msra.mxu0 %v13813_v33  ;;  %v13833_v33 = vld [vmem:[%s18240_s0 + $0x13a0] ss:$100 sps:$4 sm:$0xff]  }
 0x3a0   :  { %9392 = vmatprep.subr.bf16.mxu0 %v14338_v0 }
 0x3a1   :  { %7482 = vmatmul.mubr.bf16.gmra.mrb[48].mxu1 %v13741_v34  ;;  %v13834_v34 = vld [vmem:[%s18240_s0 + $0xd90] ss:$100 sps:$4 sm:$0xff]  }
 0x3a2   :  { %9152 = vmatmul.mubr.bf16.gmra.mrb[16].mxu0 %v13742_v35  ;;  %7489 = vmatprep.mubr.bf16.mxu1 %v13745_v36  ;;  %v13835_v35 = vld [vmem:[%s18240_s0 + $0x146c] ss:$100 sps:$4 sm:$0xff]   ;;  %v13837_v36 = vld [vmem:[%s18240_s0 + $0xe5c] ss:$100 sps:$4 sm:$0xff]  }
 0x3a3   :  { %9159 = vmatprep.mubr.bf16.mxu0 %v13747_v37  ;;  %9393 = vmatpush1.bf16.msra.mxu0 %v13827_v38  ;;  %v13839_v37 = vld [vmem:[%s18240_s0 + $0x1468] ss:$100 sps:$4 sm:$0xff]   ;;  %v13840_v38 = vld [vmem:[%s18240_s0 + $0xe58] ss:$100 sps:$4 sm:$0xff]  }
 0x3a4   :  { %9394 = vmatprep.subr.bf16.mxu0 %v14338_v0 }
 0x3a7   :  { %9395 = vmatpush1.bf16.msra.mxu0 %v13841_v40  ;;  %v13845_v40 = vld [vmem:[%s18240_s0 + $0xf24] ss:$100 sps:$4 sm:$0xff]  }
 0x3a8   :  { %9396 = vmatprep.subr.bf16.mxu0 %v14338_v0 }
 0x3a9   :  { %7490 = vmatmul.mubr.bf16.gmra.mrb[52].mxu1 %v13749_v41  ;;  %v13847_v41 = vld [vmem:[%s18240_s0 + $0x1530] ss:$100 sps:$4 sm:$0xff]  }
 0x3aa   :  { %9160 = vmatmul.mubr.bf16.gmra.mrb[20].mxu0 %v13750_v42  ;;  %7497 = vmatprep.mubr.bf16.mxu1 %v13751_v43  ;;  %v13848_v42 = vld [vmem:[%s18240_s0 + $0xf20] ss:$100 sps:$4 sm:$0xff]  }
 0x3ab   :  { %9167 = vmatprep.mubr.bf16.mxu0 %v13753_v44  ;;  %9397 = vmatpush1.bf16.msra.mxu0 %v13855_v45  ;;  %v13849_v43 = vld [vmem:[%s18240_s0 + $0x15fc] ss:$100 sps:$4 sm:$0xff]   ;;  %v13851_v44 = vld [vmem:[%s18240_s0 + $0xfec] ss:$100 sps:$4 sm:$0xff]  }
 0x3ac   :  { %9398 = vmatprep.subr.bf16.mxu0 %v14338_v0  ;;  %v13853_v45 = vld [vmem:[%s18240_s0 + $0x15f8] ss:$100 sps:$4 sm:$0xff]  }
 0x3af   :  { %9399 = vmatpush1.bf16.msra.mxu0 %v13869_v50  ;;  %v13862_v50 = vld [vmem:[%s18240_s0 + $0x10b0] ss:$100 sps:$4 sm:$0xff]  }
 0x3b0   :  { %9400 = vmatprep.subr.bf16.mxu0 %v14338_v0 }
 0x3b1   :  { %7498 = vmatmul.mubr.bf16.gmra.mrb[56].mxu1 %v13755_v46  ;;  %v13854_v46 = vld [vmem:[%s18240_s0 + $0xfe8] ss:$100 sps:$4 sm:$0xff]  }
 0x3b2   :  { %9168 = vmatmul.mubr.bf16.gmra.mrb[24].mxu0 %v13756_v47  ;;  %7505 = vmatprep.mubr.bf16.mxu1 %v13759_v48  ;;  %v13857_v47 = vld [vmem:[%s18240_s0 + $0x16c4] ss:$100 sps:$4 sm:$0xff]   ;;  %v13859_v48 = vld [vmem:[%s18240_s0 + $0x10b4] ss:$100 sps:$4 sm:$0xff]  }
 0x3b3   :  { %9175 = vmatprep.mubr.bf16.mxu0 %v13761_v49  ;;  %9401 = vmatpush1.bf16.msra.mxu0 %v13883_v60  ;;  %v13861_v49 = vld [vmem:[%s18240_s0 + $0x16c0] ss:$100 sps:$4 sm:$0xff]   ;;  %v13880_v60 = vld [vmem:[%s18240_s0 + $0x130c] ss:$100 sps:$4 sm:$0xff]  }
 0x3b4   :  { %9402 = vmatprep.subr.bf16.mxu0 %v14338_v0 }
 0x3b7   :  { %9403 = vmatpush1.bf16.msra.mxu0 %v13896_v6  ;;  %v14322_v6 = vld [vmem:[%s18239_s1 + $0x288] sm:$0xff]  }
 0x3b8   :  { %9404 = vmatprep.subr.bf16.mxu0 %v14338_v0 }
 0x3b9   :  { %7506 = vmatmul.mubr.bf16.gmra.mrb[60].mxu1 %v13763_v52  ;;  %v13865_v52 = vld [vmem:[%s18240_s0 + $0x117c] ss:$100 sps:$4 sm:$0xff]  }
 0x3ba   :  { %9176 = vmatmul.mubr.bf16.gmra.mrb[28].mxu0 %v13764_v53  ;;  %7513 = vmatprep.mubr.bf16.mxu1 %v13765_v54  ;;  %v13867_v53 = vld [vmem:[%s18240_s0 + $0x1788] ss:$100 sps:$4 sm:$0xff]   ;;  %v13868_v54 = vld [vmem:[%s18240_s0 + $0x1178] ss:$100 sps:$4 sm:$0xff]  }
 0x3bb   :  { %9183 = vmatprep.mubr.bf16.mxu0 %v13767_v55  ;;  %9405 = vmatpush1.bf16.msra.mxu0 %v13909_v15  ;;  %v13871_v55 = vld [vmem:[%s18240_s0 + $0x1854] ss:$100 sps:$4 sm:$0xff]  }
 0x3bc   :  { %9406 = vmatprep.subr.bf16.mxu0 %v14338_v0  ;;  %v13901_v15 = vld [vmem:[%s18240_s0 + $0x278] ss:$100 sps:$4 sm:$0xff]  }
 0x3bf   :  { %9407 = vmatpush1.bf16.msra.mxu0 %v13922_v24  ;;  %v13912_v24 = vld [vmem:[%s18240_s0 + $0x16f4] ss:$100 sps:$4 sm:$0xff]  }
 0x3c0   :  { %9665 = vmatprep.subr.bf16.mxu0 %v14338_v0 }
 0x3c1   :  { %7514 = vmatmul.mubr.bf16.gmra.mrb[64].mxu1 %v13769_v56  ;;  %v13873_v56 = vld [vmem:[%s18240_s0 + $0x1244] ss:$100 sps:$4 sm:$0xff]  }
 0x3c2   :  { %9184 = vmatmul.mubr.bf16.gmra.mrb[32].mxu0 %v13770_v57  ;;  %7521 = vmatprep.mubr.bf16.mxu1 %v13773_v58  ;;  %v13875_v57 = vld [vmem:[%s18240_s0 + $0x1850] ss:$100 sps:$4 sm:$0xff]   ;;  %v13876_v58 = vld [vmem:[%s18240_s0 + $0x1240] ss:$100 sps:$4 sm:$0xff]  }
 0x3c3   :  { %9191 = vmatprep.mubr.bf16.mxu0 %v13775_v59  ;;  %v13879_v59 = vld [vmem:[%s18240_s0 + $0x24] ss:$100 sps:$4 sm:$0xff]  }
 0x3c9   :  { %7522 = vmatmul.mubr.bf16.gmra.mrb[68].mxu1 %v13777_v61  ;;  %v13877_v61 = vld [vmem:[%s18240_s0 + $0x20] ss:$100 sps:$4 sm:$0xff]  }
 0x3ca   :  { %9192 = vmatmul.mubr.bf16.gmra.mrb[36].mxu0 %v13778_v62  ;;  %7529 = vmatprep.mubr.bf16.mxu1 %v13779_v63  ;;  %v13882_v62 = vld [vmem:[%s18240_s0 + $0x1308] ss:$100 sps:$4 sm:$0xff]  }
 0x3cb   :  { %9199 = vmatprep.mubr.bf16.mxu0 %v13781_v1  ;;  %v13884_v63 = vld [vmem:[%s18240_s0 + $0xec] ss:$100 sps:$4 sm:$0xff]   ;;  %v13886_v1 = vld [vmem:[%s18240_s0 + $0x13d4] ss:$100 sps:$4 sm:$0xff]  }
 0x3d1   :  { %7530 = vmatmul.mubr.bf16.gmra.mrb[72].mxu1 %v13783_v2  ;;  %v14321_v2 = vld [vmem:[%s18239_s1 + $0x280] sm:$0xff]  }
 0x3d2   :  { %9200 = vmatmul.mubr.bf16.gmra.mrb[40].mxu0 %v13784_v3  ;;  %7537 = vmatprep.mubr.bf16.mxu1 %v13787_v4  ;;  %v13888_v3 = vld [vmem:[%s18240_s0 + $0xe8] ss:$100 sps:$4 sm:$0xff]   ;;  %v13889_v4 = vld [vmem:[%s18240_s0 + $0x13d0] ss:$100 sps:$4 sm:$0xff]  }
 0x3d3   :  { %9207 = vmatprep.mubr.bf16.mxu0 %v13789_v5  ;;  %v13890_v5 = vld [vmem:[%s18240_s0 + $0x1b4] ss:$100 sps:$4 sm:$0xff]  }
 0x3d9   :  { %7538 = vmatmul.mubr.bf16.gmra.mrb[76].mxu1 %v13791_v7  ;;  %v13892_v7 = vld [vmem:[%s18240_s0 + $0x149c] ss:$100 sps:$4 sm:$0xff]  }
 0x3da   :  { %9208 = vmatmul.mubr.bf16.gmra.mrb[44].mxu0 %v13792_v8  ;;  %7545 = vmatprep.mubr.bf16.mxu1 %v13793_v9  ;;  %v14323_v8 = vld [vmem:[%s18239_s1 + $0x290] sm:$0xff]  }
 0x3db   :  { %9215 = vmatprep.mubr.bf16.mxu0 %v13795_v10  ;;  %v13894_v9 = vld [vmem:[%s18240_s0 + $0x1b0] ss:$100 sps:$4 sm:$0xff]   ;;  %v13895_v10 = vld [vmem:[%s18240_s0 + $0x1498] ss:$100 sps:$4 sm:$0xff]  }
 0x3e1   :  { %7546 = vmatmul.mubr.bf16.gmra.mrb[80].mxu1 %v13797_v11  ;;  %v13897_v11 = vld [vmem:[%s18240_s0 + $0x27c] ss:$100 sps:$4 sm:$0xff]  }
 0x3e2   :  { %9216 = vmatmul.mubr.bf16.gmra.mrb[48].mxu0 %v13798_v12  ;;  %7553 = vmatprep.mubr.bf16.mxu1 %v13801_v13  ;;  %v13899_v12 = vld [vmem:[%s18240_s0 + $0x1564] ss:$100 sps:$4 sm:$0xff]   ;;  %v14324_v13 = vld [vmem:[%s18239_s1 + $0x298] sm:$0xff]  }
 0x3e3   :  { %9223 = vmatprep.mubr.bf16.mxu0 %v13803_v14  ;;  %v14325_v14 = vld [vmem:[%s18239_s1 + $0x2a0] sm:$0xff]  }
 0x3e9   :  { %7554 = vmatmul.mubr.bf16.gmra.mrb[84].mxu1 %v13805_v16  ;;  %v13902_v16 = vld [vmem:[%s18240_s0 + $0x1560] ss:$100 sps:$4 sm:$0xff]  }
 0x3ea   :  { %9224 = vmatmul.mubr.bf16.gmra.mrb[52].mxu0 %v13806_v17  ;;  %7561 = vmatprep.mubr.bf16.mxu1 %v13807_v18  ;;  %v13903_v17 = vld [vmem:[%s18240_s0 + $0x344] ss:$100 sps:$4 sm:$0xff]   ;;  %v13905_v18 = vld [vmem:[%s18240_s0 + $0x162c] ss:$100 sps:$4 sm:$0xff]  }
 0x3eb   :  { %9231 = vmatprep.mubr.bf16.mxu0 %v13809_v19  ;;  %v14326_v19 = vld [vmem:[%s18239_s1 + $0x2a8] sm:$0xff]  }
 0x3f1   :  { %7562 = vmatmul.mubr.bf16.gmra.mrb[88].mxu1 %v13811_v20  ;;  %v14327_v20 = vld [vmem:[%s18239_s1 + $0x2b0] sm:$0xff]  }
 0x3f2   :  { %9232 = vmatmul.mubr.bf16.gmra.mrb[56].mxu0 %v13812_v21  ;;  %7569 = vmatprep.mubr.bf16.mxu1 %v13815_v22  ;;  %v13907_v21 = vld [vmem:[%s18240_s0 + $0x340] ss:$100 sps:$4 sm:$0xff]   ;;  %v13908_v22 = vld [vmem:[%s18240_s0 + $0x1628] ss:$100 sps:$4 sm:$0xff]  }
 0x3f3   :  { %9239 = vmatprep.mubr.bf16.mxu0 %v13817_v23  ;;  %v13910_v23 = vld [vmem:[%s18240_s0 + $0x40c] ss:$100 sps:$4 sm:$0xff]  }
 0x3f9   :  { %7570 = vmatmul.mubr.bf16.gmra.mrb[92].mxu1 %v13819_v25  ;;  %v14328_v25 = vld [vmem:[%s18239_s1 + $0x2b8] sm:$0xff]  }
 0x3fa   :  { %9240 = vmatmul.mubr.bf16.gmra.mrb[60].mxu0 %v13820_v26  ;;  %7577 = vmatprep.mubr.bf16.mxu1 %v13821_v27  ;;  %v14329_v26 = vld [vmem:[%s18239_s1 + $0x2c0] sm:$0xff]   ;;  %v13914_v27 = vld [vmem:[%s18240_s0 + $0x408] ss:$100 sps:$4 sm:$0xff]  }
 0x3fb   :  { %9247 = vmatprep.mubr.bf16.mxu0 %v13823_v28  ;;  %v13915_v28 = vld [vmem:[%s18240_s0 + $0x16f0] ss:$100 sps:$4 sm:$0xff]  }
 0x401   :  { %7578 = vmatmul.mubr.bf16.gmra.mrb[96].mxu1 %v13825_v29  ;;  %v13916_v29 = vld [vmem:[%s18240_s0 + $0x4d4] ss:$100 sps:$4 sm:$0xff]  }
 0x402   :  { %9248 = vmatmul.mubr.bf16.gmra.mrb[64].mxu0 %v13826_v30  ;;  %7585 = vmatprep.mubr.bf16.mxu1 %v13829_v31  ;;  %v13918_v30 = vld [vmem:[%s18240_s0 + $0x17bc] ss:$100 sps:$4 sm:$0xff]   ;;  %v14330_v31 = vld [vmem:[%s18239_s1 + $0x2c8] sm:$0xff]  }
 0x403   :  { %9255 = vmatprep.mubr.bf16.mxu0 %v13831_v32  ;;  %v14331_v32 = vld [vmem:[%s18239_s1 + $0x2d0] sm:$0xff]  }
 0x409   :  { %7586 = vmatmul.mubr.bf16.gmra.mrb[100].mxu1 %v13833_v33  ;;  %v13920_v33 = vld [vmem:[%s18240_s0 + $0x4d0] ss:$100 sps:$4 sm:$0xff]  }
 0x40a   :  { %9256 = vmatmul.mubr.bf16.gmra.mrb[68].mxu0 %v13834_v34  ;;  %7593 = vmatprep.mubr.bf16.mxu1 %v13835_v35  ;;  %v13921_v34 = vld [vmem:[%s18240_s0 + $0x17b8] ss:$100 sps:$4 sm:$0xff]  }
 0x40b   :  { %9263 = vmatprep.mubr.bf16.mxu0 %v13837_v36  ;;  %v13923_v35 = vld [vmem:[%s18240_s0 + $0x59c] ss:$100 sps:$4 sm:$0xff]   ;;  %v13925_v36 = vld [vmem:[%s18240_s0 + $0x1884] ss:$100 sps:$4 sm:$0xff]  }
 0x411   :  { %7594 = vmatmul.mubr.bf16.gmra.mrb[104].mxu1 %v13839_v37  ;;  %v14332_v37 = vld [vmem:[%s18239_s1 + $0x2d8] sm:$0xff]  }
 0x412   :  { %9264 = vmatmul.mubr.bf16.gmra.mrb[72].mxu0 %v13840_v38  ;;  %7601 = vmatprep.mubr.bf16.mxu1 %v13843_v39  ;;  %v14333_v38 = vld [vmem:[%s18239_s1 + $0x2e0] sm:$0xff]   ;;  %v13927_v39 = vld [vmem:[%s18240_s0 + $0x598] ss:$100 sps:$4 sm:$0xff]  }
 0x413   :  { %9271 = vmatprep.mubr.bf16.mxu0 %v13845_v40  ;;  %v13928_v40 = vld [vmem:[%s18240_s0 + $0x1880] ss:$100 sps:$4 sm:$0xff]  }
 0x419   :  { %7602 = vmatmul.mubr.bf16.gmra.mrb[108].mxu1 %v13847_v41  ;;  %v13929_v41 = vld [vmem:[%s18240_s0 + $0x664] ss:$100 sps:$4 sm:$0xff]  }
 0x41a   :  { %9272 = vmatmul.mubr.bf16.gmra.mrb[76].mxu0 %v13848_v42  ;;  %7609 = vmatprep.mubr.bf16.mxu1 %v13849_v43  ;;  %v13933_v42 = vld [vmem:[%s18240_s0 + $0x54] ss:$100 sps:$4 sm:$0xff]   ;;  %v14334_v43 = vld [vmem:[%s18239_s1 + $0x2e8] sm:$0xff]  }
 0x41b   :  { %9279 = vmatprep.mubr.bf16.mxu0 %v13851_v44  ;;  %v14335_v44 = vld [vmem:[%s18239_s1 + $0x2f0] sm:$0xff]  }
 0x421   :  { %7610 = vmatmul.mubr.bf16.gmra.mrb[112].mxu1 %v13853_v45  ;;  %v13934_v45 = vld [vmem:[%s18240_s0 + $0x660] ss:$100 sps:$4 sm:$0xff]  }
 0x422   :  { %9280 = vmatmul.mubr.bf16.gmra.mrb[80].mxu0 %v13854_v46  ;;  %7617 = vmatprep.mubr.bf16.mxu1 %v13857_v47  ;;  %v13931_v46 = vld [vmem:[%s18240_s0 + $0x50] ss:$100 sps:$4 sm:$0xff]  }
 0x423   :  { %9287 = vmatprep.mubr.bf16.mxu0 %v13859_v48  ;;  %v13936_v47 = vld [vmem:[%s18240_s0 + $0x72c] ss:$100 sps:$4 sm:$0xff]   ;;  %v13935_v48 = vld [vmem:[%s18239_s1 + $0x580] sm:$0xff]  }
 0x429   :  { %7618 = vmatmul.mubr.bf16.gmra.mrb[116].mxu1 %v13861_v49  ;;  %v13938_v49 = vld [vmem:[%s18240_s0 + $0x11c] ss:$100 sps:$4 sm:$0xff]  }
 0x42a   :  { %9288 = vmatmul.mubr.bf16.gmra.mrb[84].mxu0 %v13862_v50  ;;  %7625 = vmatprep.mubr.bf16.mxu1 %v13863_v51  ;;  %v14336_v50 = vld [vmem:[%s18239_s1 + $0x2f8] sm:$0xff]   ;;  %v13948_v51 = vld [vmem:[%s18239_s1 + $0x588] sm:$0xff]  }
 0x42b   :  { %9295 = vmatprep.mubr.bf16.mxu0 %v13865_v52  ;;  %v13940_v52 = vld [vmem:[%s18240_s0 + $0x728] ss:$100 sps:$4 sm:$0xff]  }
 0x431   :  { %7626 = vmatmul.mubr.bf16.gmra.mrb[120].mxu1 %v13867_v53  ;;  %v13941_v53 = vld [vmem:[%s18240_s0 + $0x118] ss:$100 sps:$4 sm:$0xff]  }
 0x432   :  { %9296 = vmatmul.mubr.bf16.gmra.mrb[88].mxu0 %v13868_v54  ;;  %7633 = vmatprep.mubr.bf16.mxu1 %v13871_v55  ;;  %v13942_v54 = vld [vmem:[%s18240_s0 + $0x7f4] ss:$100 sps:$4 sm:$0xff]   ;;  %v13944_v55 = vld [vmem:[%s18240_s0 + $0x1e4] ss:$100 sps:$4 sm:$0xff]  }
 0x433   :  { %9303 = vmatprep.mubr.bf16.mxu0 %v13873_v56  ;;  %v13961_v56 = vld [vmem:[%s18239_s1 + $0x590] sm:$0xff]  }
 0x439   :  { %7634 = vmatmul.mubr.bf16.gmra.mrb[124].mxu1 %v13875_v57  ;;  %v13974_v57 = vld [vmem:[%s18239_s1 + $0x598] sm:$0xff]  }
 0x43a   :  { %9304 = vmatmul.mubr.bf16.gmra.mrb[92].mxu0 %v13876_v58  ;;  %7674 = vmatprep.mubr.bf16.mxu1 %v13879_v59  ;;  %v13946_v58 = vld [vmem:[%s18240_s0 + $0x7f0] ss:$100 sps:$4 sm:$0xff]   ;;  %v13947_v59 = vld [vmem:[%s18240_s0 + $0x1e0] ss:$100 sps:$4 sm:$0xff]  }
 0x43b   :  { %9311 = vmatprep.mubr.bf16.mxu0 %v13880_v60  ;;  %v13949_v60 = vld [vmem:[%s18240_s0 + $0x8bc] ss:$100 sps:$4 sm:$0xff]  }
 0x441   :  { %7675 = vmatmul.mubr.bf16.vlgmr.msra.gmra.mrb[0].mxu1 %v13877_v61  ;;  %v13951_v61 = vld [vmem:[%s18240_s0 + $0x2ac] ss:$100 sps:$4 sm:$0xff]  }
 0x442   :  { %9312 = vmatmul.mubr.bf16.gmra.mrb[96].mxu0 %v13882_v62  ;;  %11512 = vmatpush1.bf16.msra.mxu1 %v14321_v2  ;;  %v13987_v62 = vld [vmem:[%s18239_s1 + $0x5a0] sm:$0xff]   ;;  %v13954_v2 = vld [vmem:[%s18240_s0 + $0x2a8] ss:$100 sps:$4 sm:$0xff]  }
 0x443   :  { %7682 = vmatprep.mubr.bf16.mxu1 %v13884_v63  ;;  %9319 = vmatprep.mubr.bf16.mxu0 %v13886_v1  ;;  %v14000_v63 = vld [vmem:[%s18239_s1 + $0x5a8] sm:$0xff]   ;;  %v13953_v1 = vld [vmem:[%s18240_s0 + $0x8b8] ss:$100 sps:$4 sm:$0xff]  }
 0x444   :  { %11497 = vmatprep.subr.bf16.mxu1 %v14338_v0 }
 0x446   :  { %11513 = vmatpush1.bf16.msra.mxu1 %v14322_v6  ;;  %v14026_v6 = vld [vmem:[%s18239_s1 + $0x5b8] sm:$0xff]  }
 0x447   :  { %11498 = vmatprep.subr.bf16.mxu1 %v14338_v0 }
 0x449   :  { %7683 = vmatmul.mubr.bf16.gmra.mrb[4].mxu1 %v13888_v3  ;;  %v13955_v3 = vld [vmem:[%s18240_s0 + $0x984] ss:$100 sps:$4 sm:$0xff]  }
 0x44a   :  { %9320 = vmatmul.mubr.bf16.gmra.mrb[100].mxu0 %v13889_v4  ;;  %7690 = vmatprep.mubr.bf16.mxu1 %v13890_v5  ;;  %v13957_v4 = vld [vmem:[%s18240_s0 + $0x374] ss:$100 sps:$4 sm:$0xff]  }
 0x44b   :  { %9327 = vmatprep.mubr.bf16.mxu0 %v13892_v7  ;;  %11514 = vmatpush1.bf16.msra.mxu1 %v14323_v8  ;;  %v14013_v5 = vld [vmem:[%s18239_s1 + $0x5b0] sm:$0xff]   ;;  %v13959_v7 = vld [vmem:[%s18240_s0 + $0x980] ss:$100 sps:$4 sm:$0xff]  }
 0x44c   :  { %11499 = vmatprep.subr.bf16.mxu1 %v14338_v0  ;;  %v13960_v8 = vld [vmem:[%s18240_s0 + $0x370] ss:$100 sps:$4 sm:$0xff]  }
 0x44f   :  { %11515 = vmatpush1.bf16.msra.mxu1 %v14324_v13  ;;  %v13966_v13 = vld [vmem:[%s18240_s0 + $0xa48] ss:$100 sps:$4 sm:$0xff]  }
 0x450   :  { %11500 = vmatprep.subr.bf16.mxu1 %v14338_v0 }
 0x451   :  { %7691 = vmatmul.mubr.bf16.gmra.mrb[8].mxu1 %v13894_v9  ;;  %v13962_v9 = vld [vmem:[%s18240_s0 + $0xa4c] ss:$100 sps:$4 sm:$0xff]  }
 0x452   :  { %9328 = vmatmul.mubr.bf16.gmra.mrb[104].mxu0 %v13895_v10  ;;  %7698 = vmatprep.mubr.bf16.mxu1 %v13897_v11  ;;  %v13964_v10 = vld [vmem:[%s18240_s0 + $0x43c] ss:$100 sps:$4 sm:$0xff]  }
 0x453   :  { %9335 = vmatprep.mubr.bf16.mxu0 %v13899_v12  ;;  %11516 = vmatpush1.bf16.msra.mxu1 %v14325_v14  ;;  %v14039_v11 = vld [vmem:[%s18239_s1 + $0x5c0] sm:$0xff]   ;;  %v14052_v12 = vld [vmem:[%s18239_s1 + $0x5c8] sm:$0xff]   ;;  %v13967_v14 = vld [vmem:[%s18240_s0 + $0x438] ss:$100 sps:$4 sm:$0xff]  }
 0x454   :  { %11501 = vmatprep.subr.bf16.mxu1 %v14338_v0 }
 0x457   :  { %11517 = vmatpush1.bf16.msra.mxu1 %v14326_v19  ;;  %v13973_v19 = vld [vmem:[%s18240_s0 + $0x500] ss:$100 sps:$4 sm:$0xff]  }
 0x458   :  { %11502 = vmatprep.subr.bf16.mxu1 %v14338_v0 }
 0x459   :  { %7699 = vmatmul.mubr.bf16.gmra.mrb[12].mxu1 %v13901_v15  ;;  %v13968_v15 = vld [vmem:[%s18240_s0 + $0xb14] ss:$100 sps:$4 sm:$0xff]  }
 0x45a   :  { %9336 = vmatmul.mubr.bf16.gmra.mrb[108].mxu0 %v13902_v16  ;;  %7706 = vmatprep.mubr.bf16.mxu1 %v13903_v17  ;;  %v13970_v16 = vld [vmem:[%s18240_s0 + $0x504] ss:$100 sps:$4 sm:$0xff]   ;;  %v14065_v17 = vld [vmem:[%s18239_s1 + $0x5d0] sm:$0xff]  }
 0x45b   :  { %9343 = vmatprep.mubr.bf16.mxu0 %v13905_v18  ;;  %11518 = vmatpush1.bf16.msra.mxu1 %v14327_v20  ;;  %v13972_v18 = vld [vmem:[%s18240_s0 + $0xb10] ss:$100 sps:$4 sm:$0xff]   ;;  %v13975_v20 = vld [vmem:[%s18240_s0 + $0xbdc] ss:$100 sps:$4 sm:$0xff]  }
 0x45c   :  { %11503 = vmatprep.subr.bf16.mxu1 %v14338_v0 }
 0x45f   :  { %11519 = vmatpush1.bf16.msra.mxu1 %v14328_v25  ;;  %v13981_v25 = vld [vmem:[%s18240_s0 + $0xca4] ss:$100 sps:$4 sm:$0xff]  }
 0x460   :  { %11504 = vmatprep.subr.bf16.mxu1 %v14338_v0 }
 0x461   :  { %7707 = vmatmul.mubr.bf16.gmra.mrb[16].mxu1 %v13907_v21  ;;  %v13977_v21 = vld [vmem:[%s18240_s0 + $0x5cc] ss:$100 sps:$4 sm:$0xff]  }
 0x462   :  { %9344 = vmatmul.mubr.bf16.gmra.mrb[112].mxu0 %v13908_v22  ;;  %7714 = vmatprep.mubr.bf16.mxu1 %v13910_v23  ;;  %v14078_v22 = vld [vmem:[%s18239_s1 + $0x5d8] sm:$0xff]  }
 0x463   :  { %9351 = vmatprep.mubr.bf16.mxu0 %v13912_v24  ;;  %11520 = vmatpush1.bf16.msra.mxu1 %v14329_v26  ;;  %v13979_v23 = vld [vmem:[%s18240_s0 + $0xbd8] ss:$100 sps:$4 sm:$0xff]   ;;  %v13980_v24 = vld [vmem:[%s18240_s0 + $0x5c8] ss:$100 sps:$4 sm:$0xff]  }
 0x464   :  { %11505 = vmatprep.subr.bf16.mxu1 %v14338_v0  ;;  %v13983_v26 = vld [vmem:[%s18240_s0 + $0x694] ss:$100 sps:$4 sm:$0xff]  }
 0x467   :  { %11521 = vmatpush1.bf16.msra.mxu1 %v14330_v31  ;;  %v14091_v31 = vld [vmem:[%s18239_s1 + $0x5e0] sm:$0xff]  }
 0x468   :  { %11506 = vmatprep.subr.bf16.mxu1 %v14338_v0 }
 0x469   :  { %7715 = vmatmul.mubr.bf16.gmra.mrb[20].mxu1 %v13914_v27  ;;  %v13985_v27 = vld [vmem:[%s18240_s0 + $0xca0] ss:$100 sps:$4 sm:$0xff]  }
 0x46a   :  { %9352 = vmatmul.mubr.bf16.gmra.mrb[116].mxu0 %v13915_v28  ;;  %7722 = vmatprep.mubr.bf16.mxu1 %v13916_v29  ;;  %v13986_v28 = vld [vmem:[%s18240_s0 + $0x690] ss:$100 sps:$4 sm:$0xff]  }
 0x46b   :  { %9359 = vmatprep.mubr.bf16.mxu0 %v13918_v30  ;;  %11522 = vmatpush1.bf16.msra.mxu1 %v14331_v32  ;;  %v13988_v29 = vld [vmem:[%s18240_s0 + $0xd6c] ss:$100 sps:$4 sm:$0xff]   ;;  %v13990_v30 = vld [vmem:[%s18240_s0 + $0x75c] ss:$100 sps:$4 sm:$0xff]  }
 0x46c   :  { %11507 = vmatprep.subr.bf16.mxu1 %v14338_v0  ;;  %v16928_v32 = vld [vmem:[%s18239_s1 + $0x600] sm:$0xff]  }
 0x46f   :  { %11523 = vmatpush1.bf16.msra.mxu1 %v14332_v37  ;;  %v13998_v37 = vld [vmem:[%s18240_s0 + $0xe30] ss:$100 sps:$4 sm:$0xff]  }
 0x470   :  { %11508 = vmatprep.subr.bf16.mxu1 %v14338_v0 }
 0x471   :  { %7723 = vmatmul.mubr.bf16.gmra.mrb[24].mxu1 %v13920_v33  ;;  %v13992_v33 = vld [vmem:[%s18240_s0 + $0xd68] ss:$100 sps:$4 sm:$0xff]  }
 0x472   :  { %9360 = vmatmul.mubr.bf16.gmra.mrb[120].mxu0 %v13921_v34  ;;  %7730 = vmatprep.mubr.bf16.mxu1 %v13923_v35  ;;  %v13993_v34 = vld [vmem:[%s18240_s0 + $0x758] ss:$100 sps:$4 sm:$0xff]  }
 0x473   :  { %9367 = vmatprep.mubr.bf16.mxu0 %v13925_v36  ;;  %11524 = vmatpush1.bf16.msra.mxu1 %v14333_v38  ;;  %v13994_v35 = vld [vmem:[%s18240_s0 + $0xe34] ss:$100 sps:$4 sm:$0xff]   ;;  %v13996_v36 = vld [vmem:[%s18240_s0 + $0x824] ss:$100 sps:$4 sm:$0xff]  }
 0x474   :  { %11509 = vmatprep.subr.bf16.mxu1 %v14338_v0  ;;  %v13999_v38 = vld [vmem:[%s18240_s0 + $0x820] ss:$100 sps:$4 sm:$0xff]  }
 0x477   :  { %11525 = vmatpush1.bf16.msra.mxu1 %v14334_v43  ;;  %v14006_v43 = vld [vmem:[%s18240_s0 + $0x8e8] ss:$100 sps:$4 sm:$0xff]  }
 0x478   :  { %11510 = vmatprep.subr.bf16.mxu1 %v14338_v0 }
 0x479   :  { %7731 = vmatmul.mubr.bf16.gmra.mrb[28].mxu1 %v13927_v39  ;;  %v14001_v39 = vld [vmem:[%s18240_s0 + $0xefc] ss:$100 sps:$4 sm:$0xff]  }
 0x47a   :  { %9368 = vmatmul.mubr.bf16.gmra.mrb[124].mxu0 %v13928_v40  ;;  %7738 = vmatprep.mubr.bf16.mxu1 %v13929_v41  ;;  %v14003_v40 = vld [vmem:[%s18240_s0 + $0x8ec] ss:$100 sps:$4 sm:$0xff]  }
 0x47b   :  { %9408 = vmatprep.mubr.bf16.mxu0 %v13933_v42  ;;  %11526 = vmatpush1.bf16.msra.mxu1 %v14335_v44  ;;  %v14105_v41 = vld [vmem:[%s18239_s1 + $0x5e8] sm:$0xff]   ;;  %v14005_v42 = vld [vmem:[%s18240_s0 + $0xef8] ss:$100 sps:$4 sm:$0xff]  }
 0x47c   :  { %11511 = vmatprep.subr.bf16.mxu1 %v14338_v0  ;;  %v14007_v44 = vld [vmem:[%s18240_s0 + $0xfc4] ss:$100 sps:$4 sm:$0xff]  }
 0x47f   :  { %11527 = vmatpush1.bf16.msra.mxu1 %v14336_v50  ;;  %v14119_v50 = vld [vmem:[%s18239_s1 + $0x5f0] sm:$0xff]  }
 0x480   :  { %11416 = vmatprep.subr.bf16.mxu1 %v16928_v32 }
 0x481   :  { %7739 = vmatmul.mubr.bf16.gmra.mrb[32].mxu1 %v13934_v45  ;;  %v14009_v45 = vld [vmem:[%s18240_s0 + $0x9b4] ss:$100 sps:$4 sm:$0xff]  }
 0x482   :  { %9409 = vmatmul.mubr.bf16.vlgmr.msra.gmra.mrb[0].mxu0 %v13931_v46  ;;  %7746 = vmatprep.mubr.bf16.mxu1 %v13936_v47  ;;  %v14011_v46 = vld [vmem:[%s18240_s0 + $0xfc0] ss:$100 sps:$4 sm:$0xff]   ;;  %v14012_v47 = vld [vmem:[%s18240_s0 + $0x9b0] ss:$100 sps:$4 sm:$0xff]  }
 0x483   :  { %9666 = vmatpush1.bf16.msra.mxu0 %v13935_v48  ;;  %9416 = vmatprep.mubr.bf16.mxu0 %v13938_v49  ;;  %v14014_v48 = vld [vmem:[%s18240_s0 + $0x108c] ss:$100 sps:$4 sm:$0xff]   ;;  %v14016_v49 = vld [vmem:[%s18240_s0 + $0xa7c] ss:$100 sps:$4 sm:$0xff]  }
 0x484   :  { %9667 = vmatprep.subr.bf16.mxu0 %v14338_v0 }
 0x487   :  { %9668 = vmatpush1.bf16.msra.mxu0 %v13948_v51  ;;  %v14018_v51 = vld [vmem:[%s18240_s0 + $0x1088] ss:$100 sps:$4 sm:$0xff]  }
 0x488   :  { %9669 = vmatprep.subr.bf16.mxu0 %v14338_v0 }
 0x489   :  { %7747 = vmatmul.mubr.bf16.gmra.mrb[36].mxu1 %v13940_v52  ;;  %v14019_v52 = vld [vmem:[%s18240_s0 + $0xa78] ss:$100 sps:$4 sm:$0xff]  }
 0x48a   :  { %9417 = vmatmul.mubr.bf16.gmra.mrb[4].mxu0 %v13941_v53  ;;  %7754 = vmatprep.mubr.bf16.mxu1 %v13942_v54  ;;  %v14020_v53 = vld [vmem:[%s18240_s0 + $0x1154] ss:$100 sps:$4 sm:$0xff]   ;;  %v14022_v54 = vld [vmem:[%s18240_s0 + $0xb44] ss:$100 sps:$4 sm:$0xff]  }
 0x48b   :  { %9424 = vmatprep.mubr.bf16.mxu0 %v13944_v55  ;;  %9670 = vmatpush1.bf16.msra.mxu0 %v13961_v56  ;;  %v14025_v55 = vld [vmem:[%s18240_s0 + $0xb40] ss:$100 sps:$4 sm:$0xff]  }
 0x48c   :  { %9671 = vmatprep.subr.bf16.mxu0 %v14338_v0  ;;  %v14027_v56 = vld [vmem:[%s18240_s0 + $0x121c] ss:$100 sps:$4 sm:$0xff]  }
 0x48f   :  { %9672 = vmatpush1.bf16.msra.mxu0 %v13974_v57  ;;  %v14029_v57 = vld [vmem:[%s18240_s0 + $0xc0c] ss:$100 sps:$4 sm:$0xff]  }
 0x490   :  { %9673 = vmatprep.subr.bf16.mxu0 %v14338_v0 }
 0x491   :  { %7755 = vmatmul.mubr.bf16.gmra.mrb[40].mxu1 %v13946_v58  ;;  %v14132_v58 = vld [vmem:[%s18239_s1 + $0x5f8] sm:$0xff]  }
 0x492   :  { %9425 = vmatmul.mubr.bf16.gmra.mrb[8].mxu0 %v13947_v59  ;;  %7762 = vmatprep.mubr.bf16.mxu1 %v13949_v60  ;;  %v14031_v59 = vld [vmem:[%s18240_s0 + $0x1218] ss:$100 sps:$4 sm:$0xff]   ;;  %v14032_v60 = vld [vmem:[%s18240_s0 + $0xc08] ss:$100 sps:$4 sm:$0xff]  }
 0x493   :  { %9432 = vmatprep.mubr.bf16.mxu0 %v13951_v61  ;;  %9674 = vmatpush1.bf16.msra.mxu0 %v13987_v62  ;;  %v14033_v61 = vld [vmem:[%s18240_s0 + $0x12e4] ss:$100 sps:$4 sm:$0xff]   ;;  %v14035_v62 = vld [vmem:[%s18240_s0 + $0xcd4] ss:$100 sps:$4 sm:$0xff]  }
 0x494   :  { %9675 = vmatprep.subr.bf16.mxu0 %v14338_v0 }
 0x497   :  { %9676 = vmatpush1.bf16.msra.mxu0 %v14000_v63  ;;  %v14037_v63 = vld [vmem:[%s18240_s0 + $0x12e0] ss:$100 sps:$4 sm:$0xff]  }
 0x498   :  { %9677 = vmatprep.subr.bf16.mxu0 %v14338_v0 }
 0x499   :  { %7763 = vmatmul.mubr.bf16.gmra.mrb[44].mxu1 %v13953_v1  ;;  %v14038_v1 = vld [vmem:[%s18240_s0 + $0xcd0] ss:$100 sps:$4 sm:$0xff]  }
 0x49a   :  { %9433 = vmatmul.mubr.bf16.gmra.mrb[12].mxu0 %v13954_v2  ;;  %7770 = vmatprep.mubr.bf16.mxu1 %v13955_v3  ;;  %v14040_v2 = vld [vmem:[%s18240_s0 + $0x13ac] ss:$100 sps:$4 sm:$0xff]   ;;  %v14042_v3 = vld [vmem:[%s18240_s0 + $0xd9c] ss:$100 sps:$4 sm:$0xff]  }
 0x49b   :  { %9440 = vmatprep.mubr.bf16.mxu0 %v13957_v4  ;;  %9678 = vmatpush1.bf16.msra.mxu0 %v14013_v5  ;;  %v14044_v4 = vld [vmem:[%s18240_s0 + $0x13a8] ss:$100 sps:$4 sm:$0xff]   ;;  %v14045_v5 = vld [vmem:[%s18240_s0 + $0xd98] ss:$100 sps:$4 sm:$0xff]  }
 0x49c   :  { %9679 = vmatprep.subr.bf16.mxu0 %v14338_v0 }
 0x49f   :  { %9680 = vmatpush1.bf16.msra.mxu0 %v14026_v6  ;;  %v14046_v6 = vld [vmem:[%s18240_s0 + $0x1474] ss:$100 sps:$4 sm:$0xff]  }
 0x4a0   :  { %9681 = vmatprep.subr.bf16.mxu0 %v14338_v0 }
 0x4a1   :  { %7771 = vmatmul.mubr.bf16.gmra.mrb[48].mxu1 %v13959_v7  ;;  %v14048_v7 = vld [vmem:[%s18240_s0 + $0xe64] ss:$100 sps:$4 sm:$0xff]  }
 0x4a2   :  { %9441 = vmatmul.mubr.bf16.gmra.mrb[16].mxu0 %v13960_v8  ;;  %7778 = vmatprep.mubr.bf16.mxu1 %v13962_v9  ;;  %v14050_v8 = vld [vmem:[%s18240_s0 + $0x1470] ss:$100 sps:$4 sm:$0xff]   ;;  %v14051_v9 = vld [vmem:[%s18240_s0 + $0xe60] ss:$100 sps:$4 sm:$0xff]  }
 0x4a3   :  { %9448 = vmatprep.mubr.bf16.mxu0 %v13964_v10  ;;  %9682 = vmatpush1.bf16.msra.mxu0 %v14039_v11  ;;  %v14053_v10 = vld [vmem:[%s18240_s0 + $0x153c] ss:$100 sps:$4 sm:$0xff]   ;;  %v14055_v11 = vld [vmem:[%s18240_s0 + $0xf2c] ss:$100 sps:$4 sm:$0xff]  }
 0x4a4   :  { %9683 = vmatprep.subr.bf16.mxu0 %v14338_v0 }
 0x4a7   :  { %9684 = vmatpush1.bf16.msra.mxu0 %v14052_v12 }
 0x4a8   :  { %9685 = vmatprep.subr.bf16.mxu0 %v14338_v0 }
 0x4a9   :  { %7779 = vmatmul.mubr.bf16.gmra.mrb[52].mxu1 %v13966_v13 }
 0x4aa   :  { %9449 = vmatmul.mubr.bf16.gmra.mrb[20].mxu0 %v13967_v14  ;;  %7786 = vmatprep.mubr.bf16.mxu1 %v13968_v15  ;;  %v14057_v14 = vld [vmem:[%s18240_s0 + $0x1538] ss:$100 sps:$4 sm:$0xff]  }
 0x4ab   :  { %9456 = vmatprep.mubr.bf16.mxu0 %v13970_v16  ;;  %9686 = vmatpush1.bf16.msra.mxu0 %v14065_v17  ;;  %v14058_v16 = vld [vmem:[%s18240_s0 + $0xf28] ss:$100 sps:$4 sm:$0xff]  }
 0x4ac   :  { %9687 = vmatprep.subr.bf16.mxu0 %v14338_v0  ;;  %v14059_v17 = vld [vmem:[%s18240_s0 + $0x1604] ss:$100 sps:$4 sm:$0xff]  }
 0x4af   :  { %9688 = vmatpush1.bf16.msra.mxu0 %v14078_v22  ;;  %v14063_v22 = vld [vmem:[%s18240_s0 + $0x1600] ss:$100 sps:$4 sm:$0xff]  }
 0x4b0   :  { %9689 = vmatprep.subr.bf16.mxu0 %v14338_v0 }
 0x4b1   :  { %7787 = vmatmul.mubr.bf16.gmra.mrb[56].mxu1 %v13972_v18 }
 0x4b2   :  { %9457 = vmatmul.mubr.bf16.gmra.mrb[24].mxu0 %v13973_v19  ;;  %7794 = vmatprep.mubr.bf16.mxu1 %v13975_v20  ;;  %v14061_v19 = vld [vmem:[%s18240_s0 + $0xff4] ss:$100 sps:$4 sm:$0xff]  }
 0x4b3   :  { %9464 = vmatprep.mubr.bf16.mxu0 %v13977_v21  ;;  %9690 = vmatpush1.bf16.msra.mxu0 %v14091_v31 }
 0x4b4   :  { %9691 = vmatprep.subr.bf16.mxu0 %v14338_v0 }
 0x4b7   :  { %9692 = vmatpush1.bf16.msra.mxu0 %v14105_v41  ;;  %v14077_v41 = vld [vmem:[%s18240_s0 + $0x1180] ss:$100 sps:$4 sm:$0xff]  }
 0x4b8   :  { %9693 = vmatprep.subr.bf16.mxu0 %v14338_v0 }
 0x4b9   :  { %7795 = vmatmul.mubr.bf16.gmra.mrb[60].mxu1 %v13979_v23 }
 0x4ba   :  { %9465 = vmatmul.mubr.bf16.gmra.mrb[28].mxu0 %v13980_v24  ;;  %7802 = vmatprep.mubr.bf16.mxu1 %v13981_v25  ;;  %v14064_v24 = vld [vmem:[%s18240_s0 + $0xff0] ss:$100 sps:$4 sm:$0xff]  }
 0x4bb   :  { %9472 = vmatprep.mubr.bf16.mxu0 %v13983_v26  ;;  %9694 = vmatpush1.bf16.msra.mxu0 %v14119_v50  ;;  %v14066_v25 = vld [vmem:[%s18240_s0 + $0x16cc] ss:$100 sps:$4 sm:$0xff]  }
 0x4bc   :  { %9695 = vmatprep.subr.bf16.mxu0 %v14338_v0  ;;  %v14024_v0 = vld [vmem:[%s18240_s0 + $0x1150] ss:$100 sps:$4 sm:$0xff]  }
 0x4bd   :  { %v14087_v50 = vld [vmem:[%s18240_s0 + $0x66c] ss:$100 sps:$4 sm:$0xff]  }
 0x4bf   :  { %9696 = vmatpush1.bf16.msra.mxu0 %v14132_v58  ;;  %v14093_v58 = vld [vmem:[%s18240_s0 + $0x734] ss:$100 sps:$4 sm:$0xff]  }
 0x4c1   :  { %7803 = vmatmul.mubr.bf16.gmra.mrb[64].mxu1 %v13985_v27  ;;  %v14068_v27 = vld [vmem:[%s18240_s0 + $0x10bc] ss:$100 sps:$4 sm:$0xff]  }
 0x4c2   :  { %9473 = vmatmul.mubr.bf16.gmra.mrb[32].mxu0 %v13986_v28  ;;  %7810 = vmatprep.mubr.bf16.mxu1 %v13988_v29 }
 0x4c3   :  { %9480 = vmatprep.mubr.bf16.mxu0 %v13990_v30  ;;  %v14070_v30 = vld [vmem:[%s18240_s0 + $0x16c8] ss:$100 sps:$4 sm:$0xff]  }
 0x4c9   :  { %7811 = vmatmul.mubr.bf16.gmra.mrb[68].mxu1 %v13992_v33  ;;  %v14071_v33 = vld [vmem:[%s18240_s0 + $0x10b8] ss:$100 sps:$4 sm:$0xff]  }
 0x4ca   :  { %9481 = vmatmul.mubr.bf16.gmra.mrb[36].mxu0 %v13993_v34  ;;  %7818 = vmatprep.mubr.bf16.mxu1 %v13994_v35  ;;  %v14072_v34 = vld [vmem:[%s18240_s0 + $0x1794] ss:$100 sps:$4 sm:$0xff]  }
 0x4cb   :  { %9488 = vmatprep.mubr.bf16.mxu0 %v13996_v36  ;;  %v14074_v36 = vld [vmem:[%s18240_s0 + $0x1184] ss:$100 sps:$4 sm:$0xff]  }
 0x4d1   :  { %7819 = vmatmul.mubr.bf16.gmra.mrb[72].mxu1 %v13998_v37 }
 0x4d2   :  { %9489 = vmatmul.mubr.bf16.gmra.mrb[40].mxu0 %v13999_v38  ;;  %7826 = vmatprep.mubr.bf16.mxu1 %v14001_v39  ;;  %v14076_v39 = vld [vmem:[%s18240_s0 + $0x1790] ss:$100 sps:$4 sm:$0xff]  }
 0x4d3   :  { %9496 = vmatprep.mubr.bf16.mxu0 %v14003_v40 }
 0x4d9   :  { %7827 = vmatmul.mubr.bf16.gmra.mrb[76].mxu1 %v14005_v42  ;;  %v14079_v42 = vld [vmem:[%s18240_s0 + $0x185c] ss:$100 sps:$4 sm:$0xff]  }
 0x4da   :  { %9497 = vmatmul.mubr.bf16.gmra.mrb[44].mxu0 %v14006_v43  ;;  %7834 = vmatprep.mubr.bf16.mxu1 %v14007_v44  ;;  %v14081_v44 = vld [vmem:[%s18240_s0 + $0x124c] ss:$100 sps:$4 sm:$0xff]  }
 0x4db   :  { %9504 = vmatprep.mubr.bf16.mxu0 %v14009_v45 }
 0x4e1   :  { %7835 = vmatmul.mubr.bf16.gmra.mrb[80].mxu1 %v14011_v46 }
 0x4e2   :  { %9505 = vmatmul.mubr.bf16.gmra.mrb[48].mxu0 %v14012_v47  ;;  %7842 = vmatprep.mubr.bf16.mxu1 %v14014_v48  ;;  %v14083_v47 = vld [vmem:[%s18240_s0 + $0x1858] ss:$100 sps:$4 sm:$0xff]  }
 0x4e3   :  { %9512 = vmatprep.mubr.bf16.mxu0 %v14016_v49  ;;  %v14084_v49 = vld [vmem:[%s18240_s0 + $0x1248] ss:$100 sps:$4 sm:$0xff]  }
 0x4e9   :  { %7843 = vmatmul.mubr.bf16.gmra.mrb[84].mxu1 %v14018_v51 }
 0x4ea   :  { %9513 = vmatmul.mubr.bf16.gmra.mrb[52].mxu0 %v14019_v52  ;;  %7850 = vmatprep.mubr.bf16.mxu1 %v14020_v53  ;;  %v14088_v52 = vld [vmem:[%s18240_s0 + $0x1314] ss:$100 sps:$4 sm:$0xff]  }
 0x4eb   :  { %9520 = vmatprep.mubr.bf16.mxu0 %v14022_v54 }
 0x4f1   :  { %7851 = vmatmul.mubr.bf16.gmra.mrb[88].mxu1 %v14024_v0  ;;  %v14085_v0 = vld [vmem:[%s18240_s0 + $0x668] ss:$100 sps:$4 sm:$0xff]  }
 0x4f2   :  { %9521 = vmatmul.mubr.bf16.gmra.mrb[56].mxu0 %v14025_v55  ;;  %7858 = vmatprep.mubr.bf16.mxu1 %v14027_v56  ;;  %v14090_v56 = vld [vmem:[%s18240_s0 + $0x1310] ss:$100 sps:$4 sm:$0xff]  }
 0x4f3   :  { %9528 = vmatprep.mubr.bf16.mxu0 %v14029_v57 }
 0x4f9   :  { %7859 = vmatmul.mubr.bf16.gmra.mrb[92].mxu1 %v14031_v59  ;;  %v14095_v59 = vld [vmem:[%s18240_s0 + $0x13dc] ss:$100 sps:$4 sm:$0xff]  }
 0x4fa   :  { %9529 = vmatmul.mubr.bf16.gmra.mrb[60].mxu0 %v14032_v60  ;;  %7866 = vmatprep.mubr.bf16.mxu1 %v14033_v61  ;;  %v14112_v60 = vld [vmem:[%s18239_s1 + $0x608] sm:$0xff]   ;;  %v14133_v61 = vld [vmem:[%s18239_s1 + $0x610] sm:$0xff]  }
 0x4fb   :  { %9536 = vmatprep.mubr.bf16.mxu0 %v14035_v62 }
 0x501   :  { %7867 = vmatmul.mubr.bf16.gmra.mrb[96].mxu1 %v14037_v63 }
 0x502   :  { %9537 = vmatmul.mubr.bf16.gmra.mrb[64].mxu0 %v14038_v1  ;;  %7874 = vmatprep.mubr.bf16.mxu1 %v14040_v2  ;;  %v14097_v1 = vld [vmem:[%s18240_s0 + $0x730] ss:$100 sps:$4 sm:$0xff]  }
 0x503   :  { %9544 = vmatprep.mubr.bf16.mxu0 %v14042_v3  ;;  %v14099_v3 = vld [vmem:[%s18240_s0 + $0x7fc] ss:$100 sps:$4 sm:$0xff]  }
 0x509   :  { %7875 = vmatmul.mubr.bf16.gmra.mrb[100].mxu1 %v14044_v4 }
 0x50a   :  { %9545 = vmatmul.mubr.bf16.gmra.mrb[68].mxu0 %v14045_v5  ;;  %7882 = vmatprep.mubr.bf16.mxu1 %v14046_v6  ;;  %v14101_v5 = vld [vmem:[%s18240_s0 + $0x14a4] ss:$100 sps:$4 sm:$0xff]   ;;  %v14152_v6 = vld [vmem:[%s18239_s1 + $0x618] sm:$0xff]  }
 0x50b   :  { %9552 = vmatprep.mubr.bf16.mxu0 %v14048_v7 }
 0x511   :  { %7883 = vmatmul.mubr.bf16.gmra.mrb[104].mxu1 %v14050_v8  ;;  %v14171_v8 = vld [vmem:[%s18239_s1 + $0x620] sm:$0xff]  }
 0x512   :  { %9553 = vmatmul.mubr.bf16.gmra.mrb[72].mxu0 %v14051_v9  ;;  %7890 = vmatprep.mubr.bf16.mxu1 %v14053_v10  ;;  %v14103_v10 = vld [vmem:[%s18240_s0 + $0x7f8] ss:$100 sps:$4 sm:$0xff]  }
 0x513   :  { %9560 = vmatprep.mubr.bf16.mxu0 %v14055_v11 }
 0x514   :  { %v17063_v12 = vpop.f32.mrb[0].mxu1 }
 0x515   :  { %v7678_v13 = vpop.f32.mrb[1].mxu1 }
 0x516   :  { %v17068_v15 = vpop.f32.mrb[2].mxu1  ;;  %v14104_v13 = vld [vmem:[%s18240_s0 + $0x14a0] ss:$100 sps:$4 sm:$0xff]  }
 0x517   :  { %v7681_v18 = vpop.f32.mrb[3].mxu1 }
 0x518   :  { %v14190_v18 = vld [vmem:[%s18239_s1 + $0x628] sm:$0xff]  }
 0x519   :  { %7891 = vmatmul.mubr.bf16.gmra.mrb[108].mxu1 %v14057_v14  ;;  %v14106_v14 = vld [vmem:[%s18240_s0 + $0x8c4] ss:$100 sps:$4 sm:$0xff]  }
 0x51a   :  { %9561 = vmatmul.mubr.bf16.gmra.mrb[76].mxu0 %v14058_v16  ;;  %7898 = vmatprep.mubr.bf16.mxu1 %v14059_v17  ;;  %v14108_v17 = vld [vmem:[%s18240_s0 + $0x156c] ss:$100 sps:$4 sm:$0xff]  }
 0x51b   :  { %9568 = vmatprep.mubr.bf16.mxu0 %v14061_v19  ;;  %v14209_v19 = vld [vmem:[%s18239_s1 + $0x630] sm:$0xff]  }
 0x51c   :  { %v17079_v20 = vpop.f32.mrb[4].mxu1 }
 0x51d   :  { %v7686_v21 = vpop.f32.mrb[5].mxu1 }
 0x51e   :  { %v17084_v23 = vpop.f32.mrb[6].mxu1  ;;  %v14110_v21 = vld [vmem:[%s18240_s0 + $0x8c0] ss:$100 sps:$4 sm:$0xff]  }
 0x51f   :  { %v7689_v26 = vpop.f32.mrb[7].mxu1 }
 0x520   :  { %v14117_v26 = vld [vmem:[%s18240_s0 + $0x988] ss:$100 sps:$4 sm:$0xff]  }
 0x521   :  { %7899 = vmatmul.mubr.bf16.gmra.mrb[112].mxu1 %v14063_v22  ;;  %v14111_v22 = vld [vmem:[%s18240_s0 + $0x1568] ss:$100 sps:$4 sm:$0xff]  }
 0x522   :  { %9569 = vmatmul.mubr.bf16.gmra.mrb[80].mxu0 %v14064_v24  ;;  %7906 = vmatprep.mubr.bf16.mxu1 %v14066_v25  ;;  %v14113_v24 = vld [vmem:[%s18240_s0 + $0x98c] ss:$100 sps:$4 sm:$0xff]   ;;  %v14115_v25 = vld [vmem:[%s18240_s0 + $0x1634] ss:$100 sps:$4 sm:$0xff]  }
 0x523   :  { %9576 = vmatprep.mubr.bf16.mxu0 %v14068_v27  ;;  %v14118_v27 = vld [vmem:[%s18240_s0 + $0x1630] ss:$100 sps:$4 sm:$0xff]  }
 0x524   :  { %v17095_v28 = vpop.f32.mrb[8].mxu1 }
 0x525   :  { %v7694_v29 = vpop.f32.mrb[9].mxu1 }
 0x526   :  { %v17100_v31 = vpop.f32.mrb[10].mxu1  ;;  %v14120_v29 = vld [vmem:[%s18240_s0 + $0xa54] ss:$100 sps:$4 sm:$0xff]  }
 0x527   :  { %v7697_v35 = vpop.f32.mrb[11].mxu1 }
 0x528   :  { %v14126_v35 = vld [vmem:[%s18240_s0 + $0xb1c] ss:$100 sps:$4 sm:$0xff]  }
 0x529   :  { %7907 = vmatmul.mubr.bf16.gmra.mrb[116].mxu1 %v14070_v30  ;;  %v14122_v30 = vld [vmem:[%s18240_s0 + $0x16fc] ss:$100 sps:$4 sm:$0xff]  }
 0x52a   :  { %9577 = vmatmul.mubr.bf16.gmra.mrb[84].mxu0 %v14071_v33  ;;  %7914 = vmatprep.mubr.bf16.mxu1 %v14072_v34  ;;  %v14124_v33 = vld [vmem:[%s18240_s0 + $0xa50] ss:$100 sps:$4 sm:$0xff]   ;;  %v14125_v34 = vld [vmem:[%s18240_s0 + $0x16f8] ss:$100 sps:$4 sm:$0xff]  }
 0x52b   :  { %9584 = vmatprep.mubr.bf16.mxu0 %v14074_v36  ;;  %v14128_v36 = vld [vmem:[%s18240_s0 + $0x17c4] ss:$100 sps:$4 sm:$0xff]  }
 0x52c   :  { %v17111_v37 = vpop.f32.mrb[12].mxu1 }
 0x52d   :  { %v7702_v38 = vpop.f32.mrb[13].mxu1 }
 0x52e   :  { %v17116_v40 = vpop.f32.mrb[14].mxu1  ;;  %v14228_v38 = vld [vmem:[%s18239_s1 + $0x638] sm:$0xff]  }
 0x52f   :  { %v7705_v43 = vpop.f32.mrb[15].mxu1 }
 0x530   :  { %v14136_v43 = vld [vmem:[%s18240_s0 + $0x188c] ss:$100 sps:$4 sm:$0xff]  }
 0x531   :  { %7915 = vmatmul.mubr.bf16.gmra.mrb[120].mxu1 %v14076_v39  ;;  %v14130_v39 = vld [vmem:[%s18240_s0 + $0xb18] ss:$100 sps:$4 sm:$0xff]  }
 0x532   :  { %9585 = vmatmul.mubr.bf16.gmra.mrb[88].mxu0 %v14077_v41  ;;  %7922 = vmatprep.mubr.bf16.mxu1 %v14079_v42  ;;  %v14131_v41 = vld [vmem:[%s18240_s0 + $0x17c0] ss:$100 sps:$4 sm:$0xff]  }
 0x533   :  { %9592 = vmatprep.mubr.bf16.mxu0 %v14081_v44  ;;  %v14134_v42 = vld [vmem:[%s18240_s0 + $0xbe4] ss:$100 sps:$4 sm:$0xff]  }
 0x534   :  { %v17127_v45 = vpop.f32.mrb[16].mxu1  ;;  %v14138_v44 = vld [vmem:[%s18240_s0 + $0xbe0] ss:$100 sps:$4 sm:$0xff]  }
 0x535   :  { %v7710_v46 = vpop.f32.mrb[17].mxu1 }
 0x536   :  { %v17132_v48 = vpop.f32.mrb[18].mxu1  ;;  %v14139_v46 = vld [vmem:[%s18240_s0 + $0x1888] ss:$100 sps:$4 sm:$0xff]  }
 0x537   :  { %v7713_v51 = vpop.f32.mrb[19].mxu1 }
 0x538   :  { %v14142_v51 = vld [vmem:[%s18240_s0 + $0x58] ss:$100 sps:$4 sm:$0xff]  }
 0x539   :  { %7923 = vmatmul.mubr.bf16.gmra.mrb[124].mxu1 %v14083_v47  ;;  %v14140_v47 = vld [vmem:[%s18240_s0 + $0xcac] ss:$100 sps:$4 sm:$0xff]  }
 0x53a   :  { %9593 = vmatmul.mubr.bf16.gmra.mrb[92].mxu0 %v14084_v49  ;;  %8027 = vmatprep.mubr.bf16.mxu1 %v14087_v50  ;;  %v14144_v49 = vld [vmem:[%s18240_s0 + $0x5c] ss:$100 sps:$4 sm:$0xff]   ;;  %v14145_v50 = vld [vmem:[%s18240_s0 + $0xca8] ss:$100 sps:$4 sm:$0xff]  }
 0x53b   :  { %9600 = vmatprep.mubr.bf16.mxu0 %v14088_v52  ;;  %v14146_v52 = vld [vmem:[%s18240_s0 + $0xd74] ss:$100 sps:$4 sm:$0xff]  }
 0x53c   :  { %v17143_v53 = vpop.f32.mrb[20].mxu1 }
 0x53d   :  { %v7718_v54 = vpop.f32.mrb[21].mxu1 }
 0x53e   :  { %v17148_v55 = vpop.f32.mrb[22].mxu1  ;;  %v14148_v54 = vld [vmem:[%s18240_s0 + $0x124] ss:$100 sps:$4 sm:$0xff]  }
 0x53f   :  { %v7721_v57 = vpop.f32.mrb[23].mxu1 }
 0x540   :  { %v14153_v57 = vld [vmem:[%s18240_s0 + $0xe3c] ss:$100 sps:$4 sm:$0xff]  }
 0x541   :  { %8028 = vmatmul.mubr.bf16.vlgmr.msra.gmra.mrb[32].mxu1 %v14085_v0  ;;  %v14150_v0 = vld [vmem:[%s18240_s0 + $0xd70] ss:$100 sps:$4 sm:$0xff]  }
 0x542   :  { %9601 = vmatmul.mubr.bf16.gmra.mrb[96].mxu0 %v14090_v56  ;;  %11417 = vmatpush3.bf16.msra.mxu1 %v16928_v32  ;;  %v14098_v32 = vld [vmem:[%s18240_s0 + $0x13d8] ss:$100 sps:$4 sm:$0xff]   ;;  %v14151_v56 = vld [vmem:[%s18240_s0 + $0x120] ss:$100 sps:$4 sm:$0xff]  }
 0x543   :  { %8035 = vmatprep.mubr.bf16.mxu1 %v14093_v58  ;;  %9608 = vmatprep.mubr.bf16.mxu0 %v14095_v59  ;;  %v14155_v58 = vld [vmem:[%s18240_s0 + $0x1ec] ss:$100 sps:$4 sm:$0xff]   ;;  %v14157_v59 = vld [vmem:[%s18240_s0 + $0xe38] ss:$100 sps:$4 sm:$0xff]  }
 0x544   :  { %v17166_v62 = vpop.f32.mrb[24].mxu1  ;;  %11418 = vmatprep.subr.bf16.mxu1 %v14112_v60 }
 0x545   :  { %v7726_v63 = vpop.f32.mrb[25].mxu1 }
 0x546   :  { %v17171_v2 = vpop.f32.mrb[26].mxu1  ;;  %11419 = vmatpush3.bf16.msra.mxu1 %v14112_v60  ;;  %v14158_v60 = vld [vmem:[%s18240_s0 + $0x1e8] ss:$100 sps:$4 sm:$0xff]   ;;  %v14161_v63 = vld [vmem:[%s18240_s0 + $0x2b4] ss:$100 sps:$4 sm:$0xff]  }
 0x547   :  { %v7729_v4 = vpop.f32.mrb[27].mxu1  ;;  %11420 = vmatprep.subr.bf16.mxu1 %v14133_v61 }
 0x548   :  { %v14167_v4 = vld [vmem:[%s18240_s0 + $0x37c] ss:$100 sps:$4 sm:$0xff]  }
 0x549   :  { %8036 = vmatmul.mubr.bf16.gmra.mrb[36].mxu1 %v14097_v1  ;;  %v14163_v1 = vld [vmem:[%s18240_s0 + $0xf00] ss:$100 sps:$4 sm:$0xff]  }
 0x54a   :  { %9609 = vmatmul.mubr.bf16.gmra.mrb[100].mxu0 %v14098_v32  ;;  %8043 = vmatprep.mubr.bf16.mxu1 %v14099_v3  ;;  %v14164_v32 = vld [vmem:[%s18240_s0 + $0x2b0] ss:$100 sps:$4 sm:$0xff]  }
 0x54b   :  { %9616 = vmatprep.mubr.bf16.mxu0 %v14101_v5  ;;  %11421 = vmatpush3.bf16.msra.mxu1 %v14133_v61  ;;  %v14159_v61 = vld [vmem:[%s18240_s0 + $0xf04] ss:$100 sps:$4 sm:$0xff]   ;;  %v14165_v3 = vld [vmem:[%s18240_s0 + $0xfcc] ss:$100 sps:$4 sm:$0xff]  }
 0x54c   :  { %v17185_v7 = vpop.f32.mrb[28].mxu1  ;;  %11422 = vmatprep.subr.bf16.mxu1 %v14152_v6  ;;  %v14169_v5 = vld [vmem:[%s18240_s0 + $0xfc8] ss:$100 sps:$4 sm:$0xff]  }
 0x54d   :  { %v7734_v9 = vpop.f32.mrb[29].mxu1 }
 0x54e   :  { %v17193_v11 = vpop.f32.mrb[30].mxu1  ;;  %v14174_v9 = vld [vmem:[%s18240_s0 + $0x444] ss:$100 sps:$4 sm:$0xff]  }
 0x54f   :  { %v7737_v16 = vpop.f32.mrb[31].mxu1  ;;  %11423 = vmatpush3.bf16.msra.mxu1 %v14152_v6  ;;  %v14170_v6 = vld [vmem:[%s18240_s0 + $0x378] ss:$100 sps:$4 sm:$0xff]  }
 0x550   :  { %11424 = vmatprep.subr.bf16.mxu1 %v14171_v8  ;;  %v14180_v16 = vld [vmem:[%s18240_s0 + $0x50c] ss:$100 sps:$4 sm:$0xff]  }
 0x551   :  { %8044 = vmatmul.mubr.bf16.gmra.mrb[40].mxu1 %v14103_v10  ;;  %v14176_v10 = vld [vmem:[%s18240_s0 + $0x1090] ss:$100 sps:$4 sm:$0xff]  }
 0x552   :  { %9617 = vmatmul.mubr.bf16.gmra.mrb[104].mxu0 %v14104_v13  ;;  %8051 = vmatprep.mubr.bf16.mxu1 %v14106_v14  ;;  %v14177_v13 = vld [vmem:[%s18240_s0 + $0x440] ss:$100 sps:$4 sm:$0xff]  }
 0x553   :  { %9624 = vmatprep.mubr.bf16.mxu0 %v14108_v17  ;;  %11425 = vmatpush3.bf16.msra.mxu1 %v14171_v8  ;;  %v14172_v8 = vld [vmem:[%s18240_s0 + $0x1094] ss:$100 sps:$4 sm:$0xff]   ;;  %v14178_v14 = vld [vmem:[%s18240_s0 + $0x115c] ss:$100 sps:$4 sm:$0xff]  }
 0x554   :  { %11426 = vmatprep.subr.bf16.mxu1 %v14190_v18  ;;  %v14182_v17 = vld [vmem:[%s18240_s0 + $0x1158] ss:$100 sps:$4 sm:$0xff]  }
 0x557   :  { %11427 = vmatpush3.bf16.msra.mxu1 %v14190_v18  ;;  %v14183_v18 = vld [vmem:[%s18240_s0 + $0x508] ss:$100 sps:$4 sm:$0xff]  }
 0x558   :  { %11428 = vmatprep.subr.bf16.mxu1 %v14209_v19 }
 0x559   :  { %8052 = vmatmul.mubr.bf16.gmra.mrb[44].mxu1 %v14110_v21  ;;  %v14186_v21 = vld [vmem:[%s18240_s0 + $0x5d4] ss:$100 sps:$4 sm:$0xff]  }
 0x55a   :  { %9625 = vmatmul.mubr.bf16.gmra.mrb[108].mxu0 %v14111_v22  ;;  %8059 = vmatprep.mubr.bf16.mxu1 %v14113_v24  ;;  %v14188_v22 = vld [vmem:[%s18240_s0 + $0x1220] ss:$100 sps:$4 sm:$0xff]   ;;  %v14189_v24 = vld [vmem:[%s18240_s0 + $0x5d0] ss:$100 sps:$4 sm:$0xff]  }
 0x55b   :  { %9632 = vmatprep.mubr.bf16.mxu0 %v14115_v25  ;;  %11429 = vmatpush3.bf16.msra.mxu1 %v14209_v19  ;;  %v14184_v19 = vld [vmem:[%s18240_s0 + $0x1224] ss:$100 sps:$4 sm:$0xff]   ;;  %v14191_v25 = vld [vmem:[%s18240_s0 + $0x12ec] ss:$100 sps:$4 sm:$0xff]  }
 0x55c   :  { %11430 = vmatprep.subr.bf16.mxu1 %v14228_v38 }
 0x55f   :  { %11431 = vmatpush3.bf16.msra.mxu1 %v14228_v38  ;;  %v14205_v38 = vld [vmem:[%s18240_s0 + $0x82c] ss:$100 sps:$4 sm:$0xff]  }
 0x561   :  { %8060 = vmatmul.mubr.bf16.gmra.mrb[48].mxu1 %v14117_v26  ;;  %v14193_v26 = vld [vmem:[%s18240_s0 + $0x69c] ss:$100 sps:$4 sm:$0xff]  }
 0x562   :  { %9633 = vmatmul.mubr.bf16.gmra.mrb[112].mxu0 %v14118_v27  ;;  %8067 = vmatprep.mubr.bf16.mxu1 %v14120_v29  ;;  %v14195_v27 = vld [vmem:[%s18240_s0 + $0x12e8] ss:$100 sps:$4 sm:$0xff]   ;;  %v14196_v29 = vld [vmem:[%s18240_s0 + $0x698] ss:$100 sps:$4 sm:$0xff]  }
 0x563   :  { %9640 = vmatprep.mubr.bf16.mxu0 %v14122_v30  ;;  %v14197_v30 = vld [vmem:[%s18240_s0 + $0x13b4] ss:$100 sps:$4 sm:$0xff]  }
 0x569   :  { %8068 = vmatmul.mubr.bf16.gmra.mrb[52].mxu1 %v14124_v33  ;;  %v14199_v33 = vld [vmem:[%s18240_s0 + $0x764] ss:$100 sps:$4 sm:$0xff]  }
 0x56a   :  { %9641 = vmatmul.mubr.bf16.gmra.mrb[116].mxu0 %v14125_v34  ;;  %8075 = vmatprep.mubr.bf16.mxu1 %v14126_v35  ;;  %v14201_v34 = vld [vmem:[%s18240_s0 + $0x13b0] ss:$100 sps:$4 sm:$0xff]   ;;  %v14202_v35 = vld [vmem:[%s18240_s0 + $0x760] ss:$100 sps:$4 sm:$0xff]  }
 0x56b   :  { %9648 = vmatprep.mubr.bf16.mxu0 %v14128_v36  ;;  %v14203_v36 = vld [vmem:[%s18240_s0 + $0x147c] ss:$100 sps:$4 sm:$0xff]  }
 0x571   :  { %8076 = vmatmul.mubr.bf16.gmra.mrb[56].mxu1 %v14130_v39  ;;  %v14207_v39 = vld [vmem:[%s18240_s0 + $0x1478] ss:$100 sps:$4 sm:$0xff]  }
 0x572   :  { %9649 = vmatmul.mubr.bf16.gmra.mrb[120].mxu0 %v14131_v41  ;;  %8083 = vmatprep.mubr.bf16.mxu1 %v14134_v42  ;;  %v14208_v41 = vld [vmem:[%s18240_s0 + $0x828] ss:$100 sps:$4 sm:$0xff]  }
 0x573   :  { %9656 = vmatprep.mubr.bf16.mxu0 %v14136_v43  ;;  %v14210_v42 = vld [vmem:[%s18240_s0 + $0x1544] ss:$100 sps:$4 sm:$0xff]   ;;  %v14212_v43 = vld [vmem:[%s18240_s0 + $0x8f4] ss:$100 sps:$4 sm:$0xff]  }
 0x579   :  { %8084 = vmatmul.mubr.bf16.gmra.mrb[60].mxu1 %v14138_v44  ;;  %v14214_v44 = vld [vmem:[%s18240_s0 + $0x1540] ss:$100 sps:$4 sm:$0xff]  }
 0x57a   :  { %9657 = vmatmul.mubr.bf16.gmra.mrb[124].mxu0 %v14139_v46  ;;  %8091 = vmatprep.mubr.bf16.mxu1 %v14140_v47  ;;  %v14215_v46 = vld [vmem:[%s18240_s0 + $0x8f0] ss:$100 sps:$4 sm:$0xff]  }
 0x57b   :  { %9697 = vmatprep.mubr.bf16.mxu0 %v14144_v49  ;;  %v14216_v47 = vld [vmem:[%s18240_s0 + $0x160c] ss:$100 sps:$4 sm:$0xff]   ;;  %v14218_v49 = vld [vmem:[%s18240_s0 + $0x9bc] ss:$100 sps:$4 sm:$0xff]  }
 0x581   :  { %8092 = vmatmul.mubr.bf16.gmra.mrb[64].mxu1 %v14145_v50  ;;  %v14220_v50 = vld [vmem:[%s18240_s0 + $0x1608] ss:$100 sps:$4 sm:$0xff]  }
 0x582   :  { %9698 = vmatmul.mubr.bf16.vlgmr.msra.gmra.mrb[0].mxu0 %v14142_v51  ;;  %8099 = vmatprep.mubr.bf16.mxu1 %v14146_v52  ;;  %v14221_v51 = vld [vmem:[%s18240_s0 + $0x9b8] ss:$100 sps:$4 sm:$0xff]  }
 0x583   :  { %9705 = vmatprep.mubr.bf16.mxu0 %v14148_v54  ;;  %v14222_v52 = vld [vmem:[%s18240_s0 + $0x16d4] ss:$100 sps:$4 sm:$0xff]   ;;  %v14224_v54 = vld [vmem:[%s18240_s0 + $0xa84] ss:$100 sps:$4 sm:$0xff]  }
 0x589   :  { %8100 = vmatmul.mubr.bf16.gmra.mrb[68].mxu1 %v14150_v0  ;;  %v14226_v0 = vld [vmem:[%s18240_s0 + $0x16d0] ss:$100 sps:$4 sm:$0xff]  }
 0x58a   :  { %9706 = vmatmul.mubr.bf16.gmra.mrb[4].mxu0 %v14151_v56  ;;  %8107 = vmatprep.mubr.bf16.mxu1 %v14153_v57  ;;  %v14227_v56 = vld [vmem:[%s18240_s0 + $0xa80] ss:$100 sps:$4 sm:$0xff]  }
 0x58b   :  { %9713 = vmatprep.mubr.bf16.mxu0 %v14155_v58  ;;  %v14229_v57 = vld [vmem:[%s18240_s0 + $0x179c] ss:$100 sps:$4 sm:$0xff]   ;;  %v14231_v58 = vld [vmem:[%s18240_s0 + $0xb4c] ss:$100 sps:$4 sm:$0xff]  }
 0x591   :  { %8108 = vmatmul.mubr.bf16.gmra.mrb[72].mxu1 %v14157_v59  ;;  %v14233_v59 = vld [vmem:[%s18240_s0 + $0x1798] ss:$100 sps:$4 sm:$0xff]  }
 0x592   :  { %9714 = vmatmul.mubr.bf16.gmra.mrb[8].mxu0 %v14158_v60  ;;  %8115 = vmatprep.mubr.bf16.mxu1 %v14159_v61  ;;  %v14234_v60 = vld [vmem:[%s18240_s0 + $0xb48] ss:$100 sps:$4 sm:$0xff]  }
 0x593   :  { %9721 = vmatprep.mubr.bf16.mxu0 %v14161_v63  ;;  %v14235_v61 = vld [vmem:[%s18240_s0 + $0x1864] ss:$100 sps:$4 sm:$0xff]   ;;  %v14237_v63 = vld [vmem:[%s18240_s0 + $0xc14] ss:$100 sps:$4 sm:$0xff]  }
 0x599   :  { %8116 = vmatmul.mubr.bf16.gmra.mrb[76].mxu1 %v14163_v1  ;;  %v14239_v1 = vld [vmem:[%s18240_s0 + $0x1860] ss:$100 sps:$4 sm:$0xff]  }
 0x59a   :  { %9722 = vmatmul.mubr.bf16.gmra.mrb[12].mxu0 %v14164_v32  ;;  %8123 = vmatprep.mubr.bf16.mxu1 %v14165_v3  ;;  %v14240_v32 = vld [vmem:[%s18240_s0 + $0xc10] ss:$100 sps:$4 sm:$0xff]   ;;  %v14243_v3 = vld [vmem:[%s18240_s0 + $0x60] ss:$100 sps:$4 sm:$0xff]  }
 0x59b   :  { %9729 = vmatprep.mubr.bf16.mxu0 %v14167_v4  ;;  %v14241_v4 = vld [vmem:[%s18240_s0 + $0xcdc] ss:$100 sps:$4 sm:$0xff]  }
 0x5a1   :  { %8124 = vmatmul.mubr.bf16.gmra.mrb[80].mxu1 %v14169_v5  ;;  %v14245_v5 = vld [vmem:[%s18240_s0 + $0x128] ss:$100 sps:$4 sm:$0xff]  }
 0x5a2   :  { %9730 = vmatmul.mubr.bf16.gmra.mrb[16].mxu0 %v14170_v6  ;;  %8131 = vmatprep.mubr.bf16.mxu1 %v14172_v8  ;;  %v14244_v6 = vld [vmem:[%s18240_s0 + $0xcd8] ss:$100 sps:$4 sm:$0xff]   ;;  %v14248_v8 = vld [vmem:[%s18240_s0 + $0x1f0] ss:$100 sps:$4 sm:$0xff]  }
 0x5a3   :  { %9737 = vmatprep.mubr.bf16.mxu0 %v14174_v9  ;;  %v14246_v9 = vld [vmem:[%s18240_s0 + $0xda4] ss:$100 sps:$4 sm:$0xff]  }
 0x5a9   :  { %8132 = vmatmul.mubr.bf16.gmra.mrb[84].mxu1 %v14176_v10  ;;  %v14250_v10 = vld [vmem:[%s18240_s0 + $0x2b8] ss:$100 sps:$4 sm:$0xff]  }
 0x5aa   :  { %9738 = vmatmul.mubr.bf16.gmra.mrb[20].mxu0 %v14177_v13  ;;  %8139 = vmatprep.mubr.bf16.mxu1 %v14178_v14  ;;  %v14249_v13 = vld [vmem:[%s18240_s0 + $0xda0] ss:$100 sps:$4 sm:$0xff]  }
 0x5ab   :  { %9745 = vmatprep.mubr.bf16.mxu0 %v14180_v16  ;;  %v14253_v14 = vld [vmem:[%s18240_s0 + $0x380] ss:$100 sps:$4 sm:$0xff]   ;;  %v14251_v16 = vld [vmem:[%s18240_s0 + $0xe6c] ss:$100 sps:$4 sm:$0xff]  }
 0x5b1   :  { %8140 = vmatmul.mubr.bf16.gmra.mrb[88].mxu1 %v14182_v17  ;;  %v14255_v17 = vld [vmem:[%s18240_s0 + $0x448] ss:$100 sps:$4 sm:$0xff]  }
 0x5b2   :  { %9746 = vmatmul.mubr.bf16.gmra.mrb[24].mxu0 %v14183_v18  ;;  %8147 = vmatprep.mubr.bf16.mxu1 %v14184_v19  ;;  %v14254_v18 = vld [vmem:[%s18240_s0 + $0xe68] ss:$100 sps:$4 sm:$0xff]   ;;  %v14258_v19 = vld [vmem:[%s18240_s0 + $0x510] ss:$100 sps:$4 sm:$0xff]  }
 0x5b3   :  { %9753 = vmatprep.mubr.bf16.mxu0 %v14186_v21  ;;  %v14256_v21 = vld [vmem:[%s18240_s0 + $0xf34] ss:$100 sps:$4 sm:$0xff]  }
 0x5b9   :  { %8148 = vmatmul.mubr.bf16.gmra.mrb[92].mxu1 %v14188_v22 }
 0x5ba   :  { %9754 = vmatmul.mubr.bf16.gmra.mrb[28].mxu0 %v14189_v24  ;;  %8155 = vmatprep.mubr.bf16.mxu1 %v14191_v25  ;;  %v14260_v25 = vld [vmem:[%s18240_s0 + $0x5d8] ss:$100 sps:$4 sm:$0xff]  }
 0x5bb   :  { %9761 = vmatprep.mubr.bf16.mxu0 %v14193_v26 }
 0x5c1   :  { %8156 = vmatmul.mubr.bf16.gmra.mrb[96].mxu1 %v14195_v27  ;;  %v14259_v27 = vld [vmem:[%s18240_s0 + $0xf30] ss:$100 sps:$4 sm:$0xff]  }
 0x5c2   :  { %9762 = vmatmul.mubr.bf16.gmra.mrb[32].mxu0 %v14196_v29  ;;  %8163 = vmatprep.mubr.bf16.mxu1 %v14197_v30  ;;  %v14263_v29 = vld [vmem:[%s18240_s0 + $0x6a0] ss:$100 sps:$4 sm:$0xff]  }
 0x5c3   :  { %9769 = vmatprep.mubr.bf16.mxu0 %v14199_v33  ;;  %v14261_v33 = vld [vmem:[%s18240_s0 + $0xffc] ss:$100 sps:$4 sm:$0xff]  }
 0x5c9   :  { %8164 = vmatmul.mubr.bf16.gmra.mrb[100].mxu1 %v14201_v34 }
 0x5ca   :  { %9770 = vmatmul.mubr.bf16.gmra.mrb[36].mxu0 %v14202_v35  ;;  %8171 = vmatprep.mubr.bf16.mxu1 %v14203_v36  ;;  %v14265_v36 = vld [vmem:[%s18240_s0 + $0x768] ss:$100 sps:$4 sm:$0xff]  }
 0x5cb   :  { %9777 = vmatprep.mubr.bf16.mxu0 %v14205_v38 }
 0x5d1   :  { %8172 = vmatmul.mubr.bf16.gmra.mrb[104].mxu1 %v14207_v39  ;;  %v14264_v39 = vld [vmem:[%s18240_s0 + $0xff8] ss:$100 sps:$4 sm:$0xff]  }
 0x5d2   :  { %9778 = vmatmul.mubr.bf16.gmra.mrb[40].mxu0 %v14208_v41  ;;  %8179 = vmatprep.mubr.bf16.mxu1 %v14210_v42  ;;  %v14268_v41 = vld [vmem:[%s18240_s0 + $0x830] ss:$100 sps:$4 sm:$0xff]  }
 0x5d3   :  { %9785 = vmatprep.mubr.bf16.mxu0 %v14212_v43  ;;  %v14266_v43 = vld [vmem:[%s18240_s0 + $0x10c4] ss:$100 sps:$4 sm:$0xff]  }
 0x5d9   :  { %8180 = vmatmul.mubr.bf16.gmra.mrb[108].mxu1 %v14214_v44 }
 0x5da   :  { %9786 = vmatmul.mubr.bf16.gmra.mrb[44].mxu0 %v14215_v46  ;;  %8187 = vmatprep.mubr.bf16.mxu1 %v14216_v47  ;;  %v14270_v47 = vld [vmem:[%s18240_s0 + $0x8f8] ss:$100 sps:$4 sm:$0xff]  }
 0x5db   :  { %9793 = vmatprep.mubr.bf16.mxu0 %v14218_v49 }
 0x5e1   :  { %8188 = vmatmul.mubr.bf16.gmra.mrb[112].mxu1 %v14220_v50  ;;  %v14269_v50 = vld [vmem:[%s18240_s0 + $0x10c0] ss:$100 sps:$4 sm:$0xff]  }
 0x5e2   :  { %9794 = vmatmul.mubr.bf16.gmra.mrb[48].mxu0 %v14221_v51  ;;  %8195 = vmatprep.mubr.bf16.mxu1 %v14222_v52  ;;  %v14273_v51 = vld [vmem:[%s18240_s0 + $0x9c0] ss:$100 sps:$4 sm:$0xff]  }
 0x5e3   :  { %9801 = vmatprep.mubr.bf16.mxu0 %v14224_v54  ;;  %v14271_v54 = vld [vmem:[%s18240_s0 + $0x118c] ss:$100 sps:$4 sm:$0xff]  }
 0x5e9   :  { %8196 = vmatmul.mubr.bf16.gmra.mrb[116].mxu1 %v14226_v0 }
 0x5ea   :  { %9802 = vmatmul.mubr.bf16.gmra.mrb[52].mxu0 %v14227_v56  ;;  %8203 = vmatprep.mubr.bf16.mxu1 %v14229_v57  ;;  %v14275_v57 = vld [vmem:[%s18240_s0 + $0xa88] ss:$100 sps:$4 sm:$0xff]  }
 0x5eb   :  { %9809 = vmatprep.mubr.bf16.mxu0 %v14231_v58 }
 0x5f1   :  { %8204 = vmatmul.mubr.bf16.gmra.mrb[120].mxu1 %v14233_v59  ;;  %v14274_v59 = vld [vmem:[%s18240_s0 + $0x1188] ss:$100 sps:$4 sm:$0xff]  }
 0x5f2   :  { %9810 = vmatmul.mubr.bf16.gmra.mrb[56].mxu0 %v14234_v60  ;;  %8211 = vmatprep.mubr.bf16.mxu1 %v14235_v61  ;;  %v14278_v60 = vld [vmem:[%s18240_s0 + $0xb50] ss:$100 sps:$4 sm:$0xff]  }
 0x5f3   :  { %9817 = vmatprep.mubr.bf16.mxu0 %v14237_v63  ;;  %v14276_v63 = vld [vmem:[%s18240_s0 + $0x1254] ss:$100 sps:$4 sm:$0xff]  }
 0x5f9   :  { %8212 = vmatmul.mubr.bf16.gmra.mrb[124].mxu1 %v14239_v1 }
 0x5fa   :  { %9818 = vmatmul.mubr.bf16.gmra.mrb[60].mxu0 %v14240_v32  ;;  %11432 = vmatprep.mubr.bf16.mxu1 %v14243_v3  ;;  %v14280_v3 = vld [vmem:[%s18240_s0 + $0xc18] ss:$100 sps:$4 sm:$0xff]  }
 0x5fb   :  { %9825 = vmatprep.mubr.bf16.mxu0 %v14241_v4 }
 0x601   :  { %11433 = vmatmul.mubr.bf16.vlgmr.msra.gmra.mrb[128].mxu1 %v14245_v5  ;;  %v14279_v5 = vld [vmem:[%s18240_s0 + $0x1250] ss:$100 sps:$4 sm:$0xff]  }
 0x602   :  { %9826 = vmatmul.mubr.bf16.gmra.mrb[64].mxu0 %v14244_v6  ;;  %11436 = vmatprep.mubr.bf16.mxu1 %v14248_v8  ;;  %v14283_v6 = vld [vmem:[%s18240_s0 + $0xce0] ss:$100 sps:$4 sm:$0xff]  }
 0x603   :  { %9833 = vmatprep.mubr.bf16.mxu0 %v14246_v9  ;;  %v14281_v9 = vld [vmem:[%s18240_s0 + $0x131c] ss:$100 sps:$4 sm:$0xff]  }
 0x609   :  { %11437 = vmatmul.mubr.bf16.gmra.mrb[132].mxu1 %v14250_v10 }
 0x60a   :  { %9834 = vmatmul.mubr.bf16.gmra.mrb[68].mxu0 %v14249_v13  ;;  %11440 = vmatprep.mubr.bf16.mxu1 %v14253_v14  ;;  %v14285_v14 = vld [vmem:[%s18240_s0 + $0xda8] ss:$100 sps:$4 sm:$0xff]  }
 0x60b   :  { %9841 = vmatprep.mubr.bf16.mxu0 %v14251_v16 }
 0x611   :  { %11441 = vmatmul.mubr.bf16.gmra.mrb[136].mxu1 %v14255_v17  ;;  %v14284_v17 = vld [vmem:[%s18240_s0 + $0x1318] ss:$100 sps:$4 sm:$0xff]  }
 0x612   :  { %9842 = vmatmul.mubr.bf16.gmra.mrb[72].mxu0 %v14254_v18  ;;  %11444 = vmatprep.mubr.bf16.mxu1 %v14258_v19  ;;  %v14288_v18 = vld [vmem:[%s18240_s0 + $0xe70] ss:$100 sps:$4 sm:$0xff]  }
 0x613   :  { %9849 = vmatprep.mubr.bf16.mxu0 %v14256_v21  ;;  %v14286_v21 = vld [vmem:[%s18240_s0 + $0x13e4] ss:$100 sps:$4 sm:$0xff]  }
 0x614   :  { %v17501_v22 = vpop.f32.mrb[32].mxu1 }
 0x615   :  { %v8031_v24 = vpop.f32.mrb[33].mxu1 }
 0x616   :  { %v17506_v26 = vpop.f32.mrb[34].mxu1 }
 0x617   :  { %v8034_v30 = vpop.f32.mrb[35].mxu1 }
 0x618   :  { %v14289_v30 = vld [vmem:[%s18240_s0 + $0x13e0] ss:$100 sps:$4 sm:$0xff]  }
 0x619   :  { %11445 = vmatmul.mubr.bf16.gmra.mrb[140].mxu1 %v14260_v25 }
 0x61a   :  { %9850 = vmatmul.mubr.bf16.gmra.mrb[76].mxu0 %v14259_v27  ;;  %11448 = vmatprep.mubr.bf16.mxu1 %v14263_v29  ;;  %v14290_v27 = vld [vmem:[%s18240_s0 + $0xf38] ss:$100 sps:$4 sm:$0xff]  }
 0x61b   :  { %9857 = vmatprep.mubr.bf16.mxu0 %v14261_v33  ;;  %v14293_v33 = vld [vmem:[%s18240_s0 + $0x1000] ss:$100 sps:$4 sm:$0xff]  }
 0x61c   :  { %v17517_v34 = vpop.f32.mrb[36].mxu1 }
 0x61d   :  { %v8039_v35 = vpop.f32.mrb[37].mxu1 }
 0x61e   :  { %v17522_v38 = vpop.f32.mrb[38].mxu1 }
 0x61f   :  { %v8042_v42 = vpop.f32.mrb[39].mxu1 }
 0x620   :  { %v14295_v42 = vld [vmem:[%s18240_s0 + $0x10c8] ss:$100 sps:$4 sm:$0xff]  }
 0x621   :  { %11449 = vmatmul.mubr.bf16.gmra.mrb[144].mxu1 %v14265_v36  ;;  %v14291_v36 = vld [vmem:[%s18240_s0 + $0x14ac] ss:$100 sps:$4 sm:$0xff]  }
 0x622   :  { %9858 = vmatmul.mubr.bf16.gmra.mrb[80].mxu0 %v14264_v39  ;;  %11452 = vmatprep.mubr.bf16.mxu1 %v14268_v41 }
 0x623   :  { %9865 = vmatprep.mubr.bf16.mxu0 %v14266_v43 }
 0x624   :  { %v17533_v44 = vpop.f32.mrb[40].mxu1 }
 0x625   :  { %v8047_v46 = vpop.f32.mrb[41].mxu1 }
 0x626   :  { %v17538_v49 = vpop.f32.mrb[42].mxu1  ;;  %v14294_v46 = vld [vmem:[%s18240_s0 + $0x14a8] ss:$100 sps:$4 sm:$0xff]  }
 0x627   :  { %v8050_v52 = vpop.f32.mrb[43].mxu1 }
 0x628   :  { %v17632_v52 = vld [vmem:[%s18241_s2] ss:$0 sm:$0xff] }
 0x629   :  { %11453 = vmatmul.mubr.bf16.gmra.mrb[148].mxu1 %v14270_v47  ;;  %v14298_v47 = vld [vmem:[%s18240_s0 + $0x1190] ss:$100 sps:$4 sm:$0xff]  }
 0x62a   :  { %9866 = vmatmul.mubr.bf16.gmra.mrb[84].mxu0 %v14269_v50  ;;  %11456 = vmatprep.mubr.bf16.mxu1 %v14273_v51  ;;  %v14296_v51 = vld [vmem:[%s18240_s0 + $0x1574] ss:$100 sps:$4 sm:$0xff]  }
 0x62b   :  { %9873 = vmatprep.mubr.bf16.mxu0 %v14271_v54  ;;  %v11528_v54 = vadd.f32 %v17632_v52, %v17063_v12  ;;  %v14299_v12 = vld [vmem:[%s18240_s0 + $0x1570] ss:$100 sps:$4 sm:$0xff]  }
 0x62c   :  { %v17549_v0 = vpop.f32.mrb[44].mxu1 }
 0x62d   :  { %v8055_v56 = vpop.f32.mrb[45].mxu1 }
 0x62e   :  { %v17554_v58 = vpop.f32.mrb[46].mxu1 }
 0x62f   :  { %v8058_v61 = vpop.f32.mrb[47].mxu1 }
 0x630   :  { %v11530_v61 = vadd.f32 %v17632_v52, %v17068_v15 }
 0x631   :  { %11457 = vmatmul.mubr.bf16.gmra.mrb[152].mxu1 %v14275_v57 }
 0x632   :  { %9874 = vmatmul.mubr.bf16.gmra.mrb[88].mxu0 %v14274_v59  ;;  %11460 = vmatprep.mubr.bf16.mxu1 %v14278_v60  ;;  %v14300_v60 = vld [vmem:[%s18240_s0 + $0x1258] ss:$100 sps:$4 sm:$0xff]  }
 0x633   :  { %9881 = vmatprep.mubr.bf16.mxu0 %v14276_v63 }
 0x634   :  { %v17565_v1 = vpop.f32.mrb[48].mxu1 }
 0x635   :  { %v8063_v32 = vpop.f32.mrb[49].mxu1 }
 0x636   :  { %v17570_v4 = vpop.f32.mrb[50].mxu1 }
 0x637   :  { %v8066_v8 = vpop.f32.mrb[51].mxu1 }
 0x639   :  { %11461 = vmatmul.mubr.bf16.gmra.mrb[156].mxu1 %v14280_v3 }
 0x63a   :  { %9882 = vmatmul.mubr.bf16.gmra.mrb[92].mxu0 %v14279_v5  ;;  %11464 = vmatprep.mubr.bf16.mxu1 %v14283_v6  ;;  %v14303_v5 = vld [vmem:[%s18240_s0 + $0x1320] ss:$100 sps:$4 sm:$0xff]  }
 0x63b   :  { %9889 = vmatprep.mubr.bf16.mxu0 %v14281_v9  ;;  %v14301_v9 = vld [vmem:[%s18240_s0 + $0x163c] ss:$100 sps:$4 sm:$0xff]  }
 0x63c   :  { %v17581_v10 = vpop.f32.mrb[52].mxu1 }
 0x63d   :  { %v8071_v13 = vpop.f32.mrb[53].mxu1 }
 0x63e   :  { %v17586_v16 = vpop.f32.mrb[54].mxu1 }
 0x63f   :  { %v8074_v19 = vpop.f32.mrb[55].mxu1 }
 0x641   :  { %11465 = vmatmul.mubr.bf16.gmra.mrb[160].mxu1 %v14285_v14  ;;  %v11532_v14 = vadd.f32 %v17632_v52, %v17079_v20  ;;  %v14304_v20 = vld [vmem:[%s18240_s0 + $0x1638] ss:$100 sps:$4 sm:$0xff]  }
 0x642   :  { %9890 = vmatmul.mubr.bf16.gmra.mrb[96].mxu0 %v14284_v17  ;;  %11468 = vmatprep.mubr.bf16.mxu1 %v14288_v18 }
 0x643   :  { %9897 = vmatprep.mubr.bf16.mxu0 %v14286_v21  ;;  %v14305_v21 = vld [vmem:[%s18240_s0 + $0x13e8] ss:$100 sps:$4 sm:$0xff]  }
 0x644   :  { %v17597_v24 = vpop.f32.mrb[56].mxu1 }
 0x645   :  { %v8079_v25 = vpop.f32.mrb[57].mxu1 }
 0x646   :  { %v17602_v29 = vpop.f32.mrb[58].mxu1  ;;  %v11534_v25 = vadd.f32 %v17632_v52, %v17084_v23 }
 0x647   :  { %v8082_v35 = vpop.f32.mrb[59].mxu1 }
 0x648   :  { %v14308_v35 = vld [vmem:[%s18240_s0 + $0x14b0] ss:$100 sps:$4 sm:$0xff]  }
 0x649   :  { %11469 = vmatmul.mubr.bf16.gmra.mrb[164].mxu1 %v14290_v27 }
 0x64a   :  { %9898 = vmatmul.mubr.bf16.gmra.mrb[100].mxu0 %v14289_v30  ;;  %11472 = vmatprep.mubr.bf16.mxu1 %v14293_v33 }
 0x64b   :  { %9905 = vmatprep.mubr.bf16.mxu0 %v14291_v36 }
 0x64c   :  { %v17613_v39 = vpop.f32.mrb[60].mxu1 }
 0x64d   :  { %v8087_v41 = vpop.f32.mrb[61].mxu1 }
 0x64e   :  { %v17618_v43 = vpop.f32.mrb[62].mxu1 }
 0x64f   :  { %v8090_v50 = vpop.f32.mrb[63].mxu1 }
 0x651   :  { %11473 = vmatmul.mubr.bf16.gmra.mrb[168].mxu1 %v14295_v42  ;;  %v14306_v42 = vld [vmem:[%s18240_s0 + $0x1704] ss:$100 sps:$4 sm:$0xff]  }
 0x652   :  { %9906 = vmatmul.mubr.bf16.gmra.mrb[104].mxu0 %v14294_v46  ;;  %11476 = vmatprep.mubr.bf16.mxu1 %v14298_v47  ;;  %v11536_v47 = vadd.f32 %v17632_v52, %v17095_v28  ;;  %v14309_v28 = vld [vmem:[%s18240_s0 + $0x1700] ss:$100 sps:$4 sm:$0xff]  }
 0x653   :  { %9913 = vmatprep.mubr.bf16.mxu0 %v14296_v51 }
 0x654   :  { %v17636_v56 = vpop.f32.mrb[64].mxu1 }
 0x655   :  { %v9699_v57 = vpop.f32.mrb[0].mxu0  ;;  %v8095_v59 = vpop.f32.mrb[65].mxu1 }
 0x656   :  { %v17643_v63 = vadd.f32 %v11528_v54, %v9699_v57  ;;  %v9701_v32 = vpop.f32.mrb[1].mxu0  ;;  %v17645_v3 = vpop.f32.mrb[66].mxu1  ;;  %v14310_v57 = vld [vmem:[%s18240_s0 + $0x1578] ss:$100 sps:$4 sm:$0xff]   ;;  %v11538_v59 = vadd.f32 %v17632_v52, %v17100_v31 }
 0x657   :  { %v9702_v6 = vpop.f32.mrb[2].mxu0  ;;  %v8098_v8 = vpop.f32.mrb[67].mxu1 }
 0x658   :  { %v17656_v15 = vadd.f32 %v11530_v61, %v9702_v6  ;;  %v9704_v13 = vpop.f32.mrb[3].mxu0  ;;  %v14311_v8 = vld [vmem:[%s18240_s0 + $0x17cc] ss:$100 sps:$4 sm:$0xff]  }
 0x659   :  { %11477 = vmatmul.mubr.bf16.gmra.mrb[172].mxu1 %v14300_v60  ;;  %v11540_v13 = vadd.f32 %v17632_v52, %v17111_v37  ;;  %v14314_v37 = vld [vmem:[%s18240_s0 + $0x17c8] ss:$100 sps:$4 sm:$0xff]  }
 0x65a   :  { %9914 = vmatmul.mubr.bf16.gmra.mrb[108].mxu0 %v14299_v12  ;;  %11480 = vmatprep.mubr.bf16.mxu1 %v14303_v5  ;;  %v14313_v12 = vld [vmem:[%s18240_s0 + $0x1640] ss:$100 sps:$4 sm:$0xff]  }
 0x65b   :  { %9921 = vmatprep.mubr.bf16.mxu0 %v14301_v9 }
 0x65c   :  { %v17660_v17 = vpop.f32.mrb[68].mxu1 }
 0x65d   :  { %v9707_v18 = vpop.f32.mrb[4].mxu0  ;;  %v8103_v19 = vpop.f32.mrb[69].mxu1 }
 0x65e   :  { %v17667_v27 = vadd.f32 %v11532_v14, %v9707_v18  ;;  %v9709_v30 = vpop.f32.mrb[5].mxu0  ;;  %v17669_v33 = vpop.f32.mrb[70].mxu1 }
 0x65f   :  { %v9710_v36 = vpop.f32.mrb[6].mxu0  ;;  %v8106_v41 = vpop.f32.mrb[71].mxu1 }
 0x660   :  { %v17680_v23 = vadd.f32 %v11534_v25, %v9710_v36  ;;  %v9712_v46 = vpop.f32.mrb[7].mxu0  ;;  %v11542_v25 = vadd.f32 %v17632_v52, %v17116_v40  ;;  %v14318_v36 = vld [vmem:[%s18240_s0 + $0x17d0] ss:$100 sps:$4 sm:$0xff]  }
 0x661   :  { %11481 = vmatmul.mubr.bf16.gmra.mrb[176].mxu1 %v14305_v21  ;;  %v14315_v21 = vld [vmem:[%s18240_s0 + $0x1708] ss:$100 sps:$4 sm:$0xff]   ;;  %v14316_v46 = vld [vmem:[%s18240_s0 + $0x1894] ss:$100 sps:$4 sm:$0xff]  }
 0x662   :  { %9922 = vmatmul.mubr.bf16.gmra.mrb[112].mxu0 %v14304_v20  ;;  %11484 = vmatprep.mubr.bf16.mxu1 %v14308_v35 }
 0x663   :  { %9929 = vmatprep.mubr.bf16.mxu0 %v14306_v42 }
 0x664   :  { %v17684_v50 = vpop.f32.mrb[72].mxu1 }
 0x665   :  { %v9715_v51 = vpop.f32.mrb[8].mxu0  ;;  %v8111_v54 = vpop.f32.mrb[73].mxu1 }
 0x666   :  { %v17691_v60 = vadd.f32 %v11536_v47, %v9715_v51  ;;  %v9717_v61 = vpop.f32.mrb[9].mxu0  ;;  %v17693_v32 = vpop.f32.mrb[74].mxu1  ;;  %v11544_v51 = vadd.f32 %v17632_v52, %v17127_v45  ;;  %v14319_v45 = vld [vmem:[%s18240_s0 + $0x1890] ss:$100 sps:$4 sm:$0xff]  }
 0x667   :  { %v9718_v5 = vpop.f32.mrb[10].mxu0  ;;  %v8114_v6 = vpop.f32.mrb[75].mxu1  ;;  %v14320_v61 = vld [vmem:[%s18240_s0 + $0x1898] ss:$100 sps:$4 sm:$0xff]  }
 0x668   :  { %v17704_v31 = vadd.f32 %v11538_v59, %v9718_v5  ;;  %v9720_v9 = vpop.f32.mrb[11].mxu0 }
 0x669   :  { %11485 = vmatmul.mubr.bf16.gmra.mrb[180].mxu1 %v14310_v57 }
 0x66a   :  { %9930 = vmatmul.mubr.bf16.gmra.mrb[116].mxu0 %v14309_v28  ;;  %11488 = vmatprep.mubr.bf16.mxu1 %v14313_v12  ;;  %v11546_v28 = vadd.f32 %v17632_v52, %v17132_v48 }
 0x66b   :  { %9937 = vmatprep.mubr.bf16.mxu0 %v14311_v8 }
 0x66c   :  { %v17708_v14 = vpop.f32.mrb[76].mxu1 }
 0x66d   :  { %v9723_v18 = vpop.f32.mrb[12].mxu0  ;;  %v8119_v19 = vpop.f32.mrb[77].mxu1 }
 0x66e   :  { %v17715_v30 = vadd.f32 %v11540_v13, %v9723_v18  ;;  %v9725_v20 = vpop.f32.mrb[13].mxu0  ;;  %v17717_v35 = vpop.f32.mrb[78].mxu1  ;;  %v11548_v19 = vadd.f32 %v17632_v52, %v17143_v53  ;;  %v11552_v53 = vadd.f32 %v17632_v52, %v17166_v62  ;;  %v11556_v62 = vadd.f32 %v17632_v52, %v17185_v7 }
 0x66f   :  { %v9726_v41 = vpop.f32.mrb[14].mxu0  ;;  %v8122_v42 = vpop.f32.mrb[79].mxu1  ;;  %v11550_v20 = vadd.f32 %v17632_v52, %v17148_v55  ;;  %v11554_v55 = vadd.f32 %v17632_v52, %v17171_v2  ;;  %v11558_v2 = vadd.f32 %v17632_v52, %v17193_v11  ;;  %v11560_v7 = vadd.f32 %v17632_v52, %v17501_v22 }
 0x670   :  { %v17728_v40 = vadd.f32 %v11542_v25, %v9726_v41  ;;  %v9728_v47 = vpop.f32.mrb[15].mxu0  ;;  %v11562_v11 = vadd.f32 %v17632_v52, %v17506_v26  ;;  %v11564_v22 = vadd.f32 %v17632_v52, %v17517_v34  ;;  %v11566_v26 = vadd.f32 %v17632_v52, %v17522_v38 }
 0x671   :  { %11489 = vmatmul.mubr.bf16.gmra.mrb[184].mxu1 %v14315_v21  ;;  %v11568_v34 = vadd.f32 %v17632_v52, %v17533_v44  ;;  %v11570_v38 = vadd.f32 %v17632_v52, %v17538_v49  ;;  %v11572_v44 = vadd.f32 %v17632_v52, %v17549_v0  ;;  %v11574_v49 = vadd.f32 %v17632_v52, %v17554_v58 }
 0x672   :  { %9938 = vmatmul.mubr.bf16.gmra.mrb[120].mxu0 %v14314_v37  ;;  %11492 = vmatprep.mubr.bf16.mxu1 %v14318_v36  ;;  %v11576_v0 = vadd.f32 %v17632_v52, %v17565_v1  ;;  %v11578_v58 = vadd.f32 %v17632_v52, %v17570_v4  ;;  %v11580_v1 = vadd.f32 %v17632_v52, %v17581_v10 }
 0x673   :  { %9945 = vmatprep.mubr.bf16.mxu0 %v14316_v46  ;;  %v11582_v4 = vadd.f32 %v17632_v52, %v17586_v16  ;;  %v11584_v10 = vadd.f32 %v17632_v52, %v17597_v24  ;;  %v11586_v16 = vadd.f32 %v17632_v52, %v17602_v29  ;;  %v11588_v24 = vadd.f32 %v17632_v52, %v17613_v39 }
 0x674   :  { %v17732_v54 = vpop.f32.mrb[80].mxu1  ;;  %v11590_v29 = vadd.f32 %v17632_v52, %v17618_v43  ;;  %v11592_v39 = vadd.f32 %v17632_v52, %v17636_v56  ;;  %v11594_v43 = vadd.f32 %v17632_v52, %v17645_v3 }
 0x675   :  { %v9731_v57 = vpop.f32.mrb[16].mxu0  ;;  %v8127_v59 = vpop.f32.mrb[81].mxu1 }
 0x676   :  { %v17739_v12 = vadd.f32 %v11544_v51, %v9731_v57  ;;  %v9733_v5 = vpop.f32.mrb[17].mxu0  ;;  %v17741_v6 = vpop.f32.mrb[82].mxu1 }
 0x677   :  { %v9734_v8 = vpop.f32.mrb[18].mxu0  ;;  %v8130_v9 = vpop.f32.mrb[83].mxu1 }
 0x678   :  { %v17746_v13 = vadd.f32 %v11546_v28, %v9734_v8  ;;  %v9736_v18 = vpop.f32.mrb[19].mxu0 }
 0x679   :  { %11493 = vmatmul.mubr.bf16.gmra.mrb[188].mxu1 %v14320_v61 }
 0x67a   :  { %9946 = vmatmul.mubr.bf16.gmra.mrb[124].mxu0 %v14319_v45 }
 0x67c   :  { %v17750_v48 = vpop.f32.mrb[84].mxu1 }
 0x67d   :  { %v9739_v21 = vpop.f32.mrb[20].mxu0  ;;  %v8135_v25 = vpop.f32.mrb[85].mxu1 }
 0x67e   :  { %v17754_v37 = vadd.f32 %v11548_v19, %v9739_v21  ;;  %v9741_v36 = vpop.f32.mrb[21].mxu0  ;;  %v17756_v41 = vpop.f32.mrb[86].mxu1 }
 0x67f   :  { %v9742_v42 = vpop.f32.mrb[22].mxu0  ;;  %v8138_v46 = vpop.f32.mrb[87].mxu1 }
 0x680   :  { %v17758_v47 = vadd.f32 %v11550_v20, %v9742_v42  ;;  %v9744_v51 = vpop.f32.mrb[23].mxu0 }
 0x684   :  { %v17762_v57 = vpop.f32.mrb[88].mxu1 }
 0x685   :  { %v9747_v59 = vpop.f32.mrb[24].mxu0  ;;  %v8143_v61 = vpop.f32.mrb[89].mxu1 }
 0x686   :  { %v17766_v28 = vadd.f32 %v11552_v53, %v9747_v59  ;;  %v9749_v5 = vpop.f32.mrb[25].mxu0  ;;  %v17768_v45 = vpop.f32.mrb[90].mxu1 }
 0x687   :  { %v9750_v8 = vpop.f32.mrb[26].mxu0  ;;  %v8146_v9 = vpop.f32.mrb[91].mxu1 }
 0x688   :  { %v17770_v18 = vadd.f32 %v11554_v55, %v9750_v8  ;;  %v9752_v19 = vpop.f32.mrb[27].mxu0 }
 0x68c   :  { %v17774_v21 = vpop.f32.mrb[92].mxu1 }
 0x68d   :  { %v9755_v25 = vpop.f32.mrb[28].mxu0  ;;  %v8151_v20 = vpop.f32.mrb[93].mxu1 }
 0x68e   :  { %v17778_v36 = vadd.f32 %v11556_v62, %v9755_v25  ;;  %v9757_v42 = vpop.f32.mrb[29].mxu0  ;;  %v17780_v46 = vpop.f32.mrb[94].mxu1 }
 0x68f   :  { %v9758_v51 = vpop.f32.mrb[30].mxu0  ;;  %v8154_v53 = vpop.f32.mrb[95].mxu1 }
 0x690   :  { %v17782_v59 = vadd.f32 %v11558_v2, %v9758_v51  ;;  %v9760_v61 = vpop.f32.mrb[31].mxu0 }
 0x694   :  { %v17786_v55 = vpop.f32.mrb[96].mxu1 }
 0x695   :  { %18243 = vst [vmem:[#allocation2_spill] sm:$0xff] %v17786_v55  ;;  %v9763_v5 = vpop.f32.mrb[32].mxu0  ;;  %v8159_v8 = vpop.f32.mrb[97].mxu1 }
 0x696   :  { %v17790_v9 = vadd.f32 %v11560_v7, %v9763_v5  ;;  %v9765_v19 = vpop.f32.mrb[33].mxu0  ;;  %v17792_v62 = vpop.f32.mrb[98].mxu1 }
 0x697   :  { %18244 = vst [vmem:[#allocation3_spill] sm:$0xff] %v17792_v62  ;;  %v9766_v25 = vpop.f32.mrb[34].mxu0  ;;  %v8162_v20 = vpop.f32.mrb[99].mxu1 }
 0x698   :  { %v17794_v2 = vadd.f32 %v11562_v11, %v9766_v25  ;;  %v9768_v42 = vpop.f32.mrb[35].mxu0 }
 0x69c   :  { %v17798_v51 = vpop.f32.mrb[100].mxu1 }
 0x69d   :  { %18245 = vst [vmem:[#allocation4_spill] sm:$0xff] %v17798_v51  ;;  %v9771_v53 = vpop.f32.mrb[36].mxu0  ;;  %v8167_v61 = vpop.f32.mrb[101].mxu1 }
 0x69e   :  { %v17802_v7 = vadd.f32 %v11564_v22, %v9771_v53  ;;  %v9773_v5 = vpop.f32.mrb[37].mxu0  ;;  %v17804_v8 = vpop.f32.mrb[102].mxu1 }
 0x69f   :  { %18246 = vst [vmem:[#allocation5_spill] sm:$0xff] %v17804_v8  ;;  %v9774_v19 = vpop.f32.mrb[38].mxu0  ;;  %v8170_v20 = vpop.f32.mrb[103].mxu1 }
 0x6a0   :  { %v17806_v11 = vadd.f32 %v11566_v26, %v9774_v19  ;;  %v9776_v25 = vpop.f32.mrb[39].mxu0 }
 0x6a4   :  { %v17810_v42 = vpop.f32.mrb[104].mxu1 }
 0x6a5   :  { %18247 = vst [vmem:[#allocation6_spill] sm:$0xff] %v17810_v42  ;;  %v9779_v51 = vpop.f32.mrb[40].mxu0  ;;  %v8175_v61 = vpop.f32.mrb[105].mxu1 }
 0x6a6   :  { %v17814_v22 = vadd.f32 %v11568_v34, %v9779_v51  ;;  %v9781_v53 = vpop.f32.mrb[41].mxu0  ;;  %v17816_v5 = vpop.f32.mrb[106].mxu1 }
 0x6a7   :  { %18248 = vst [vmem:[#allocation7_spill] sm:$0xff] %v17816_v5  ;;  %v9782_v8 = vpop.f32.mrb[42].mxu0  ;;  %v8178_v20 = vpop.f32.mrb[107].mxu1 }
 0x6a8   :  { %v17818_v26 = vadd.f32 %v11570_v38, %v9782_v8  ;;  %v9784_v19 = vpop.f32.mrb[43].mxu0 }
 0x6ac   :  { %v17822_v25 = vpop.f32.mrb[108].mxu1 }
 0x6ad   :  { %18249 = vst [vmem:[#allocation8_spill] sm:$0xff] %v17822_v25  ;;  %v9787_v42 = vpop.f32.mrb[44].mxu0  ;;  %v8183_v61 = vpop.f32.mrb[109].mxu1 }
 0x6ae   :  { %v17826_v51 = vadd.f32 %v11572_v44, %v9787_v42  ;;  %v9789_v34 = vpop.f32.mrb[45].mxu0  ;;  %v17828_v53 = vpop.f32.mrb[110].mxu1 }
 0x6af   :  { %18250 = vst [vmem:[#allocation9_spill] sm:$0xff] %v17828_v53  ;;  %v9790_v5 = vpop.f32.mrb[46].mxu0  ;;  %v8186_v20 = vpop.f32.mrb[111].mxu1 }
 0x6b0   :  { %v17830_v8 = vadd.f32 %v11574_v49, %v9790_v5  ;;  %v9792_v38 = vpop.f32.mrb[47].mxu0 }
 0x6b4   :  { %v17834_v19 = vpop.f32.mrb[112].mxu1 }
 0x6b5   :  { %18251 = vst [vmem:[#allocation10_spill] sm:$0xff] %v17834_v19  ;;  %v9795_v25 = vpop.f32.mrb[48].mxu0  ;;  %v8191_v61 = vpop.f32.mrb[113].mxu1 }
 0x6b6   :  { %v17838_v42 = vadd.f32 %v11576_v0, %v9795_v25  ;;  %v9797_v44 = vpop.f32.mrb[49].mxu0  ;;  %v17840_v34 = vpop.f32.mrb[114].mxu1 }
 0x6b7   :  { %18252 = vst [vmem:[#allocation11_spill] sm:$0xff] %v17840_v34  ;;  %v9798_v53 = vpop.f32.mrb[50].mxu0  ;;  %v8194_v20 = vpop.f32.mrb[115].mxu1 }
 0x6b8   :  { %v17842_v5 = vadd.f32 %v11578_v58, %v9798_v53  ;;  %v9800_v49 = vpop.f32.mrb[51].mxu0 }
 0x6bc   :  { %v17846_v38 = vpop.f32.mrb[116].mxu1 }
 0x6bd   :  { %18253 = vst [vmem:[#allocation12_spill] sm:$0xff] %v17846_v38  ;;  %v9803_v19 = vpop.f32.mrb[52].mxu0  ;;  %v8199_v61 = vpop.f32.mrb[117].mxu1 }
 0x6be   :  { %v17850_v25 = vadd.f32 %v11580_v1, %v9803_v19  ;;  %v9805_v0 = vpop.f32.mrb[53].mxu0  ;;  %v17852_v44 = vpop.f32.mrb[118].mxu1 }
 0x6bf   :  { %18254 = vst [vmem:[#allocation13_spill] sm:$0xff] %v17852_v44  ;;  %v9806_v34 = vpop.f32.mrb[54].mxu0  ;;  %v8202_v20 = vpop.f32.mrb[119].mxu1 }
 0x6c0   :  { %v17854_v53 = vadd.f32 %v11582_v4, %v9806_v34  ;;  %v9808_v58 = vpop.f32.mrb[55].mxu0 }
 0x6c4   :  { %v17858_v49 = vpop.f32.mrb[120].mxu1 }
 0x6c5   :  { %18255 = vst [vmem:[#allocation14_spill] sm:$0xff] %v17858_v49  ;;  %v9811_v38 = vpop.f32.mrb[56].mxu0  ;;  %v8207_v61 = vpop.f32.mrb[121].mxu1 }
 0x6c6   :  { %v17862_v19 = vadd.f32 %v11584_v10, %v9811_v38  ;;  %v9813_v1 = vpop.f32.mrb[57].mxu0  ;;  %v17864_v0 = vpop.f32.mrb[122].mxu1 }
 0x6c7   :  { %18256 = vst [vmem:[#allocation15_spill] sm:$0xff] %v17864_v0  ;;  %v9814_v44 = vpop.f32.mrb[58].mxu0  ;;  %v8210_v20 = vpop.f32.mrb[123].mxu1 }
 0x6c8   :  { %v17866_v34 = vadd.f32 %v11586_v16, %v9814_v44  ;;  %v9816_v4 = vpop.f32.mrb[59].mxu0 }
 0x6ca   :  { %18257 = vst [vmem:[#allocation16_spill] sm:$0xff] %v17866_v34 }
 0x6cc   :  { %v17870_v58 = vpop.f32.mrb[124].mxu1 }
 0x6cd   :  { %18258 = vst [vmem:[#allocation17_spill] sm:$0xff] %v17870_v58  ;;  %v9819_v49 = vpop.f32.mrb[60].mxu0  ;;  %v8215_v61 = vpop.f32.mrb[125].mxu1 }
 0x6ce   :  { %v17874_v38 = vadd.f32 %v11588_v24, %v9819_v49  ;;  %v9821_v10 = vpop.f32.mrb[61].mxu0  ;;  %v17876_v1 = vpop.f32.mrb[126].mxu1 }
 0x6cf   :  { %18259 = vst [vmem:[#allocation18_spill] sm:$0xff] %v17876_v1  ;;  %v9822_v0 = vpop.f32.mrb[62].mxu0  ;;  %v8218_v20 = vpop.f32.mrb[127].mxu1 }
 0x6d0   :  { %v17878_v44 = vadd.f32 %v11590_v29, %v9822_v0  ;;  %v9824_v16 = vpop.f32.mrb[63].mxu0 }
 0x6d4   :  { %v11434_v4 = vpop.f32.mrb[128].mxu1 }
 0x6d5   :  { %v9827_v58 = vpop.f32.mrb[64].mxu0  ;;  %v9997_v61 = vadd.f32 %v17667_v27, %v11434_v4  ;;  %v9988_v62 = vpop.f32.mrb[129].mxu1 }
 0x6d6   :  { %v17885_v49 = vadd.f32 %v11592_v39, %v9827_v58  ;;  %v9829_v24 = vpop.f32.mrb[65].mxu0  ;;  %v9989_v10 = vadd.f32 %v17643_v63, %v9988_v62  ;;  %v11435_v20 = vpop.f32.mrb[130].mxu1 }
 0x6d7   :  { %v10245_v0 = vmax.f32 %v9997_v61, 0.0  ;;  %v9830_v29 = vpop.f32.mrb[66].mxu0  ;;  %v10000_v16 = vadd.f32 %v17680_v23, %v11435_v20  ;;  %v9991_v1 = vpop.f32.mrb[131].mxu1  ;;  %v11596_v23 = vadd.f32 %v17632_v52, %v17660_v17 }
 0x6d8   :  { %v10243_v56 = vmax.f32 %v9989_v10, 0.0  ;;  %v17889_v55 = vadd.f32 %v11594_v43, %v9830_v29  ;;  %v9832_v34 = vpop.f32.mrb[67].mxu0  ;;  %v9992_v27 = vadd.f32 %v17656_v15, %v9991_v1  ;;  %v11598_v1 = vadd.f32 %v17632_v52, %v17669_v33 }
 0x6d9   :  { %10309 = vst [vmem:[%s18242_s3 + $0x10] sm:$0xff] %v10245_v0  ;;  %v10246_v3 = vmax.f32 %v10000_v16, 0.0 }
 0x6da   :  { %10307 = vst [vmem:[%s18242_s3] sm:$0xff] %v10243_v56  ;;  %v10244_v63 = vmax.f32 %v9992_v27, 0.0 }
 0x6db   :  { %10310 = vst [vmem:[%s18242_s3 + $0x18] sm:$0xff] %v10246_v3 }
 0x6dc   :  { %10308 = vst [vmem:[%s18242_s3 + $0x8] sm:$0xff] %v10244_v63  ;;  %v11438_v15 = vpop.f32.mrb[132].mxu1  ;;  %v11602_v63 = vadd.f32 %v17632_v52, %v17693_v32 }
 0x6dd   :  { %v9835_v62 = vpop.f32.mrb[68].mxu0  ;;  %v10013_v34 = vadd.f32 %v17715_v30, %v11438_v15  ;;  %v10004_v58 = vpop.f32.mrb[133].mxu1 }
 0x6de   :  { %v17909_v39 = vadd.f32 %v11596_v23, %v9835_v62  ;;  %v9837_v4 = vpop.f32.mrb[69].mxu0  ;;  %v10005_v61 = vadd.f32 %v17691_v60, %v10004_v58  ;;  %v11439_v43 = vpop.f32.mrb[134].mxu1 }
 0x6df   :  { %v10249_v24 = vmax.f32 %v10013_v34, 0.0  ;;  %v9838_v17 = vpop.f32.mrb[70].mxu0  ;;  %v10016_v10 = vadd.f32 %v17728_v40, %v11439_v43  ;;  %v10007_v20 = vpop.f32.mrb[135].mxu1  ;;  %v11600_v40 = vadd.f32 %v17632_v52, %v17684_v50 }
 0x6e0   :  { %v10247_v0 = vmax.f32 %v10005_v61, 0.0  ;;  %v17913_v29 = vadd.f32 %v11598_v1, %v9838_v17  ;;  %v9840_v16 = vpop.f32.mrb[71].mxu0  ;;  %v10008_v30 = vadd.f32 %v17704_v31, %v10007_v20 }
 0x6e1   :  { %10313 = vst [vmem:[%s18242_s3 + $0x30] sm:$0xff] %v10249_v24  ;;  %v10250_v33 = vmax.f32 %v10016_v10, 0.0 }
 0x6e2   :  { %10311 = vst [vmem:[%s18242_s3 + $0x20] sm:$0xff] %v10247_v0  ;;  %v10248_v60 = vmax.f32 %v10008_v30, 0.0  ;;  %v11606_v0 = vadd.f32 %v17632_v52, %v17717_v35 }
 0x6e3   :  { %10314 = vst [vmem:[%s18242_s3 + $0x38] sm:$0xff] %v10250_v33 }
 0x6e4   :  { %10312 = vst [vmem:[%s18242_s3 + $0x28] sm:$0xff] %v10248_v60  ;;  %v11442_v31 = vpop.f32.mrb[136].mxu1 }
 0x6e5   :  { %v9843_v56 = vpop.f32.mrb[72].mxu0  ;;  %v10029_v27 = vadd.f32 %v17754_v37, %v11442_v31  ;;  %v10020_v3 = vpop.f32.mrb[137].mxu1 }
 0x6e6   :  { %v17933_v23 = vadd.f32 %v11600_v40, %v9843_v56  ;;  %v9845_v15 = vpop.f32.mrb[73].mxu0  ;;  %v10021_v62 = vadd.f32 %v17739_v12, %v10020_v3  ;;  %v11443_v34 = vpop.f32.mrb[138].mxu1 }
 0x6e7   :  { %v10253_v58 = vmax.f32 %v10029_v27, 0.0  ;;  %v9846_v50 = vpop.f32.mrb[74].mxu0  ;;  %v10032_v1 = vadd.f32 %v17758_v47, %v11443_v34  ;;  %v10023_v4 = vpop.f32.mrb[139].mxu1  ;;  %v11604_v47 = vadd.f32 %v17632_v52, %v17708_v14 }
 0x6e8   :  { %v10251_v61 = vmax.f32 %v10021_v62, 0.0  ;;  %v17937_v43 = vadd.f32 %v11602_v63, %v9846_v50  ;;  %v9848_v24 = vpop.f32.mrb[75].mxu0  ;;  %v10024_v37 = vadd.f32 %v17746_v13, %v10023_v4 }
 0x6e9   :  { %10317 = vst [vmem:[%s18242_s3 + $0x50] sm:$0xff] %v10253_v58  ;;  %v10254_v32 = vmax.f32 %v10032_v1, 0.0  ;;  %v11610_v58 = vadd.f32 %v17632_v52, %v17741_v6 }
 0x6ea   :  { %10315 = vst [vmem:[%s18242_s3 + $0x40] sm:$0xff] %v10251_v61  ;;  %v10252_v12 = vmax.f32 %v10024_v37, 0.0 }
 0x6eb   :  { %10318 = vst [vmem:[%s18242_s3 + $0x58] sm:$0xff] %v10254_v32 }
 0x6ec   :  { %10316 = vst [vmem:[%s18242_s3 + $0x48] sm:$0xff] %v10252_v12  ;;  %v11446_v13 = vpop.f32.mrb[140].mxu1 }
 0x6ed   :  { %v9851_v17 = vpop.f32.mrb[76].mxu0  ;;  %v10045_v10 = vadd.f32 %v17778_v36, %v11446_v13  ;;  %v10036_v20 = vpop.f32.mrb[141].mxu1 }
 0x6ee   :  { %v17957_v16 = vadd.f32 %v11604_v47, %v9851_v17  ;;  %v9853_v30 = vpop.f32.mrb[77].mxu0  ;;  %v10037_v33 = vadd.f32 %v17766_v28, %v10036_v20  ;;  %v11447_v60 = vpop.f32.mrb[142].mxu1 }
 0x6ef   :  { %v10257_v40 = vmax.f32 %v10045_v10, 0.0  ;;  %v9854_v14 = vpop.f32.mrb[78].mxu0  ;;  %v10048_v31 = vadd.f32 %v17782_v59, %v11447_v60  ;;  %v10039_v56 = vpop.f32.mrb[143].mxu1  ;;  %v11608_v59 = vadd.f32 %v17632_v52, %v17732_v54 }
 0x6f0   :  { %v10255_v27 = vmax.f32 %v10037_v33, 0.0  ;;  %v17961_v3 = vadd.f32 %v11606_v0, %v9854_v14  ;;  %v9856_v63 = vpop.f32.mrb[79].mxu0  ;;  %v10040_v36 = vadd.f32 %v17770_v18, %v10039_v56  ;;  %v11614_v0 = vadd.f32 %v17632_v52, %v17756_v41 }
 0x6f1   :  { %10321 = vst [vmem:[%s18242_s3 + $0x70] sm:$0xff] %v10257_v40  ;;  %v10258_v35 = vmax.f32 %v10048_v31, 0.0 }
 0x6f2   :  { %10319 = vst [vmem:[%s18242_s3 + $0x60] sm:$0xff] %v10255_v27  ;;  %v10256_v28 = vmax.f32 %v10040_v36, 0.0 }
 0x6f3   :  { %10322 = vst [vmem:[%s18242_s3 + $0x78] sm:$0xff] %v10258_v35 }
 0x6f4   :  { %10320 = vst [vmem:[%s18242_s3 + $0x68] sm:$0xff] %v10256_v28  ;;  %v11450_v18 = vpop.f32.mrb[144].mxu1 }
 0x6f5   :  { %v9859_v15 = vpop.f32.mrb[80].mxu0  ;;  %v10061_v62 = vadd.f32 %v17802_v7, %v11450_v18  ;;  %v10052_v34 = vpop.f32.mrb[145].mxu1  ;;  %v11618_v18 = vadd.f32 %v17632_v52, %v17768_v45 }
 0x6f6   :  { %v17981_v50 = vadd.f32 %v11608_v59, %v9859_v15  ;;  %v9861_v1 = vpop.f32.mrb[81].mxu0  ;;  %v10053_v4 = vadd.f32 %v17790_v9, %v10052_v34  ;;  %v11451_v61 = vpop.f32.mrb[146].mxu1 }
 0x6f7   :  { %v10261_v24 = vmax.f32 %v10061_v62, 0.0  ;;  %v9862_v54 = vpop.f32.mrb[82].mxu0  ;;  %v10064_v37 = vadd.f32 %v17806_v11, %v11451_v61  ;;  %v10055_v32 = vpop.f32.mrb[147].mxu1  ;;  %v11612_v11 = vadd.f32 %v17632_v52, %v17750_v48 }
 0x6f8   :  { %v10259_v12 = vmax.f32 %v10053_v4, 0.0  ;;  %v17985_v47 = vadd.f32 %v11610_v58, %v9862_v54  ;;  %v9864_v13 = vpop.f32.mrb[83].mxu0  ;;  %v10056_v7 = vadd.f32 %v17794_v2, %v10055_v32 }
 0x6f9   :  { %10325 = vst [vmem:[%s18242_s3 + $0x90] sm:$0xff] %v10261_v24  ;;  %v10262_v6 = vmax.f32 %v10064_v37, 0.0 }
 0x6fa   :  { %10323 = vst [vmem:[%s18242_s3 + $0x80] sm:$0xff] %v10259_v12  ;;  %v10260_v9 = vmax.f32 %v10056_v7, 0.0  ;;  %v11622_v7 = vadd.f32 %v17632_v52, %v17780_v46 }
 0x6fb   :  { %10326 = vst [vmem:[%s18242_s3 + $0x98] sm:$0xff] %v10262_v6 }
 0x6fc   :  { %10324 = vst [vmem:[%s18242_s3 + $0x88] sm:$0xff] %v10260_v9  ;;  %v11454_v2 = vpop.f32.mrb[148].mxu1 }
 0x6fd   :  { %v9867_v17 = vpop.f32.mrb[84].mxu0  ;;  %v10077_v10 = vadd.f32 %v17826_v51, %v11454_v2  ;;  %v10068_v20 = vpop.f32.mrb[149].mxu1 }
 0x6fe   :  { %v18005_v30 = vadd.f32 %v11612_v11, %v9867_v17  ;;  %v9869_v33 = vpop.f32.mrb[85].mxu0  ;;  %v10069_v60 = vadd.f32 %v17814_v22, %v10068_v20  ;;  %v11455_v40 = vpop.f32.mrb[150].mxu1 }
 0x6ff   :  { %v10265_v14 = vmax.f32 %v10077_v10, 0.0  ;;  %v9870_v48 = vpop.f32.mrb[86].mxu0  ;;  %v10080_v31 = vadd.f32 %v17830_v8, %v11455_v40  ;;  %v10071_v56 = vpop.f32.mrb[151].mxu1  ;;  %v11616_v8 = vadd.f32 %v17632_v52, %v17762_v57 }
 0x700   :  { %v10263_v27 = vmax.f32 %v10069_v60, 0.0  ;;  %v18009_v63 = vadd.f32 %v11614_v0, %v9870_v48  ;;  %v9872_v36 = vpop.f32.mrb[87].mxu0  ;;  %v10072_v51 = vadd.f32 %v17818_v26, %v10071_v56 }
 0x701   :  { %10329 = vst [vmem:[%s18242_s3 + $0xb0] sm:$0xff] %v10265_v14  ;;  %v10266_v41 = vmax.f32 %v10080_v31, 0.0  ;;  %v18262_v36 = vld [vmem:[#allocation3_spill] sm:$0xff] }
 0x702   :  { %10327 = vst [vmem:[%s18242_s3 + $0xa0] sm:$0xff] %v10263_v27  ;;  %v10264_v22 = vmax.f32 %v10072_v51, 0.0  ;;  %v11626_v51 = vadd.f32 %v17632_v52, %v18262_v36 }
 0x703   :  { %10330 = vst [vmem:[%s18242_s3 + $0xb8] sm:$0xff] %v10266_v41 }
 0x704   :  { %10328 = vst [vmem:[%s18242_s3 + $0xa8] sm:$0xff] %v10264_v22  ;;  %v11458_v26 = vpop.f32.mrb[152].mxu1 }
 0x705   :  { %v9875_v35 = vpop.f32.mrb[88].mxu0  ;;  %v10093_v28 = vadd.f32 %v17850_v25, %v11458_v26  ;;  %v10084_v59 = vpop.f32.mrb[153].mxu1 }
 0x706   :  { %v18029_v15 = vadd.f32 %v11616_v8, %v9875_v35  ;;  %v9877_v62 = vpop.f32.mrb[89].mxu0  ;;  %v10085_v34 = vadd.f32 %v17838_v42, %v10084_v59  ;;  %v11459_v58 = vpop.f32.mrb[154].mxu1 }
 0x707   :  { %v10269_v1 = vmax.f32 %v10093_v28, 0.0  ;;  %v9878_v57 = vpop.f32.mrb[90].mxu0  ;;  %v10096_v4 = vadd.f32 %v17854_v53, %v11459_v58  ;;  %v10087_v61 = vpop.f32.mrb[155].mxu1  ;;  %v11620_v53 = vadd.f32 %v17632_v52, %v17774_v21 }
 0x708   :  { %v10267_v24 = vmax.f32 %v10085_v34, 0.0  ;;  %v18033_v54 = vadd.f32 %v11618_v18, %v9878_v57  ;;  %v9880_v37 = vpop.f32.mrb[91].mxu0  ;;  %v10088_v25 = vadd.f32 %v17842_v5, %v10087_v61 }
 0x709   :  { %10333 = vst [vmem:[%s18242_s3 + $0xd0] sm:$0xff] %v10269_v1  ;;  %v10270_v45 = vmax.f32 %v10096_v4, 0.0  ;;  %v18264_v37 = vld [vmem:[#allocation5_spill] sm:$0xff] }
 0x70a   :  { %10331 = vst [vmem:[%s18242_s3 + $0xc0] sm:$0xff] %v10267_v24  ;;  %v10268_v42 = vmax.f32 %v10088_v25, 0.0  ;;  %v11630_v25 = vadd.f32 %v17632_v52, %v18264_v37 }
 0x70b   :  { %10334 = vst [vmem:[%s18242_s3 + $0xd8] sm:$0xff] %v10270_v45 }
 0x70c   :  { %10332 = vst [vmem:[%s18242_s3 + $0xc8] sm:$0xff] %v10268_v42  ;;  %v11462_v5 = vpop.f32.mrb[156].mxu1 }
 0x70d   :  { %v9883_v32 = vpop.f32.mrb[92].mxu0  ;;  %v10109_v12 = vadd.f32 %v17874_v38, %v11462_v5  ;;  %v10100_v13 = vpop.f32.mrb[157].mxu1  ;;  %v18260_v38 = vld [vmem:[#allocation16_spill] sm:$0xff] }
 0x70e   :  { %v18053_v6 = vadd.f32 %v11620_v53, %v9883_v32  ;;  %v9885_v9 = vpop.f32.mrb[93].mxu0  ;;  %v10101_v11 = vadd.f32 %v17862_v19, %v10100_v13  ;;  %v11463_v2 = vpop.f32.mrb[158].mxu1 }
 0x70f   :  { %v10273_v17 = vmax.f32 %v10109_v12, 0.0  ;;  %v9886_v21 = vpop.f32.mrb[94].mxu0  ;;  %v10112_v10 = vadd.f32 %v17878_v44, %v11463_v2  ;;  %v10103_v20 = vpop.f32.mrb[159].mxu1  ;;  %v18261_v44 = vld [vmem:[#allocation2_spill] sm:$0xff] }
 0x710   :  { %v10271_v0 = vmax.f32 %v10101_v11, 0.0  ;;  %v18057_v33 = vadd.f32 %v11622_v7, %v9886_v21  ;;  %v9888_v60 = vpop.f32.mrb[95].mxu0  ;;  %v10104_v40 = vadd.f32 %v18260_v38, %v10103_v20  ;;  %v11624_v14 = vadd.f32 %v17632_v52, %v18261_v44 }
 0x711   :  { %10337 = vst [vmem:[%s18242_s3 + $0xf0] sm:$0xff] %v10273_v17  ;;  %v10274_v46 = vmax.f32 %v10112_v10, 0.0  ;;  %v18266_v60 = vld [vmem:[#allocation7_spill] sm:$0xff] }
 0x712   :  { %10335 = vst [vmem:[%s18242_s3 + $0xe0] sm:$0xff] %v10271_v0  ;;  %v10272_v19 = vmax.f32 %v10104_v40, 0.0  ;;  %v11634_v38 = vadd.f32 %v17632_v52, %v18266_v60 }
 0x713   :  { %10338 = vst [vmem:[%s18242_s3 + $0xf8] sm:$0xff] %v10274_v46 }
 0x714   :  { %10336 = vst [vmem:[%s18242_s3 + $0xe8] sm:$0xff] %v10272_v19  ;;  %v11466_v48 = vpop.f32.mrb[160].mxu1 }
 0x715   :  { %v9891_v31 = vpop.f32.mrb[96].mxu0  ;;  %v10125_v56 = vadd.f32 %v17909_v39, %v11466_v48  ;;  %v10116_v27 = vpop.f32.mrb[161].mxu1 }
 0x716   :  { %v18077_v41 = vadd.f32 %v11624_v14, %v9891_v31  ;;  %v9893_v22 = vpop.f32.mrb[97].mxu0  ;;  %v10117_v8 = vadd.f32 %v17885_v49, %v10116_v27  ;;  %v11467_v26 = vpop.f32.mrb[162].mxu1 }
 0x717   :  { %v10277_v35 = vmax.f32 %v10125_v56, 0.0  ;;  %v9894_v28 = vpop.f32.mrb[98].mxu0  ;;  %v10128_v59 = vadd.f32 %v17913_v29, %v11467_v26  ;;  %v10119_v18 = vpop.f32.mrb[163].mxu1  ;;  %v18263_v29 = vld [vmem:[#allocation4_spill] sm:$0xff] }
 0x718   :  { %v10275_v62 = vmax.f32 %v10117_v8, 0.0  ;;  %v18081_v34 = vadd.f32 %v11626_v51, %v9894_v28  ;;  %v9896_v58 = vpop.f32.mrb[99].mxu0  ;;  %v10120_v39 = vadd.f32 %v17889_v55, %v10119_v18  ;;  %v11628_v57 = vadd.f32 %v17632_v52, %v18263_v29 }
 0x719   :  { %10341 = vst [vmem:[%s18242_s3 + $0x110] sm:$0xff] %v10277_v35  ;;  %v10278_v1 = vmax.f32 %v10128_v59, 0.0  ;;  %v18268_v59 = vld [vmem:[#allocation9_spill] sm:$0xff] }
 0x71a   :  { %10339 = vst [vmem:[%s18242_s3 + $0x100] sm:$0xff] %v10275_v62  ;;  %v10276_v49 = vmax.f32 %v10120_v39, 0.0  ;;  %v11638_v18 = vadd.f32 %v17632_v52, %v18268_v59 }
 0x71b   :  { %10342 = vst [vmem:[%s18242_s3 + $0x118] sm:$0xff] %v10278_v1 }
 0x71c   :  { %10340 = vst [vmem:[%s18242_s3 + $0x108] sm:$0xff] %v10276_v49  ;;  %v11470_v55 = vpop.f32.mrb[164].mxu1 }
 0x71d   :  { %v9899_v4 = vpop.f32.mrb[100].mxu0  ;;  %v10141_v61 = vadd.f32 %v17957_v16, %v11470_v55  ;;  %v10132_v24 = vpop.f32.mrb[165].mxu1 }
 0x71e   :  { %v18101_v45 = vadd.f32 %v11628_v57, %v9899_v4  ;;  %v9901_v42 = vpop.f32.mrb[101].mxu0  ;;  %v10133_v53 = vadd.f32 %v17933_v23, %v10132_v24  ;;  %v11471_v5 = vpop.f32.mrb[166].mxu1 }
 0x71f   :  { %v10281_v32 = vmax.f32 %v10141_v61, 0.0  ;;  %v9902_v12 = vpop.f32.mrb[102].mxu0  ;;  %v10144_v13 = vadd.f32 %v17961_v3, %v11471_v5  ;;  %v10135_v7 = vpop.f32.mrb[167].mxu1  ;;  %v18265_v3 = vld [vmem:[#allocation6_spill] sm:$0xff] }
 0x720   :  { %v10279_v9 = vmax.f32 %v10133_v53, 0.0  ;;  %v18105_v11 = vadd.f32 %v11630_v25, %v9902_v12  ;;  %v9904_v2 = vpop.f32.mrb[103].mxu0  ;;  %v10136_v16 = vadd.f32 %v17937_v43, %v10135_v7  ;;  %v11632_v21 = vadd.f32 %v17632_v52, %v18265_v3 }
 0x721   :  { %10345 = vst [vmem:[%s18242_s3 + $0x130] sm:$0xff] %v10281_v32  ;;  %v10282_v17 = vmax.f32 %v10144_v13, 0.0  ;;  %v18270_v32 = vld [vmem:[#allocation11_spill] sm:$0xff] }
 0x722   :  { %10343 = vst [vmem:[%s18242_s3 + $0x120] sm:$0xff] %v10279_v9  ;;  %v10280_v23 = vmax.f32 %v10136_v16, 0.0 }
 0x723   :  { %10346 = vst [vmem:[%s18242_s3 + $0x138] sm:$0xff] %v10282_v17 }
 0x724   :  { %10344 = vst [vmem:[%s18242_s3 + $0x128] sm:$0xff] %v10280_v23  ;;  %v11474_v43 = vpop.f32.mrb[168].mxu1 }
 0x725   :  { %v9907_v10 = vpop.f32.mrb[104].mxu0  ;;  %v10157_v20 = vadd.f32 %v18005_v30, %v11474_v43  ;;  %v10148_v0 = vpop.f32.mrb[169].mxu1 }
 0x726   :  { %v18125_v40 = vadd.f32 %v11632_v21, %v9907_v10  ;;  %v9909_v46 = vpop.f32.mrb[105].mxu0  ;;  %v10149_v19 = vadd.f32 %v17981_v50, %v10148_v0  ;;  %v11475_v44 = vpop.f32.mrb[170].mxu1 }
 0x727   :  { %v10285_v14 = vmax.f32 %v10157_v20, 0.0  ;;  %v9910_v48 = vpop.f32.mrb[106].mxu0  ;;  %v10160_v31 = vadd.f32 %v18009_v63, %v11475_v44  ;;  %v10151_v56 = vpop.f32.mrb[171].mxu1  ;;  %v18267_v63 = vld [vmem:[#allocation8_spill] sm:$0xff] }
 0x728   :  { %v10283_v27 = vmax.f32 %v10149_v19, 0.0  ;;  %v18129_v36 = vadd.f32 %v11634_v38, %v9910_v48  ;;  %v9912_v51 = vpop.f32.mrb[107].mxu0  ;;  %v10152_v30 = vadd.f32 %v17985_v47, %v10151_v56  ;;  %v11636_v8 = vadd.f32 %v17632_v52, %v18267_v63  ;;  %v18272_v19 = vld [vmem:[#allocation13_spill] sm:$0xff] }
 0x729   :  { %10349 = vst [vmem:[%s18242_s3 + $0x150] sm:$0xff] %v10285_v14  ;;  %v10286_v22 = vmax.f32 %v10160_v31, 0.0 }
 0x72a   :  { %10347 = vst [vmem:[%s18242_s3 + $0x140] sm:$0xff] %v10283_v27  ;;  %v10284_v50 = vmax.f32 %v10152_v30, 0.0 }
 0x72b   :  { %10350 = vst [vmem:[%s18242_s3 + $0x158] sm:$0xff] %v10286_v22 }
 0x72c   :  { %10348 = vst [vmem:[%s18242_s3 + $0x148] sm:$0xff] %v10284_v50  ;;  %v11478_v47 = vpop.f32.mrb[172].mxu1 }
 0x72d   :  { %v9915_v26 = vpop.f32.mrb[108].mxu0  ;;  %v10173_v35 = vadd.f32 %v18053_v6, %v11478_v47  ;;  %v10164_v28 = vpop.f32.mrb[173].mxu1  ;;  %v18164_v6 = vld [vmem:[%s18241_s2] ss:$0 sm:$0xff] }
 0x72e   :  { %v11637_v62 = vadd.f32 %v11636_v8, %v9915_v26  ;;  %v9917_v58 = vpop.f32.mrb[109].mxu0  ;;  %v10165_v39 = vadd.f32 %v18029_v15, %v10164_v28  ;;  %v11479_v1 = vpop.f32.mrb[174].mxu1  ;;  %v11642_v12 = vadd.f32 %v18164_v6, %v18270_v32  ;;  %v11646_v44 = vadd.f32 %v18164_v6, %v18272_v19 }
 0x72f   :  { %v10289_v49 = vmax.f32 %v10173_v35, 0.0  ;;  %v9918_v29 = vpop.f32.mrb[110].mxu0  ;;  %v10176_v57 = vadd.f32 %v18057_v33, %v11479_v1  ;;  %v10167_v55 = vpop.f32.mrb[175].mxu1  ;;  %v18273_v35 = vld [vmem:[#allocation14_spill] sm:$0xff]  ;;  %v18274_v58 = vld [vmem:[#allocation15_spill] sm:$0xff] }
 0x730   :  { %v10287_v4 = vmax.f32 %v10165_v39, 0.0  ;;  %v11639_v61 = vadd.f32 %v11638_v18, %v9918_v29  ;;  %v9920_v24 = vpop.f32.mrb[111].mxu0  ;;  %v10168_v37 = vadd.f32 %v18033_v54, %v10167_v55  ;;  %v18269_v54 = vld [vmem:[#allocation10_spill] sm:$0xff]  ;;  %v11648_v28 = vadd.f32 %v18164_v6, %v18273_v35 }
 0x731   :  { %10353 = vst [vmem:[%s18242_s3 + $0x170] sm:$0xff] %v10289_v49  ;;  %v10290_v52 = vmax.f32 %v10176_v57, 0.0  ;;  %v11640_v33 = vadd.f32 %v18164_v6, %v18269_v54  ;;  %v11650_v39 = vadd.f32 %v18164_v6, %v18274_v58 }
 0x732   :  { %10351 = vst [vmem:[%s18242_s3 + $0x160] sm:$0xff] %v10287_v4  ;;  %v10288_v15 = vmax.f32 %v10168_v37, 0.0 }
 0x733   :  { %10354 = vst [vmem:[%s18242_s3 + $0x178] sm:$0xff] %v10290_v52 }
 0x734   :  { %10352 = vst [vmem:[%s18242_s3 + $0x168] sm:$0xff] %v10288_v15  ;;  %v11482_v25 = vpop.f32.mrb[176].mxu1 }
 0x735   :  { %v9923_v42 = vpop.f32.mrb[112].mxu0  ;;  %v10189_v53 = vadd.f32 %v18101_v45, %v11482_v25  ;;  %v10180_v5 = vpop.f32.mrb[177].mxu1 }
 0x736   :  { %v11641_v13 = vadd.f32 %v11640_v33, %v9923_v42  ;;  %v9925_v7 = vpop.f32.mrb[113].mxu0  ;;  %v10181_v9 = vadd.f32 %v18077_v41, %v10180_v5  ;;  %v11483_v2 = vpop.f32.mrb[178].mxu1  ;;  %v18275_v42 = vld [vmem:[#allocation17_spill] sm:$0xff] }
 0x737   :  { %v10293_v16 = vmax.f32 %v10189_v53, 0.0  ;;  %v9926_v17 = vpop.f32.mrb[114].mxu0  ;;  %v10192_v23 = vadd.f32 %v18105_v11, %v11483_v2  ;;  %v10183_v3 = vpop.f32.mrb[179].mxu1  ;;  %v18271_v11 = vld [vmem:[#allocation12_spill] sm:$0xff]  ;;  %v11652_v53 = vadd.f32 %v18164_v6, %v18275_v42 }
 0x738   :  { %v10291_v21 = vmax.f32 %v10181_v9, 0.0  ;;  %v11643_v43 = vadd.f32 %v11642_v12, %v9926_v17  ;;  %v9928_v10 = vpop.f32.mrb[115].mxu0  ;;  %v10184_v20 = vadd.f32 %v18081_v34, %v10183_v3  ;;  %v11644_v0 = vadd.f32 %v18164_v6, %v18271_v11 }
 0x739   :  { %10357 = vst [vmem:[%s18242_s3 + $0x190] sm:$0xff] %v10293_v16  ;;  %v10294_v45 = vmax.f32 %v10192_v23, 0.0 }
 0x73a   :  { %10355 = vst [vmem:[%s18242_s3 + $0x180] sm:$0xff] %v10291_v21  ;;  %v10292_v41 = vmax.f32 %v10184_v20, 0.0 }
 0x73b   :  { %10358 = vst [vmem:[%s18242_s3 + $0x198] sm:$0xff] %v10294_v45 }
 0x73c   :  { %10356 = vst [vmem:[%s18242_s3 + $0x188] sm:$0xff] %v10292_v41  ;;  %v11486_v34 = vpop.f32.mrb[180].mxu1 }
 0x73d   :  { %v9931_v60 = vpop.f32.mrb[116].mxu0  ;;  %v10205_v38 = vadd.f32 %v11637_v62, %v11486_v34  ;;  %v10196_v46 = vpop.f32.mrb[181].mxu1 }
 0x73e   :  { %v11645_v14 = vadd.f32 %v11644_v0, %v9931_v60  ;;  %v9933_v48 = vpop.f32.mrb[117].mxu0  ;;  %v10197_v31 = vadd.f32 %v18125_v40, %v10196_v46  ;;  %v11487_v56 = vpop.f32.mrb[182].mxu1 }
 0x73f   :  { %v10297_v27 = vmax.f32 %v10205_v38, 0.0  ;;  %v9934_v51 = vpop.f32.mrb[118].mxu0  ;;  %v10208_v30 = vadd.f32 %v11639_v61, %v11487_v56  ;;  %v10199_v22 = vpop.f32.mrb[183].mxu1 }
 0x740   :  { %v10295_v50 = vmax.f32 %v10197_v31, 0.0  ;;  %v11647_v63 = vadd.f32 %v11646_v44, %v9934_v51  ;;  %v9936_v8 = vpop.f32.mrb[119].mxu0  ;;  %v10200_v47 = vadd.f32 %v18129_v36, %v10199_v22 }
 0x741   :  { %10361 = vst [vmem:[%s18242_s3 + $0x1b0] sm:$0xff] %v10297_v27  ;;  %v10298_v26 = vmax.f32 %v10208_v30, 0.0 }
 0x742   :  { %10359 = vst [vmem:[%s18242_s3 + $0x1a0] sm:$0xff] %v10295_v50  ;;  %v10296_v40 = vmax.f32 %v10200_v47, 0.0 }
 0x743   :  { %10362 = vst [vmem:[%s18242_s3 + $0x1b8] sm:$0xff] %v10298_v26 }
 0x744   :  { %10360 = vst [vmem:[%s18242_s3 + $0x1a8] sm:$0xff] %v10296_v40  ;;  %v11490_v36 = vpop.f32.mrb[184].mxu1 }
 0x745   :  { %v9939_v59 = vpop.f32.mrb[120].mxu0  ;;  %v10221_v18 = vadd.f32 %v11645_v14, %v11490_v36  ;;  %v10212_v62 = vpop.f32.mrb[185].mxu1 }
 0x746   :  { %v11649_v1 = vadd.f32 %v11648_v28, %v9939_v59  ;;  %v9941_v49 = vpop.f32.mrb[121].mxu0  ;;  %v10213_v29 = vadd.f32 %v11641_v13, %v10212_v62  ;;  %v11491_v57 = vpop.f32.mrb[186].mxu1  ;;  %v18276_v13 = vld [vmem:[#allocation18_spill] sm:$0xff] }
 0x747   :  { %v10301_v55 = vmax.f32 %v10221_v18, 0.0  ;;  %v9942_v4 = vpop.f32.mrb[122].mxu0  ;;  %v10224_v61 = vadd.f32 %v11647_v63, %v11491_v57  ;;  %v10215_v24 = vpop.f32.mrb[187].mxu1  ;;  %v11654_v7 = vadd.f32 %v18164_v6, %v18276_v13 }
 0x748   :  { %v10299_v37 = vmax.f32 %v10213_v29, 0.0  ;;  %v11651_v52 = vadd.f32 %v11650_v39, %v9942_v4  ;;  %v9944_v15 = vpop.f32.mrb[123].mxu0  ;;  %v10216_v54 = vadd.f32 %v11643_v43, %v10215_v24 }
 0x749   :  { %10365 = vst [vmem:[%s18242_s3 + $0x1d0] sm:$0xff] %v10301_v55  ;;  %v10302_v33 = vmax.f32 %v10224_v61, 0.0 }
 0x74a   :  { %10363 = vst [vmem:[%s18242_s3 + $0x1c0] sm:$0xff] %v10299_v37  ;;  %v10300_v25 = vmax.f32 %v10216_v54, 0.0 }
 0x74b   :  { %10366 = vst [vmem:[%s18242_s3 + $0x1d8] sm:$0xff] %v10302_v33 }
 0x74c   :  { %10364 = vst [vmem:[%s18242_s3 + $0x1c8] sm:$0xff] %v10300_v25  ;;  %v11494_v5 = vpop.f32.mrb[188].mxu1 }
 0x74d   :  { %v9947_v32 = vpop.f32.mrb[124].mxu0  ;;  %v10228_v12 = vpop.f32.mrb[189].mxu1 }
 0x74e   :  { %v11653_v9 = vadd.f32 %v11652_v53, %v9947_v32  ;;  %v9949_v2 = vpop.f32.mrb[125].mxu0  ;;  %v10229_v16 = vadd.f32 %v11649_v1, %v10228_v12  ;;  %v11495_v17 = vpop.f32.mrb[190].mxu1 }
 0x74f   :  { %v9950_v23 = vpop.f32.mrb[126].mxu0  ;;  %v10231_v3 = vpop.f32.mrb[191].mxu1 }
 0x750   :  { %v10237_v21 = vadd.f32 %v11653_v9, %v11494_v5  ;;  %v10303_v43 = vmax.f32 %v10229_v16, 0.0  ;;  %v11655_v10 = vadd.f32 %v11654_v7, %v9950_v23  ;;  %v9952_v20 = vpop.f32.mrb[127].mxu0  ;;  %v10232_v45 = vadd.f32 %v11651_v52, %v10231_v3 }
 0x752   :  { %v10305_v41 = vmax.f32 %v10237_v21, 0.0  ;;  %10367 = vst [vmem:[%s18242_s3 + $0x1e0] sm:$0xff] %v10303_v43  ;;  %v10240_v11 = vadd.f32 %v11655_v10, %v11495_v17  ;;  %v10304_v0 = vmax.f32 %v10232_v45, 0.0 }
 0x754   :  { %10369 = vst [vmem:[%s18242_s3 + $0x1f0] sm:$0xff] %v10305_v41  ;;  %v10306_v6 = vmax.f32 %v10240_v11, 0.0  ;;  %10368 = vst [vmem:[%s18242_s3 + $0x1e8] sm:$0xff] %v10304_v0 }
 0x756   :  { %10370 = vst [vmem:[%s18242_s3 + $0x1f8] sm:$0xff] %v10306_v6 }

// kernel: spatialblock_forward.7
= control target key start
LH: loop header
LB: loop body
LE: loop exit
PB: predicated region body
PF: predicated region fallthrough
CT: control target
= control target key end

     0   :  { %v10101_v0 = vmov 0   ;;  %s12847_s1 = inlined_call_operand.vmem [shape: bf16[2304,128], index: 1, kind: input, shape index: {}]   ;;  %s12848_s0 = inlined_call_operand.vmem [shape: bf16[512,2304], index: 0, kind: input, shape index: {}]   ;;  %s12849_s2 = inlined_call_operand.vmem [shape: f32[1,128], index: 2, kind: input, shape index: {}]   ;;  %s12850_s3 = inlined_call_operand.vmem [shape: f32[512,128], index: 3, kind: output, shape index: {}]  }
   0x1   :  { %4630 = vmatprep.subr.bf16.mxu1 %v10101_v0  ;;  %5786 = vmatprep.subr.bf16.mxu0 %v10101_v0  ;;  %v9077_v1 = vld [vmem:[%s12847_s1] sm:$0xff]   ;;  %v9079_v3 = vld [vmem:[%s12847_s1 + $0x8] sm:$0xff]   ;;  %v9081_v5 = vld [vmem:[%s12847_s1 + $0x10] sm:$0xff]  }
   0x2   :  { %v9078_v2 = vld [vmem:[%s12847_s1 + $0x200] sm:$0xff]   ;;  %4631 = vmatpush1.bf16.msra.mxu1 %v9077_v1  ;;  %v9080_v4 = vld [vmem:[%s12847_s1 + $0x208] sm:$0xff]   ;;  %v9082_v6 = vld [vmem:[%s12847_s1 + $0x210] sm:$0xff]  }
   0x3   :  { %5787 = vmatpush1.bf16.msra.mxu0 %v9078_v2  ;;  %4632 = vmatprep.subr.bf16.mxu1 %v10101_v0  ;;  %v9083_v7 = vld [vmem:[%s12847_s1 + $0x18] sm:$0xff]   ;;  %v9085_v9 = vld [vmem:[%s12847_s1 + $0x20] sm:$0xff]   ;;  %v9087_v11 = vld [vmem:[%s12847_s1 + $0x28] sm:$0xff]  }
   0x4   :  { %5788 = vmatprep.subr.bf16.mxu0 %v10101_v0  ;;  %v9084_v8 = vld [vmem:[%s12847_s1 + $0x218] sm:$0xff]   ;;  %v9086_v10 = vld [vmem:[%s12847_s1 + $0x220] sm:$0xff]   ;;  %v9088_v12 = vld [vmem:[%s12847_s1 + $0x228] sm:$0xff]  }
   0x5   :  { %v9089_v13 = vld [vmem:[%s12847_s1 + $0x30] sm:$0xff]   ;;  %v9091_v15 = vld [vmem:[%s12847_s1 + $0x38] sm:$0xff]   ;;  %v9093_v17 = vld [vmem:[%s12847_s1 + $0x40] sm:$0xff]  }
   0x6   :  { %4633 = vmatpush1.bf16.msra.mxu1 %v9079_v3  ;;  %v9090_v14 = vld [vmem:[%s12847_s1 + $0x230] sm:$0xff]   ;;  %v9092_v16 = vld [vmem:[%s12847_s1 + $0x238] sm:$0xff]   ;;  %v9094_v18 = vld [vmem:[%s12847_s1 + $0x240] sm:$0xff]  }
   0x7   :  { %5789 = vmatpush1.bf16.msra.mxu0 %v9080_v4  ;;  %4634 = vmatprep.subr.bf16.mxu1 %v10101_v0  ;;  %v9111_v19 = vld [vmem:[%s12848_s0 + $0x4] ss:$72 sps:$4 sm:$0xff]   ;;  %v9097_v23 = vld [vmem:[%s12847_s1 + $0x50] sm:$0xff]   ;;  %v9099_v25 = vld [vmem:[%s12847_s1 + $0x58] sm:$0xff]  }
   0x8   :  { %5790 = vmatprep.subr.bf16.mxu0 %v10101_v0  ;;  %v9095_v20 = vld [vmem:[%s12847_s1 + $0x48] sm:$0xff]   ;;  %4662 = vmatprep.mubr.bf16.mxu1 %v9111_v19  ;;  %v9098_v24 = vld [vmem:[%s12847_s1 + $0x250] sm:$0xff]   ;;  %v9100_v26 = vld [vmem:[%s12847_s1 + $0x258] sm:$0xff]  }
   0x9   :  { %v9114_v21 = vld [vmem:[%s12848_s0 + $0x24] ss:$72 sps:$4 sm:$0xff]   ;;  %v9105_v31 = vld [vmem:[%s12847_s1 + $0x70] sm:$0xff]   ;;  %v9107_v33 = vld [vmem:[%s12847_s1 + $0x78] sm:$0xff]  }
   0xa   :  { %4635 = vmatpush1.bf16.msra.mxu1 %v9081_v5  ;;  %v9096_v22 = vld [vmem:[%s12847_s1 + $0x248] sm:$0xff]   ;;  %5818 = vmatprep.mubr.bf16.mxu0 %v9114_v21  ;;  %v9101_v27 = vld [vmem:[%s12847_s1 + $0x60] sm:$0xff]   ;;  %v9106_v32 = vld [vmem:[%s12847_s1 + $0x270] sm:$0xff]  }
   0xb   :  { %5791 = vmatpush1.bf16.msra.mxu0 %v9082_v6  ;;  %4636 = vmatprep.subr.bf16.mxu1 %v10101_v0  ;;  %v9102_v28 = vld [vmem:[%s12847_s1 + $0x260] sm:$0xff]   ;;  %v9103_v29 = vld [vmem:[%s12847_s1 + $0x68] sm:$0xff]   ;;  %v9108_v34 = vld [vmem:[%s12847_s1 + $0x278] sm:$0xff]  }
   0xc   :  { %5792 = vmatprep.subr.bf16.mxu0 %v10101_v0  ;;  %v9104_v30 = vld [vmem:[%s12847_s1 + $0x268] sm:$0xff]   ;;  %v9115_v37 = vld [vmem:[%s12847_s1 + $0x80] sm:$0xff]   ;;  %v9117_v39 = vld [vmem:[%s12848_s0 + $0x94] ss:$72 sps:$4 sm:$0xff]  }
   0xd   :  { %v9109_v35 = vld [vmem:[%s12848_s0] ss:$72 sps:$4 sm:$0xff]   ;;  %v9119_v40 = vld [vmem:[%s12848_s0 + $0xb4] ss:$72 sps:$4 sm:$0xff]   ;;  %v9121_v42 = vld [vmem:[%s12848_s0 + $0x90] ss:$72 sps:$4 sm:$0xff]  }
   0xe   :  { %4637 = vmatpush1.bf16.msra.mxu1 %v9083_v7  ;;  %v9112_v36 = vld [vmem:[%s12848_s0 + $0x20] ss:$72 sps:$4 sm:$0xff]   ;;  %v9122_v44 = vld [vmem:[%s12848_s0 + $0xb0] ss:$72 sps:$4 sm:$0xff]   ;;  %v9124_v45 = vld [vmem:[%s12848_s0 + $0x124] ss:$72 sps:$4 sm:$0xff]  }
   0xf   :  { %5793 = vmatpush1.bf16.msra.mxu0 %v9084_v8  ;;  %4638 = vmatprep.subr.bf16.mxu1 %v10101_v0  ;;  %v9116_v38 = vld [vmem:[%s12847_s1 + $0x280] sm:$0xff]   ;;  %v9130_v41 = vld [vmem:[%s12847_s1 + $0x88] sm:$0xff]   ;;  %v9131_v47 = vld [vmem:[%s12847_s1 + $0x290] sm:$0xff]  }
  0x10   :  { %5794 = vmatprep.subr.bf16.mxu0 %v10101_v0  ;;  %v9123_v43 = vld [vmem:[%s12847_s1 + $0x288] sm:$0xff]   ;;  %v9145_v48 = vld [vmem:[%s12847_s1 + $0x90] sm:$0xff]   ;;  %v9138_v50 = vld [vmem:[%s12847_s1 + $0x298] sm:$0xff]  }
  0x11   :  { %v9126_v46 = vld [vmem:[%s12848_s0 + $0x144] ss:$72 sps:$4 sm:$0xff]   ;;  %v9128_v49 = vld [vmem:[%s12848_s0 + $0x120] ss:$72 sps:$4 sm:$0xff]   ;;  %v9160_v52 = vld [vmem:[%s12847_s1 + $0x98] sm:$0xff]  }
  0x12   :  { %4639 = vmatpush1.bf16.msra.mxu1 %v9085_v9  ;;  %v9129_v51 = vld [vmem:[%s12848_s0 + $0x140] ss:$72 sps:$4 sm:$0xff]   ;;  %v9132_v53 = vld [vmem:[%s12848_s0 + $0x1b4] ss:$72 sps:$4 sm:$0xff]   ;;  %v9136_v57 = vld [vmem:[%s12848_s0 + $0x1b0] ss:$72 sps:$4 sm:$0xff]  }
  0x13   :  { %5795 = vmatpush1.bf16.msra.mxu0 %v9086_v10  ;;  %4640 = vmatprep.subr.bf16.mxu1 %v10101_v0  ;;  %v9134_v54 = vld [vmem:[%s12848_s0 + $0x1d4] ss:$72 sps:$4 sm:$0xff]   ;;  %v9146_v55 = vld [vmem:[%s12847_s1 + $0x2a0] sm:$0xff]   ;;  %v9153_v58 = vld [vmem:[%s12847_s1 + $0x2a8] sm:$0xff]  }
  0x14   :  { %5796 = vmatprep.subr.bf16.mxu0 %v10101_v0  ;;  %v9175_v56 = vld [vmem:[%s12847_s1 + $0xa0] sm:$0xff]   ;;  %v9137_v59 = vld [vmem:[%s12848_s0 + $0x1d0] ss:$72 sps:$4 sm:$0xff]   ;;  %v9190_v60 = vld [vmem:[%s12847_s1 + $0xa8] sm:$0xff]  }
  0x15   :  { %v9139_v61 = vld [vmem:[%s12848_s0 + $0x244] ss:$72 sps:$4 sm:$0xff]   ;;  %v9161_v63 = vld [vmem:[%s12847_s1 + $0x2b0] sm:$0xff]   ;;  %v9168_v2 = vld [vmem:[%s12847_s1 + $0x2b8] sm:$0xff]  }
  0x16   :  { %4641 = vmatpush1.bf16.msra.mxu1 %v9087_v11  ;;  %v9141_v62 = vld [vmem:[%s12848_s0 + $0x264] ss:$72 sps:$4 sm:$0xff]   ;;  %v9205_v1 = vld [vmem:[%s12847_s1 + $0xb0] sm:$0xff]   ;;  %v9143_v3 = vld [vmem:[%s12848_s0 + $0x240] ss:$72 sps:$4 sm:$0xff]  }
  0x17   :  { %5797 = vmatpush1.bf16.msra.mxu0 %v9088_v12  ;;  %4642 = vmatprep.subr.bf16.mxu1 %v10101_v0  ;;  %v9144_v4 = vld [vmem:[%s12848_s0 + $0x260] ss:$72 sps:$4 sm:$0xff]   ;;  %v9147_v5 = vld [vmem:[%s12848_s0 + $0x2d4] ss:$72 sps:$4 sm:$0xff]   ;;  %v9151_v9 = vld [vmem:[%s12848_s0 + $0x2d0] ss:$72 sps:$4 sm:$0xff]  }
  0x18   :  { %5798 = vmatprep.subr.bf16.mxu0 %v10101_v0  ;;  %v9220_v6 = vld [vmem:[%s12847_s1 + $0xb8] sm:$0xff]   ;;  %v9176_v8 = vld [vmem:[%s12847_s1 + $0x2c0] sm:$0xff]   ;;  %v9183_v10 = vld [vmem:[%s12847_s1 + $0x2c8] sm:$0xff]  }
  0x19   :  { %v9149_v7 = vld [vmem:[%s12848_s0 + $0x2f4] ss:$72 sps:$4 sm:$0xff]   ;;  %v9152_v11 = vld [vmem:[%s12848_s0 + $0x2f0] ss:$72 sps:$4 sm:$0xff]   ;;  %v9154_v12 = vld [vmem:[%s12848_s0 + $0x364] ss:$72 sps:$4 sm:$0xff]  }
  0x1a   :  { %4643 = vmatpush1.bf16.msra.mxu1 %v9089_v13  ;;  %v9156_v13 = vld [vmem:[%s12848_s0 + $0x384] ss:$72 sps:$4 sm:$0xff]   ;;  %v9162_v19 = vld [vmem:[%s12848_s0 + $0x3f4] ss:$72 sps:$4 sm:$0xff]  }
  0x1b   :  { %5799 = vmatpush1.bf16.msra.mxu0 %v9090_v14  ;;  %4644 = vmatprep.subr.bf16.mxu1 %v10101_v0  ;;  %v9235_v14 = vld [vmem:[%s12847_s1 + $0xc0] sm:$0xff]   ;;  %v9164_v21 = vld [vmem:[%s12848_s0 + $0x414] ss:$72 sps:$4 sm:$0xff]  }
  0x1c   :  { %5800 = vmatprep.subr.bf16.mxu0 %v10101_v0 }
  0x1e   :  { %4645 = vmatpush1.bf16.msra.mxu1 %v9091_v15  ;;  %v9191_v15 = vld [vmem:[%s12847_s1 + $0x2d0] sm:$0xff]  }
  0x1f   :  { %5801 = vmatpush1.bf16.msra.mxu0 %v9092_v16  ;;  %4646 = vmatprep.subr.bf16.mxu1 %v10101_v0  ;;  %v9158_v16 = vld [vmem:[%s12848_s0 + $0x360] ss:$72 sps:$4 sm:$0xff]  }
  0x20   :  { %5802 = vmatprep.subr.bf16.mxu0 %v10101_v0 }
  0x22   :  { %4647 = vmatpush1.bf16.msra.mxu1 %v9093_v17  ;;  %v9198_v17 = vld [vmem:[%s12847_s1 + $0x2d8] sm:$0xff]  }
  0x23   :  { %5803 = vmatpush1.bf16.msra.mxu0 %v9094_v18  ;;  %4648 = vmatprep.subr.bf16.mxu1 %v10101_v0  ;;  %v9159_v18 = vld [vmem:[%s12848_s0 + $0x380] ss:$72 sps:$4 sm:$0xff]  }
  0x24   :  { %5804 = vmatprep.subr.bf16.mxu0 %v10101_v0 }
  0x26   :  { %4649 = vmatpush1.bf16.msra.mxu1 %v9095_v20  ;;  %v9249_v20 = vld [vmem:[%s12847_s1 + $0xc8] sm:$0xff]  }
  0x27   :  { %5805 = vmatpush1.bf16.msra.mxu0 %v9096_v22  ;;  %4650 = vmatprep.subr.bf16.mxu1 %v10101_v0  ;;  %v9206_v22 = vld [vmem:[%s12847_s1 + $0x2e0] sm:$0xff]  }
  0x28   :  { %5806 = vmatprep.subr.bf16.mxu0 %v10101_v0 }
  0x2a   :  { %4651 = vmatpush1.bf16.msra.mxu1 %v9097_v23  ;;  %v9166_v23 = vld [vmem:[%s12848_s0 + $0x3f0] ss:$72 sps:$4 sm:$0xff]  }
  0x2b   :  { %5807 = vmatpush1.bf16.msra.mxu0 %v9098_v24  ;;  %4652 = vmatprep.subr.bf16.mxu1 %v10101_v0  ;;  %v9213_v24 = vld [vmem:[%s12847_s1 + $0x2e8] sm:$0xff]  }
  0x2c   :  { %5808 = vmatprep.subr.bf16.mxu0 %v10101_v0 }
  0x2e   :  { %4653 = vmatpush1.bf16.msra.mxu1 %v9099_v25  ;;  %v9167_v25 = vld [vmem:[%s12848_s0 + $0x410] ss:$72 sps:$4 sm:$0xff]  }
  0x2f   :  { %5809 = vmatpush1.bf16.msra.mxu0 %v9100_v26  ;;  %4654 = vmatprep.subr.bf16.mxu1 %v10101_v0  ;;  %v9263_v26 = vld [vmem:[%s12847_s1 + $0xd0] sm:$0xff]  }
  0x30   :  { %5810 = vmatprep.subr.bf16.mxu0 %v10101_v0 }
  0x32   :  { %4655 = vmatpush1.bf16.msra.mxu1 %v9101_v27  ;;  %v9169_v27 = vld [vmem:[%s12848_s0 + $0x484] ss:$72 sps:$4 sm:$0xff]  }
  0x33   :  { %5811 = vmatpush1.bf16.msra.mxu0 %v9102_v28  ;;  %4656 = vmatprep.subr.bf16.mxu1 %v10101_v0  ;;  %v9171_v28 = vld [vmem:[%s12848_s0 + $0x4a4] ss:$72 sps:$4 sm:$0xff]  }
  0x34   :  { %5812 = vmatprep.subr.bf16.mxu0 %v10101_v0 }
  0x36   :  { %4657 = vmatpush1.bf16.msra.mxu1 %v9103_v29  ;;  %v9221_v29 = vld [vmem:[%s12847_s1 + $0x2f0] sm:$0xff]  }
  0x37   :  { %5813 = vmatpush1.bf16.msra.mxu0 %v9104_v30  ;;  %4658 = vmatprep.subr.bf16.mxu1 %v10101_v0  ;;  %v9173_v30 = vld [vmem:[%s12848_s0 + $0x480] ss:$72 sps:$4 sm:$0xff]  }
  0x38   :  { %5814 = vmatprep.subr.bf16.mxu0 %v10101_v0 }
  0x3a   :  { %4659 = vmatpush1.bf16.msra.mxu1 %v9105_v31  ;;  %v9228_v31 = vld [vmem:[%s12847_s1 + $0x2f8] sm:$0xff]  }
  0x3b   :  { %5815 = vmatpush1.bf16.msra.mxu0 %v9106_v32  ;;  %4660 = vmatprep.subr.bf16.mxu1 %v10101_v0  ;;  %v9277_v32 = vld [vmem:[%s12847_s1 + $0xd8] sm:$0xff]  }
  0x3c   :  { %5816 = vmatprep.subr.bf16.mxu0 %v10101_v0 }
  0x3e   :  { %4661 = vmatpush1.bf16.msra.mxu1 %v9107_v33  ;;  %v9174_v33 = vld [vmem:[%s12848_s0 + $0x4a0] ss:$72 sps:$4 sm:$0xff]  }
  0x3f   :  { %5817 = vmatpush1.bf16.msra.mxu0 %v9108_v34  ;;  %4919 = vmatprep.subr.bf16.mxu1 %v10101_v0  ;;  %v9177_v34 = vld [vmem:[%s12848_s0 + $0x514] ss:$72 sps:$4 sm:$0xff]  }
  0x40   :  { %6075 = vmatprep.subr.bf16.mxu0 %v10101_v0 }
  0x41   :  { %4663 = vmatmul.mubr.bf16.vlgmr.msra.gmra.mrb[0].mxu1 %v9109_v35  ;;  %v9179_v35 = vld [vmem:[%s12848_s0 + $0x534] ss:$72 sps:$4 sm:$0xff]  }
  0x42   :  { %5819 = vmatmul.mubr.bf16.vlgmr.msra.gmra.mrb[0].mxu0 %v9112_v36  ;;  %4920 = vmatpush1.bf16.msra.mxu1 %v9115_v37  ;;  %v9291_v36 = vld [vmem:[%s12847_s1 + $0xe0] sm:$0xff]   ;;  %v9181_v37 = vld [vmem:[%s12848_s0 + $0x510] ss:$72 sps:$4 sm:$0xff]  }
  0x43   :  { %6076 = vmatpush1.bf16.msra.mxu0 %v9116_v38  ;;  %4670 = vmatprep.mubr.bf16.mxu1 %v9117_v39  ;;  %v9182_v38 = vld [vmem:[%s12848_s0 + $0x530] ss:$72 sps:$4 sm:$0xff]   ;;  %v9184_v39 = vld [vmem:[%s12848_s0 + $0x5a4] ss:$72 sps:$4 sm:$0xff]  }
  0x44   :  { %5826 = vmatprep.mubr.bf16.mxu0 %v9119_v40  ;;  %6077 = vmatprep.subr.bf16.mxu0 %v10101_v0  ;;  %v9186_v40 = vld [vmem:[%s12848_s0 + $0x5c4] ss:$72 sps:$4 sm:$0xff]  }
  0x45   :  { %4921 = vmatprep.subr.bf16.mxu1 %v10101_v0 }
  0x46   :  { %4922 = vmatpush1.bf16.msra.mxu1 %v9130_v41  ;;  %v9188_v41 = vld [vmem:[%s12848_s0 + $0x5a0] ss:$72 sps:$4 sm:$0xff]  }
  0x47   :  { %6078 = vmatpush1.bf16.msra.mxu0 %v9123_v43  ;;  %4923 = vmatprep.subr.bf16.mxu1 %v10101_v0  ;;  %v9192_v43 = vld [vmem:[%s12848_s0 + $0x634] ss:$72 sps:$4 sm:$0xff]  }
  0x48   :  { %6079 = vmatprep.subr.bf16.mxu0 %v10101_v0 }
  0x49   :  { %4671 = vmatmul.mubr.bf16.gmra.mrb[4].mxu1 %v9121_v42  ;;  %v9189_v42 = vld [vmem:[%s12848_s0 + $0x5c0] ss:$72 sps:$4 sm:$0xff]  }
  0x4a   :  { %5827 = vmatmul.mubr.bf16.gmra.mrb[4].mxu0 %v9122_v44  ;;  %4678 = vmatprep.mubr.bf16.mxu1 %v9124_v45  ;;  %v9194_v44 = vld [vmem:[%s12848_s0 + $0x654] ss:$72 sps:$4 sm:$0xff]   ;;  %v9305_v45 = vld [vmem:[%s12847_s1 + $0xe8] sm:$0xff]  }
  0x4b   :  { %5834 = vmatprep.mubr.bf16.mxu0 %v9126_v46  ;;  %6080 = vmatpush1.bf16.msra.mxu0 %v9131_v47  ;;  %v9196_v46 = vld [vmem:[%s12848_s0 + $0x630] ss:$72 sps:$4 sm:$0xff]  }
  0x4c   :  { %6081 = vmatprep.subr.bf16.mxu0 %v10101_v0  ;;  %4924 = vmatpush1.bf16.msra.mxu1 %v9145_v48  ;;  %v9197_v47 = vld [vmem:[%s12848_s0 + $0x650] ss:$72 sps:$4 sm:$0xff]   ;;  %v9199_v48 = vld [vmem:[%s12848_s0 + $0x6c4] ss:$72 sps:$4 sm:$0xff]  }
  0x4d   :  { %4925 = vmatprep.subr.bf16.mxu1 %v10101_v0 }
  0x4f   :  { %6082 = vmatpush1.bf16.msra.mxu0 %v9138_v50  ;;  %v9203_v50 = vld [vmem:[%s12848_s0 + $0x6c0] ss:$72 sps:$4 sm:$0xff]  }
  0x50   :  { %6083 = vmatprep.subr.bf16.mxu0 %v10101_v0  ;;  %4926 = vmatpush1.bf16.msra.mxu1 %v9160_v52  ;;  %v9207_v52 = vld [vmem:[%s12848_s0 + $0x754] ss:$72 sps:$4 sm:$0xff]  }
  0x51   :  { %4679 = vmatmul.mubr.bf16.gmra.mrb[8].mxu1 %v9128_v49  ;;  %4927 = vmatprep.subr.bf16.mxu1 %v10101_v0  ;;  %v9201_v49 = vld [vmem:[%s12848_s0 + $0x6e4] ss:$72 sps:$4 sm:$0xff]  }
  0x52   :  { %5835 = vmatmul.mubr.bf16.gmra.mrb[8].mxu0 %v9129_v51  ;;  %4686 = vmatprep.mubr.bf16.mxu1 %v9132_v53  ;;  %v9204_v51 = vld [vmem:[%s12848_s0 + $0x6e0] ss:$72 sps:$4 sm:$0xff]   ;;  %v9209_v53 = vld [vmem:[%s12848_s0 + $0x774] ss:$72 sps:$4 sm:$0xff]  }
  0x53   :  { %5842 = vmatprep.mubr.bf16.mxu0 %v9134_v54  ;;  %6084 = vmatpush1.bf16.msra.mxu0 %v9146_v55  ;;  %v9319_v54 = vld [vmem:[%s12847_s1 + $0xf0] sm:$0xff]  }
  0x54   :  { %6085 = vmatprep.subr.bf16.mxu0 %v10101_v0  ;;  %4928 = vmatpush1.bf16.msra.mxu1 %v9175_v56  ;;  %v9211_v55 = vld [vmem:[%s12848_s0 + $0x750] ss:$72 sps:$4 sm:$0xff]  }
  0x55   :  { %4929 = vmatprep.subr.bf16.mxu1 %v10101_v0  ;;  %v9212_v56 = vld [vmem:[%s12848_s0 + $0x770] ss:$72 sps:$4 sm:$0xff]  }
  0x57   :  { %6086 = vmatpush1.bf16.msra.mxu0 %v9153_v58  ;;  %v9216_v58 = vld [vmem:[%s12848_s0 + $0x804] ss:$72 sps:$4 sm:$0xff]  }
  0x58   :  { %6087 = vmatprep.subr.bf16.mxu0 %v10101_v0  ;;  %4930 = vmatpush1.bf16.msra.mxu1 %v9190_v60  ;;  %v9219_v60 = vld [vmem:[%s12848_s0 + $0x800] ss:$72 sps:$4 sm:$0xff]  }
  0x59   :  { %4687 = vmatmul.mubr.bf16.gmra.mrb[12].mxu1 %v9136_v57  ;;  %4931 = vmatprep.subr.bf16.mxu1 %v10101_v0  ;;  %v9214_v57 = vld [vmem:[%s12848_s0 + $0x7e4] ss:$72 sps:$4 sm:$0xff]  }
  0x5a   :  { %5843 = vmatmul.mubr.bf16.gmra.mrb[12].mxu0 %v9137_v59  ;;  %4694 = vmatprep.mubr.bf16.mxu1 %v9139_v61  ;;  %v9218_v59 = vld [vmem:[%s12848_s0 + $0x7e0] ss:$72 sps:$4 sm:$0xff]   ;;  %v9222_v61 = vld [vmem:[%s12848_s0 + $0x874] ss:$72 sps:$4 sm:$0xff]  }
  0x5b   :  { %5850 = vmatprep.mubr.bf16.mxu0 %v9141_v62  ;;  %6088 = vmatpush1.bf16.msra.mxu0 %v9161_v63  ;;  %v9224_v62 = vld [vmem:[%s12848_s0 + $0x894] ss:$72 sps:$4 sm:$0xff]  }
  0x5c   :  { %6089 = vmatprep.subr.bf16.mxu0 %v10101_v0  ;;  %4932 = vmatpush1.bf16.msra.mxu1 %v9205_v1  ;;  %v9333_v63 = vld [vmem:[%s12847_s1 + $0xf8] sm:$0xff]  }
  0x5d   :  { %4933 = vmatprep.subr.bf16.mxu1 %v10101_v0  ;;  %v9226_v1 = vld [vmem:[%s12848_s0 + $0x870] ss:$72 sps:$4 sm:$0xff]  }
  0x5f   :  { %6090 = vmatpush1.bf16.msra.mxu0 %v9168_v2  ;;  %v9227_v2 = vld [vmem:[%s12848_s0 + $0x890] ss:$72 sps:$4 sm:$0xff]  }
  0x60   :  { %6091 = vmatprep.subr.bf16.mxu0 %v10101_v0  ;;  %4934 = vmatpush1.bf16.msra.mxu1 %v9220_v6  ;;  %v9231_v6 = vld [vmem:[%s12848_s0 + $0x28] ss:$72 sps:$4 sm:$0xff]  }
  0x61   :  { %4695 = vmatmul.mubr.bf16.gmra.mrb[16].mxu1 %v9143_v3  ;;  %4935 = vmatprep.subr.bf16.mxu1 %v10101_v0  ;;  %v9229_v3 = vld [vmem:[%s12848_s0 + $0x904] ss:$72 sps:$4 sm:$0xff]  }
  0x62   :  { %5851 = vmatmul.mubr.bf16.gmra.mrb[16].mxu0 %v9144_v4  ;;  %4702 = vmatprep.mubr.bf16.mxu1 %v9147_v5  ;;  %v9233_v4 = vld [vmem:[%s12848_s0 + $0x2c] ss:$72 sps:$4 sm:$0xff]   ;;  %v9234_v5 = vld [vmem:[%s12848_s0 + $0x900] ss:$72 sps:$4 sm:$0xff]  }
  0x63   :  { %5858 = vmatprep.mubr.bf16.mxu0 %v9149_v7  ;;  %6092 = vmatpush1.bf16.msra.mxu0 %v9176_v8  ;;  %v9237_v7 = vld [vmem:[%s12848_s0 + $0x994] ss:$72 sps:$4 sm:$0xff]   ;;  %v9236_v8 = vld [vmem:[%s12847_s1 + $0x300] sm:$0xff]  }
  0x64   :  { %6093 = vmatprep.subr.bf16.mxu0 %v10101_v0  ;;  %4936 = vmatpush1.bf16.msra.mxu1 %v9235_v14  ;;  %v9245_v14 = vld [vmem:[%s12848_s0 + $0x14c] ss:$72 sps:$4 sm:$0xff]  }
  0x65   :  { %4937 = vmatprep.subr.bf16.mxu1 %v10101_v0 }
  0x67   :  { %6094 = vmatpush1.bf16.msra.mxu0 %v9183_v10  ;;  %v9241_v10 = vld [vmem:[%s12848_s0 + $0x990] ss:$72 sps:$4 sm:$0xff]  }
  0x68   :  { %6095 = vmatprep.subr.bf16.mxu0 %v10101_v0  ;;  %4938 = vmatpush1.bf16.msra.mxu1 %v9249_v20  ;;  %v9253_v20 = vld [vmem:[%s12848_s0 + $0x1dc] ss:$72 sps:$4 sm:$0xff]  }
  0x69   :  { %4703 = vmatmul.mubr.bf16.gmra.mrb[20].mxu1 %v9151_v9  ;;  %4939 = vmatprep.subr.bf16.mxu1 %v10101_v0  ;;  %v9239_v9 = vld [vmem:[%s12848_s0 + $0xbc] ss:$72 sps:$4 sm:$0xff]  }
  0x6a   :  { %5859 = vmatmul.mubr.bf16.gmra.mrb[20].mxu0 %v9152_v11  ;;  %4710 = vmatprep.mubr.bf16.mxu1 %v9154_v12  ;;  %v9250_v11 = vld [vmem:[%s12847_s1 + $0x308] sm:$0xff]   ;;  %v9242_v12 = vld [vmem:[%s12848_s0 + $0xb8] ss:$72 sps:$4 sm:$0xff]  }
  0x6b   :  { %5866 = vmatprep.mubr.bf16.mxu0 %v9156_v13  ;;  %6096 = vmatpush1.bf16.msra.mxu0 %v9191_v15  ;;  %v9243_v13 = vld [vmem:[%s12848_s0 + $0xa24] ss:$72 sps:$4 sm:$0xff]   ;;  %v9264_v15 = vld [vmem:[%s12847_s1 + $0x310] sm:$0xff]  }
  0x6c   :  { %6097 = vmatprep.subr.bf16.mxu0 %v10101_v0  ;;  %4940 = vmatpush1.bf16.msra.mxu1 %v9263_v26  ;;  %v9259_v26 = vld [vmem:[%s12848_s0 + $0x26c] ss:$72 sps:$4 sm:$0xff]  }
  0x6d   :  { %4941 = vmatprep.subr.bf16.mxu1 %v10101_v0 }
  0x6f   :  { %6098 = vmatpush1.bf16.msra.mxu0 %v9198_v17  ;;  %v9278_v17 = vld [vmem:[%s12847_s1 + $0x318] sm:$0xff]  }
  0x70   :  { %6099 = vmatprep.subr.bf16.mxu0 %v10101_v0  ;;  %4942 = vmatpush1.bf16.msra.mxu1 %v9277_v32  ;;  %v9267_v32 = vld [vmem:[%s12848_s0 + $0x2fc] ss:$72 sps:$4 sm:$0xff]  }
  0x71   :  { %4711 = vmatmul.mubr.bf16.gmra.mrb[24].mxu1 %v9158_v16  ;;  %4943 = vmatprep.subr.bf16.mxu1 %v10101_v0  ;;  %v9247_v16 = vld [vmem:[%s12848_s0 + $0xa20] ss:$72 sps:$4 sm:$0xff]  }
  0x72   :  { %5867 = vmatmul.mubr.bf16.gmra.mrb[24].mxu0 %v9159_v18  ;;  %4718 = vmatprep.mubr.bf16.mxu1 %v9162_v19  ;;  %v9248_v18 = vld [vmem:[%s12848_s0 + $0x148] ss:$72 sps:$4 sm:$0xff]   ;;  %v9251_v19 = vld [vmem:[%s12848_s0 + $0xab4] ss:$72 sps:$4 sm:$0xff]  }
  0x73   :  { %5874 = vmatprep.mubr.bf16.mxu0 %v9164_v21  ;;  %6100 = vmatpush1.bf16.msra.mxu0 %v9206_v22  ;;  %v9292_v21 = vld [vmem:[%s12847_s1 + $0x320] sm:$0xff]   ;;  %v9255_v22 = vld [vmem:[%s12848_s0 + $0xab0] ss:$72 sps:$4 sm:$0xff]  }
  0x74   :  { %6101 = vmatprep.subr.bf16.mxu0 %v10101_v0  ;;  %4944 = vmatpush1.bf16.msra.mxu1 %v9291_v36  ;;  %v9270_v36 = vld [vmem:[%s12848_s0 + $0x2f8] ss:$72 sps:$4 sm:$0xff]  }
  0x75   :  { %4945 = vmatprep.subr.bf16.mxu1 %v10101_v0 }
  0x77   :  { %6102 = vmatpush1.bf16.msra.mxu0 %v9213_v24  ;;  %v9256_v24 = vld [vmem:[%s12848_s0 + $0x1d8] ss:$72 sps:$4 sm:$0xff]  }
  0x78   :  { %6103 = vmatprep.subr.bf16.mxu0 %v10101_v0  ;;  %4946 = vmatpush1.bf16.msra.mxu1 %v9305_v45  ;;  %v9283_v45 = vld [vmem:[%s12848_s0 + $0xcf0] ss:$72 sps:$4 sm:$0xff]  }
  0x79   :  { %4719 = vmatmul.mubr.bf16.gmra.mrb[28].mxu1 %v9166_v23  ;;  %4947 = vmatprep.subr.bf16.mxu1 %v10101_v0  ;;  %v9306_v23 = vld [vmem:[%s12847_s1 + $0x328] sm:$0xff]  }
  0x7a   :  { %5875 = vmatmul.mubr.bf16.gmra.mrb[28].mxu0 %v9167_v25  ;;  %4726 = vmatprep.mubr.bf16.mxu1 %v9169_v27  ;;  %v9257_v25 = vld [vmem:[%s12848_s0 + $0xb44] ss:$72 sps:$4 sm:$0xff]   ;;  %v9320_v27 = vld [vmem:[%s12847_s1 + $0x330] sm:$0xff]  }
  0x7b   :  { %5882 = vmatprep.mubr.bf16.mxu0 %v9171_v28  ;;  %6104 = vmatpush1.bf16.msra.mxu0 %v9221_v29  ;;  %v9261_v28 = vld [vmem:[%s12848_s0 + $0xb40] ss:$72 sps:$4 sm:$0xff]   ;;  %v9334_v29 = vld [vmem:[%s12847_s1 + $0x338] sm:$0xff]  }
  0x7c   :  { %6105 = vmatprep.subr.bf16.mxu0 %v10101_v0  ;;  %4948 = vmatpush1.bf16.msra.mxu1 %v9319_v54  ;;  %v9297_v54 = vld [vmem:[%s12848_s0 + $0xe10] ss:$72 sps:$4 sm:$0xff]  }
  0x7d   :  { %4949 = vmatprep.subr.bf16.mxu1 %v10101_v0 }
  0x7f   :  { %6106 = vmatpush1.bf16.msra.mxu0 %v9228_v31  ;;  %v9265_v31 = vld [vmem:[%s12848_s0 + $0xbd4] ss:$72 sps:$4 sm:$0xff]  }
  0x80   :  { %6364 = vmatprep.subr.bf16.mxu0 %v10101_v0  ;;  %4950 = vmatpush1.bf16.msra.mxu1 %v9333_v63  ;;  %v9311_v63 = vld [vmem:[%s12848_s0 + $0xf30] ss:$72 sps:$4 sm:$0xff]  }
  0x81   :  { %4727 = vmatmul.mubr.bf16.gmra.mrb[32].mxu1 %v9173_v30  ;;  %5208 = vmatprep.subr.bf16.mxu1 %v10101_v0  ;;  %v9262_v30 = vld [vmem:[%s12848_s0 + $0x268] ss:$72 sps:$4 sm:$0xff]  }
  0x82   :  { %5883 = vmatmul.mubr.bf16.gmra.mrb[32].mxu0 %v9174_v33  ;;  %4734 = vmatprep.mubr.bf16.mxu1 %v9177_v34  ;;  %v9348_v33 = vld [vmem:[%s12847_s1 + $0x340] sm:$0xff]   ;;  %v9269_v34 = vld [vmem:[%s12848_s0 + $0xbd0] ss:$72 sps:$4 sm:$0xff]  }
  0x83   :  { %5890 = vmatprep.mubr.bf16.mxu0 %v9179_v35  ;;  %v9362_v35 = vld [vmem:[%s12847_s1 + $0x348] sm:$0xff]  }
  0x89   :  { %4735 = vmatmul.mubr.bf16.gmra.mrb[36].mxu1 %v9181_v37  ;;  %v9271_v37 = vld [vmem:[%s12848_s0 + $0xc64] ss:$72 sps:$4 sm:$0xff]  }
  0x8a   :  { %5891 = vmatmul.mubr.bf16.gmra.mrb[36].mxu0 %v9182_v38  ;;  %4742 = vmatprep.mubr.bf16.mxu1 %v9184_v39  ;;  %v9273_v38 = vld [vmem:[%s12848_s0 + $0x38c] ss:$72 sps:$4 sm:$0xff]  }
  0x8b   :  { %5898 = vmatprep.mubr.bf16.mxu0 %v9186_v40  ;;  %v9376_v39 = vld [vmem:[%s12847_s1 + $0x350] sm:$0xff]   ;;  %v9275_v40 = vld [vmem:[%s12848_s0 + $0xc60] ss:$72 sps:$4 sm:$0xff]  }
  0x91   :  { %4743 = vmatmul.mubr.bf16.gmra.mrb[40].mxu1 %v9188_v41  ;;  %v9276_v41 = vld [vmem:[%s12848_s0 + $0x388] ss:$72 sps:$4 sm:$0xff]  }
  0x92   :  { %5899 = vmatmul.mubr.bf16.gmra.mrb[40].mxu0 %v9189_v42  ;;  %4750 = vmatprep.mubr.bf16.mxu1 %v9192_v43  ;;  %v9279_v42 = vld [vmem:[%s12848_s0 + $0xcf4] ss:$72 sps:$4 sm:$0xff]  }
  0x93   :  { %5906 = vmatprep.mubr.bf16.mxu0 %v9194_v44  ;;  %v9281_v43 = vld [vmem:[%s12848_s0 + $0x41c] ss:$72 sps:$4 sm:$0xff]  }
  0x94   :  { %v9390_v44 = vld [vmem:[%s12847_s1 + $0x358] sm:$0xff]  }
  0x99   :  { %4751 = vmatmul.mubr.bf16.gmra.mrb[44].mxu1 %v9196_v46  ;;  %v9284_v46 = vld [vmem:[%s12848_s0 + $0x418] ss:$72 sps:$4 sm:$0xff]  }
  0x9a   :  { %5907 = vmatmul.mubr.bf16.gmra.mrb[44].mxu0 %v9197_v47  ;;  %4758 = vmatprep.mubr.bf16.mxu1 %v9199_v48  ;;  %v9285_v47 = vld [vmem:[%s12848_s0 + $0xd84] ss:$72 sps:$4 sm:$0xff]  }
  0x9b   :  { %5914 = vmatprep.mubr.bf16.mxu0 %v9201_v49  ;;  %v9287_v48 = vld [vmem:[%s12848_s0 + $0x4ac] ss:$72 sps:$4 sm:$0xff]   ;;  %v9289_v49 = vld [vmem:[%s12848_s0 + $0xd80] ss:$72 sps:$4 sm:$0xff]  }
  0xa1   :  { %4759 = vmatmul.mubr.bf16.gmra.mrb[48].mxu1 %v9203_v50  ;;  %v9290_v50 = vld [vmem:[%s12848_s0 + $0x4a8] ss:$72 sps:$4 sm:$0xff]  }
  0xa2   :  { %5915 = vmatmul.mubr.bf16.gmra.mrb[48].mxu0 %v9204_v51  ;;  %4766 = vmatprep.mubr.bf16.mxu1 %v9207_v52  ;;  %v9293_v51 = vld [vmem:[%s12848_s0 + $0xe14] ss:$72 sps:$4 sm:$0xff]  }
  0xa3   :  { %5922 = vmatprep.mubr.bf16.mxu0 %v9209_v53  ;;  %v9295_v52 = vld [vmem:[%s12848_s0 + $0x53c] ss:$72 sps:$4 sm:$0xff]  }
  0xa4   :  { %v9404_v53 = vld [vmem:[%s12847_s1 + $0x360] sm:$0xff]  }
  0xa9   :  { %4767 = vmatmul.mubr.bf16.gmra.mrb[52].mxu1 %v9211_v55  ;;  %v9298_v55 = vld [vmem:[%s12848_s0 + $0x538] ss:$72 sps:$4 sm:$0xff]  }
  0xaa   :  { %5923 = vmatmul.mubr.bf16.gmra.mrb[52].mxu0 %v9212_v56  ;;  %4774 = vmatprep.mubr.bf16.mxu1 %v9214_v57  ;;  %v9299_v56 = vld [vmem:[%s12848_s0 + $0xea4] ss:$72 sps:$4 sm:$0xff]  }
  0xab   :  { %5930 = vmatprep.mubr.bf16.mxu0 %v9216_v58  ;;  %v9301_v57 = vld [vmem:[%s12848_s0 + $0x5cc] ss:$72 sps:$4 sm:$0xff]   ;;  %v9303_v58 = vld [vmem:[%s12848_s0 + $0xea0] ss:$72 sps:$4 sm:$0xff]  }
  0xb1   :  { %4775 = vmatmul.mubr.bf16.gmra.mrb[56].mxu1 %v9218_v59  ;;  %v9304_v59 = vld [vmem:[%s12848_s0 + $0x5c8] ss:$72 sps:$4 sm:$0xff]  }
  0xb2   :  { %5931 = vmatmul.mubr.bf16.gmra.mrb[56].mxu0 %v9219_v60  ;;  %4782 = vmatprep.mubr.bf16.mxu1 %v9222_v61  ;;  %v9307_v60 = vld [vmem:[%s12848_s0 + $0xf34] ss:$72 sps:$4 sm:$0xff]  }
  0xb3   :  { %5938 = vmatprep.mubr.bf16.mxu0 %v9224_v62  ;;  %v9309_v61 = vld [vmem:[%s12848_s0 + $0x65c] ss:$72 sps:$4 sm:$0xff]   ;;  %v9418_v62 = vld [vmem:[%s12847_s1 + $0x368] sm:$0xff]  }
  0xb9   :  { %4783 = vmatmul.mubr.bf16.gmra.mrb[60].mxu1 %v9226_v1  ;;  %v9312_v1 = vld [vmem:[%s12848_s0 + $0x658] ss:$72 sps:$4 sm:$0xff]  }
  0xba   :  { %5939 = vmatmul.mubr.bf16.gmra.mrb[60].mxu0 %v9227_v2  ;;  %4790 = vmatprep.mubr.bf16.mxu1 %v9229_v3  ;;  %v9313_v2 = vld [vmem:[%s12848_s0 + $0xfc4] ss:$72 sps:$4 sm:$0xff]  }
  0xbb   :  { %6107 = vmatprep.mubr.bf16.mxu0 %v9233_v4  ;;  %v9315_v3 = vld [vmem:[%s12848_s0 + $0x6ec] ss:$72 sps:$4 sm:$0xff]   ;;  %v9317_v4 = vld [vmem:[%s12848_s0 + $0xfc0] ss:$72 sps:$4 sm:$0xff]  }
  0xc1   :  { %4791 = vmatmul.mubr.bf16.gmra.mrb[64].mxu1 %v9234_v5  ;;  %v9318_v5 = vld [vmem:[%s12848_s0 + $0x6e8] ss:$72 sps:$4 sm:$0xff]  }
  0xc2   :  { %6108 = vmatmul.mubr.bf16.vlgmr.msra.gmra.mrb[0].mxu0 %v9231_v6  ;;  %4798 = vmatprep.mubr.bf16.mxu1 %v9237_v7  ;;  %v9321_v6 = vld [vmem:[%s12848_s0 + $0x1054] ss:$72 sps:$4 sm:$0xff]  }
  0xc3   :  { %6365 = vmatpush1.bf16.msra.mxu0 %v9236_v8  ;;  %6115 = vmatprep.mubr.bf16.mxu0 %v9239_v9  ;;  %v9323_v7 = vld [vmem:[%s12848_s0 + $0x77c] ss:$72 sps:$4 sm:$0xff]   ;;  %v9432_v8 = vld [vmem:[%s12847_s1 + $0x370] sm:$0xff]  }
  0xc4   :  { %6366 = vmatprep.subr.bf16.mxu0 %v10101_v0  ;;  %v9325_v9 = vld [vmem:[%s12848_s0 + $0x1050] ss:$72 sps:$4 sm:$0xff]  }
  0xc7   :  { %6367 = vmatpush1.bf16.msra.mxu0 %v9250_v11  ;;  %v9327_v11 = vld [vmem:[%s12848_s0 + $0x10e4] ss:$72 sps:$4 sm:$0xff]  }
  0xc8   :  { %6368 = vmatprep.subr.bf16.mxu0 %v10101_v0 }
  0xc9   :  { %4799 = vmatmul.mubr.bf16.gmra.mrb[68].mxu1 %v9241_v10  ;;  %v9326_v10 = vld [vmem:[%s12848_s0 + $0x778] ss:$72 sps:$4 sm:$0xff]  }
  0xca   :  { %6116 = vmatmul.mubr.bf16.gmra.mrb[4].mxu0 %v9242_v12  ;;  %4806 = vmatprep.mubr.bf16.mxu1 %v9243_v13  ;;  %v9329_v12 = vld [vmem:[%s12848_s0 + $0x80c] ss:$72 sps:$4 sm:$0xff]   ;;  %v9331_v13 = vld [vmem:[%s12848_s0 + $0x10e0] ss:$72 sps:$4 sm:$0xff]  }
  0xcb   :  { %6123 = vmatprep.mubr.bf16.mxu0 %v9245_v14  ;;  %6369 = vmatpush1.bf16.msra.mxu0 %v9264_v15  ;;  %v9332_v14 = vld [vmem:[%s12848_s0 + $0x808] ss:$72 sps:$4 sm:$0xff]   ;;  %v9335_v15 = vld [vmem:[%s12848_s0 + $0x1174] ss:$72 sps:$4 sm:$0xff]  }
  0xcc   :  { %6370 = vmatprep.subr.bf16.mxu0 %v10101_v0 }
  0xcf   :  { %6371 = vmatpush1.bf16.msra.mxu0 %v9278_v17  ;;  %v9446_v17 = vld [vmem:[%s12847_s1 + $0x378] sm:$0xff]  }
  0xd0   :  { %6372 = vmatprep.subr.bf16.mxu0 %v10101_v0 }
  0xd1   :  { %4807 = vmatmul.mubr.bf16.gmra.mrb[72].mxu1 %v9247_v16  ;;  %v9337_v16 = vld [vmem:[%s12848_s0 + $0x89c] ss:$72 sps:$4 sm:$0xff]  }
  0xd2   :  { %6124 = vmatmul.mubr.bf16.gmra.mrb[8].mxu0 %v9248_v18  ;;  %4814 = vmatprep.mubr.bf16.mxu1 %v9251_v19  ;;  %v9339_v18 = vld [vmem:[%s12848_s0 + $0x1170] ss:$72 sps:$4 sm:$0xff]  }
  0xd3   :  { %6131 = vmatprep.mubr.bf16.mxu0 %v9253_v20  ;;  %6373 = vmatpush1.bf16.msra.mxu0 %v9292_v21  ;;  %v9340_v19 = vld [vmem:[%s12848_s0 + $0x898] ss:$72 sps:$4 sm:$0xff]   ;;  %v9343_v20 = vld [vmem:[%s12848_s0 + $0xc] ss:$72 sps:$4 sm:$0xff]  }
  0xd4   :  { %6374 = vmatprep.subr.bf16.mxu0 %v10101_v0  ;;  %v9344_v21 = vld [vmem:[%s12848_s0 + $0x92c] ss:$72 sps:$4 sm:$0xff]  }
  0xd7   :  { %6375 = vmatpush1.bf16.msra.mxu0 %v9306_v23  ;;  %v9346_v23 = vld [vmem:[%s12848_s0 + $0x928] ss:$72 sps:$4 sm:$0xff]  }
  0xd8   :  { %6376 = vmatprep.subr.bf16.mxu0 %v10101_v0 }
  0xd9   :  { %4815 = vmatmul.mubr.bf16.gmra.mrb[76].mxu1 %v9255_v22  ;;  %v9341_v22 = vld [vmem:[%s12848_s0 + $0x8] ss:$72 sps:$4 sm:$0xff]  }
  0xda   :  { %6132 = vmatmul.mubr.bf16.gmra.mrb[12].mxu0 %v9256_v24  ;;  %4822 = vmatprep.mubr.bf16.mxu1 %v9257_v25  ;;  %v9347_v24 = vld [vmem:[%s12847_s1 + $0x100] sm:$0xff]  }
  0xdb   :  { %6139 = vmatprep.mubr.bf16.mxu0 %v9259_v26  ;;  %6377 = vmatpush1.bf16.msra.mxu0 %v9320_v27  ;;  %v9349_v25 = vld [vmem:[%s12848_s0 + $0x9c] ss:$72 sps:$4 sm:$0xff]   ;;  %v9361_v27 = vld [vmem:[%s12847_s1 + $0x108] sm:$0xff]  }
  0xdc   :  { %6378 = vmatprep.subr.bf16.mxu0 %v10101_v0  ;;  %v9351_v26 = vld [vmem:[%s12848_s0 + $0x9bc] ss:$72 sps:$4 sm:$0xff]  }
  0xdf   :  { %6379 = vmatpush1.bf16.msra.mxu0 %v9334_v29  ;;  %v9354_v29 = vld [vmem:[%s12848_s0 + $0x9b8] ss:$72 sps:$4 sm:$0xff]  }
  0xe0   :  { %6380 = vmatprep.subr.bf16.mxu0 %v10101_v0 }
  0xe1   :  { %4823 = vmatmul.mubr.bf16.gmra.mrb[80].mxu1 %v9261_v28  ;;  %v9353_v28 = vld [vmem:[%s12848_s0 + $0x98] ss:$72 sps:$4 sm:$0xff]  }
  0xe2   :  { %6140 = vmatmul.mubr.bf16.gmra.mrb[16].mxu0 %v9262_v30  ;;  %4830 = vmatprep.mubr.bf16.mxu1 %v9265_v31  ;;  %v9355_v30 = vld [vmem:[%s12848_s0 + $0x12c] ss:$72 sps:$4 sm:$0xff]  }
  0xe3   :  { %6147 = vmatprep.mubr.bf16.mxu0 %v9267_v32  ;;  %6381 = vmatpush1.bf16.msra.mxu0 %v9348_v33  ;;  %v9357_v31 = vld [vmem:[%s12848_s0 + $0xa4c] ss:$72 sps:$4 sm:$0xff]   ;;  %v9359_v33 = vld [vmem:[%s12848_s0 + $0x128] ss:$72 sps:$4 sm:$0xff]  }
  0xe4   :  { %6382 = vmatprep.subr.bf16.mxu0 %v10101_v0  ;;  %v9375_v32 = vld [vmem:[%s12847_s1 + $0x110] sm:$0xff]  }
  0xe7   :  { %6383 = vmatpush1.bf16.msra.mxu0 %v9362_v35  ;;  %v9360_v35 = vld [vmem:[%s12848_s0 + $0xa48] ss:$72 sps:$4 sm:$0xff]  }
  0xe8   :  { %6384 = vmatprep.subr.bf16.mxu0 %v10101_v0 }
  0xe9   :  { %4831 = vmatmul.mubr.bf16.gmra.mrb[84].mxu1 %v9269_v34  ;;  %v9389_v34 = vld [vmem:[%s12847_s1 + $0x118] sm:$0xff]  }
  0xea   :  { %6148 = vmatmul.mubr.bf16.gmra.mrb[20].mxu0 %v9270_v36  ;;  %4838 = vmatprep.mubr.bf16.mxu1 %v9271_v37  ;;  %v9363_v36 = vld [vmem:[%s12848_s0 + $0x1bc] ss:$72 sps:$4 sm:$0xff]  }
  0xeb   :  { %6155 = vmatprep.mubr.bf16.mxu0 %v9273_v38  ;;  %6385 = vmatpush1.bf16.msra.mxu0 %v9376_v39  ;;  %v9365_v37 = vld [vmem:[%s12848_s0 + $0xadc] ss:$72 sps:$4 sm:$0xff]   ;;  %v9367_v39 = vld [vmem:[%s12848_s0 + $0x1b8] ss:$72 sps:$4 sm:$0xff]  }
  0xec   :  { %6386 = vmatprep.subr.bf16.mxu0 %v10101_v0  ;;  %v9403_v38 = vld [vmem:[%s12847_s1 + $0x120] sm:$0xff]  }
  0xef   :  { %6387 = vmatpush1.bf16.msra.mxu0 %v9390_v44  ;;  %v9431_v44 = vld [vmem:[%s12847_s1 + $0x130] sm:$0xff]  }
  0xf0   :  { %6388 = vmatprep.subr.bf16.mxu0 %v10101_v0 }
  0xf1   :  { %4839 = vmatmul.mubr.bf16.gmra.mrb[88].mxu1 %v9275_v40  ;;  %v9417_v40 = vld [vmem:[%s12847_s1 + $0x128] sm:$0xff]  }
  0xf2   :  { %6156 = vmatmul.mubr.bf16.gmra.mrb[24].mxu0 %v9276_v41  ;;  %4846 = vmatprep.mubr.bf16.mxu1 %v9279_v42  ;;  %v9368_v41 = vld [vmem:[%s12848_s0 + $0xad8] ss:$72 sps:$4 sm:$0xff]   ;;  %v9369_v42 = vld [vmem:[%s12848_s0 + $0x24c] ss:$72 sps:$4 sm:$0xff]  }
  0xf3   :  { %6163 = vmatprep.mubr.bf16.mxu0 %v9281_v43  ;;  %6389 = vmatpush1.bf16.msra.mxu0 %v9404_v53  ;;  %v9371_v43 = vld [vmem:[%s12848_s0 + $0xb6c] ss:$72 sps:$4 sm:$0xff]   ;;  %v9382_v53 = vld [vmem:[%s12848_s0 + $0xbf8] ss:$72 sps:$4 sm:$0xff]  }
  0xf4   :  { %6390 = vmatprep.subr.bf16.mxu0 %v10101_v0 }
  0xf7   :  { %6391 = vmatpush1.bf16.msra.mxu0 %v9418_v62  ;;  %v9395_v62 = vld [vmem:[%s12848_s0 + $0x3f8] ss:$72 sps:$4 sm:$0xff]  }
  0xf8   :  { %6392 = vmatprep.subr.bf16.mxu0 %v10101_v0 }
  0xf9   :  { %4847 = vmatmul.mubr.bf16.gmra.mrb[92].mxu1 %v9283_v45  ;;  %v9373_v45 = vld [vmem:[%s12848_s0 + $0x248] ss:$72 sps:$4 sm:$0xff]  }
  0xfa   :  { %6164 = vmatmul.mubr.bf16.gmra.mrb[28].mxu0 %v9284_v46  ;;  %4854 = vmatprep.mubr.bf16.mxu1 %v9285_v47  ;;  %v9445_v46 = vld [vmem:[%s12847_s1 + $0x138] sm:$0xff]   ;;  %v9374_v47 = vld [vmem:[%s12848_s0 + $0xb68] ss:$72 sps:$4 sm:$0xff]  }
  0xfb   :  { %6171 = vmatprep.mubr.bf16.mxu0 %v9287_v48  ;;  %6393 = vmatpush1.bf16.msra.mxu0 %v9432_v8  ;;  %v9377_v48 = vld [vmem:[%s12848_s0 + $0x2dc] ss:$72 sps:$4 sm:$0xff]   ;;  %v9409_v8 = vld [vmem:[%s12848_s0 + $0x518] ss:$72 sps:$4 sm:$0xff]  }
  0xfc   :  { %6394 = vmatprep.subr.bf16.mxu0 %v10101_v0 }
  0xff   :  { %6395 = vmatpush1.bf16.msra.mxu0 %v9446_v17  ;;  %v9423_v17 = vld [vmem:[%s12848_s0 + $0x638] ss:$72 sps:$4 sm:$0xff]  }
 0x100   :  { %6653 = vmatprep.subr.bf16.mxu0 %v10101_v0 }
 0x101   :  { %4855 = vmatmul.mubr.bf16.gmra.mrb[96].mxu1 %v9289_v49  ;;  %v9379_v49 = vld [vmem:[%s12848_s0 + $0xbfc] ss:$72 sps:$4 sm:$0xff]  }
 0x102   :  { %6172 = vmatmul.mubr.bf16.gmra.mrb[32].mxu0 %v9290_v50  ;;  %4862 = vmatprep.mubr.bf16.mxu1 %v9293_v51  ;;  %v9459_v50 = vld [vmem:[%s12847_s1 + $0x140] sm:$0xff]  }
 0x103   :  { %6179 = vmatprep.mubr.bf16.mxu0 %v9295_v52  ;;  %v9381_v51 = vld [vmem:[%s12848_s0 + $0x2d8] ss:$72 sps:$4 sm:$0xff]   ;;  %v9473_v52 = vld [vmem:[%s12847_s1 + $0x148] sm:$0xff]  }
 0x109   :  { %4863 = vmatmul.mubr.bf16.gmra.mrb[100].mxu1 %v9297_v54  ;;  %v9383_v54 = vld [vmem:[%s12848_s0 + $0x36c] ss:$72 sps:$4 sm:$0xff]  }
 0x10a   :  { %6180 = vmatmul.mubr.bf16.gmra.mrb[36].mxu0 %v9298_v55  ;;  %4870 = vmatprep.mubr.bf16.mxu1 %v9299_v56  ;;  %v9385_v55 = vld [vmem:[%s12848_s0 + $0xc8c] ss:$72 sps:$4 sm:$0xff]  }
 0x10b   :  { %6187 = vmatprep.mubr.bf16.mxu0 %v9301_v57  ;;  %v9487_v56 = vld [vmem:[%s12847_s1 + $0x150] sm:$0xff]  }
 0x10c   :  { %v9387_v57 = vld [vmem:[%s12848_s0 + $0x368] ss:$72 sps:$4 sm:$0xff]  }
 0x111   :  { %4871 = vmatmul.mubr.bf16.gmra.mrb[104].mxu1 %v9303_v58  ;;  %v9388_v58 = vld [vmem:[%s12848_s0 + $0xc88] ss:$72 sps:$4 sm:$0xff]  }
 0x112   :  { %6188 = vmatmul.mubr.bf16.gmra.mrb[40].mxu0 %v9304_v59  ;;  %4878 = vmatprep.mubr.bf16.mxu1 %v9307_v60  ;;  %v9391_v59 = vld [vmem:[%s12848_s0 + $0x3fc] ss:$72 sps:$4 sm:$0xff]  }
 0x113   :  { %6195 = vmatprep.mubr.bf16.mxu0 %v9309_v61  ;;  %v9393_v60 = vld [vmem:[%s12848_s0 + $0xd1c] ss:$72 sps:$4 sm:$0xff]  }
 0x114   :  { %v9501_v61 = vld [vmem:[%s12847_s1 + $0x158] sm:$0xff]  }
 0x119   :  { %4879 = vmatmul.mubr.bf16.gmra.mrb[108].mxu1 %v9311_v63  ;;  %v9396_v63 = vld [vmem:[%s12848_s0 + $0xd18] ss:$72 sps:$4 sm:$0xff]  }
 0x11a   :  { %6196 = vmatmul.mubr.bf16.gmra.mrb[44].mxu0 %v9312_v1  ;;  %4886 = vmatprep.mubr.bf16.mxu1 %v9313_v2  ;;  %v9397_v1 = vld [vmem:[%s12848_s0 + $0x48c] ss:$72 sps:$4 sm:$0xff]  }
 0x11b   :  { %6203 = vmatprep.mubr.bf16.mxu0 %v9315_v3  ;;  %v9399_v2 = vld [vmem:[%s12848_s0 + $0xdac] ss:$72 sps:$4 sm:$0xff]   ;;  %v9401_v3 = vld [vmem:[%s12848_s0 + $0x488] ss:$72 sps:$4 sm:$0xff]  }
 0x121   :  { %4887 = vmatmul.mubr.bf16.gmra.mrb[112].mxu1 %v9317_v4  ;;  %v9402_v4 = vld [vmem:[%s12848_s0 + $0xda8] ss:$72 sps:$4 sm:$0xff]  }
 0x122   :  { %6204 = vmatmul.mubr.bf16.gmra.mrb[48].mxu0 %v9318_v5  ;;  %4894 = vmatprep.mubr.bf16.mxu1 %v9321_v6  ;;  %v9405_v5 = vld [vmem:[%s12848_s0 + $0x51c] ss:$72 sps:$4 sm:$0xff]  }
 0x123   :  { %6211 = vmatprep.mubr.bf16.mxu0 %v9323_v7  ;;  %v9407_v6 = vld [vmem:[%s12848_s0 + $0xe3c] ss:$72 sps:$4 sm:$0xff]  }
 0x124   :  { %v9515_v7 = vld [vmem:[%s12847_s1 + $0x160] sm:$0xff]  }
 0x129   :  { %4895 = vmatmul.mubr.bf16.gmra.mrb[116].mxu1 %v9325_v9  ;;  %v9410_v9 = vld [vmem:[%s12848_s0 + $0xe38] ss:$72 sps:$4 sm:$0xff]  }
 0x12a   :  { %6212 = vmatmul.mubr.bf16.gmra.mrb[52].mxu0 %v9326_v10  ;;  %4902 = vmatprep.mubr.bf16.mxu1 %v9327_v11  ;;  %v9411_v10 = vld [vmem:[%s12848_s0 + $0x5ac] ss:$72 sps:$4 sm:$0xff]  }
 0x12b   :  { %6219 = vmatprep.mubr.bf16.mxu0 %v9329_v12  ;;  %v9413_v11 = vld [vmem:[%s12848_s0 + $0xecc] ss:$72 sps:$4 sm:$0xff]   ;;  %v9415_v12 = vld [vmem:[%s12848_s0 + $0x5a8] ss:$72 sps:$4 sm:$0xff]  }
 0x131   :  { %4903 = vmatmul.mubr.bf16.gmra.mrb[120].mxu1 %v9331_v13  ;;  %v9416_v13 = vld [vmem:[%s12848_s0 + $0xec8] ss:$72 sps:$4 sm:$0xff]  }
 0x132   :  { %6220 = vmatmul.mubr.bf16.gmra.mrb[56].mxu0 %v9332_v14  ;;  %4910 = vmatprep.mubr.bf16.mxu1 %v9335_v15  ;;  %v9419_v14 = vld [vmem:[%s12848_s0 + $0x63c] ss:$72 sps:$4 sm:$0xff]  }
 0x133   :  { %6227 = vmatprep.mubr.bf16.mxu0 %v9337_v16  ;;  %v9421_v15 = vld [vmem:[%s12848_s0 + $0xf5c] ss:$72 sps:$4 sm:$0xff]   ;;  %v9529_v16 = vld [vmem:[%s12847_s1 + $0x168] sm:$0xff]  }
 0x139   :  { %4911 = vmatmul.mubr.bf16.gmra.mrb[124].mxu1 %v9339_v18  ;;  %v9424_v18 = vld [vmem:[%s12848_s0 + $0xf58] ss:$72 sps:$4 sm:$0xff]  }
 0x13a   :  { %6228 = vmatmul.mubr.bf16.gmra.mrb[60].mxu0 %v9340_v19  ;;  %4951 = vmatprep.mubr.bf16.mxu1 %v9343_v20  ;;  %v9425_v19 = vld [vmem:[%s12848_s0 + $0x6cc] ss:$72 sps:$4 sm:$0xff]  }
 0x13b   :  { %6235 = vmatprep.mubr.bf16.mxu0 %v9344_v21  ;;  %v9427_v20 = vld [vmem:[%s12848_s0 + $0xfec] ss:$72 sps:$4 sm:$0xff]   ;;  %v9429_v21 = vld [vmem:[%s12848_s0 + $0x6c8] ss:$72 sps:$4 sm:$0xff]  }
 0x141   :  { %4952 = vmatmul.mubr.bf16.vlgmr.msra.gmra.mrb[0].mxu1 %v9341_v22  ;;  %v9430_v22 = vld [vmem:[%s12848_s0 + $0xfe8] ss:$72 sps:$4 sm:$0xff]  }
 0x142   :  { %6236 = vmatmul.mubr.bf16.gmra.mrb[64].mxu0 %v9346_v23  ;;  %5209 = vmatpush1.bf16.msra.mxu1 %v9347_v24  ;;  %v9433_v23 = vld [vmem:[%s12848_s0 + $0x75c] ss:$72 sps:$4 sm:$0xff]  }
 0x143   :  { %4959 = vmatprep.mubr.bf16.mxu1 %v9349_v25  ;;  %6243 = vmatprep.mubr.bf16.mxu0 %v9351_v26  ;;  %v9435_v24 = vld [vmem:[%s12848_s0 + $0x107c] ss:$72 sps:$4 sm:$0xff]   ;;  %v9543_v25 = vld [vmem:[%s12847_s1 + $0x170] sm:$0xff]   ;;  %v9437_v26 = vld [vmem:[%s12848_s0 + $0x758] ss:$72 sps:$4 sm:$0xff]  }
 0x144   :  { %5210 = vmatprep.subr.bf16.mxu1 %v10101_v0 }
 0x146   :  { %5211 = vmatpush1.bf16.msra.mxu1 %v9361_v27  ;;  %v9438_v27 = vld [vmem:[%s12848_s0 + $0x1078] ss:$72 sps:$4 sm:$0xff]  }
 0x147   :  { %5212 = vmatprep.subr.bf16.mxu1 %v10101_v0 }
 0x149   :  { %4960 = vmatmul.mubr.bf16.gmra.mrb[4].mxu1 %v9353_v28  ;;  %v9439_v28 = vld [vmem:[%s12848_s0 + $0x7ec] ss:$72 sps:$4 sm:$0xff]  }
 0x14a   :  { %6244 = vmatmul.mubr.bf16.gmra.mrb[68].mxu0 %v9354_v29  ;;  %4967 = vmatprep.mubr.bf16.mxu1 %v9355_v30  ;;  %v9441_v29 = vld [vmem:[%s12848_s0 + $0x110c] ss:$72 sps:$4 sm:$0xff]   ;;  %v9443_v30 = vld [vmem:[%s12848_s0 + $0x7e8] ss:$72 sps:$4 sm:$0xff]  }
 0x14b   :  { %6251 = vmatprep.mubr.bf16.mxu0 %v9357_v31  ;;  %5213 = vmatpush1.bf16.msra.mxu1 %v9375_v32  ;;  %v9444_v31 = vld [vmem:[%s12848_s0 + $0x1108] ss:$72 sps:$4 sm:$0xff]   ;;  %v9447_v32 = vld [vmem:[%s12848_s0 + $0x87c] ss:$72 sps:$4 sm:$0xff]  }
 0x14c   :  { %5214 = vmatprep.subr.bf16.mxu1 %v10101_v0 }
 0x14f   :  { %5215 = vmatpush1.bf16.msra.mxu1 %v9389_v34  ;;  %v9557_v34 = vld [vmem:[%s12847_s1 + $0x178] sm:$0xff]  }
 0x150   :  { %5216 = vmatprep.subr.bf16.mxu1 %v10101_v0 }
 0x151   :  { %4968 = vmatmul.mubr.bf16.gmra.mrb[8].mxu1 %v9359_v33  ;;  %v9449_v33 = vld [vmem:[%s12848_s0 + $0x119c] ss:$72 sps:$4 sm:$0xff]  }
 0x152   :  { %6252 = vmatmul.mubr.bf16.gmra.mrb[72].mxu0 %v9360_v35  ;;  %4975 = vmatprep.mubr.bf16.mxu1 %v9363_v36  ;;  %v9451_v35 = vld [vmem:[%s12848_s0 + $0x878] ss:$72 sps:$4 sm:$0xff]  }
 0x153   :  { %6259 = vmatprep.mubr.bf16.mxu0 %v9365_v37  ;;  %5217 = vmatpush1.bf16.msra.mxu1 %v9403_v38  ;;  %v9452_v36 = vld [vmem:[%s12848_s0 + $0x1198] ss:$72 sps:$4 sm:$0xff]   ;;  %v9453_v37 = vld [vmem:[%s12848_s0 + $0x90c] ss:$72 sps:$4 sm:$0xff]  }
 0x154   :  { %5218 = vmatprep.subr.bf16.mxu1 %v10101_v0  ;;  %v9457_v38 = vld [vmem:[%s12848_s0 + $0x34] ss:$72 sps:$4 sm:$0xff]  }
 0x157   :  { %5219 = vmatpush1.bf16.msra.mxu1 %v9417_v40  ;;  %v9455_v40 = vld [vmem:[%s12848_s0 + $0x30] ss:$72 sps:$4 sm:$0xff]  }
 0x158   :  { %5220 = vmatprep.subr.bf16.mxu1 %v10101_v0 }
 0x159   :  { %4976 = vmatmul.mubr.bf16.gmra.mrb[12].mxu1 %v9367_v39  ;;  %v9458_v39 = vld [vmem:[%s12848_s0 + $0x908] ss:$72 sps:$4 sm:$0xff]  }
 0x15a   :  { %6260 = vmatmul.mubr.bf16.gmra.mrb[76].mxu0 %v9368_v41  ;;  %4983 = vmatprep.mubr.bf16.mxu1 %v9369_v42  ;;  %v9461_v41 = vld [vmem:[%s12848_s0 + $0x99c] ss:$72 sps:$4 sm:$0xff]  }
 0x15b   :  { %6267 = vmatprep.mubr.bf16.mxu0 %v9371_v43  ;;  %5221 = vmatpush1.bf16.msra.mxu1 %v9431_v44  ;;  %v9460_v42 = vld [vmem:[%s12847_s1 + $0x380] sm:$0xff]   ;;  %v9474_v44 = vld [vmem:[%s12847_s1 + $0x388] sm:$0xff]  }
 0x15c   :  { %5222 = vmatprep.subr.bf16.mxu1 %v10101_v0  ;;  %v9463_v43 = vld [vmem:[%s12848_s0 + $0xc4] ss:$72 sps:$4 sm:$0xff]  }
 0x15f   :  { %5223 = vmatpush1.bf16.msra.mxu1 %v9445_v46  ;;  %v9466_v46 = vld [vmem:[%s12848_s0 + $0xc0] ss:$72 sps:$4 sm:$0xff]  }
 0x160   :  { %5224 = vmatprep.subr.bf16.mxu1 %v10101_v0 }
 0x161   :  { %4984 = vmatmul.mubr.bf16.gmra.mrb[16].mxu1 %v9373_v45  ;;  %v9465_v45 = vld [vmem:[%s12848_s0 + $0x998] ss:$72 sps:$4 sm:$0xff]  }
 0x162   :  { %6268 = vmatmul.mubr.bf16.gmra.mrb[80].mxu0 %v9374_v47  ;;  %4991 = vmatprep.mubr.bf16.mxu1 %v9377_v48  ;;  %v9467_v47 = vld [vmem:[%s12848_s0 + $0xa2c] ss:$72 sps:$4 sm:$0xff]  }
 0x163   :  { %6275 = vmatprep.mubr.bf16.mxu0 %v9379_v49  ;;  %5225 = vmatpush1.bf16.msra.mxu1 %v9459_v50  ;;  %v9469_v48 = vld [vmem:[%s12848_s0 + $0x154] ss:$72 sps:$4 sm:$0xff]  }
 0x164   :  { %5226 = vmatprep.subr.bf16.mxu1 %v10101_v0  ;;  %v9488_v49 = vld [vmem:[%s12847_s1 + $0x390] sm:$0xff]   ;;  %v9502_v50 = vld [vmem:[%s12847_s1 + $0x398] sm:$0xff]  }
 0x167   :  { %5227 = vmatpush1.bf16.msra.mxu1 %v9473_v52  ;;  %v9472_v52 = vld [vmem:[%s12848_s0 + $0x150] ss:$72 sps:$4 sm:$0xff]  }
 0x168   :  { %5228 = vmatprep.subr.bf16.mxu1 %v10101_v0 }
 0x169   :  { %4992 = vmatmul.mubr.bf16.gmra.mrb[20].mxu1 %v9381_v51  ;;  %v9471_v51 = vld [vmem:[%s12848_s0 + $0xa28] ss:$72 sps:$4 sm:$0xff]  }
 0x16a   :  { %6276 = vmatmul.mubr.bf16.gmra.mrb[84].mxu0 %v9382_v53  ;;  %4999 = vmatprep.mubr.bf16.mxu1 %v9383_v54  ;;  %v9475_v53 = vld [vmem:[%s12848_s0 + $0xabc] ss:$72 sps:$4 sm:$0xff]  }
 0x16b   :  { %6283 = vmatprep.mubr.bf16.mxu0 %v9385_v55  ;;  %5229 = vmatpush1.bf16.msra.mxu1 %v9487_v56  ;;  %v9477_v54 = vld [vmem:[%s12848_s0 + $0x1e4] ss:$72 sps:$4 sm:$0xff]  }
 0x16c   :  { %5230 = vmatprep.subr.bf16.mxu1 %v10101_v0  ;;  %v9516_v55 = vld [vmem:[%s12847_s1 + $0x3a0] sm:$0xff]   ;;  %v9530_v56 = vld [vmem:[%s12847_s1 + $0x3a8] sm:$0xff]  }
 0x16f   :  { %5231 = vmatpush1.bf16.msra.mxu1 %v9501_v61  ;;  %v9544_v61 = vld [vmem:[%s12847_s1 + $0x3b0] sm:$0xff]  }
 0x170   :  { %5232 = vmatprep.subr.bf16.mxu1 %v10101_v0 }
 0x171   :  { %5000 = vmatmul.mubr.bf16.gmra.mrb[24].mxu1 %v9387_v57  ;;  %v9479_v57 = vld [vmem:[%s12848_s0 + $0xab8] ss:$72 sps:$4 sm:$0xff]  }
 0x172   :  { %6284 = vmatmul.mubr.bf16.gmra.mrb[88].mxu0 %v9388_v58  ;;  %5007 = vmatprep.mubr.bf16.mxu1 %v9391_v59  ;;  %v9480_v58 = vld [vmem:[%s12848_s0 + $0x1e0] ss:$72 sps:$4 sm:$0xff]   ;;  %v9481_v59 = vld [vmem:[%s12848_s0 + $0xb4c] ss:$72 sps:$4 sm:$0xff]  }
 0x173   :  { %6291 = vmatprep.mubr.bf16.mxu0 %v9393_v60  ;;  %5233 = vmatpush1.bf16.msra.mxu1 %v9515_v7  ;;  %v9483_v60 = vld [vmem:[%s12848_s0 + $0x274] ss:$72 sps:$4 sm:$0xff]   ;;  %v9494_v7 = vld [vmem:[%s12848_s0 + $0x300] ss:$72 sps:$4 sm:$0xff]  }
 0x174   :  { %5234 = vmatprep.subr.bf16.mxu1 %v10101_v0 }
 0x177   :  { %5235 = vmatpush1.bf16.msra.mxu1 %v9529_v16  ;;  %v9507_v16 = vld [vmem:[%s12848_s0 + $0xcf8] ss:$72 sps:$4 sm:$0xff]  }
 0x178   :  { %5236 = vmatprep.subr.bf16.mxu1 %v10101_v0 }
 0x179   :  { %5008 = vmatmul.mubr.bf16.gmra.mrb[28].mxu1 %v9395_v62  ;;  %v9558_v62 = vld [vmem:[%s12847_s1 + $0x3b8] sm:$0xff]  }
 0x17a   :  { %6292 = vmatmul.mubr.bf16.gmra.mrb[92].mxu0 %v9396_v63  ;;  %5015 = vmatprep.mubr.bf16.mxu1 %v9397_v1  ;;  %v9485_v63 = vld [vmem:[%s12848_s0 + $0xb48] ss:$72 sps:$4 sm:$0xff]  }
 0x17b   :  { %6299 = vmatprep.mubr.bf16.mxu0 %v9399_v2  ;;  %5237 = vmatpush1.bf16.msra.mxu1 %v9543_v25  ;;  %v9486_v1 = vld [vmem:[%s12848_s0 + $0x270] ss:$72 sps:$4 sm:$0xff]   ;;  %v9489_v2 = vld [vmem:[%s12848_s0 + $0xbdc] ss:$72 sps:$4 sm:$0xff]  }
 0x17c   :  { %5238 = vmatprep.subr.bf16.mxu1 %v10101_v0  ;;  %v9521_v25 = vld [vmem:[%s12848_s0 + $0xe18] ss:$72 sps:$4 sm:$0xff]  }
 0x17f   :  { %5239 = vmatpush1.bf16.msra.mxu1 %v9557_v34  ;;  %v9535_v34 = vld [vmem:[%s12848_s0 + $0xf38] ss:$72 sps:$4 sm:$0xff]  }
 0x180   :  { %5497 = vmatprep.subr.bf16.mxu1 %v10101_v0 }
 0x181   :  { %5016 = vmatmul.mubr.bf16.gmra.mrb[32].mxu1 %v9401_v3  ;;  %v9491_v3 = vld [vmem:[%s12848_s0 + $0x304] ss:$72 sps:$4 sm:$0xff]  }
 0x182   :  { %6300 = vmatmul.mubr.bf16.gmra.mrb[96].mxu0 %v9402_v4  ;;  %5023 = vmatprep.mubr.bf16.mxu1 %v9405_v5  ;;  %v9572_v4 = vld [vmem:[%s12847_s1 + $0x3c0] sm:$0xff]   ;;  %v9586_v5 = vld [vmem:[%s12847_s1 + $0x3c8] sm:$0xff]  }
 0x183   :  { %6307 = vmatprep.mubr.bf16.mxu0 %v9407_v6  ;;  %v9493_v6 = vld [vmem:[%s12848_s0 + $0xbd8] ss:$72 sps:$4 sm:$0xff]  }
 0x189   :  { %5024 = vmatmul.mubr.bf16.gmra.mrb[36].mxu1 %v9409_v8  ;;  %v9495_v8 = vld [vmem:[%s12848_s0 + $0xc6c] ss:$72 sps:$4 sm:$0xff]  }
 0x18a   :  { %6308 = vmatmul.mubr.bf16.gmra.mrb[100].mxu0 %v9410_v9  ;;  %5031 = vmatprep.mubr.bf16.mxu1 %v9411_v10  ;;  %v9497_v9 = vld [vmem:[%s12848_s0 + $0x394] ss:$72 sps:$4 sm:$0xff]  }
 0x18b   :  { %6315 = vmatprep.mubr.bf16.mxu0 %v9413_v11  ;;  %v9600_v10 = vld [vmem:[%s12847_s1 + $0x3d0] sm:$0xff]  }
 0x18c   :  { %v9499_v11 = vld [vmem:[%s12848_s0 + $0xc68] ss:$72 sps:$4 sm:$0xff]  }
 0x191   :  { %5032 = vmatmul.mubr.bf16.gmra.mrb[40].mxu1 %v9415_v12  ;;  %v9500_v12 = vld [vmem:[%s12848_s0 + $0x390] ss:$72 sps:$4 sm:$0xff]  }
 0x192   :  { %6316 = vmatmul.mubr.bf16.gmra.mrb[104].mxu0 %v9416_v13  ;;  %5039 = vmatprep.mubr.bf16.mxu1 %v9419_v14  ;;  %v9503_v13 = vld [vmem:[%s12848_s0 + $0xcfc] ss:$72 sps:$4 sm:$0xff]  }
 0x193   :  { %6323 = vmatprep.mubr.bf16.mxu0 %v9421_v15  ;;  %v9505_v14 = vld [vmem:[%s12848_s0 + $0x424] ss:$72 sps:$4 sm:$0xff]   ;;  %v9614_v15 = vld [vmem:[%s12847_s1 + $0x3d8] sm:$0xff]  }
 0x199   :  { %5040 = vmatmul.mubr.bf16.gmra.mrb[44].mxu1 %v9423_v17  ;;  %v9508_v17 = vld [vmem:[%s12848_s0 + $0x420] ss:$72 sps:$4 sm:$0xff]  }
 0x19a   :  { %6324 = vmatmul.mubr.bf16.gmra.mrb[108].mxu0 %v9424_v18  ;;  %5047 = vmatprep.mubr.bf16.mxu1 %v9425_v19  ;;  %v9509_v18 = vld [vmem:[%s12848_s0 + $0xd8c] ss:$72 sps:$4 sm:$0xff]  }
 0x19b   :  { %6331 = vmatprep.mubr.bf16.mxu0 %v9427_v20  ;;  %v9511_v19 = vld [vmem:[%s12848_s0 + $0x4b4] ss:$72 sps:$4 sm:$0xff]   ;;  %v9513_v20 = vld [vmem:[%s12848_s0 + $0xd88] ss:$72 sps:$4 sm:$0xff]  }
 0x1a1   :  { %5048 = vmatmul.mubr.bf16.gmra.mrb[48].mxu1 %v9429_v21  ;;  %v9514_v21 = vld [vmem:[%s12848_s0 + $0x4b0] ss:$72 sps:$4 sm:$0xff]  }
 0x1a2   :  { %6332 = vmatmul.mubr.bf16.gmra.mrb[112].mxu0 %v9430_v22  ;;  %5055 = vmatprep.mubr.bf16.mxu1 %v9433_v23  ;;  %v9517_v22 = vld [vmem:[%s12848_s0 + $0xe1c] ss:$72 sps:$4 sm:$0xff]  }
 0x1a3   :  { %6339 = vmatprep.mubr.bf16.mxu0 %v9435_v24  ;;  %v9519_v23 = vld [vmem:[%s12848_s0 + $0x544] ss:$72 sps:$4 sm:$0xff]  }
 0x1a4   :  { %v9628_v24 = vld [vmem:[%s12847_s1 + $0x3e0] sm:$0xff]  }
 0x1a9   :  { %5056 = vmatmul.mubr.bf16.gmra.mrb[52].mxu1 %v9437_v26  ;;  %v9522_v26 = vld [vmem:[%s12848_s0 + $0x540] ss:$72 sps:$4 sm:$0xff]  }
 0x1aa   :  { %6340 = vmatmul.mubr.bf16.gmra.mrb[116].mxu0 %v9438_v27  ;;  %5063 = vmatprep.mubr.bf16.mxu1 %v9439_v28  ;;  %v9523_v27 = vld [vmem:[%s12848_s0 + $0xeac] ss:$72 sps:$4 sm:$0xff]  }
 0x1ab   :  { %6347 = vmatprep.mubr.bf16.mxu0 %v9441_v29  ;;  %v9525_v28 = vld [vmem:[%s12848_s0 + $0x5d4] ss:$72 sps:$4 sm:$0xff]   ;;  %v9527_v29 = vld [vmem:[%s12848_s0 + $0xea8] ss:$72 sps:$4 sm:$0xff]  }
 0x1b1   :  { %5064 = vmatmul.mubr.bf16.gmra.mrb[56].mxu1 %v9443_v30  ;;  %v9528_v30 = vld [vmem:[%s12848_s0 + $0x5d0] ss:$72 sps:$4 sm:$0xff]  }
 0x1b2   :  { %6348 = vmatmul.mubr.bf16.gmra.mrb[120].mxu0 %v9444_v31  ;;  %5071 = vmatprep.mubr.bf16.mxu1 %v9447_v32  ;;  %v9531_v31 = vld [vmem:[%s12848_s0 + $0xf3c] ss:$72 sps:$4 sm:$0xff]  }
 0x1b3   :  { %6355 = vmatprep.mubr.bf16.mxu0 %v9449_v33  ;;  %v9533_v32 = vld [vmem:[%s12848_s0 + $0x664] ss:$72 sps:$4 sm:$0xff]  }
 0x1b4   :  { %v9642_v33 = vld [vmem:[%s12847_s1 + $0x3e8] sm:$0xff]  }
 0x1b9   :  { %5072 = vmatmul.mubr.bf16.gmra.mrb[60].mxu1 %v9451_v35  ;;  %v9536_v35 = vld [vmem:[%s12848_s0 + $0x660] ss:$72 sps:$4 sm:$0xff]  }
 0x1ba   :  { %6356 = vmatmul.mubr.bf16.gmra.mrb[124].mxu0 %v9452_v36  ;;  %5079 = vmatprep.mubr.bf16.mxu1 %v9453_v37  ;;  %v9537_v36 = vld [vmem:[%s12848_s0 + $0xfcc] ss:$72 sps:$4 sm:$0xff]  }
 0x1bb   :  { %6396 = vmatprep.mubr.bf16.mxu0 %v9457_v38  ;;  %v9539_v37 = vld [vmem:[%s12848_s0 + $0x6f4] ss:$72 sps:$4 sm:$0xff]   ;;  %v9541_v38 = vld [vmem:[%s12848_s0 + $0xfc8] ss:$72 sps:$4 sm:$0xff]  }
 0x1c1   :  { %5080 = vmatmul.mubr.bf16.gmra.mrb[64].mxu1 %v9458_v39  ;;  %v9542_v39 = vld [vmem:[%s12848_s0 + $0x6f0] ss:$72 sps:$4 sm:$0xff]  }
 0x1c2   :  { %6397 = vmatmul.mubr.bf16.vlgmr.msra.gmra.mrb[0].mxu0 %v9455_v40  ;;  %5087 = vmatprep.mubr.bf16.mxu1 %v9461_v41  ;;  %v9545_v40 = vld [vmem:[%s12848_s0 + $0x105c] ss:$72 sps:$4 sm:$0xff]  }
 0x1c3   :  { %6654 = vmatpush1.bf16.msra.mxu0 %v9460_v42  ;;  %6404 = vmatprep.mubr.bf16.mxu0 %v9463_v43  ;;  %v9547_v41 = vld [vmem:[%s12848_s0 + $0x784] ss:$72 sps:$4 sm:$0xff]   ;;  %v9656_v42 = vld [vmem:[%s12847_s1 + $0x3f0] sm:$0xff]   ;;  %v9549_v43 = vld [vmem:[%s12848_s0 + $0x1058] ss:$72 sps:$4 sm:$0xff]  }
 0x1c4   :  { %6655 = vmatprep.subr.bf16.mxu0 %v10101_v0 }
 0x1c7   :  { %6656 = vmatpush1.bf16.msra.mxu0 %v9474_v44  ;;  %v9550_v44 = vld [vmem:[%s12848_s0 + $0x780] ss:$72 sps:$4 sm:$0xff]  }
 0x1c8   :  { %6657 = vmatprep.subr.bf16.mxu0 %v10101_v0 }
 0x1c9   :  { %5088 = vmatmul.mubr.bf16.gmra.mrb[68].mxu1 %v9465_v45  ;;  %v9551_v45 = vld [vmem:[%s12848_s0 + $0x10ec] ss:$72 sps:$4 sm:$0xff]  }
 0x1ca   :  { %6405 = vmatmul.mubr.bf16.gmra.mrb[4].mxu0 %v9466_v46  ;;  %5095 = vmatprep.mubr.bf16.mxu1 %v9467_v47  ;;  %v9553_v46 = vld [vmem:[%s12848_s0 + $0x814] ss:$72 sps:$4 sm:$0xff]   ;;  %v9555_v47 = vld [vmem:[%s12848_s0 + $0x10e8] ss:$72 sps:$4 sm:$0xff]  }
 0x1cb   :  { %6412 = vmatprep.mubr.bf16.mxu0 %v9469_v48  ;;  %6658 = vmatpush1.bf16.msra.mxu0 %v9488_v49  ;;  %v9556_v48 = vld [vmem:[%s12848_s0 + $0x810] ss:$72 sps:$4 sm:$0xff]   ;;  %v9559_v49 = vld [vmem:[%s12848_s0 + $0x117c] ss:$72 sps:$4 sm:$0xff]  }
 0x1cc   :  { %6659 = vmatprep.subr.bf16.mxu0 %v10101_v0 }
 0x1cf   :  { %6660 = vmatpush1.bf16.msra.mxu0 %v9502_v50  ;;  %v9561_v50 = vld [vmem:[%s12848_s0 + $0x8a4] ss:$72 sps:$4 sm:$0xff]  }
 0x1d0   :  { %6661 = vmatprep.subr.bf16.mxu0 %v10101_v0 }
 0x1d1   :  { %5096 = vmatmul.mubr.bf16.gmra.mrb[72].mxu1 %v9471_v51  ;;  %v9670_v51 = vld [vmem:[%s12847_s1 + $0x3f8] sm:$0xff]  }
 0x1d2   :  { %6413 = vmatmul.mubr.bf16.gmra.mrb[8].mxu0 %v9472_v52  ;;  %5103 = vmatprep.mubr.bf16.mxu1 %v9475_v53  ;;  %v9563_v52 = vld [vmem:[%s12848_s0 + $0x1178] ss:$72 sps:$4 sm:$0xff]  }
 0x1d3   :  { %6420 = vmatprep.mubr.bf16.mxu0 %v9477_v54  ;;  %6662 = vmatpush1.bf16.msra.mxu0 %v9516_v55  ;;  %v9564_v53 = vld [vmem:[%s12848_s0 + $0x8a0] ss:$72 sps:$4 sm:$0xff]   ;;  %v9567_v54 = vld [vmem:[%s12848_s0 + $0x14] ss:$72 sps:$4 sm:$0xff]  }
 0x1d4   :  { %6663 = vmatprep.subr.bf16.mxu0 %v10101_v0  ;;  %v9568_v55 = vld [vmem:[%s12848_s0 + $0x934] ss:$72 sps:$4 sm:$0xff]  }
 0x1d7   :  { %6664 = vmatpush1.bf16.msra.mxu0 %v9530_v56  ;;  %v9565_v56 = vld [vmem:[%s12848_s0 + $0x10] ss:$72 sps:$4 sm:$0xff]  }
 0x1d8   :  { %6665 = vmatprep.subr.bf16.mxu0 %v10101_v0 }
 0x1d9   :  { %5104 = vmatmul.mubr.bf16.gmra.mrb[76].mxu1 %v9479_v57  ;;  %v9570_v57 = vld [vmem:[%s12848_s0 + $0x930] ss:$72 sps:$4 sm:$0xff]  }
 0x1da   :  { %6421 = vmatmul.mubr.bf16.gmra.mrb[12].mxu0 %v9480_v58  ;;  %5111 = vmatprep.mubr.bf16.mxu1 %v9481_v59  ;;  %v9571_v58 = vld [vmem:[%s12847_s1 + $0x180] sm:$0xff]  }
 0x1db   :  { %6428 = vmatprep.mubr.bf16.mxu0 %v9483_v60  ;;  %6666 = vmatpush1.bf16.msra.mxu0 %v9544_v61  ;;  %v9573_v59 = vld [vmem:[%s12848_s0 + $0xa4] ss:$72 sps:$4 sm:$0xff]  }
 0x1dc   :  { %6667 = vmatprep.subr.bf16.mxu0 %v10101_v0  ;;  %v9575_v60 = vld [vmem:[%s12848_s0 + $0x9c4] ss:$72 sps:$4 sm:$0xff]  }
 0x1dd   :  { %v9585_v61 = vld [vmem:[%s12847_s1 + $0x188] sm:$0xff]  }
 0x1df   :  { %6668 = vmatpush1.bf16.msra.mxu0 %v9558_v62  ;;  %v9577_v62 = vld [vmem:[%s12848_s0 + $0xa0] ss:$72 sps:$4 sm:$0xff]  }
 0x1e0   :  { %6669 = vmatprep.subr.bf16.mxu0 %v10101_v0 }
 0x1e1   :  { %5112 = vmatmul.mubr.bf16.gmra.mrb[80].mxu1 %v9485_v63  ;;  %v9578_v63 = vld [vmem:[%s12848_s0 + $0x9c0] ss:$72 sps:$4 sm:$0xff]  }
 0x1e2   :  { %6429 = vmatmul.mubr.bf16.gmra.mrb[16].mxu0 %v9486_v1  ;;  %5119 = vmatprep.mubr.bf16.mxu1 %v9489_v2  ;;  %v9579_v1 = vld [vmem:[%s12848_s0 + $0x134] ss:$72 sps:$4 sm:$0xff]  }
 0x1e3   :  { %6436 = vmatprep.mubr.bf16.mxu0 %v9491_v3  ;;  %6670 = vmatpush1.bf16.msra.mxu0 %v9572_v4  ;;  %v9581_v2 = vld [vmem:[%s12848_s0 + $0xa54] ss:$72 sps:$4 sm:$0xff]  }
 0x1e4   :  { %6671 = vmatprep.subr.bf16.mxu0 %v10101_v0  ;;  %v9599_v3 = vld [vmem:[%s12847_s1 + $0x190] sm:$0xff]   ;;  %v9613_v4 = vld [vmem:[%s12847_s1 + $0x198] sm:$0xff]  }
 0x1e7   :  { %6672 = vmatpush1.bf16.msra.mxu0 %v9586_v5  ;;  %v9583_v5 = vld [vmem:[%s12848_s0 + $0x130] ss:$72 sps:$4 sm:$0xff]  }
 0x1e8   :  { %6673 = vmatprep.subr.bf16.mxu0 %v10101_v0 }
 0x1e9   :  { %5120 = vmatmul.mubr.bf16.gmra.mrb[84].mxu1 %v9493_v6  ;;  %v9584_v6 = vld [vmem:[%s12848_s0 + $0xa50] ss:$72 sps:$4 sm:$0xff]  }
 0x1ea   :  { %6437 = vmatmul.mubr.bf16.gmra.mrb[20].mxu0 %v9494_v7  ;;  %5127 = vmatprep.mubr.bf16.mxu1 %v9495_v8  ;;  %v9587_v7 = vld [vmem:[%s12848_s0 + $0x1c4] ss:$72 sps:$4 sm:$0xff]  }
 0x1eb   :  { %6444 = vmatprep.mubr.bf16.mxu0 %v9497_v9  ;;  %6674 = vmatpush1.bf16.msra.mxu0 %v9600_v10  ;;  %v9589_v8 = vld [vmem:[%s12848_s0 + $0xae4] ss:$72 sps:$4 sm:$0xff]  }
 0x1ec   :  { %6675 = vmatprep.subr.bf16.mxu0 %v10101_v0  ;;  %v9627_v9 = vld [vmem:[%s12847_s1 + $0x1a0] sm:$0xff]   ;;  %v9641_v10 = vld [vmem:[%s12847_s1 + $0x1a8] sm:$0xff]  }
 0x1ef   :  { %6676 = vmatpush1.bf16.msra.mxu0 %v9614_v15  ;;  %v9655_v15 = vld [vmem:[%s12847_s1 + $0x1b0] sm:$0xff]  }
 0x1f0   :  { %6677 = vmatprep.subr.bf16.mxu0 %v10101_v0 }
 0x1f1   :  { %5128 = vmatmul.mubr.bf16.gmra.mrb[88].mxu1 %v9499_v11  ;;  %v9591_v11 = vld [vmem:[%s12848_s0 + $0x1c0] ss:$72 sps:$4 sm:$0xff]  }
 0x1f2   :  { %6445 = vmatmul.mubr.bf16.gmra.mrb[24].mxu0 %v9500_v12  ;;  %5135 = vmatprep.mubr.bf16.mxu1 %v9503_v13  ;;  %v9592_v12 = vld [vmem:[%s12848_s0 + $0xae0] ss:$72 sps:$4 sm:$0xff]   ;;  %v9593_v13 = vld [vmem:[%s12848_s0 + $0x254] ss:$72 sps:$4 sm:$0xff]  }
 0x1f3   :  { %6452 = vmatprep.mubr.bf16.mxu0 %v9505_v14  ;;  %6678 = vmatpush1.bf16.msra.mxu0 %v9628_v24  ;;  %v9595_v14 = vld [vmem:[%s12848_s0 + $0xb74] ss:$72 sps:$4 sm:$0xff]   ;;  %v9606_v24 = vld [vmem:[%s12848_s0 + $0xc00] ss:$72 sps:$4 sm:$0xff]  }
 0x1f4   :  { %6679 = vmatprep.subr.bf16.mxu0 %v10101_v0 }
 0x1f7   :  { %6680 = vmatpush1.bf16.msra.mxu0 %v9642_v33  ;;  %v9619_v33 = vld [vmem:[%s12848_s0 + $0x400] ss:$72 sps:$4 sm:$0xff]  }
 0x1f8   :  { %6681 = vmatprep.subr.bf16.mxu0 %v10101_v0 }
 0x1f9   :  { %5136 = vmatmul.mubr.bf16.gmra.mrb[92].mxu1 %v9507_v16  ;;  %v9669_v16 = vld [vmem:[%s12847_s1 + $0x1b8] sm:$0xff]  }
 0x1fa   :  { %6453 = vmatmul.mubr.bf16.gmra.mrb[28].mxu0 %v9508_v17  ;;  %5143 = vmatprep.mubr.bf16.mxu1 %v9509_v18  ;;  %v9597_v17 = vld [vmem:[%s12848_s0 + $0x250] ss:$72 sps:$4 sm:$0xff]  }
 0x1fb   :  { %6460 = vmatprep.mubr.bf16.mxu0 %v9511_v19  ;;  %6682 = vmatpush1.bf16.msra.mxu0 %v9656_v42  ;;  %v9598_v18 = vld [vmem:[%s12848_s0 + $0xb70] ss:$72 sps:$4 sm:$0xff]   ;;  %v9601_v19 = vld [vmem:[%s12848_s0 + $0x2e4] ss:$72 sps:$4 sm:$0xff]   ;;  %v9633_v42 = vld [vmem:[%s12848_s0 + $0x520] ss:$72 sps:$4 sm:$0xff]  }
 0x1fc   :  { %6683 = vmatprep.subr.bf16.mxu0 %v10101_v0 }
 0x1ff   :  { %6684 = vmatpush1.bf16.msra.mxu0 %v9670_v51  ;;  %v9647_v51 = vld [vmem:[%s12848_s0 + $0x640] ss:$72 sps:$4 sm:$0xff]  }
 0x200   :  { %6942 = vmatprep.subr.bf16.mxu0 %v10101_v0 }
 0x201   :  { %5144 = vmatmul.mubr.bf16.gmra.mrb[96].mxu1 %v9513_v20  ;;  %v9603_v20 = vld [vmem:[%s12848_s0 + $0xc04] ss:$72 sps:$4 sm:$0xff]  }
 0x202   :  { %6461 = vmatmul.mubr.bf16.gmra.mrb[32].mxu0 %v9514_v21  ;;  %5151 = vmatprep.mubr.bf16.mxu1 %v9517_v22  ;;  %v9683_v21 = vld [vmem:[%s12847_s1 + $0x1c0] sm:$0xff]   ;;  %v9697_v22 = vld [vmem:[%s12847_s1 + $0x1c8] sm:$0xff]  }
 0x203   :  { %6468 = vmatprep.mubr.bf16.mxu0 %v9519_v23  ;;  %v9605_v23 = vld [vmem:[%s12848_s0 + $0x2e0] ss:$72 sps:$4 sm:$0xff]  }
 0x209   :  { %5152 = vmatmul.mubr.bf16.gmra.mrb[100].mxu1 %v9521_v25  ;;  %v9607_v25 = vld [vmem:[%s12848_s0 + $0x374] ss:$72 sps:$4 sm:$0xff]  }
 0x20a   :  { %6469 = vmatmul.mubr.bf16.gmra.mrb[36].mxu0 %v9522_v26  ;;  %5159 = vmatprep.mubr.bf16.mxu1 %v9523_v27  ;;  %v9609_v26 = vld [vmem:[%s12848_s0 + $0xc94] ss:$72 sps:$4 sm:$0xff]  }
 0x20b   :  { %6476 = vmatprep.mubr.bf16.mxu0 %v9525_v28  ;;  %v9711_v27 = vld [vmem:[%s12847_s1 + $0x1d0] sm:$0xff]  }
 0x20c   :  { %v9611_v28 = vld [vmem:[%s12848_s0 + $0x370] ss:$72 sps:$4 sm:$0xff]  }
 0x211   :  { %5160 = vmatmul.mubr.bf16.gmra.mrb[104].mxu1 %v9527_v29  ;;  %v9612_v29 = vld [vmem:[%s12848_s0 + $0xc90] ss:$72 sps:$4 sm:$0xff]  }
 0x212   :  { %6477 = vmatmul.mubr.bf16.gmra.mrb[40].mxu0 %v9528_v30  ;;  %5167 = vmatprep.mubr.bf16.mxu1 %v9531_v31  ;;  %v9615_v30 = vld [vmem:[%s12848_s0 + $0x404] ss:$72 sps:$4 sm:$0xff]  }
 0x213   :  { %6484 = vmatprep.mubr.bf16.mxu0 %v9533_v32  ;;  %v9617_v31 = vld [vmem:[%s12848_s0 + $0xd24] ss:$72 sps:$4 sm:$0xff]   ;;  %v9725_v32 = vld [vmem:[%s12847_s1 + $0x1d8] sm:$0xff]  }
 0x219   :  { %5168 = vmatmul.mubr.bf16.gmra.mrb[108].mxu1 %v9535_v34  ;;  %v9620_v34 = vld [vmem:[%s12848_s0 + $0xd20] ss:$72 sps:$4 sm:$0xff]  }
 0x21a   :  { %6485 = vmatmul.mubr.bf16.gmra.mrb[44].mxu0 %v9536_v35  ;;  %5175 = vmatprep.mubr.bf16.mxu1 %v9537_v36  ;;  %v9621_v35 = vld [vmem:[%s12848_s0 + $0x494] ss:$72 sps:$4 sm:$0xff]  }
 0x21b   :  { %6492 = vmatprep.mubr.bf16.mxu0 %v9539_v37  ;;  %v9623_v36 = vld [vmem:[%s12848_s0 + $0xdb4] ss:$72 sps:$4 sm:$0xff]   ;;  %v9625_v37 = vld [vmem:[%s12848_s0 + $0x490] ss:$72 sps:$4 sm:$0xff]  }
 0x221   :  { %5176 = vmatmul.mubr.bf16.gmra.mrb[112].mxu1 %v9541_v38  ;;  %v9626_v38 = vld [vmem:[%s12848_s0 + $0xdb0] ss:$72 sps:$4 sm:$0xff]  }
 0x222   :  { %6493 = vmatmul.mubr.bf16.gmra.mrb[48].mxu0 %v9542_v39  ;;  %5183 = vmatprep.mubr.bf16.mxu1 %v9545_v40  ;;  %v9629_v39 = vld [vmem:[%s12848_s0 + $0x524] ss:$72 sps:$4 sm:$0xff]  }
 0x223   :  { %6500 = vmatprep.mubr.bf16.mxu0 %v9547_v41  ;;  %v9631_v40 = vld [vmem:[%s12848_s0 + $0xe44] ss:$72 sps:$4 sm:$0xff]  }
 0x224   :  { %v9739_v41 = vld [vmem:[%s12847_s1 + $0x1e0] sm:$0xff]  }
 0x229   :  { %5184 = vmatmul.mubr.bf16.gmra.mrb[116].mxu1 %v9549_v43  ;;  %v9634_v43 = vld [vmem:[%s12848_s0 + $0xe40] ss:$72 sps:$4 sm:$0xff]  }
 0x22a   :  { %6501 = vmatmul.mubr.bf16.gmra.mrb[52].mxu0 %v9550_v44  ;;  %5191 = vmatprep.mubr.bf16.mxu1 %v9551_v45  ;;  %v9635_v44 = vld [vmem:[%s12848_s0 + $0x5b4] ss:$72 sps:$4 sm:$0xff]  }
 0x22b   :  { %6508 = vmatprep.mubr.bf16.mxu0 %v9553_v46  ;;  %v9637_v45 = vld [vmem:[%s12848_s0 + $0xed4] ss:$72 sps:$4 sm:$0xff]   ;;  %v9639_v46 = vld [vmem:[%s12848_s0 + $0x5b0] ss:$72 sps:$4 sm:$0xff]  }
 0x231   :  { %5192 = vmatmul.mubr.bf16.gmra.mrb[120].mxu1 %v9555_v47  ;;  %v9640_v47 = vld [vmem:[%s12848_s0 + $0xed0] ss:$72 sps:$4 sm:$0xff]  }
 0x232   :  { %6509 = vmatmul.mubr.bf16.gmra.mrb[56].mxu0 %v9556_v48  ;;  %5199 = vmatprep.mubr.bf16.mxu1 %v9559_v49  ;;  %v9643_v48 = vld [vmem:[%s12848_s0 + $0x644] ss:$72 sps:$4 sm:$0xff]  }
 0x233   :  { %6516 = vmatprep.mubr.bf16.mxu0 %v9561_v50  ;;  %v9645_v49 = vld [vmem:[%s12848_s0 + $0xf64] ss:$72 sps:$4 sm:$0xff]  }
 0x234   :  { %v9753_v50 = vld [vmem:[%s12847_s1 + $0x1e8] sm:$0xff]  }
 0x239   :  { %5200 = vmatmul.mubr.bf16.gmra.mrb[124].mxu1 %v9563_v52  ;;  %v9648_v52 = vld [vmem:[%s12848_s0 + $0xf60] ss:$72 sps:$4 sm:$0xff]  }
 0x23a   :  { %6517 = vmatmul.mubr.bf16.gmra.mrb[60].mxu0 %v9564_v53  ;;  %5240 = vmatprep.mubr.bf16.mxu1 %v9567_v54  ;;  %v9649_v53 = vld [vmem:[%s12848_s0 + $0x6d4] ss:$72 sps:$4 sm:$0xff]  }
 0x23b   :  { %6524 = vmatprep.mubr.bf16.mxu0 %v9568_v55  ;;  %v9651_v54 = vld [vmem:[%s12848_s0 + $0xff4] ss:$72 sps:$4 sm:$0xff]   ;;  %v9653_v55 = vld [vmem:[%s12848_s0 + $0x6d0] ss:$72 sps:$4 sm:$0xff]  }
 0x241   :  { %5241 = vmatmul.mubr.bf16.vlgmr.msra.gmra.mrb[0].mxu1 %v9565_v56  ;;  %v9654_v56 = vld [vmem:[%s12848_s0 + $0xff0] ss:$72 sps:$4 sm:$0xff]  }
 0x242   :  { %6525 = vmatmul.mubr.bf16.gmra.mrb[64].mxu0 %v9570_v57  ;;  %5498 = vmatpush1.bf16.msra.mxu1 %v9571_v58  ;;  %v9657_v57 = vld [vmem:[%s12848_s0 + $0x764] ss:$72 sps:$4 sm:$0xff]  }
 0x243   :  { %5248 = vmatprep.mubr.bf16.mxu1 %v9573_v59  ;;  %6532 = vmatprep.mubr.bf16.mxu0 %v9575_v60  ;;  %v9659_v58 = vld [vmem:[%s12848_s0 + $0x1084] ss:$72 sps:$4 sm:$0xff]   ;;  %v9767_v59 = vld [vmem:[%s12847_s1 + $0x1f0] sm:$0xff]   ;;  %v9661_v60 = vld [vmem:[%s12848_s0 + $0x760] ss:$72 sps:$4 sm:$0xff]  }
 0x244   :  { %5499 = vmatprep.subr.bf16.mxu1 %v10101_v0 }
 0x246   :  { %5500 = vmatpush1.bf16.msra.mxu1 %v9585_v61  ;;  %v9662_v61 = vld [vmem:[%s12848_s0 + $0x1080] ss:$72 sps:$4 sm:$0xff]  }
 0x247   :  { %5501 = vmatprep.subr.bf16.mxu1 %v10101_v0 }
 0x249   :  { %5249 = vmatmul.mubr.bf16.gmra.mrb[4].mxu1 %v9577_v62  ;;  %v9663_v62 = vld [vmem:[%s12848_s0 + $0x7f4] ss:$72 sps:$4 sm:$0xff]  }
 0x24a   :  { %6533 = vmatmul.mubr.bf16.gmra.mrb[68].mxu0 %v9578_v63  ;;  %5256 = vmatprep.mubr.bf16.mxu1 %v9579_v1  ;;  %v9665_v63 = vld [vmem:[%s12848_s0 + $0x1114] ss:$72 sps:$4 sm:$0xff]   ;;  %v9667_v1 = vld [vmem:[%s12848_s0 + $0x7f0] ss:$72 sps:$4 sm:$0xff]  }
 0x24b   :  { %6540 = vmatprep.mubr.bf16.mxu0 %v9581_v2  ;;  %5502 = vmatpush1.bf16.msra.mxu1 %v9599_v3  ;;  %v9668_v2 = vld [vmem:[%s12848_s0 + $0x1110] ss:$72 sps:$4 sm:$0xff]   ;;  %v9671_v3 = vld [vmem:[%s12848_s0 + $0x884] ss:$72 sps:$4 sm:$0xff]  }
 0x24c   :  { %5503 = vmatprep.subr.bf16.mxu1 %v10101_v0 }
 0x24f   :  { %5504 = vmatpush1.bf16.msra.mxu1 %v9613_v4  ;;  %v9673_v4 = vld [vmem:[%s12848_s0 + $0x11a4] ss:$72 sps:$4 sm:$0xff]  }
 0x250   :  { %5505 = vmatprep.subr.bf16.mxu1 %v10101_v0 }
 0x251   :  { %5257 = vmatmul.mubr.bf16.gmra.mrb[8].mxu1 %v9583_v5  ;;  %v9781_v5 = vld [vmem:[%s12847_s1 + $0x1f8] sm:$0xff]  }
 0x252   :  { %6541 = vmatmul.mubr.bf16.gmra.mrb[72].mxu0 %v9584_v6  ;;  %5264 = vmatprep.mubr.bf16.mxu1 %v9587_v7  ;;  %v9675_v6 = vld [vmem:[%s12848_s0 + $0x880] ss:$72 sps:$4 sm:$0xff]  }
 0x253   :  { %6548 = vmatprep.mubr.bf16.mxu0 %v9589_v8  ;;  %5506 = vmatpush1.bf16.msra.mxu1 %v9627_v9  ;;  %v9676_v7 = vld [vmem:[%s12848_s0 + $0x11a0] ss:$72 sps:$4 sm:$0xff]   ;;  %v9677_v8 = vld [vmem:[%s12848_s0 + $0x914] ss:$72 sps:$4 sm:$0xff]  }
 0x254   :  { %5507 = vmatprep.subr.bf16.mxu1 %v10101_v0  ;;  %v9681_v9 = vld [vmem:[%s12848_s0 + $0x3c] ss:$72 sps:$4 sm:$0xff]  }
 0x257   :  { %5508 = vmatpush1.bf16.msra.mxu1 %v9641_v10  ;;  %v9682_v10 = vld [vmem:[%s12848_s0 + $0x910] ss:$72 sps:$4 sm:$0xff]  }
 0x258   :  { %5509 = vmatprep.subr.bf16.mxu1 %v10101_v0 }
 0x259   :  { %5265 = vmatmul.mubr.bf16.gmra.mrb[12].mxu1 %v9591_v11  ;;  %v9679_v11 = vld [vmem:[%s12848_s0 + $0x38] ss:$72 sps:$4 sm:$0xff]  }
 0x25a   :  { %6549 = vmatmul.mubr.bf16.gmra.mrb[76].mxu0 %v9592_v12  ;;  %5272 = vmatprep.mubr.bf16.mxu1 %v9593_v13  ;;  %v9685_v12 = vld [vmem:[%s12848_s0 + $0x9a4] ss:$72 sps:$4 sm:$0xff]  }
 0x25b   :  { %6556 = vmatprep.mubr.bf16.mxu0 %v9595_v14  ;;  %5510 = vmatpush1.bf16.msra.mxu1 %v9655_v15  ;;  %v9684_v13 = vld [vmem:[%s12847_s1 + $0x400] sm:$0xff]   ;;  %v9687_v14 = vld [vmem:[%s12848_s0 + $0xcc] ss:$72 sps:$4 sm:$0xff]  }
 0x25c   :  { %5511 = vmatprep.subr.bf16.mxu1 %v10101_v0  ;;  %v9698_v15 = vld [vmem:[%s12847_s1 + $0x408] sm:$0xff]  }
 0x25f   :  { %5512 = vmatpush1.bf16.msra.mxu1 %v9669_v16  ;;  %v9689_v16 = vld [vmem:[%s12848_s0 + $0x9a0] ss:$72 sps:$4 sm:$0xff]  }
 0x260   :  { %5513 = vmatprep.subr.bf16.mxu1 %v10101_v0 }
 0x261   :  { %5273 = vmatmul.mubr.bf16.gmra.mrb[16].mxu1 %v9597_v17  ;;  %v9690_v17 = vld [vmem:[%s12848_s0 + $0xc8] ss:$72 sps:$4 sm:$0xff]  }
 0x262   :  { %6557 = vmatmul.mubr.bf16.gmra.mrb[80].mxu0 %v9598_v18  ;;  %5280 = vmatprep.mubr.bf16.mxu1 %v9601_v19  ;;  %v9691_v18 = vld [vmem:[%s12848_s0 + $0xa34] ss:$72 sps:$4 sm:$0xff]  }
 0x263   :  { %6564 = vmatprep.mubr.bf16.mxu0 %v9603_v20  ;;  %5514 = vmatpush1.bf16.msra.mxu1 %v9683_v21  ;;  %v9693_v19 = vld [vmem:[%s12848_s0 + $0x15c] ss:$72 sps:$4 sm:$0xff]   ;;  %v9712_v20 = vld [vmem:[%s12847_s1 + $0x410] sm:$0xff]  }
 0x264   :  { %5515 = vmatprep.subr.bf16.mxu1 %v10101_v0  ;;  %v9726_v21 = vld [vmem:[%s12847_s1 + $0x418] sm:$0xff]  }
 0x267   :  { %5516 = vmatpush1.bf16.msra.mxu1 %v9697_v22  ;;  %v9695_v22 = vld [vmem:[%s12848_s0 + $0xa30] ss:$72 sps:$4 sm:$0xff]  }
 0x268   :  { %5517 = vmatprep.subr.bf16.mxu1 %v10101_v0 }
 0x269   :  { %5281 = vmatmul.mubr.bf16.gmra.mrb[20].mxu1 %v9605_v23  ;;  %v9696_v23 = vld [vmem:[%s12848_s0 + $0x158] ss:$72 sps:$4 sm:$0xff]  }
 0x26a   :  { %6565 = vmatmul.mubr.bf16.gmra.mrb[84].mxu0 %v9606_v24  ;;  %5288 = vmatprep.mubr.bf16.mxu1 %v9607_v25  ;;  %v9699_v24 = vld [vmem:[%s12848_s0 + $0xac4] ss:$72 sps:$4 sm:$0xff]  }
 0x26b   :  { %6572 = vmatprep.mubr.bf16.mxu0 %v9609_v26  ;;  %5518 = vmatpush1.bf16.msra.mxu1 %v9711_v27  ;;  %v9701_v25 = vld [vmem:[%s12848_s0 + $0x1ec] ss:$72 sps:$4 sm:$0xff]   ;;  %v9740_v26 = vld [vmem:[%s12847_s1 + $0x420] sm:$0xff]  }
 0x26c   :  { %5519 = vmatprep.subr.bf16.mxu1 %v10101_v0  ;;  %v9754_v27 = vld [vmem:[%s12847_s1 + $0x428] sm:$0xff]  }
 0x26f   :  { %5520 = vmatpush1.bf16.msra.mxu1 %v9725_v32  ;;  %v9768_v32 = vld [vmem:[%s12847_s1 + $0x430] sm:$0xff]  }
 0x270   :  { %5521 = vmatprep.subr.bf16.mxu1 %v10101_v0 }
 0x271   :  { %5289 = vmatmul.mubr.bf16.gmra.mrb[24].mxu1 %v9611_v28  ;;  %v9703_v28 = vld [vmem:[%s12848_s0 + $0xac0] ss:$72 sps:$4 sm:$0xff]  }
 0x272   :  { %6573 = vmatmul.mubr.bf16.gmra.mrb[88].mxu0 %v9612_v29  ;;  %5296 = vmatprep.mubr.bf16.mxu1 %v9615_v30  ;;  %v9704_v29 = vld [vmem:[%s12848_s0 + $0x1e8] ss:$72 sps:$4 sm:$0xff]   ;;  %v9705_v30 = vld [vmem:[%s12848_s0 + $0xb54] ss:$72 sps:$4 sm:$0xff]  }
 0x273   :  { %6580 = vmatprep.mubr.bf16.mxu0 %v9617_v31  ;;  %5522 = vmatpush1.bf16.msra.mxu1 %v9739_v41  ;;  %v9707_v31 = vld [vmem:[%s12848_s0 + $0x27c] ss:$72 sps:$4 sm:$0xff]   ;;  %v9718_v41 = vld [vmem:[%s12848_s0 + $0x308] ss:$72 sps:$4 sm:$0xff]  }
 0x274   :  { %5523 = vmatprep.subr.bf16.mxu1 %v10101_v0 }
 0x277   :  { %5524 = vmatpush1.bf16.msra.mxu1 %v9753_v50  ;;  %v9731_v50 = vld [vmem:[%s12848_s0 + $0xd00] ss:$72 sps:$4 sm:$0xff]  }
 0x278   :  { %5525 = vmatprep.subr.bf16.mxu1 %v10101_v0 }
 0x279   :  { %5297 = vmatmul.mubr.bf16.gmra.mrb[28].mxu1 %v9619_v33  ;;  %v9782_v33 = vld [vmem:[%s12847_s1 + $0x438] sm:$0xff]  }
 0x27a   :  { %6581 = vmatmul.mubr.bf16.gmra.mrb[92].mxu0 %v9620_v34  ;;  %5304 = vmatprep.mubr.bf16.mxu1 %v9621_v35  ;;  %v9709_v34 = vld [vmem:[%s12848_s0 + $0xb50] ss:$72 sps:$4 sm:$0xff]  }
 0x27b   :  { %6588 = vmatprep.mubr.bf16.mxu0 %v9623_v36  ;;  %5526 = vmatpush1.bf16.msra.mxu1 %v9767_v59  ;;  %v9710_v35 = vld [vmem:[%s12848_s0 + $0x278] ss:$72 sps:$4 sm:$0xff]   ;;  %v9713_v36 = vld [vmem:[%s12848_s0 + $0xbe4] ss:$72 sps:$4 sm:$0xff]  }
 0x27c   :  { %5527 = vmatprep.subr.bf16.mxu1 %v10101_v0  ;;  %v9745_v59 = vld [vmem:[%s12848_s0 + $0xe20] ss:$72 sps:$4 sm:$0xff]  }
 0x27f   :  { %5528 = vmatpush1.bf16.msra.mxu1 %v9781_v5  ;;  %v9759_v5 = vld [vmem:[%s12848_s0 + $0xf40] ss:$72 sps:$4 sm:$0xff]  }
 0x280   :  { %8020 = vmatprep.subr.bf16.mxu1 %v10101_v0 }
 0x281   :  { %5305 = vmatmul.mubr.bf16.gmra.mrb[32].mxu1 %v9625_v37  ;;  %v9715_v37 = vld [vmem:[%s12848_s0 + $0x30c] ss:$72 sps:$4 sm:$0xff]  }
 0x282   :  { %6589 = vmatmul.mubr.bf16.gmra.mrb[96].mxu0 %v9626_v38  ;;  %5312 = vmatprep.mubr.bf16.mxu1 %v9629_v39  ;;  %v9795_v38 = vld [vmem:[%s12847_s1 + $0x440] sm:$0xff]   ;;  %v9808_v39 = vld [vmem:[%s12847_s1 + $0x448] sm:$0xff]  }
 0x283   :  { %6596 = vmatprep.mubr.bf16.mxu0 %v9631_v40  ;;  %v9717_v40 = vld [vmem:[%s12848_s0 + $0xbe0] ss:$72 sps:$4 sm:$0xff]  }
 0x289   :  { %5313 = vmatmul.mubr.bf16.gmra.mrb[36].mxu1 %v9633_v42  ;;  %v9719_v42 = vld [vmem:[%s12848_s0 + $0xc74] ss:$72 sps:$4 sm:$0xff]  }
 0x28a   :  { %6597 = vmatmul.mubr.bf16.gmra.mrb[100].mxu0 %v9634_v43  ;;  %5320 = vmatprep.mubr.bf16.mxu1 %v9635_v44  ;;  %v9721_v43 = vld [vmem:[%s12848_s0 + $0x39c] ss:$72 sps:$4 sm:$0xff]   ;;  %v9821_v44 = vld [vmem:[%s12847_s1 + $0x450] sm:$0xff]  }
 0x28b   :  { %6604 = vmatprep.mubr.bf16.mxu0 %v9637_v45  ;;  %v9723_v45 = vld [vmem:[%s12848_s0 + $0xc70] ss:$72 sps:$4 sm:$0xff]  }
 0x291   :  { %5321 = vmatmul.mubr.bf16.gmra.mrb[40].mxu1 %v9639_v46  ;;  %v9724_v46 = vld [vmem:[%s12848_s0 + $0x398] ss:$72 sps:$4 sm:$0xff]  }
 0x292   :  { %6605 = vmatmul.mubr.bf16.gmra.mrb[104].mxu0 %v9640_v47  ;;  %5328 = vmatprep.mubr.bf16.mxu1 %v9643_v48  ;;  %v9727_v47 = vld [vmem:[%s12848_s0 + $0xd04] ss:$72 sps:$4 sm:$0xff]  }
 0x293   :  { %6612 = vmatprep.mubr.bf16.mxu0 %v9645_v49  ;;  %v9729_v48 = vld [vmem:[%s12848_s0 + $0x42c] ss:$72 sps:$4 sm:$0xff]   ;;  %v9834_v49 = vld [vmem:[%s12847_s1 + $0x458] sm:$0xff]  }
 0x299   :  { %5329 = vmatmul.mubr.bf16.gmra.mrb[44].mxu1 %v9647_v51  ;;  %v9732_v51 = vld [vmem:[%s12848_s0 + $0x428] ss:$72 sps:$4 sm:$0xff]  }
 0x29a   :  { %6613 = vmatmul.mubr.bf16.gmra.mrb[108].mxu0 %v9648_v52  ;;  %5336 = vmatprep.mubr.bf16.mxu1 %v9649_v53  ;;  %v9733_v52 = vld [vmem:[%s12848_s0 + $0xd94] ss:$72 sps:$4 sm:$0xff]  }
 0x29b   :  { %6620 = vmatprep.mubr.bf16.mxu0 %v9651_v54  ;;  %v9735_v53 = vld [vmem:[%s12848_s0 + $0x4bc] ss:$72 sps:$4 sm:$0xff]   ;;  %v9737_v54 = vld [vmem:[%s12848_s0 + $0xd90] ss:$72 sps:$4 sm:$0xff]  }
 0x2a1   :  { %5337 = vmatmul.mubr.bf16.gmra.mrb[48].mxu1 %v9653_v55  ;;  %v9738_v55 = vld [vmem:[%s12848_s0 + $0x4b8] ss:$72 sps:$4 sm:$0xff]  }
 0x2a2   :  { %6621 = vmatmul.mubr.bf16.gmra.mrb[112].mxu0 %v9654_v56  ;;  %5344 = vmatprep.mubr.bf16.mxu1 %v9657_v57  ;;  %v9741_v56 = vld [vmem:[%s12848_s0 + $0xe24] ss:$72 sps:$4 sm:$0xff]  }
 0x2a3   :  { %6628 = vmatprep.mubr.bf16.mxu0 %v9659_v58  ;;  %v9743_v57 = vld [vmem:[%s12848_s0 + $0x54c] ss:$72 sps:$4 sm:$0xff]   ;;  %v9847_v58 = vld [vmem:[%s12847_s1 + $0x460] sm:$0xff]  }
 0x2a9   :  { %5345 = vmatmul.mubr.bf16.gmra.mrb[52].mxu1 %v9661_v60  ;;  %v9746_v60 = vld [vmem:[%s12848_s0 + $0x548] ss:$72 sps:$4 sm:$0xff]  }
 0x2aa   :  { %6629 = vmatmul.mubr.bf16.gmra.mrb[116].mxu0 %v9662_v61  ;;  %5352 = vmatprep.mubr.bf16.mxu1 %v9663_v62  ;;  %v9747_v61 = vld [vmem:[%s12848_s0 + $0xeb4] ss:$72 sps:$4 sm:$0xff]  }
 0x2ab   :  { %6636 = vmatprep.mubr.bf16.mxu0 %v9665_v63  ;;  %v9749_v62 = vld [vmem:[%s12848_s0 + $0x5dc] ss:$72 sps:$4 sm:$0xff]   ;;  %v9751_v63 = vld [vmem:[%s12848_s0 + $0xeb0] ss:$72 sps:$4 sm:$0xff]  }
 0x2b1   :  { %5353 = vmatmul.mubr.bf16.gmra.mrb[56].mxu1 %v9667_v1  ;;  %v9752_v1 = vld [vmem:[%s12848_s0 + $0x5d8] ss:$72 sps:$4 sm:$0xff]  }
 0x2b2   :  { %6637 = vmatmul.mubr.bf16.gmra.mrb[120].mxu0 %v9668_v2  ;;  %5360 = vmatprep.mubr.bf16.mxu1 %v9671_v3  ;;  %v9755_v2 = vld [vmem:[%s12848_s0 + $0xf44] ss:$72 sps:$4 sm:$0xff]  }
 0x2b3   :  { %6644 = vmatprep.mubr.bf16.mxu0 %v9673_v4  ;;  %v9757_v3 = vld [vmem:[%s12848_s0 + $0x66c] ss:$72 sps:$4 sm:$0xff]  }
 0x2b4   :  { %v9860_v4 = vld [vmem:[%s12847_s1 + $0x468] sm:$0xff]  }
 0x2b9   :  { %5361 = vmatmul.mubr.bf16.gmra.mrb[60].mxu1 %v9675_v6  ;;  %v9760_v6 = vld [vmem:[%s12848_s0 + $0x668] ss:$72 sps:$4 sm:$0xff]  }
 0x2ba   :  { %6645 = vmatmul.mubr.bf16.gmra.mrb[124].mxu0 %v9676_v7  ;;  %5368 = vmatprep.mubr.bf16.mxu1 %v9677_v8  ;;  %v9761_v7 = vld [vmem:[%s12848_s0 + $0xfd4] ss:$72 sps:$4 sm:$0xff]  }
 0x2bb   :  { %6685 = vmatprep.mubr.bf16.mxu0 %v9681_v9  ;;  %v9763_v8 = vld [vmem:[%s12848_s0 + $0x6fc] ss:$72 sps:$4 sm:$0xff]   ;;  %v9765_v9 = vld [vmem:[%s12848_s0 + $0xfd0] ss:$72 sps:$4 sm:$0xff]  }
 0x2c1   :  { %5369 = vmatmul.mubr.bf16.gmra.mrb[64].mxu1 %v9682_v10  ;;  %v9766_v10 = vld [vmem:[%s12848_s0 + $0x6f8] ss:$72 sps:$4 sm:$0xff]  }
 0x2c2   :  { %6686 = vmatmul.mubr.bf16.vlgmr.msra.gmra.mrb[0].mxu0 %v9679_v11  ;;  %5376 = vmatprep.mubr.bf16.mxu1 %v9685_v12  ;;  %v9769_v11 = vld [vmem:[%s12848_s0 + $0x1064] ss:$72 sps:$4 sm:$0xff]  }
 0x2c3   :  { %6943 = vmatpush1.bf16.msra.mxu0 %v9684_v13  ;;  %6693 = vmatprep.mubr.bf16.mxu0 %v9687_v14  ;;  %v9771_v12 = vld [vmem:[%s12848_s0 + $0x78c] ss:$72 sps:$4 sm:$0xff]   ;;  %v9773_v14 = vld [vmem:[%s12848_s0 + $0x1060] ss:$72 sps:$4 sm:$0xff]  }
 0x2c4   :  { %6944 = vmatprep.subr.bf16.mxu0 %v10101_v0  ;;  %v9873_v13 = vld [vmem:[%s12847_s1 + $0x470] sm:$0xff]  }
 0x2c7   :  { %6945 = vmatpush1.bf16.msra.mxu0 %v9698_v15  ;;  %v9774_v15 = vld [vmem:[%s12848_s0 + $0x788] ss:$72 sps:$4 sm:$0xff]  }
 0x2c8   :  { %6946 = vmatprep.subr.bf16.mxu0 %v10101_v0 }
 0x2c9   :  { %5377 = vmatmul.mubr.bf16.gmra.mrb[68].mxu1 %v9689_v16  ;;  %v9775_v16 = vld [vmem:[%s12848_s0 + $0x10f4] ss:$72 sps:$4 sm:$0xff]  }
 0x2ca   :  { %6694 = vmatmul.mubr.bf16.gmra.mrb[4].mxu0 %v9690_v17  ;;  %5384 = vmatprep.mubr.bf16.mxu1 %v9691_v18  ;;  %v9777_v17 = vld [vmem:[%s12848_s0 + $0x81c] ss:$72 sps:$4 sm:$0xff]   ;;  %v9779_v18 = vld [vmem:[%s12848_s0 + $0x10f0] ss:$72 sps:$4 sm:$0xff]  }
 0x2cb   :  { %6701 = vmatprep.mubr.bf16.mxu0 %v9693_v19  ;;  %6947 = vmatpush1.bf16.msra.mxu0 %v9712_v20  ;;  %v9780_v19 = vld [vmem:[%s12848_s0 + $0x818] ss:$72 sps:$4 sm:$0xff]   ;;  %v9783_v20 = vld [vmem:[%s12848_s0 + $0x1184] ss:$72 sps:$4 sm:$0xff]  }
 0x2cc   :  { %6948 = vmatprep.subr.bf16.mxu0 %v10101_v0 }
 0x2cf   :  { %6949 = vmatpush1.bf16.msra.mxu0 %v9726_v21  ;;  %v9785_v21 = vld [vmem:[%s12848_s0 + $0x8ac] ss:$72 sps:$4 sm:$0xff]  }
 0x2d0   :  { %6950 = vmatprep.subr.bf16.mxu0 %v10101_v0 }
 0x2d1   :  { %5385 = vmatmul.mubr.bf16.gmra.mrb[72].mxu1 %v9695_v22  ;;  %v9886_v22 = vld [vmem:[%s12847_s1 + $0x478] sm:$0xff]  }
 0x2d2   :  { %6702 = vmatmul.mubr.bf16.gmra.mrb[8].mxu0 %v9696_v23  ;;  %5392 = vmatprep.mubr.bf16.mxu1 %v9699_v24  ;;  %v9787_v23 = vld [vmem:[%s12848_s0 + $0x1180] ss:$72 sps:$4 sm:$0xff]  }
 0x2d3   :  { %6709 = vmatprep.mubr.bf16.mxu0 %v9701_v25  ;;  %6951 = vmatpush1.bf16.msra.mxu0 %v9740_v26  ;;  %v9788_v24 = vld [vmem:[%s12848_s0 + $0x8a8] ss:$72 sps:$4 sm:$0xff]   ;;  %v9791_v25 = vld [vmem:[%s12848_s0 + $0x1c] ss:$72 sps:$4 sm:$0xff]  }
 0x2d4   :  { %6952 = vmatprep.subr.bf16.mxu0 %v10101_v0  ;;  %v9792_v26 = vld [vmem:[%s12848_s0 + $0x93c] ss:$72 sps:$4 sm:$0xff]  }
 0x2d7   :  { %6953 = vmatpush1.bf16.msra.mxu0 %v9754_v27  ;;  %v9789_v27 = vld [vmem:[%s12848_s0 + $0x18] ss:$72 sps:$4 sm:$0xff]  }
 0x2d8   :  { %6954 = vmatprep.subr.bf16.mxu0 %v10101_v0 }
 0x2d9   :  { %5393 = vmatmul.mubr.bf16.gmra.mrb[76].mxu1 %v9703_v28  ;;  %v9794_v28 = vld [vmem:[%s12848_s0 + $0x938] ss:$72 sps:$4 sm:$0xff]  }
 0x2da   :  { %6710 = vmatmul.mubr.bf16.gmra.mrb[12].mxu0 %v9704_v29  ;;  %5400 = vmatprep.mubr.bf16.mxu1 %v9705_v30  ;;  %v9796_v29 = vld [vmem:[%s12848_s0 + $0xac] ss:$72 sps:$4 sm:$0xff]  }
 0x2db   :  { %6717 = vmatprep.mubr.bf16.mxu0 %v9707_v31  ;;  %6955 = vmatpush1.bf16.msra.mxu0 %v9768_v32  ;;  %v9798_v30 = vld [vmem:[%s12848_s0 + $0x9cc] ss:$72 sps:$4 sm:$0xff]   ;;  %v10085_v31 = vld [vmem:[%s12847_s1 + $0x200] sm:$0xff]   ;;  %v9800_v32 = vld [vmem:[%s12848_s0 + $0xa8] ss:$72 sps:$4 sm:$0xff]  }
 0x2dc   :  { %6956 = vmatprep.subr.bf16.mxu0 %v10101_v0 }
 0x2df   :  { %6957 = vmatpush1.bf16.msra.mxu0 %v9782_v33  ;;  %v9801_v33 = vld [vmem:[%s12848_s0 + $0x9c8] ss:$72 sps:$4 sm:$0xff]  }
 0x2e0   :  { %6958 = vmatprep.subr.bf16.mxu0 %v10101_v0 }
 0x2e1   :  { %5401 = vmatmul.mubr.bf16.gmra.mrb[80].mxu1 %v9709_v34  ;;  %v9802_v34 = vld [vmem:[%s12848_s0 + $0x13c] ss:$72 sps:$4 sm:$0xff]  }
 0x2e2   :  { %6718 = vmatmul.mubr.bf16.gmra.mrb[16].mxu0 %v9710_v35  ;;  %5408 = vmatprep.mubr.bf16.mxu1 %v9713_v36  ;;  %v10086_v35 = vld [vmem:[%s12847_s1 + $0x208] sm:$0xff]   ;;  %v9804_v36 = vld [vmem:[%s12848_s0 + $0xa5c] ss:$72 sps:$4 sm:$0xff]  }
 0x2e3   :  { %6725 = vmatprep.mubr.bf16.mxu0 %v9715_v37  ;;  %6959 = vmatpush1.bf16.msra.mxu0 %v9795_v38  ;;  %v10087_v37 = vld [vmem:[%s12847_s1 + $0x210] sm:$0xff]   ;;  %v9806_v38 = vld [vmem:[%s12848_s0 + $0x138] ss:$72 sps:$4 sm:$0xff]  }
 0x2e4   :  { %6960 = vmatprep.subr.bf16.mxu0 %v10101_v0 }
 0x2e7   :  { %6961 = vmatpush1.bf16.msra.mxu0 %v9808_v39  ;;  %v9807_v39 = vld [vmem:[%s12848_s0 + $0xa58] ss:$72 sps:$4 sm:$0xff]  }
 0x2e8   :  { %6962 = vmatprep.subr.bf16.mxu0 %v10101_v0 }
 0x2e9   :  { %5409 = vmatmul.mubr.bf16.gmra.mrb[84].mxu1 %v9717_v40  ;;  %v9809_v40 = vld [vmem:[%s12848_s0 + $0x1cc] ss:$72 sps:$4 sm:$0xff]  }
 0x2ea   :  { %6726 = vmatmul.mubr.bf16.gmra.mrb[20].mxu0 %v9718_v41  ;;  %5416 = vmatprep.mubr.bf16.mxu1 %v9719_v42  ;;  %v9811_v41 = vld [vmem:[%s12848_s0 + $0xaec] ss:$72 sps:$4 sm:$0xff]   ;;  %v10088_v42 = vld [vmem:[%s12847_s1 + $0x218] sm:$0xff]  }
 0x2eb   :  { %6733 = vmatprep.mubr.bf16.mxu0 %v9721_v43  ;;  %6963 = vmatpush1.bf16.msra.mxu0 %v9821_v44  ;;  %v10089_v43 = vld [vmem:[%s12847_s1 + $0x220] sm:$0xff]   ;;  %v9813_v44 = vld [vmem:[%s12848_s0 + $0x1c8] ss:$72 sps:$4 sm:$0xff]  }
 0x2ec   :  { %6964 = vmatprep.subr.bf16.mxu0 %v10101_v0 }
 0x2ef   :  { %6965 = vmatpush1.bf16.msra.mxu0 %v9834_v49  ;;  %v10091_v49 = vld [vmem:[%s12847_s1 + $0x230] sm:$0xff]  }
 0x2f0   :  { %6966 = vmatprep.subr.bf16.mxu0 %v10101_v0 }
 0x2f1   :  { %5417 = vmatmul.mubr.bf16.gmra.mrb[88].mxu1 %v9723_v45  ;;  %v9814_v45 = vld [vmem:[%s12848_s0 + $0xae8] ss:$72 sps:$4 sm:$0xff]  }
 0x2f2   :  { %6734 = vmatmul.mubr.bf16.gmra.mrb[24].mxu0 %v9724_v46  ;;  %5424 = vmatprep.mubr.bf16.mxu1 %v9727_v47  ;;  %v9815_v46 = vld [vmem:[%s12848_s0 + $0x25c] ss:$72 sps:$4 sm:$0xff]  }
 0x2f3   :  { %6741 = vmatprep.mubr.bf16.mxu0 %v9729_v48  ;;  %6967 = vmatpush1.bf16.msra.mxu0 %v9847_v58  ;;  %v9817_v47 = vld [vmem:[%s12848_s0 + $0xb7c] ss:$72 sps:$4 sm:$0xff]   ;;  %v10090_v48 = vld [vmem:[%s12847_s1 + $0x228] sm:$0xff]  }
 0x2f4   :  { %6968 = vmatprep.subr.bf16.mxu0 %v10101_v0  ;;  %v9828_v58 = vld [vmem:[%s12848_s0 + $0x37c] ss:$72 sps:$4 sm:$0xff]  }
 0x2f7   :  { %6969 = vmatpush1.bf16.msra.mxu0 %v9860_v4  ;;  %v10097_v4 = vld [vmem:[%s12847_s1 + $0x260] sm:$0xff]  }
 0x2f8   :  { %6970 = vmatprep.subr.bf16.mxu0 %v10101_v0 }
 0x2f9   :  { %5425 = vmatmul.mubr.bf16.gmra.mrb[92].mxu1 %v9731_v50  ;;  %v9819_v50 = vld [vmem:[%s12848_s0 + $0x258] ss:$72 sps:$4 sm:$0xff]  }
 0x2fa   :  { %6742 = vmatmul.mubr.bf16.gmra.mrb[28].mxu0 %v9732_v51  ;;  %5432 = vmatprep.mubr.bf16.mxu1 %v9733_v52  ;;  %v9820_v51 = vld [vmem:[%s12848_s0 + $0xb78] ss:$72 sps:$4 sm:$0xff]   ;;  %v9822_v52 = vld [vmem:[%s12848_s0 + $0x2ec] ss:$72 sps:$4 sm:$0xff]  }
 0x2fb   :  { %6749 = vmatprep.mubr.bf16.mxu0 %v9735_v53  ;;  %6971 = vmatpush1.bf16.msra.mxu0 %v9873_v13  ;;  %v9824_v53 = vld [vmem:[%s12848_s0 + $0xc0c] ss:$72 sps:$4 sm:$0xff]  }
 0x2fc   :  { %6972 = vmatprep.subr.bf16.mxu0 %v10101_v0  ;;  %v9848_v13 = vld [vmem:[%s12848_s0 + $0x52c] ss:$72 sps:$4 sm:$0xff]  }
 0x2ff   :  { %6973 = vmatpush1.bf16.msra.mxu0 %v9886_v22  ;;  %v9863_v22 = vld [vmem:[%s12848_s0 + $0xf6c] ss:$72 sps:$4 sm:$0xff]  }
 0x301   :  { %5433 = vmatmul.mubr.bf16.gmra.mrb[96].mxu1 %v9737_v54  ;;  %v10092_v54 = vld [vmem:[%s12847_s1 + $0x238] sm:$0xff]  }
 0x302   :  { %6750 = vmatmul.mubr.bf16.gmra.mrb[32].mxu0 %v9738_v55  ;;  %5440 = vmatprep.mubr.bf16.mxu1 %v9741_v56  ;;  %v10093_v55 = vld [vmem:[%s12847_s1 + $0x240] sm:$0xff]   ;;  %v9826_v56 = vld [vmem:[%s12848_s0 + $0x2e8] ss:$72 sps:$4 sm:$0xff]  }
 0x303   :  { %6757 = vmatprep.mubr.bf16.mxu0 %v9743_v57  ;;  %v9827_v57 = vld [vmem:[%s12848_s0 + $0xc08] ss:$72 sps:$4 sm:$0xff]  }
 0x309   :  { %5441 = vmatmul.mubr.bf16.gmra.mrb[100].mxu1 %v9745_v59  ;;  %v9830_v59 = vld [vmem:[%s12848_s0 + $0xc9c] ss:$72 sps:$4 sm:$0xff]  }
 0x30a   :  { %6758 = vmatmul.mubr.bf16.gmra.mrb[36].mxu0 %v9746_v60  ;;  %5448 = vmatprep.mubr.bf16.mxu1 %v9747_v61  ;;  %v10094_v60 = vld [vmem:[%s12847_s1 + $0x248] sm:$0xff]   ;;  %v10095_v61 = vld [vmem:[%s12847_s1 + $0x250] sm:$0xff]  }
 0x30b   :  { %6765 = vmatprep.mubr.bf16.mxu0 %v9749_v62  ;;  %v9832_v62 = vld [vmem:[%s12848_s0 + $0x378] ss:$72 sps:$4 sm:$0xff]  }
 0x311   :  { %5449 = vmatmul.mubr.bf16.gmra.mrb[104].mxu1 %v9751_v63  ;;  %v9833_v63 = vld [vmem:[%s12848_s0 + $0xc98] ss:$72 sps:$4 sm:$0xff]  }
 0x312   :  { %6766 = vmatmul.mubr.bf16.gmra.mrb[40].mxu0 %v9752_v1  ;;  %5456 = vmatprep.mubr.bf16.mxu1 %v9755_v2  ;;  %v9835_v1 = vld [vmem:[%s12848_s0 + $0x40c] ss:$72 sps:$4 sm:$0xff]  }
 0x313   :  { %6773 = vmatprep.mubr.bf16.mxu0 %v9757_v3  ;;  %v9837_v2 = vld [vmem:[%s12848_s0 + $0xd2c] ss:$72 sps:$4 sm:$0xff]   ;;  %v10096_v3 = vld [vmem:[%s12847_s1 + $0x258] sm:$0xff]  }
 0x319   :  { %5457 = vmatmul.mubr.bf16.gmra.mrb[108].mxu1 %v9759_v5  ;;  %v9839_v5 = vld [vmem:[%s12848_s0 + $0x408] ss:$72 sps:$4 sm:$0xff]  }
 0x31a   :  { %6774 = vmatmul.mubr.bf16.gmra.mrb[44].mxu0 %v9760_v6  ;;  %5464 = vmatprep.mubr.bf16.mxu1 %v9761_v7  ;;  %v9840_v6 = vld [vmem:[%s12848_s0 + $0xd28] ss:$72 sps:$4 sm:$0xff]   ;;  %v9841_v7 = vld [vmem:[%s12848_s0 + $0x49c] ss:$72 sps:$4 sm:$0xff]  }
 0x31b   :  { %6781 = vmatprep.mubr.bf16.mxu0 %v9763_v8  ;;  %v9843_v8 = vld [vmem:[%s12848_s0 + $0xdbc] ss:$72 sps:$4 sm:$0xff]  }
 0x321   :  { %5465 = vmatmul.mubr.bf16.gmra.mrb[112].mxu1 %v9765_v9  ;;  %v10098_v9 = vld [vmem:[%s12847_s1 + $0x268] sm:$0xff]  }
 0x322   :  { %6782 = vmatmul.mubr.bf16.gmra.mrb[48].mxu0 %v9766_v10  ;;  %5472 = vmatprep.mubr.bf16.mxu1 %v9769_v11  ;;  %v10099_v10 = vld [vmem:[%s12847_s1 + $0x270] sm:$0xff]   ;;  %v9845_v11 = vld [vmem:[%s12848_s0 + $0x498] ss:$72 sps:$4 sm:$0xff]  }
 0x323   :  { %6789 = vmatprep.mubr.bf16.mxu0 %v9771_v12  ;;  %v9846_v12 = vld [vmem:[%s12848_s0 + $0xdb8] ss:$72 sps:$4 sm:$0xff]  }
 0x329   :  { %5473 = vmatmul.mubr.bf16.gmra.mrb[116].mxu1 %v9773_v14  ;;  %v9850_v14 = vld [vmem:[%s12848_s0 + $0xe4c] ss:$72 sps:$4 sm:$0xff]  }
 0x32a   :  { %6790 = vmatmul.mubr.bf16.gmra.mrb[52].mxu0 %v9774_v15  ;;  %5480 = vmatprep.mubr.bf16.mxu1 %v9775_v16  ;;  %v9852_v15 = vld [vmem:[%s12848_s0 + $0x528] ss:$72 sps:$4 sm:$0xff]  }
 0x32b   :  { %6797 = vmatprep.mubr.bf16.mxu0 %v9777_v17  ;;  %v9853_v16 = vld [vmem:[%s12848_s0 + $0xe48] ss:$72 sps:$4 sm:$0xff]   ;;  %v9854_v17 = vld [vmem:[%s12848_s0 + $0x5bc] ss:$72 sps:$4 sm:$0xff]  }
 0x331   :  { %5481 = vmatmul.mubr.bf16.gmra.mrb[120].mxu1 %v9779_v18  ;;  %v9856_v18 = vld [vmem:[%s12848_s0 + $0xedc] ss:$72 sps:$4 sm:$0xff]  }
 0x332   :  { %6798 = vmatmul.mubr.bf16.gmra.mrb[56].mxu0 %v9780_v19  ;;  %5488 = vmatprep.mubr.bf16.mxu1 %v9783_v20  ;;  %v9858_v19 = vld [vmem:[%s12848_s0 + $0x5b8] ss:$72 sps:$4 sm:$0xff]  }
 0x333   :  { %6805 = vmatprep.mubr.bf16.mxu0 %v9785_v21  ;;  %v9859_v20 = vld [vmem:[%s12848_s0 + $0xed8] ss:$72 sps:$4 sm:$0xff]   ;;  %v9861_v21 = vld [vmem:[%s12848_s0 + $0x64c] ss:$72 sps:$4 sm:$0xff]  }
 0x339   :  { %5489 = vmatmul.mubr.bf16.gmra.mrb[124].mxu1 %v9787_v23  ;;  %v9865_v23 = vld [vmem:[%s12848_s0 + $0x648] ss:$72 sps:$4 sm:$0xff]  }
 0x33a   :  { %6806 = vmatmul.mubr.bf16.gmra.mrb[60].mxu0 %v9788_v24  ;;  %5529 = vmatprep.mubr.bf16.mxu1 %v9791_v25  ;;  %v9866_v24 = vld [vmem:[%s12848_s0 + $0xf68] ss:$72 sps:$4 sm:$0xff]   ;;  %v9867_v25 = vld [vmem:[%s12848_s0 + $0x6dc] ss:$72 sps:$4 sm:$0xff]  }
 0x33b   :  { %6813 = vmatprep.mubr.bf16.mxu0 %v9792_v26  ;;  %v9869_v26 = vld [vmem:[%s12848_s0 + $0xffc] ss:$72 sps:$4 sm:$0xff]  }
 0x341   :  { %5530 = vmatmul.mubr.bf16.vlgmr.msra.gmra.mrb[0].mxu1 %v9789_v27  ;;  %v9871_v27 = vld [vmem:[%s12848_s0 + $0x6d8] ss:$72 sps:$4 sm:$0xff]  }
 0x342   :  { %6814 = vmatmul.mubr.bf16.gmra.mrb[64].mxu0 %v9794_v28  ;;  %8036 = vmatpush1.bf16.msra.mxu1 %v10085_v31  ;;  %v9872_v28 = vld [vmem:[%s12848_s0 + $0xff8] ss:$72 sps:$4 sm:$0xff]   ;;  %v9878_v31 = vld [vmem:[%s12848_s0 + $0x768] ss:$72 sps:$4 sm:$0xff]  }
 0x343   :  { %5537 = vmatprep.mubr.bf16.mxu1 %v9796_v29  ;;  %6821 = vmatprep.mubr.bf16.mxu0 %v9798_v30  ;;  %v9874_v29 = vld [vmem:[%s12848_s0 + $0x76c] ss:$72 sps:$4 sm:$0xff]  }
 0x344   :  { %8021 = vmatprep.subr.bf16.mxu1 %v10101_v0  ;;  %v9876_v30 = vld [vmem:[%s12848_s0 + $0x108c] ss:$72 sps:$4 sm:$0xff]  }
 0x346   :  { %8037 = vmatpush1.bf16.msra.mxu1 %v10086_v35  ;;  %v9884_v35 = vld [vmem:[%s12848_s0 + $0x7f8] ss:$72 sps:$4 sm:$0xff]  }
 0x347   :  { %8022 = vmatprep.subr.bf16.mxu1 %v10101_v0 }
 0x349   :  { %5538 = vmatmul.mubr.bf16.gmra.mrb[4].mxu1 %v9800_v32  ;;  %v9879_v32 = vld [vmem:[%s12848_s0 + $0x1088] ss:$72 sps:$4 sm:$0xff]  }
 0x34a   :  { %6822 = vmatmul.mubr.bf16.gmra.mrb[68].mxu0 %v9801_v33  ;;  %5545 = vmatprep.mubr.bf16.mxu1 %v9802_v34  ;;  %v9880_v33 = vld [vmem:[%s12848_s0 + $0x7fc] ss:$72 sps:$4 sm:$0xff]  }
 0x34b   :  { %6829 = vmatprep.mubr.bf16.mxu0 %v9804_v36  ;;  %8038 = vmatpush1.bf16.msra.mxu1 %v10087_v37  ;;  %v9882_v34 = vld [vmem:[%s12848_s0 + $0x111c] ss:$72 sps:$4 sm:$0xff]   ;;  %v9885_v36 = vld [vmem:[%s12848_s0 + $0x1118] ss:$72 sps:$4 sm:$0xff]   ;;  %v9887_v37 = vld [vmem:[%s12848_s0 + $0x88c] ss:$72 sps:$4 sm:$0xff]  }
 0x34c   :  { %8023 = vmatprep.subr.bf16.mxu1 %v10101_v0 }
 0x34f   :  { %8039 = vmatpush1.bf16.msra.mxu1 %v10088_v42  ;;  %v9897_v42 = vld [vmem:[%s12848_s0 + $0x44] ss:$72 sps:$4 sm:$0xff]  }
 0x350   :  { %8024 = vmatprep.subr.bf16.mxu1 %v10101_v0 }
 0x351   :  { %5546 = vmatmul.mubr.bf16.gmra.mrb[8].mxu1 %v9806_v38  ;;  %v9889_v38 = vld [vmem:[%s12848_s0 + $0x11ac] ss:$72 sps:$4 sm:$0xff]  }
 0x352   :  { %6830 = vmatmul.mubr.bf16.gmra.mrb[72].mxu0 %v9807_v39  ;;  %5553 = vmatprep.mubr.bf16.mxu1 %v9809_v40  ;;  %v9891_v39 = vld [vmem:[%s12848_s0 + $0x888] ss:$72 sps:$4 sm:$0xff]  }
 0x353   :  { %6837 = vmatprep.mubr.bf16.mxu0 %v9811_v41  ;;  %8040 = vmatpush1.bf16.msra.mxu1 %v10089_v43  ;;  %v9892_v40 = vld [vmem:[%s12848_s0 + $0x11a8] ss:$72 sps:$4 sm:$0xff]   ;;  %v9893_v41 = vld [vmem:[%s12848_s0 + $0x91c] ss:$72 sps:$4 sm:$0xff]   ;;  %v9898_v43 = vld [vmem:[%s12848_s0 + $0x918] ss:$72 sps:$4 sm:$0xff]  }
 0x354   :  { %8025 = vmatprep.subr.bf16.mxu1 %v10101_v0 }
 0x357   :  { %8041 = vmatpush1.bf16.msra.mxu1 %v10090_v48  ;;  %v9904_v48 = vld [vmem:[%s12848_s0 + $0xd0] ss:$72 sps:$4 sm:$0xff]  }
 0x358   :  { %8026 = vmatprep.subr.bf16.mxu1 %v10101_v0 }
 0x359   :  { %5554 = vmatmul.mubr.bf16.gmra.mrb[12].mxu1 %v9813_v44  ;;  %v9895_v44 = vld [vmem:[%s12848_s0 + $0x40] ss:$72 sps:$4 sm:$0xff]  }
 0x35a   :  { %6838 = vmatmul.mubr.bf16.gmra.mrb[76].mxu0 %v9814_v45  ;;  %5561 = vmatprep.mubr.bf16.mxu1 %v9815_v46  ;;  %v9899_v45 = vld [vmem:[%s12848_s0 + $0x9ac] ss:$72 sps:$4 sm:$0xff]  }
 0x35b   :  { %6845 = vmatprep.mubr.bf16.mxu0 %v9817_v47  ;;  %8042 = vmatpush1.bf16.msra.mxu1 %v10091_v49  ;;  %v9901_v46 = vld [vmem:[%s12848_s0 + $0xd4] ss:$72 sps:$4 sm:$0xff]   ;;  %v9903_v47 = vld [vmem:[%s12848_s0 + $0x9a8] ss:$72 sps:$4 sm:$0xff]  }
 0x35c   :  { %8027 = vmatprep.subr.bf16.mxu1 %v10101_v0  ;;  %v9905_v49 = vld [vmem:[%s12848_s0 + $0xa3c] ss:$72 sps:$4 sm:$0xff]  }
 0x35f   :  { %8043 = vmatpush1.bf16.msra.mxu1 %v10092_v54  ;;  %v9913_v54 = vld [vmem:[%s12848_s0 + $0x1f4] ss:$72 sps:$4 sm:$0xff]  }
 0x360   :  { %8028 = vmatprep.subr.bf16.mxu1 %v10101_v0 }
 0x361   :  { %5562 = vmatmul.mubr.bf16.gmra.mrb[16].mxu1 %v9819_v50  ;;  %v9907_v50 = vld [vmem:[%s12848_s0 + $0x164] ss:$72 sps:$4 sm:$0xff]  }
 0x362   :  { %6846 = vmatmul.mubr.bf16.gmra.mrb[80].mxu0 %v9820_v51  ;;  %5569 = vmatprep.mubr.bf16.mxu1 %v9822_v52  ;;  %v9909_v51 = vld [vmem:[%s12848_s0 + $0xa38] ss:$72 sps:$4 sm:$0xff]  }
 0x363   :  { %6853 = vmatprep.mubr.bf16.mxu0 %v9824_v53  ;;  %8044 = vmatpush1.bf16.msra.mxu1 %v10093_v55  ;;  %v9910_v52 = vld [vmem:[%s12848_s0 + $0x160] ss:$72 sps:$4 sm:$0xff]   ;;  %v9911_v53 = vld [vmem:[%s12848_s0 + $0xacc] ss:$72 sps:$4 sm:$0xff]  }
 0x364   :  { %8029 = vmatprep.subr.bf16.mxu1 %v10101_v0  ;;  %v9915_v55 = vld [vmem:[%s12848_s0 + $0xac8] ss:$72 sps:$4 sm:$0xff]  }
 0x367   :  { %8045 = vmatpush1.bf16.msra.mxu1 %v10094_v60  ;;  %v9922_v60 = vld [vmem:[%s12848_s0 + $0x280] ss:$72 sps:$4 sm:$0xff]  }
 0x368   :  { %8030 = vmatprep.subr.bf16.mxu1 %v10101_v0 }
 0x369   :  { %5570 = vmatmul.mubr.bf16.gmra.mrb[20].mxu1 %v9826_v56  ;;  %v9916_v56 = vld [vmem:[%s12848_s0 + $0x1f0] ss:$72 sps:$4 sm:$0xff]  }
 0x36a   :  { %6854 = vmatmul.mubr.bf16.gmra.mrb[84].mxu0 %v9827_v57  ;;  %5577 = vmatprep.mubr.bf16.mxu1 %v9828_v58  ;;  %v9917_v57 = vld [vmem:[%s12848_s0 + $0xb5c] ss:$72 sps:$4 sm:$0xff]  }
 0x36b   :  { %6861 = vmatprep.mubr.bf16.mxu0 %v9830_v59  ;;  %8046 = vmatpush1.bf16.msra.mxu1 %v10095_v61  ;;  %v9919_v58 = vld [vmem:[%s12848_s0 + $0x284] ss:$72 sps:$4 sm:$0xff]   ;;  %v9921_v59 = vld [vmem:[%s12848_s0 + $0xb58] ss:$72 sps:$4 sm:$0xff]  }
 0x36c   :  { %8031 = vmatprep.subr.bf16.mxu1 %v10101_v0  ;;  %v9923_v61 = vld [vmem:[%s12848_s0 + $0xbec] ss:$72 sps:$4 sm:$0xff]  }
 0x36f   :  { %8047 = vmatpush1.bf16.msra.mxu1 %v10096_v3  ;;  %v9931_v3 = vld [vmem:[%s12848_s0 + $0x3a4] ss:$72 sps:$4 sm:$0xff]  }
 0x370   :  { %8032 = vmatprep.subr.bf16.mxu1 %v10101_v0 }
 0x371   :  { %5578 = vmatmul.mubr.bf16.gmra.mrb[24].mxu1 %v9832_v62  ;;  %v9925_v62 = vld [vmem:[%s12848_s0 + $0x314] ss:$72 sps:$4 sm:$0xff]  }
 0x372   :  { %6862 = vmatmul.mubr.bf16.gmra.mrb[88].mxu0 %v9833_v63  ;;  %5585 = vmatprep.mubr.bf16.mxu1 %v9835_v1  ;;  %v9927_v63 = vld [vmem:[%s12848_s0 + $0xbe8] ss:$72 sps:$4 sm:$0xff]  }
 0x373   :  { %6869 = vmatprep.mubr.bf16.mxu0 %v9837_v2  ;;  %8048 = vmatpush1.bf16.msra.mxu1 %v10097_v4  ;;  %v9928_v1 = vld [vmem:[%s12848_s0 + $0x310] ss:$72 sps:$4 sm:$0xff]   ;;  %v9929_v2 = vld [vmem:[%s12848_s0 + $0xc7c] ss:$72 sps:$4 sm:$0xff]  }
 0x374   :  { %8033 = vmatprep.subr.bf16.mxu1 %v10101_v0  ;;  %v9933_v4 = vld [vmem:[%s12848_s0 + $0xc78] ss:$72 sps:$4 sm:$0xff]  }
 0x377   :  { %8049 = vmatpush1.bf16.msra.mxu1 %v10098_v9  ;;  %v9940_v9 = vld [vmem:[%s12848_s0 + $0x430] ss:$72 sps:$4 sm:$0xff]  }
 0x378   :  { %8034 = vmatprep.subr.bf16.mxu1 %v10101_v0 }
 0x379   :  { %5586 = vmatmul.mubr.bf16.gmra.mrb[28].mxu1 %v9839_v5  ;;  %v9934_v5 = vld [vmem:[%s12848_s0 + $0x3a0] ss:$72 sps:$4 sm:$0xff]  }
 0x37a   :  { %6870 = vmatmul.mubr.bf16.gmra.mrb[92].mxu0 %v9840_v6  ;;  %5593 = vmatprep.mubr.bf16.mxu1 %v9841_v7  ;;  %v9935_v6 = vld [vmem:[%s12848_s0 + $0xd0c] ss:$72 sps:$4 sm:$0xff]  }
 0x37b   :  { %6877 = vmatprep.mubr.bf16.mxu0 %v9843_v8  ;;  %8050 = vmatpush1.bf16.msra.mxu1 %v10099_v10  ;;  %v9937_v7 = vld [vmem:[%s12848_s0 + $0x434] ss:$72 sps:$4 sm:$0xff]   ;;  %v9939_v8 = vld [vmem:[%s12848_s0 + $0xd08] ss:$72 sps:$4 sm:$0xff]  }
 0x37c   :  { %8035 = vmatprep.subr.bf16.mxu1 %v10101_v0  ;;  %v10100_v0 = vld [vmem:[%s12847_s1 + $0x278] sm:$0xff]  }
 0x37d   :  { %v9941_v10 = vld [vmem:[%s12848_s0 + $0xd9c] ss:$72 sps:$4 sm:$0xff]  }
 0x37f   :  { %8051 = vmatpush1.bf16.msra.mxu1 %v10100_v0  ;;  %v9949_v0 = vld [vmem:[%s12848_s0 + $0x554] ss:$72 sps:$4 sm:$0xff]  }
 0x381   :  { %5594 = vmatmul.mubr.bf16.gmra.mrb[32].mxu1 %v9845_v11  ;;  %v9943_v11 = vld [vmem:[%s12848_s0 + $0x4c4] ss:$72 sps:$4 sm:$0xff]  }
 0x382   :  { %6878 = vmatmul.mubr.bf16.gmra.mrb[96].mxu0 %v9846_v12  ;;  %5601 = vmatprep.mubr.bf16.mxu1 %v9848_v13  ;;  %v9945_v12 = vld [vmem:[%s12848_s0 + $0xd98] ss:$72 sps:$4 sm:$0xff]  }
 0x383   :  { %6885 = vmatprep.mubr.bf16.mxu0 %v9850_v14  ;;  %v9946_v13 = vld [vmem:[%s12848_s0 + $0x4c0] ss:$72 sps:$4 sm:$0xff]   ;;  %v9947_v14 = vld [vmem:[%s12848_s0 + $0xe2c] ss:$72 sps:$4 sm:$0xff]  }
 0x389   :  { %5602 = vmatmul.mubr.bf16.gmra.mrb[36].mxu1 %v9852_v15  ;;  %v9951_v15 = vld [vmem:[%s12848_s0 + $0xe28] ss:$72 sps:$4 sm:$0xff]  }
 0x38a   :  { %6886 = vmatmul.mubr.bf16.gmra.mrb[100].mxu0 %v9853_v16  ;;  %5609 = vmatprep.mubr.bf16.mxu1 %v9854_v17  ;;  %v9952_v16 = vld [vmem:[%s12848_s0 + $0x550] ss:$72 sps:$4 sm:$0xff]   ;;  %v9953_v17 = vld [vmem:[%s12848_s0 + $0xebc] ss:$72 sps:$4 sm:$0xff]  }
 0x38b   :  { %6893 = vmatprep.mubr.bf16.mxu0 %v9856_v18  ;;  %v9955_v18 = vld [vmem:[%s12848_s0 + $0x5e4] ss:$72 sps:$4 sm:$0xff]  }
 0x391   :  { %5610 = vmatmul.mubr.bf16.gmra.mrb[40].mxu1 %v9858_v19  ;;  %v9957_v19 = vld [vmem:[%s12848_s0 + $0xeb8] ss:$72 sps:$4 sm:$0xff]  }
 0x392   :  { %6894 = vmatmul.mubr.bf16.gmra.mrb[104].mxu0 %v9859_v20  ;;  %5617 = vmatprep.mubr.bf16.mxu1 %v9861_v21  ;;  %v9958_v20 = vld [vmem:[%s12848_s0 + $0x5e0] ss:$72 sps:$4 sm:$0xff]   ;;  %v9959_v21 = vld [vmem:[%s12848_s0 + $0xf4c] ss:$72 sps:$4 sm:$0xff]  }
 0x393   :  { %6901 = vmatprep.mubr.bf16.mxu0 %v9863_v22  ;;  %v9961_v22 = vld [vmem:[%s12848_s0 + $0x674] ss:$72 sps:$4 sm:$0xff]  }
 0x399   :  { %5618 = vmatmul.mubr.bf16.gmra.mrb[44].mxu1 %v9865_v23 }
 0x39a   :  { %6902 = vmatmul.mubr.bf16.gmra.mrb[108].mxu0 %v9866_v24  ;;  %5625 = vmatprep.mubr.bf16.mxu1 %v9867_v25  ;;  %v9963_v25 = vld [vmem:[%s12848_s0 + $0xf48] ss:$72 sps:$4 sm:$0xff]  }
 0x39b   :  { %6909 = vmatprep.mubr.bf16.mxu0 %v9869_v26 }
 0x3a1   :  { %5626 = vmatmul.mubr.bf16.gmra.mrb[48].mxu1 %v9871_v27  ;;  %v9964_v27 = vld [vmem:[%s12848_s0 + $0x670] ss:$72 sps:$4 sm:$0xff]  }
 0x3a2   :  { %6910 = vmatmul.mubr.bf16.gmra.mrb[112].mxu0 %v9872_v28  ;;  %5633 = vmatprep.mubr.bf16.mxu1 %v9874_v29  ;;  %v9965_v28 = vld [vmem:[%s12848_s0 + $0xfdc] ss:$72 sps:$4 sm:$0xff]  }
 0x3a3   :  { %6917 = vmatprep.mubr.bf16.mxu0 %v9876_v30  ;;  %v9967_v30 = vld [vmem:[%s12848_s0 + $0x704] ss:$72 sps:$4 sm:$0xff]  }
 0x3a9   :  { %5634 = vmatmul.mubr.bf16.gmra.mrb[52].mxu1 %v9878_v31 }
 0x3aa   :  { %6918 = vmatmul.mubr.bf16.gmra.mrb[116].mxu0 %v9879_v32  ;;  %5641 = vmatprep.mubr.bf16.mxu1 %v9880_v33  ;;  %v9969_v33 = vld [vmem:[%s12848_s0 + $0xfd8] ss:$72 sps:$4 sm:$0xff]  }
 0x3ab   :  { %6925 = vmatprep.mubr.bf16.mxu0 %v9882_v34 }
 0x3b1   :  { %5642 = vmatmul.mubr.bf16.gmra.mrb[56].mxu1 %v9884_v35  ;;  %v9970_v35 = vld [vmem:[%s12848_s0 + $0x700] ss:$72 sps:$4 sm:$0xff]  }
 0x3b2   :  { %6926 = vmatmul.mubr.bf16.gmra.mrb[120].mxu0 %v9885_v36  ;;  %5649 = vmatprep.mubr.bf16.mxu1 %v9887_v37  ;;  %v9971_v36 = vld [vmem:[%s12848_s0 + $0x106c] ss:$72 sps:$4 sm:$0xff]  }
 0x3b3   :  { %6933 = vmatprep.mubr.bf16.mxu0 %v9889_v38  ;;  %v9973_v38 = vld [vmem:[%s12848_s0 + $0x794] ss:$72 sps:$4 sm:$0xff]  }
 0x3b9   :  { %5650 = vmatmul.mubr.bf16.gmra.mrb[60].mxu1 %v9891_v39 }
 0x3ba   :  { %6934 = vmatmul.mubr.bf16.gmra.mrb[124].mxu0 %v9892_v40  ;;  %5657 = vmatprep.mubr.bf16.mxu1 %v9893_v41  ;;  %v9975_v41 = vld [vmem:[%s12848_s0 + $0x1068] ss:$72 sps:$4 sm:$0xff]  }
 0x3bb   :  { %6974 = vmatprep.mubr.bf16.mxu0 %v9897_v42 }
 0x3c1   :  { %5658 = vmatmul.mubr.bf16.gmra.mrb[64].mxu1 %v9898_v43  ;;  %v9976_v43 = vld [vmem:[%s12848_s0 + $0x790] ss:$72 sps:$4 sm:$0xff]  }
 0x3c2   :  { %6975 = vmatmul.mubr.bf16.vlgmr.msra.gmra.mrb[0].mxu0 %v9895_v44  ;;  %5665 = vmatprep.mubr.bf16.mxu1 %v9899_v45  ;;  %v9977_v44 = vld [vmem:[%s12848_s0 + $0x10fc] ss:$72 sps:$4 sm:$0xff]  }
 0x3c3   :  { %6982 = vmatprep.mubr.bf16.mxu0 %v9901_v46  ;;  %v9979_v46 = vld [vmem:[%s12848_s0 + $0x824] ss:$72 sps:$4 sm:$0xff]  }
 0x3c9   :  { %5666 = vmatmul.mubr.bf16.gmra.mrb[68].mxu1 %v9903_v47 }
 0x3ca   :  { %6983 = vmatmul.mubr.bf16.gmra.mrb[4].mxu0 %v9904_v48  ;;  %5673 = vmatprep.mubr.bf16.mxu1 %v9905_v49  ;;  %v9981_v49 = vld [vmem:[%s12848_s0 + $0x10f8] ss:$72 sps:$4 sm:$0xff]  }
 0x3cb   :  { %6990 = vmatprep.mubr.bf16.mxu0 %v9907_v50 }
 0x3d1   :  { %5674 = vmatmul.mubr.bf16.gmra.mrb[72].mxu1 %v9909_v51  ;;  %v9982_v51 = vld [vmem:[%s12848_s0 + $0x820] ss:$72 sps:$4 sm:$0xff]  }
 0x3d2   :  { %6991 = vmatmul.mubr.bf16.gmra.mrb[8].mxu0 %v9910_v52  ;;  %5681 = vmatprep.mubr.bf16.mxu1 %v9911_v53  ;;  %v9983_v52 = vld [vmem:[%s12848_s0 + $0x118c] ss:$72 sps:$4 sm:$0xff]  }
 0x3d3   :  { %6998 = vmatprep.mubr.bf16.mxu0 %v9913_v54  ;;  %v9985_v54 = vld [vmem:[%s12848_s0 + $0x8b4] ss:$72 sps:$4 sm:$0xff]  }
 0x3d9   :  { %5682 = vmatmul.mubr.bf16.gmra.mrb[76].mxu1 %v9915_v55 }
 0x3da   :  { %6999 = vmatmul.mubr.bf16.gmra.mrb[12].mxu0 %v9916_v56  ;;  %5689 = vmatprep.mubr.bf16.mxu1 %v9917_v57  ;;  %v9987_v57 = vld [vmem:[%s12848_s0 + $0x1188] ss:$72 sps:$4 sm:$0xff]  }
 0x3db   :  { %7006 = vmatprep.mubr.bf16.mxu0 %v9919_v58 }
 0x3e1   :  { %5690 = vmatmul.mubr.bf16.gmra.mrb[80].mxu1 %v9921_v59  ;;  %v9988_v59 = vld [vmem:[%s12848_s0 + $0x8b0] ss:$72 sps:$4 sm:$0xff]  }
 0x3e2   :  { %7007 = vmatmul.mubr.bf16.gmra.mrb[16].mxu0 %v9922_v60  ;;  %5697 = vmatprep.mubr.bf16.mxu1 %v9923_v61  ;;  %v9991_v60 = vld [vmem:[%s12848_s0 + $0x924] ss:$72 sps:$4 sm:$0xff]  }
 0x3e3   :  { %7014 = vmatprep.mubr.bf16.mxu0 %v9925_v62  ;;  %v9992_v62 = vld [vmem:[%s12848_s0 + $0x944] ss:$72 sps:$4 sm:$0xff]  }
 0x3e9   :  { %5698 = vmatmul.mubr.bf16.gmra.mrb[84].mxu1 %v9927_v63 }
 0x3ea   :  { %7015 = vmatmul.mubr.bf16.gmra.mrb[20].mxu0 %v9928_v1  ;;  %5705 = vmatprep.mubr.bf16.mxu1 %v9929_v2  ;;  %v9989_v2 = vld [vmem:[%s12848_s0 + $0x920] ss:$72 sps:$4 sm:$0xff]  }
 0x3eb   :  { %7022 = vmatprep.mubr.bf16.mxu0 %v9931_v3 }
 0x3f1   :  { %5706 = vmatmul.mubr.bf16.gmra.mrb[88].mxu1 %v9933_v4  ;;  %v9994_v4 = vld [vmem:[%s12848_s0 + $0x940] ss:$72 sps:$4 sm:$0xff]  }
 0x3f2   :  { %7023 = vmatmul.mubr.bf16.gmra.mrb[24].mxu0 %v9934_v5  ;;  %5713 = vmatprep.mubr.bf16.mxu1 %v9935_v6  ;;  %v9995_v5 = vld [vmem:[%s12848_s0 + $0x9b4] ss:$72 sps:$4 sm:$0xff]  }
 0x3f3   :  { %7030 = vmatprep.mubr.bf16.mxu0 %v9937_v7  ;;  %v9997_v7 = vld [vmem:[%s12848_s0 + $0x9d4] ss:$72 sps:$4 sm:$0xff]  }
 0x3f9   :  { %5714 = vmatmul.mubr.bf16.gmra.mrb[92].mxu1 %v9939_v8 }
 0x3fa   :  { %7031 = vmatmul.mubr.bf16.gmra.mrb[28].mxu0 %v9940_v9  ;;  %5721 = vmatprep.mubr.bf16.mxu1 %v9941_v10  ;;  %v9999_v10 = vld [vmem:[%s12848_s0 + $0x9b0] ss:$72 sps:$4 sm:$0xff]  }
 0x3fb   :  { %7038 = vmatprep.mubr.bf16.mxu0 %v9943_v11 }
 0x401   :  { %5722 = vmatmul.mubr.bf16.gmra.mrb[96].mxu1 %v9945_v12  ;;  %v10000_v12 = vld [vmem:[%s12848_s0 + $0x9d0] ss:$72 sps:$4 sm:$0xff]  }
 0x402   :  { %7039 = vmatmul.mubr.bf16.gmra.mrb[32].mxu0 %v9946_v13  ;;  %5729 = vmatprep.mubr.bf16.mxu1 %v9947_v14  ;;  %v10001_v13 = vld [vmem:[%s12848_s0 + $0xa44] ss:$72 sps:$4 sm:$0xff]  }
 0x403   :  { %7046 = vmatprep.mubr.bf16.mxu0 %v9949_v0  ;;  %v10003_v0 = vld [vmem:[%s12848_s0 + $0xa64] ss:$72 sps:$4 sm:$0xff]  }
 0x409   :  { %5730 = vmatmul.mubr.bf16.gmra.mrb[100].mxu1 %v9951_v15 }
 0x40a   :  { %7047 = vmatmul.mubr.bf16.gmra.mrb[36].mxu0 %v9952_v16  ;;  %5737 = vmatprep.mubr.bf16.mxu1 %v9953_v17  ;;  %v10005_v17 = vld [vmem:[%s12848_s0 + $0xa40] ss:$72 sps:$4 sm:$0xff]  }
 0x40b   :  { %7054 = vmatprep.mubr.bf16.mxu0 %v9955_v18 }
 0x411   :  { %5738 = vmatmul.mubr.bf16.gmra.mrb[104].mxu1 %v9957_v19  ;;  %v10006_v19 = vld [vmem:[%s12848_s0 + $0xa60] ss:$72 sps:$4 sm:$0xff]  }
 0x412   :  { %7055 = vmatmul.mubr.bf16.gmra.mrb[40].mxu0 %v9958_v20  ;;  %5745 = vmatprep.mubr.bf16.mxu1 %v9959_v21  ;;  %v10007_v20 = vld [vmem:[%s12848_s0 + $0xad4] ss:$72 sps:$4 sm:$0xff]  }
 0x413   :  { %7062 = vmatprep.mubr.bf16.mxu0 %v9961_v22  ;;  %v10009_v22 = vld [vmem:[%s12848_s0 + $0xaf4] ss:$72 sps:$4 sm:$0xff]  }
 0x414   :  { %v12244_v23 = vpop.f32.mrb[0].mxu1 }
 0x415   :  { %v5533_v24 = vpop.f32.mrb[1].mxu1 }
 0x416   :  { %v12249_v26 = vpop.f32.mrb[2].mxu1 }
 0x417   :  { %v5536_v29 = vpop.f32.mrb[3].mxu1 }
 0x418   :  { %v10012_v29 = vld [vmem:[%s12848_s0 + $0xaf0] ss:$72 sps:$4 sm:$0xff]  }
 0x419   :  { %5746 = vmatmul.mubr.bf16.gmra.mrb[108].mxu1 %v9963_v25 }
 0x41a   :  { %7063 = vmatmul.mubr.bf16.gmra.mrb[44].mxu0 %v9964_v27  ;;  %5753 = vmatprep.mubr.bf16.mxu1 %v9965_v28  ;;  %v10011_v27 = vld [vmem:[%s12848_s0 + $0xad0] ss:$72 sps:$4 sm:$0xff]  }
 0x41b   :  { %7070 = vmatprep.mubr.bf16.mxu0 %v9967_v30  ;;  %v10013_v30 = vld [vmem:[%s12848_s0 + $0xb64] ss:$72 sps:$4 sm:$0xff]  }
 0x41c   :  { %v12260_v31 = vpop.f32.mrb[4].mxu1 }
 0x41d   :  { %v5541_v32 = vpop.f32.mrb[5].mxu1 }
 0x41e   :  { %v12265_v34 = vpop.f32.mrb[6].mxu1 }
 0x41f   :  { %v5544_v37 = vpop.f32.mrb[7].mxu1 }
 0x420   :  { %v10017_v37 = vld [vmem:[%s12848_s0 + $0xb60] ss:$72 sps:$4 sm:$0xff]  }
 0x421   :  { %5754 = vmatmul.mubr.bf16.gmra.mrb[112].mxu1 %v9969_v33  ;;  %v10015_v33 = vld [vmem:[%s12848_s0 + $0xb84] ss:$72 sps:$4 sm:$0xff]  }
 0x422   :  { %7071 = vmatmul.mubr.bf16.gmra.mrb[48].mxu0 %v9970_v35  ;;  %5761 = vmatprep.mubr.bf16.mxu1 %v9971_v36 }
 0x423   :  { %7078 = vmatprep.mubr.bf16.mxu0 %v9973_v38 }
 0x424   :  { %v12276_v39 = vpop.f32.mrb[8].mxu1 }
 0x425   :  { %v5549_v40 = vpop.f32.mrb[9].mxu1 }
 0x426   :  { %v12281_v42 = vpop.f32.mrb[10].mxu1  ;;  %v10018_v40 = vld [vmem:[%s12848_s0 + $0xb80] ss:$72 sps:$4 sm:$0xff]  }
 0x427   :  { %v5552_v45 = vpop.f32.mrb[11].mxu1 }
 0x429   :  { %5762 = vmatmul.mubr.bf16.gmra.mrb[116].mxu1 %v9975_v41  ;;  %v10019_v41 = vld [vmem:[%s12848_s0 + $0xbf4] ss:$72 sps:$4 sm:$0xff]  }
 0x42a   :  { %7079 = vmatmul.mubr.bf16.gmra.mrb[52].mxu0 %v9976_v43  ;;  %5769 = vmatprep.mubr.bf16.mxu1 %v9977_v44  ;;  %v10021_v44 = vld [vmem:[%s12848_s0 + $0xc14] ss:$72 sps:$4 sm:$0xff]  }
 0x42b   :  { %7086 = vmatprep.mubr.bf16.mxu0 %v9979_v46 }
 0x42c   :  { %v12292_v47 = vpop.f32.mrb[12].mxu1 }
 0x42d   :  { %v5557_v48 = vpop.f32.mrb[13].mxu1 }
 0x42e   :  { %v12297_v50 = vpop.f32.mrb[14].mxu1  ;;  %v10023_v48 = vld [vmem:[%s12848_s0 + $0xbf0] ss:$72 sps:$4 sm:$0xff]  }
 0x42f   :  { %v5560_v53 = vpop.f32.mrb[15].mxu1 }
 0x431   :  { %5770 = vmatmul.mubr.bf16.gmra.mrb[120].mxu1 %v9981_v49 }
 0x432   :  { %7087 = vmatmul.mubr.bf16.gmra.mrb[56].mxu0 %v9982_v51  ;;  %5777 = vmatprep.mubr.bf16.mxu1 %v9983_v52  ;;  %v10024_v51 = vld [vmem:[%s12848_s0 + $0xc10] ss:$72 sps:$4 sm:$0xff]   ;;  %v10025_v52 = vld [vmem:[%s12848_s0 + $0xc84] ss:$72 sps:$4 sm:$0xff]  }
 0x433   :  { %7094 = vmatprep.mubr.bf16.mxu0 %v9985_v54  ;;  %v10027_v54 = vld [vmem:[%s12848_s0 + $0xca4] ss:$72 sps:$4 sm:$0xff]  }
 0x434   :  { %v12308_v55 = vpop.f32.mrb[16].mxu1 }
 0x435   :  { %v5565_v56 = vpop.f32.mrb[17].mxu1 }
 0x436   :  { %v12313_v58 = vpop.f32.mrb[18].mxu1 }
 0x437   :  { %v5568_v61 = vpop.f32.mrb[19].mxu1 }
 0x438   :  { %v10030_v61 = vld [vmem:[%s12848_s0 + $0xca0] ss:$72 sps:$4 sm:$0xff]  }
 0x439   :  { %5778 = vmatmul.mubr.bf16.gmra.mrb[124].mxu1 %v9987_v57 }
 0x43a   :  { %7095 = vmatmul.mubr.bf16.gmra.mrb[60].mxu0 %v9988_v59  ;;  %5946 = vmatprep.mubr.bf16.mxu1 %v9991_v60  ;;  %v10029_v59 = vld [vmem:[%s12848_s0 + $0xc80] ss:$72 sps:$4 sm:$0xff]  }
 0x43b   :  { %7102 = vmatprep.mubr.bf16.mxu0 %v9992_v62  ;;  %v10031_v62 = vld [vmem:[%s12848_s0 + $0xd14] ss:$72 sps:$4 sm:$0xff]  }
 0x43c   :  { %v12324_v63 = vpop.f32.mrb[20].mxu1 }
 0x43d   :  { %v5573_v1 = vpop.f32.mrb[21].mxu1 }
 0x43e   :  { %v12329_v3 = vpop.f32.mrb[22].mxu1 }
 0x43f   :  { %v5576_v6 = vpop.f32.mrb[23].mxu1 }
 0x440   :  { %v10035_v6 = vld [vmem:[%s12848_s0 + $0xd10] ss:$72 sps:$4 sm:$0xff]  }
 0x441   :  { %5947 = vmatmul.mubr.bf16.vlgmr.msra.gmra.mrb[64].mxu1 %v9989_v2  ;;  %v10033_v2 = vld [vmem:[%s12848_s0 + $0xd34] ss:$72 sps:$4 sm:$0xff]  }
 0x442   :  { %7103 = vmatmul.mubr.bf16.gmra.mrb[64].mxu0 %v9994_v4  ;;  %5954 = vmatprep.mubr.bf16.mxu1 %v9995_v5 }
 0x443   :  { %7110 = vmatprep.mubr.bf16.mxu0 %v9997_v7 }
 0x444   :  { %v12340_v8 = vpop.f32.mrb[24].mxu1 }
 0x445   :  { %v5581_v9 = vpop.f32.mrb[25].mxu1 }
 0x446   :  { %v12345_v11 = vpop.f32.mrb[26].mxu1  ;;  %v10036_v9 = vld [vmem:[%s12848_s0 + $0xd30] ss:$72 sps:$4 sm:$0xff]  }
 0x447   :  { %v5584_v14 = vpop.f32.mrb[27].mxu1 }
 0x449   :  { %5955 = vmatmul.mubr.bf16.gmra.mrb[68].mxu1 %v9999_v10  ;;  %v10037_v10 = vld [vmem:[%s12848_s0 + $0xda4] ss:$72 sps:$4 sm:$0xff]  }
 0x44a   :  { %7111 = vmatmul.mubr.bf16.gmra.mrb[68].mxu0 %v10000_v12  ;;  %5962 = vmatprep.mubr.bf16.mxu1 %v10001_v13  ;;  %v10039_v13 = vld [vmem:[%s12848_s0 + $0xdc4] ss:$72 sps:$4 sm:$0xff]  }
 0x44b   :  { %7118 = vmatprep.mubr.bf16.mxu0 %v10003_v0 }
 0x44c   :  { %v12356_v15 = vpop.f32.mrb[28].mxu1 }
 0x44d   :  { %v5589_v16 = vpop.f32.mrb[29].mxu1 }
 0x44e   :  { %v12361_v18 = vpop.f32.mrb[30].mxu1  ;;  %v10041_v16 = vld [vmem:[%s12848_s0 + $0xda0] ss:$72 sps:$4 sm:$0xff]  }
 0x44f   :  { %v5592_v21 = vpop.f32.mrb[31].mxu1 }
 0x451   :  { %5963 = vmatmul.mubr.bf16.gmra.mrb[72].mxu1 %v10005_v17 }
 0x452   :  { %7119 = vmatmul.mubr.bf16.gmra.mrb[72].mxu0 %v10006_v19  ;;  %5970 = vmatprep.mubr.bf16.mxu1 %v10007_v20  ;;  %v10042_v19 = vld [vmem:[%s12848_s0 + $0xdc0] ss:$72 sps:$4 sm:$0xff]   ;;  %v10043_v20 = vld [vmem:[%s12848_s0 + $0xe34] ss:$72 sps:$4 sm:$0xff]  }
 0x453   :  { %7126 = vmatprep.mubr.bf16.mxu0 %v10009_v22  ;;  %v10045_v22 = vld [vmem:[%s12848_s0 + $0xe54] ss:$72 sps:$4 sm:$0xff]  }
 0x454   :  { %v12372_v24 = vpop.f32.mrb[32].mxu1 }
 0x455   :  { %v5597_v25 = vpop.f32.mrb[33].mxu1 }
 0x456   :  { %v12377_v28 = vpop.f32.mrb[34].mxu1 }
 0x457   :  { %v5600_v32 = vpop.f32.mrb[35].mxu1 }
 0x458   :  { %v10048_v32 = vld [vmem:[%s12848_s0 + $0xe50] ss:$72 sps:$4 sm:$0xff]  }
 0x459   :  { %5971 = vmatmul.mubr.bf16.gmra.mrb[76].mxu1 %v10011_v27 }
 0x45a   :  { %7127 = vmatmul.mubr.bf16.gmra.mrb[76].mxu0 %v10012_v29  ;;  %5978 = vmatprep.mubr.bf16.mxu1 %v10013_v30  ;;  %v10047_v29 = vld [vmem:[%s12848_s0 + $0xe30] ss:$72 sps:$4 sm:$0xff]  }
 0x45b   :  { %7134 = vmatprep.mubr.bf16.mxu0 %v10015_v33  ;;  %v10049_v33 = vld [vmem:[%s12848_s0 + $0xec4] ss:$72 sps:$4 sm:$0xff]  }
 0x45c   :  { %v12388_v35 = vpop.f32.mrb[36].mxu1 }
 0x45d   :  { %v5605_v36 = vpop.f32.mrb[37].mxu1 }
 0x45e   :  { %v12393_v38 = vpop.f32.mrb[38].mxu1 }
 0x45f   :  { %v5608_v43 = vpop.f32.mrb[39].mxu1 }
 0x460   :  { %v10053_v43 = vld [vmem:[%s12848_s0 + $0xec0] ss:$72 sps:$4 sm:$0xff]  }
 0x461   :  { %5979 = vmatmul.mubr.bf16.gmra.mrb[80].mxu1 %v10017_v37  ;;  %v10051_v37 = vld [vmem:[%s12848_s0 + $0xee4] ss:$72 sps:$4 sm:$0xff]  }
 0x462   :  { %7135 = vmatmul.mubr.bf16.gmra.mrb[80].mxu0 %v10018_v40  ;;  %5986 = vmatprep.mubr.bf16.mxu1 %v10019_v41 }
 0x463   :  { %7142 = vmatprep.mubr.bf16.mxu0 %v10021_v44 }
 0x464   :  { %v12404_v45 = vpop.f32.mrb[40].mxu1 }
 0x465   :  { %v5613_v46 = vpop.f32.mrb[41].mxu1 }
 0x466   :  { %v12409_v49 = vpop.f32.mrb[42].mxu1  ;;  %v10054_v46 = vld [vmem:[%s12848_s0 + $0xee0] ss:$72 sps:$4 sm:$0xff]  }
 0x467   :  { %v5616_v53 = vpop.f32.mrb[43].mxu1 }
 0x468   :  { %v12503_v53 = vld [vmem:[%s12849_s2] ss:$0 sm:$0xff] }
 0x469   :  { %5987 = vmatmul.mubr.bf16.gmra.mrb[84].mxu1 %v10023_v48  ;;  %v10055_v48 = vld [vmem:[%s12848_s0 + $0xf54] ss:$72 sps:$4 sm:$0xff]  }
 0x46a   :  { %7143 = vmatmul.mubr.bf16.gmra.mrb[84].mxu0 %v10024_v51  ;;  %5994 = vmatprep.mubr.bf16.mxu1 %v10025_v52  ;;  %v10057_v52 = vld [vmem:[%s12848_s0 + $0xf74] ss:$72 sps:$4 sm:$0xff]  }
 0x46b   :  { %7150 = vmatprep.mubr.bf16.mxu0 %v10027_v54  ;;  %v8052_v54 = vadd.f32 %v12503_v53, %v12244_v23  ;;  %v10063_v23 = vld [vmem:[%s12848_s0 + $0x1004] ss:$72 sps:$4 sm:$0xff]  }
 0x46c   :  { %v12420_v56 = vpop.f32.mrb[44].mxu1 }
 0x46d   :  { %v5621_v57 = vpop.f32.mrb[45].mxu1 }
 0x46e   :  { %v12425_v60 = vpop.f32.mrb[46].mxu1 }
 0x46f   :  { %v5624_v1 = vpop.f32.mrb[47].mxu1 }
 0x471   :  { %5995 = vmatmul.mubr.bf16.gmra.mrb[88].mxu1 %v10029_v59  ;;  %v10059_v59 = vld [vmem:[%s12848_s0 + $0xf50] ss:$72 sps:$4 sm:$0xff]  }
 0x472   :  { %7151 = vmatmul.mubr.bf16.gmra.mrb[88].mxu0 %v10030_v61  ;;  %6002 = vmatprep.mubr.bf16.mxu1 %v10031_v62  ;;  %v8054_v61 = vadd.f32 %v12503_v53, %v12249_v26 }
 0x473   :  { %7158 = vmatprep.mubr.bf16.mxu0 %v10033_v2  ;;  %v10060_v2 = vld [vmem:[%s12848_s0 + $0xf70] ss:$72 sps:$4 sm:$0xff]  }
 0x474   :  { %v12436_v4 = vpop.f32.mrb[48].mxu1 }
 0x475   :  { %v5629_v5 = vpop.f32.mrb[49].mxu1 }
 0x476   :  { %v12441_v7 = vpop.f32.mrb[50].mxu1  ;;  %v10061_v5 = vld [vmem:[%s12848_s0 + $0xfe4] ss:$72 sps:$4 sm:$0xff]  }
 0x477   :  { %v5632_v12 = vpop.f32.mrb[51].mxu1 }
 0x479   :  { %6003 = vmatmul.mubr.bf16.gmra.mrb[92].mxu1 %v10035_v6 }
 0x47a   :  { %7159 = vmatmul.mubr.bf16.gmra.mrb[92].mxu0 %v10036_v9  ;;  %6010 = vmatprep.mubr.bf16.mxu1 %v10037_v10  ;;  %v8056_v10 = vadd.f32 %v12503_v53, %v12260_v31  ;;  %v10069_v31 = vld [vmem:[%s12848_s0 + $0x1094] ss:$72 sps:$4 sm:$0xff]  }
 0x47b   :  { %7166 = vmatprep.mubr.bf16.mxu0 %v10039_v13  ;;  %v10065_v13 = vld [vmem:[%s12848_s0 + $0xfe0] ss:$72 sps:$4 sm:$0xff]  }
 0x47c   :  { %v12452_v14 = vpop.f32.mrb[52].mxu1 }
 0x47d   :  { %v5637_v0 = vpop.f32.mrb[53].mxu1 }
 0x47e   :  { %v12457_v17 = vpop.f32.mrb[54].mxu1  ;;  %v8058_v0 = vadd.f32 %v12503_v53, %v12265_v34 }
 0x47f   :  { %v5640_v21 = vpop.f32.mrb[55].mxu1 }
 0x480   :  { %v10067_v21 = vld [vmem:[%s12848_s0 + $0x1074] ss:$72 sps:$4 sm:$0xff]  }
 0x481   :  { %6011 = vmatmul.mubr.bf16.gmra.mrb[96].mxu1 %v10041_v16 }
 0x482   :  { %7167 = vmatmul.mubr.bf16.gmra.mrb[96].mxu0 %v10042_v19  ;;  %6018 = vmatprep.mubr.bf16.mxu1 %v10043_v20  ;;  %v10066_v20 = vld [vmem:[%s12848_s0 + $0x1000] ss:$72 sps:$4 sm:$0xff]  }
 0x483   :  { %7174 = vmatprep.mubr.bf16.mxu0 %v10045_v22 }
 0x484   :  { %v12468_v25 = vpop.f32.mrb[56].mxu1 }
 0x485   :  { %v5645_v27 = vpop.f32.mrb[57].mxu1 }
 0x486   :  { %v12473_v30 = vpop.f32.mrb[58].mxu1 }
 0x487   :  { %v5648_v36 = vpop.f32.mrb[59].mxu1 }
 0x488   :  { %v8062_v36 = vadd.f32 %v12503_v53, %v12281_v42 }
 0x489   :  { %6019 = vmatmul.mubr.bf16.gmra.mrb[100].mxu1 %v10047_v29  ;;  %v8060_v29 = vadd.f32 %v12503_v53, %v12276_v39  ;;  %v10075_v39 = vld [vmem:[%s12848_s0 + $0x1124] ss:$72 sps:$4 sm:$0xff]  }
 0x48a   :  { %7175 = vmatmul.mubr.bf16.gmra.mrb[100].mxu0 %v10048_v32  ;;  %6026 = vmatprep.mubr.bf16.mxu1 %v10049_v33  ;;  %v10071_v33 = vld [vmem:[%s12848_s0 + $0x1070] ss:$72 sps:$4 sm:$0xff]  }
 0x48b   :  { %7182 = vmatprep.mubr.bf16.mxu0 %v10051_v37 }
 0x48c   :  { %v12484_v40 = vpop.f32.mrb[60].mxu1 }
 0x48d   :  { %v5653_v41 = vpop.f32.mrb[61].mxu1 }
 0x48e   :  { %v12489_v44 = vpop.f32.mrb[62].mxu1 }
 0x48f   :  { %v5656_v51 = vpop.f32.mrb[63].mxu1 }
 0x491   :  { %6027 = vmatmul.mubr.bf16.gmra.mrb[104].mxu1 %v10053_v43  ;;  %v10072_v43 = vld [vmem:[%s12848_s0 + $0x1090] ss:$72 sps:$4 sm:$0xff]  }
 0x492   :  { %7183 = vmatmul.mubr.bf16.gmra.mrb[104].mxu0 %v10054_v46  ;;  %6034 = vmatprep.mubr.bf16.mxu1 %v10055_v48  ;;  %v10073_v46 = vld [vmem:[%s12848_s0 + $0x1104] ss:$72 sps:$4 sm:$0xff]  }
 0x493   :  { %7190 = vmatprep.mubr.bf16.mxu0 %v10057_v52  ;;  %v8064_v52 = vadd.f32 %v12503_v53, %v12292_v47  ;;  %v10081_v47 = vld [vmem:[%s12848_s0 + $0x11b4] ss:$72 sps:$4 sm:$0xff]  }
 0x495   :  { %v6976_v57 = vpop.f32.mrb[0].mxu0 }
 0x496   :  { %v8053_v62 = vadd.f32 %v8052_v54, %v6976_v57  ;;  %v6978_v1 = vpop.f32.mrb[1].mxu0  ;;  %v10077_v57 = vld [vmem:[%s12848_s0 + $0x1100] ss:$72 sps:$4 sm:$0xff]  }
 0x497   :  { %v6979_v6 = vpop.f32.mrb[2].mxu0  ;;  %v10078_v1 = vld [vmem:[%s12848_s0 + $0x1120] ss:$72 sps:$4 sm:$0xff]  }
 0x498   :  { %7231 = vst [vmem:[%s12850_s3] sm:$0xff] %v8053_v62  ;;  %v8055_v26 = vadd.f32 %v8054_v61, %v6979_v6  ;;  %v6981_v9 = vpop.f32.mrb[3].mxu0 }
 0x499   :  { %6035 = vmatmul.mubr.bf16.gmra.mrb[108].mxu1 %v10059_v59  ;;  %v8066_v59 = vadd.f32 %v12503_v53, %v12297_v50  ;;  %v10083_v9 = vld [vmem:[%s12848_s0 + $0x1190] ss:$72 sps:$4 sm:$0xff]  }
 0x49a   :  { %7232 = vst [vmem:[%s12850_s3 + $0x8] sm:$0xff] %v8055_v26  ;;  %7191 = vmatmul.mubr.bf16.gmra.mrb[108].mxu0 %v10060_v2  ;;  %6042 = vmatprep.mubr.bf16.mxu1 %v10061_v5  ;;  %v10079_v2 = vld [vmem:[%s12848_s0 + $0x1194] ss:$72 sps:$4 sm:$0xff]  }
 0x49b   :  { %7198 = vmatprep.mubr.bf16.mxu0 %v10063_v23  ;;  %v8068_v23 = vadd.f32 %v12503_v53, %v12308_v55 }
 0x49d   :  { %v6984_v12 = vpop.f32.mrb[4].mxu0 }
 0x49e   :  { %v8057_v16 = vadd.f32 %v8056_v10, %v6984_v12  ;;  %v6986_v19 = vpop.f32.mrb[5].mxu0  ;;  %v8070_v10 = vadd.f32 %v12503_v53, %v12313_v58  ;;  %v8072_v58 = vadd.f32 %v12503_v53, %v12324_v63  ;;  %v8076_v63 = vadd.f32 %v12503_v53, %v12340_v8 }
 0x49f   :  { %v6987_v22 = vpop.f32.mrb[6].mxu0  ;;  %v8080_v8 = vadd.f32 %v12503_v53, %v12356_v15  ;;  %v8084_v15 = vadd.f32 %v12503_v53, %v12372_v24  ;;  %v8088_v24 = vadd.f32 %v12503_v53, %v12388_v35  ;;  %v8092_v35 = vadd.f32 %v12503_v53, %v12404_v45 }
 0x4a0   :  { %7233 = vst [vmem:[%s12850_s3 + $0x10] sm:$0xff] %v8057_v16  ;;  %v8059_v34 = vadd.f32 %v8058_v0, %v6987_v22  ;;  %v6989_v27 = vpop.f32.mrb[7].mxu0  ;;  %v10084_v0 = vld [vmem:[%s12848_s0 + $0x11b0] ss:$72 sps:$4 sm:$0xff]   ;;  %v8096_v45 = vadd.f32 %v12503_v53, %v12420_v56  ;;  %v8100_v56 = vadd.f32 %v12503_v53, %v12436_v4  ;;  %v8104_v4 = vadd.f32 %v12503_v53, %v12452_v14 }
 0x4a1   :  { %6043 = vmatmul.mubr.bf16.gmra.mrb[112].mxu1 %v10065_v13  ;;  %v8108_v14 = vadd.f32 %v12503_v53, %v12468_v25  ;;  %v8112_v25 = vadd.f32 %v12503_v53, %v12484_v40 }
 0x4a2   :  { %7234 = vst [vmem:[%s12850_s3 + $0x18] sm:$0xff] %v8059_v34  ;;  %7199 = vmatmul.mubr.bf16.gmra.mrb[112].mxu0 %v10066_v20  ;;  %6050 = vmatprep.mubr.bf16.mxu1 %v10067_v21  ;;  %v8074_v21 = vadd.f32 %v12503_v53, %v12329_v3  ;;  %v8078_v3 = vadd.f32 %v12503_v53, %v12345_v11 }
 0x4a3   :  { %7206 = vmatprep.mubr.bf16.mxu0 %v10069_v31  ;;  %v8082_v11 = vadd.f32 %v12503_v53, %v12361_v18  ;;  %v8086_v18 = vadd.f32 %v12503_v53, %v12377_v28  ;;  %v8090_v28 = vadd.f32 %v12503_v53, %v12393_v38  ;;  %v8094_v38 = vadd.f32 %v12503_v53, %v12409_v49 }
 0x4a4   :  { %v8098_v49 = vadd.f32 %v12503_v53, %v12425_v60  ;;  %v8102_v60 = vadd.f32 %v12503_v53, %v12441_v7  ;;  %v8106_v7 = vadd.f32 %v12503_v53, %v12457_v17  ;;  %v8110_v17 = vadd.f32 %v12503_v53, %v12473_v30 }
 0x4a5   :  { %v6992_v32 = vpop.f32.mrb[8].mxu0  ;;  %v8114_v30 = vadd.f32 %v12503_v53, %v12489_v44 }
 0x4a6   :  { %v8061_v37 = vadd.f32 %v8060_v29, %v6992_v32  ;;  %v6994_v41 = vpop.f32.mrb[9].mxu0 }
 0x4a7   :  { %v6995_v48 = vpop.f32.mrb[10].mxu0 }
 0x4a8   :  { %7235 = vst [vmem:[%s12850_s3 + $0x20] sm:$0xff] %v8061_v37  ;;  %v8063_v42 = vadd.f32 %v8062_v36, %v6995_v48  ;;  %v6997_v51 = vpop.f32.mrb[11].mxu0 }
 0x4a9   :  { %6051 = vmatmul.mubr.bf16.gmra.mrb[116].mxu1 %v10071_v33 }
 0x4aa   :  { %7236 = vst [vmem:[%s12850_s3 + $0x28] sm:$0xff] %v8063_v42  ;;  %7207 = vmatmul.mubr.bf16.gmra.mrb[116].mxu0 %v10072_v43  ;;  %6058 = vmatprep.mubr.bf16.mxu1 %v10073_v46 }
 0x4ab   :  { %7214 = vmatprep.mubr.bf16.mxu0 %v10075_v39 }
 0x4ad   :  { %v7000_v54 = vpop.f32.mrb[12].mxu0 }
 0x4ae   :  { %v8065_v61 = vadd.f32 %v8064_v52, %v7000_v54  ;;  %v7002_v62 = vpop.f32.mrb[13].mxu0 }
 0x4af   :  { %v7003_v5 = vpop.f32.mrb[14].mxu0 }
 0x4b0   :  { %7237 = vst [vmem:[%s12850_s3 + $0x30] sm:$0xff] %v8065_v61  ;;  %v8067_v50 = vadd.f32 %v8066_v59, %v7003_v5  ;;  %v7005_v6 = vpop.f32.mrb[15].mxu0 }
 0x4b1   :  { %6059 = vmatmul.mubr.bf16.gmra.mrb[120].mxu1 %v10077_v57 }
 0x4b2   :  { %7238 = vst [vmem:[%s12850_s3 + $0x38] sm:$0xff] %v8067_v50  ;;  %7215 = vmatmul.mubr.bf16.gmra.mrb[120].mxu0 %v10078_v1  ;;  %6066 = vmatprep.mubr.bf16.mxu1 %v10079_v2 }
 0x4b3   :  { %7222 = vmatprep.mubr.bf16.mxu0 %v10081_v47 }
 0x4b5   :  { %v7008_v26 = vpop.f32.mrb[16].mxu0 }
 0x4b6   :  { %v8069_v12 = vadd.f32 %v8068_v23, %v7008_v26  ;;  %v7010_v13 = vpop.f32.mrb[17].mxu0 }
 0x4b7   :  { %v7011_v16 = vpop.f32.mrb[18].mxu0 }
 0x4b8   :  { %7239 = vst [vmem:[%s12850_s3 + $0x40] sm:$0xff] %v8069_v12  ;;  %v8071_v55 = vadd.f32 %v8070_v10, %v7011_v16  ;;  %v7013_v19 = vpop.f32.mrb[19].mxu0 }
 0x4b9   :  { %6067 = vmatmul.mubr.bf16.gmra.mrb[124].mxu1 %v10083_v9 }
 0x4ba   :  { %7240 = vst [vmem:[%s12850_s3 + $0x48] sm:$0xff] %v8071_v55  ;;  %7223 = vmatmul.mubr.bf16.gmra.mrb[124].mxu0 %v10084_v0 }
 0x4bd   :  { %v7016_v20 = vpop.f32.mrb[20].mxu0 }
 0x4be   :  { %v8073_v22 = vadd.f32 %v8072_v58, %v7016_v20  ;;  %v7018_v31 = vpop.f32.mrb[21].mxu0 }
 0x4bf   :  { %v7019_v34 = vpop.f32.mrb[22].mxu0 }
 0x4c0   :  { %7241 = vst [vmem:[%s12850_s3 + $0x50] sm:$0xff] %v8073_v22  ;;  %v8075_v27 = vadd.f32 %v8074_v21, %v7019_v34  ;;  %v7021_v29 = vpop.f32.mrb[23].mxu0 }
 0x4c2   :  { %7242 = vst [vmem:[%s12850_s3 + $0x58] sm:$0xff] %v8075_v27 }
 0x4c5   :  { %v7024_v32 = vpop.f32.mrb[24].mxu0 }
 0x4c6   :  { %v8077_v33 = vadd.f32 %v8076_v63, %v7024_v32  ;;  %v7026_v36 = vpop.f32.mrb[25].mxu0 }
 0x4c7   :  { %v7027_v37 = vpop.f32.mrb[26].mxu0 }
 0x4c8   :  { %7243 = vst [vmem:[%s12850_s3 + $0x60] sm:$0xff] %v8077_v33  ;;  %v8079_v41 = vadd.f32 %v8078_v3, %v7027_v37  ;;  %v7029_v43 = vpop.f32.mrb[27].mxu0 }
 0x4ca   :  { %7244 = vst [vmem:[%s12850_s3 + $0x68] sm:$0xff] %v8079_v41 }
 0x4cd   :  { %v7032_v46 = vpop.f32.mrb[28].mxu0 }
 0x4ce   :  { %v8081_v48 = vadd.f32 %v8080_v8, %v7032_v46  ;;  %v7034_v39 = vpop.f32.mrb[29].mxu0 }
 0x4cf   :  { %v7035_v42 = vpop.f32.mrb[30].mxu0 }
 0x4d0   :  { %7245 = vst [vmem:[%s12850_s3 + $0x70] sm:$0xff] %v8081_v48  ;;  %v8083_v51 = vadd.f32 %v8082_v11, %v7035_v42  ;;  %v7037_v52 = vpop.f32.mrb[31].mxu0 }
 0x4d2   :  { %7246 = vst [vmem:[%s12850_s3 + $0x78] sm:$0xff] %v8083_v51 }
 0x4d5   :  { %v7040_v54 = vpop.f32.mrb[32].mxu0 }
 0x4d6   :  { %v8085_v57 = vadd.f32 %v8084_v15, %v7040_v54  ;;  %v7042_v59 = vpop.f32.mrb[33].mxu0 }
 0x4d7   :  { %v7043_v61 = vpop.f32.mrb[34].mxu0 }
 0x4d8   :  { %7247 = vst [vmem:[%s12850_s3 + $0x80] sm:$0xff] %v8085_v57  ;;  %v8087_v62 = vadd.f32 %v8086_v18, %v7043_v61  ;;  %v7045_v1 = vpop.f32.mrb[35].mxu0 }
 0x4da   :  { %7248 = vst [vmem:[%s12850_s3 + $0x88] sm:$0xff] %v8087_v62 }
 0x4dd   :  { %v7048_v2 = vpop.f32.mrb[36].mxu0 }
 0x4de   :  { %v8089_v5 = vadd.f32 %v8088_v24, %v7048_v2  ;;  %v7050_v47 = vpop.f32.mrb[37].mxu0 }
 0x4df   :  { %v7051_v50 = vpop.f32.mrb[38].mxu0 }
 0x4e0   :  { %7249 = vst [vmem:[%s12850_s3 + $0x90] sm:$0xff] %v8089_v5  ;;  %v8091_v6 = vadd.f32 %v8090_v28, %v7051_v50  ;;  %v7053_v23 = vpop.f32.mrb[39].mxu0 }
 0x4e2   :  { %7250 = vst [vmem:[%s12850_s3 + $0x98] sm:$0xff] %v8091_v6 }
 0x4e5   :  { %v7056_v26 = vpop.f32.mrb[40].mxu0 }
 0x4e6   :  { %v8093_v9 = vadd.f32 %v8092_v35, %v7056_v26  ;;  %v7058_v10 = vpop.f32.mrb[41].mxu0 }
 0x4e7   :  { %v7059_v12 = vpop.f32.mrb[42].mxu0 }
 0x4e8   :  { %7251 = vst [vmem:[%s12850_s3 + $0xa0] sm:$0xff] %v8093_v9  ;;  %v8095_v13 = vadd.f32 %v8094_v38, %v7059_v12  ;;  %v7061_v0 = vpop.f32.mrb[43].mxu0 }
 0x4ea   :  { %7252 = vst [vmem:[%s12850_s3 + $0xa8] sm:$0xff] %v8095_v13 }
 0x4ed   :  { %v7064_v16 = vpop.f32.mrb[44].mxu0 }
 0x4ee   :  { %v8097_v55 = vadd.f32 %v8096_v45, %v7064_v16  ;;  %v7066_v19 = vpop.f32.mrb[45].mxu0 }
 0x4ef   :  { %v7067_v58 = vpop.f32.mrb[46].mxu0 }
 0x4f0   :  { %7253 = vst [vmem:[%s12850_s3 + $0xb0] sm:$0xff] %v8097_v55  ;;  %v8099_v20 = vadd.f32 %v8098_v49, %v7067_v58  ;;  %v7069_v21 = vpop.f32.mrb[47].mxu0 }
 0x4f2   :  { %7254 = vst [vmem:[%s12850_s3 + $0xb8] sm:$0xff] %v8099_v20 }
 0x4f5   :  { %v7072_v22 = vpop.f32.mrb[48].mxu0 }
 0x4f6   :  { %v8101_v31 = vadd.f32 %v8100_v56, %v7072_v22  ;;  %v7074_v34 = vpop.f32.mrb[49].mxu0 }
 0x4f7   :  { %v7075_v27 = vpop.f32.mrb[50].mxu0 }
 0x4f8   :  { %7255 = vst [vmem:[%s12850_s3 + $0xc0] sm:$0xff] %v8101_v31  ;;  %v8103_v29 = vadd.f32 %v8102_v60, %v7075_v27  ;;  %v7077_v63 = vpop.f32.mrb[51].mxu0 }
 0x4fa   :  { %7256 = vst [vmem:[%s12850_s3 + $0xc8] sm:$0xff] %v8103_v29 }
 0x4fd   :  { %v7080_v32 = vpop.f32.mrb[52].mxu0 }
 0x4fe   :  { %v8105_v3 = vadd.f32 %v8104_v4, %v7080_v32  ;;  %v7082_v33 = vpop.f32.mrb[53].mxu0 }
 0x4ff   :  { %v7083_v36 = vpop.f32.mrb[54].mxu0 }
 0x500   :  { %7257 = vst [vmem:[%s12850_s3 + $0xd0] sm:$0xff] %v8105_v3  ;;  %v8107_v37 = vadd.f32 %v8106_v7, %v7083_v36  ;;  %v7085_v41 = vpop.f32.mrb[55].mxu0 }
 0x502   :  { %7258 = vst [vmem:[%s12850_s3 + $0xd8] sm:$0xff] %v8107_v37 }
 0x505   :  { %v7088_v43 = vpop.f32.mrb[56].mxu0 }
 0x506   :  { %v8109_v8 = vadd.f32 %v8108_v14, %v7088_v43  ;;  %v7090_v46 = vpop.f32.mrb[57].mxu0 }
 0x507   :  { %v7091_v11 = vpop.f32.mrb[58].mxu0 }
 0x508   :  { %7259 = vst [vmem:[%s12850_s3 + $0xe0] sm:$0xff] %v8109_v8  ;;  %v8111_v48 = vadd.f32 %v8110_v17, %v7091_v11  ;;  %v7093_v39 = vpop.f32.mrb[59].mxu0 }
 0x50a   :  { %7260 = vst [vmem:[%s12850_s3 + $0xe8] sm:$0xff] %v8111_v48 }
 0x50d   :  { %v7096_v42 = vpop.f32.mrb[60].mxu0 }
 0x50e   :  { %v8113_v51 = vadd.f32 %v8112_v25, %v7096_v42  ;;  %v7098_v52 = vpop.f32.mrb[61].mxu0 }
 0x50f   :  { %v7099_v15 = vpop.f32.mrb[62].mxu0 }
 0x510   :  { %7261 = vst [vmem:[%s12850_s3 + $0xf0] sm:$0xff] %v8113_v51  ;;  %v8115_v54 = vadd.f32 %v8114_v30, %v7099_v15  ;;  %v7101_v18 = vpop.f32.mrb[63].mxu0 }
 0x512   :  { %7262 = vst [vmem:[%s12850_s3 + $0xf8] sm:$0xff] %v8115_v54 }
 0x514   :  { %v5948_v57 = vpop.f32.mrb[64].mxu1 }
 0x515   :  { %v8116_v40 = vadd.f32 %v12503_v53, %v5948_v57  ;;  %v7104_v59 = vpop.f32.mrb[64].mxu0  ;;  %v5950_v61 = vpop.f32.mrb[65].mxu1 }
 0x516   :  { %v7106_v62 = vpop.f32.mrb[65].mxu0  ;;  %v5951_v44 = vpop.f32.mrb[66].mxu1 }
 0x517   :  { %v8117_v1 = vadd.f32 %v8116_v40, %v7104_v59  ;;  %v8118_v24 = vadd.f32 %v12503_v53, %v5951_v44  ;;  %v7107_v2 = vpop.f32.mrb[66].mxu0  ;;  %v5953_v28 = vpop.f32.mrb[67].mxu1 }
 0x518   :  { %v7109_v5 = vpop.f32.mrb[67].mxu0 }
 0x519   :  { %7263 = vst [vmem:[%s12850_s3 + $0x100] sm:$0xff] %v8117_v1  ;;  %v8119_v47 = vadd.f32 %v8118_v24, %v7107_v2 }
 0x51b   :  { %7264 = vst [vmem:[%s12850_s3 + $0x108] sm:$0xff] %v8119_v47 }
 0x51c   :  { %v5956_v50 = vpop.f32.mrb[68].mxu1 }
 0x51d   :  { %v8120_v6 = vadd.f32 %v12503_v53, %v5956_v50  ;;  %v7112_v23 = vpop.f32.mrb[68].mxu0  ;;  %v5958_v35 = vpop.f32.mrb[69].mxu1 }
 0x51e   :  { %v7114_v26 = vpop.f32.mrb[69].mxu0  ;;  %v5959_v38 = vpop.f32.mrb[70].mxu1 }
 0x51f   :  { %v8121_v9 = vadd.f32 %v8120_v6, %v7112_v23  ;;  %v8122_v10 = vadd.f32 %v12503_v53, %v5959_v38  ;;  %v7115_v12 = vpop.f32.mrb[70].mxu0  ;;  %v5961_v13 = vpop.f32.mrb[71].mxu1 }
 0x520   :  { %v7117_v0 = vpop.f32.mrb[71].mxu0 }
 0x521   :  { %7265 = vst [vmem:[%s12850_s3 + $0x110] sm:$0xff] %v8121_v9  ;;  %v8123_v45 = vadd.f32 %v8122_v10, %v7115_v12 }
 0x523   :  { %7266 = vst [vmem:[%s12850_s3 + $0x118] sm:$0xff] %v8123_v45 }
 0x524   :  { %v5964_v16 = vpop.f32.mrb[72].mxu1 }
 0x525   :  { %v8124_v49 = vadd.f32 %v12503_v53, %v5964_v16  ;;  %v7120_v55 = vpop.f32.mrb[72].mxu0  ;;  %v5966_v19 = vpop.f32.mrb[73].mxu1 }
 0x526   :  { %v7122_v58 = vpop.f32.mrb[73].mxu0  ;;  %v5967_v20 = vpop.f32.mrb[74].mxu1 }
 0x527   :  { %v8125_v21 = vadd.f32 %v8124_v49, %v7120_v55  ;;  %v8126_v56 = vadd.f32 %v12503_v53, %v5967_v20  ;;  %v7123_v22 = vpop.f32.mrb[74].mxu0  ;;  %v5969_v60 = vpop.f32.mrb[75].mxu1 }
 0x528   :  { %v7125_v31 = vpop.f32.mrb[75].mxu0 }
 0x529   :  { %7267 = vst [vmem:[%s12850_s3 + $0x120] sm:$0xff] %v8125_v21  ;;  %v8127_v34 = vadd.f32 %v8126_v56, %v7123_v22 }
 0x52b   :  { %7268 = vst [vmem:[%s12850_s3 + $0x128] sm:$0xff] %v8127_v34 }
 0x52c   :  { %v5972_v27 = vpop.f32.mrb[76].mxu1 }
 0x52d   :  { %v8128_v29 = vadd.f32 %v12503_v53, %v5972_v27  ;;  %v7128_v63 = vpop.f32.mrb[76].mxu0  ;;  %v5974_v4 = vpop.f32.mrb[77].mxu1 }
 0x52e   :  { %v7130_v32 = vpop.f32.mrb[77].mxu0  ;;  %v5975_v7 = vpop.f32.mrb[78].mxu1 }
 0x52f   :  { %v8129_v3 = vadd.f32 %v8128_v29, %v7128_v63  ;;  %v8130_v33 = vadd.f32 %v12503_v53, %v5975_v7  ;;  %v7131_v36 = vpop.f32.mrb[78].mxu0  ;;  %v5977_v37 = vpop.f32.mrb[79].mxu1 }
 0x530   :  { %v7133_v41 = vpop.f32.mrb[79].mxu0 }
 0x531   :  { %7269 = vst [vmem:[%s12850_s3 + $0x130] sm:$0xff] %v8129_v3  ;;  %v8131_v14 = vadd.f32 %v8130_v33, %v7131_v36 }
 0x533   :  { %7270 = vst [vmem:[%s12850_s3 + $0x138] sm:$0xff] %v8131_v14 }
 0x534   :  { %v5980_v43 = vpop.f32.mrb[80].mxu1 }
 0x535   :  { %v8132_v17 = vadd.f32 %v12503_v53, %v5980_v43  ;;  %v7136_v8 = vpop.f32.mrb[80].mxu0  ;;  %v5982_v46 = vpop.f32.mrb[81].mxu1 }
 0x536   :  { %v7138_v11 = vpop.f32.mrb[81].mxu0  ;;  %v5983_v48 = vpop.f32.mrb[82].mxu1 }
 0x537   :  { %v8133_v39 = vadd.f32 %v8132_v17, %v7136_v8  ;;  %v8134_v25 = vadd.f32 %v12503_v53, %v5983_v48  ;;  %v7139_v42 = vpop.f32.mrb[82].mxu0  ;;  %v5985_v30 = vpop.f32.mrb[83].mxu1 }
 0x538   :  { %v7141_v51 = vpop.f32.mrb[83].mxu0 }
 0x539   :  { %7271 = vst [vmem:[%s12850_s3 + $0x140] sm:$0xff] %v8133_v39  ;;  %v8135_v52 = vadd.f32 %v8134_v25, %v7139_v42 }
 0x53b   :  { %7272 = vst [vmem:[%s12850_s3 + $0x148] sm:$0xff] %v8135_v52 }
 0x53c   :  { %v5988_v15 = vpop.f32.mrb[84].mxu1 }
 0x53d   :  { %v8136_v54 = vadd.f32 %v12503_v53, %v5988_v15  ;;  %v7144_v18 = vpop.f32.mrb[84].mxu0  ;;  %v5990_v57 = vpop.f32.mrb[85].mxu1 }
 0x53e   :  { %v7146_v40 = vpop.f32.mrb[85].mxu0  ;;  %v5991_v59 = vpop.f32.mrb[86].mxu1 }
 0x53f   :  { %v8137_v61 = vadd.f32 %v8136_v54, %v7144_v18  ;;  %v8138_v62 = vadd.f32 %v12503_v53, %v5991_v59  ;;  %v7147_v44 = vpop.f32.mrb[86].mxu0  ;;  %v5993_v1 = vpop.f32.mrb[87].mxu1 }
 0x540   :  { %v7149_v24 = vpop.f32.mrb[87].mxu0 }
 0x541   :  { %7273 = vst [vmem:[%s12850_s3 + $0x150] sm:$0xff] %v8137_v61  ;;  %v8139_v2 = vadd.f32 %v8138_v62, %v7147_v44 }
 0x543   :  { %7274 = vst [vmem:[%s12850_s3 + $0x158] sm:$0xff] %v8139_v2 }
 0x544   :  { %v5996_v28 = vpop.f32.mrb[88].mxu1 }
 0x545   :  { %v8140_v5 = vadd.f32 %v12503_v53, %v5996_v28  ;;  %v7152_v47 = vpop.f32.mrb[88].mxu0  ;;  %v5998_v50 = vpop.f32.mrb[89].mxu1 }
 0x546   :  { %v7154_v6 = vpop.f32.mrb[89].mxu0  ;;  %v5999_v23 = vpop.f32.mrb[90].mxu1 }
 0x547   :  { %v8141_v35 = vadd.f32 %v8140_v5, %v7152_v47  ;;  %v8142_v26 = vadd.f32 %v12503_v53, %v5999_v23  ;;  %v7155_v38 = vpop.f32.mrb[90].mxu0  ;;  %v6001_v9 = vpop.f32.mrb[91].mxu1 }
 0x548   :  { %v7157_v10 = vpop.f32.mrb[91].mxu0 }
 0x549   :  { %7275 = vst [vmem:[%s12850_s3 + $0x160] sm:$0xff] %v8141_v35  ;;  %v8143_v12 = vadd.f32 %v8142_v26, %v7155_v38 }
 0x54b   :  { %7276 = vst [vmem:[%s12850_s3 + $0x168] sm:$0xff] %v8143_v12 }
 0x54c   :  { %v6004_v13 = vpop.f32.mrb[92].mxu1 }
 0x54d   :  { %v8144_v0 = vadd.f32 %v12503_v53, %v6004_v13  ;;  %v7160_v45 = vpop.f32.mrb[92].mxu0  ;;  %v6006_v16 = vpop.f32.mrb[93].mxu1 }
 0x54e   :  { %v7162_v49 = vpop.f32.mrb[93].mxu0  ;;  %v6007_v55 = vpop.f32.mrb[94].mxu1 }
 0x54f   :  { %v8145_v19 = vadd.f32 %v8144_v0, %v7160_v45  ;;  %v8146_v58 = vadd.f32 %v12503_v53, %v6007_v55  ;;  %v7163_v20 = vpop.f32.mrb[94].mxu0  ;;  %v6009_v21 = vpop.f32.mrb[95].mxu1 }
 0x550   :  { %v7165_v56 = vpop.f32.mrb[95].mxu0 }
 0x551   :  { %7277 = vst [vmem:[%s12850_s3 + $0x170] sm:$0xff] %v8145_v19  ;;  %v8147_v22 = vadd.f32 %v8146_v58, %v7163_v20 }
 0x553   :  { %7278 = vst [vmem:[%s12850_s3 + $0x178] sm:$0xff] %v8147_v22 }
 0x554   :  { %v6012_v60 = vpop.f32.mrb[96].mxu1 }
 0x555   :  { %v8148_v31 = vadd.f32 %v12503_v53, %v6012_v60  ;;  %v7168_v34 = vpop.f32.mrb[96].mxu0  ;;  %v6014_v27 = vpop.f32.mrb[97].mxu1 }
 0x556   :  { %v7170_v29 = vpop.f32.mrb[97].mxu0  ;;  %v6015_v63 = vpop.f32.mrb[98].mxu1 }
 0x557   :  { %v8149_v4 = vadd.f32 %v8148_v31, %v7168_v34  ;;  %v8150_v32 = vadd.f32 %v12503_v53, %v6015_v63  ;;  %v7171_v7 = vpop.f32.mrb[98].mxu0  ;;  %v6017_v3 = vpop.f32.mrb[99].mxu1 }
 0x558   :  { %v7173_v33 = vpop.f32.mrb[99].mxu0 }
 0x559   :  { %7279 = vst [vmem:[%s12850_s3 + $0x180] sm:$0xff] %v8149_v4  ;;  %v8151_v36 = vadd.f32 %v8150_v32, %v7171_v7 }
 0x55b   :  { %7280 = vst [vmem:[%s12850_s3 + $0x188] sm:$0xff] %v8151_v36 }
 0x55c   :  { %v6020_v37 = vpop.f32.mrb[100].mxu1 }
 0x55d   :  { %v8152_v41 = vadd.f32 %v12503_v53, %v6020_v37  ;;  %v7176_v14 = vpop.f32.mrb[100].mxu0  ;;  %v6022_v43 = vpop.f32.mrb[101].mxu1 }
 0x55e   :  { %v7178_v17 = vpop.f32.mrb[101].mxu0  ;;  %v6023_v8 = vpop.f32.mrb[102].mxu1 }
 0x55f   :  { %v8153_v46 = vadd.f32 %v8152_v41, %v7176_v14  ;;  %v8154_v11 = vadd.f32 %v12503_v53, %v6023_v8  ;;  %v7179_v48 = vpop.f32.mrb[102].mxu0  ;;  %v6025_v39 = vpop.f32.mrb[103].mxu1 }
 0x560   :  { %v7181_v25 = vpop.f32.mrb[103].mxu0 }
 0x561   :  { %7281 = vst [vmem:[%s12850_s3 + $0x190] sm:$0xff] %v8153_v46  ;;  %v8155_v42 = vadd.f32 %v8154_v11, %v7179_v48 }
 0x563   :  { %7282 = vst [vmem:[%s12850_s3 + $0x198] sm:$0xff] %v8155_v42 }
 0x564   :  { %v6028_v30 = vpop.f32.mrb[104].mxu1 }
 0x565   :  { %v8156_v51 = vadd.f32 %v12503_v53, %v6028_v30  ;;  %v7184_v52 = vpop.f32.mrb[104].mxu0  ;;  %v6030_v15 = vpop.f32.mrb[105].mxu1 }
 0x566   :  { %v7186_v54 = vpop.f32.mrb[105].mxu0  ;;  %v6031_v18 = vpop.f32.mrb[106].mxu1 }
 0x567   :  { %v8157_v57 = vadd.f32 %v8156_v51, %v7184_v52  ;;  %v8158_v40 = vadd.f32 %v12503_v53, %v6031_v18  ;;  %v7187_v59 = vpop.f32.mrb[106].mxu0  ;;  %v6033_v61 = vpop.f32.mrb[107].mxu1 }
 0x568   :  { %v7189_v62 = vpop.f32.mrb[107].mxu0 }
 0x569   :  { %7283 = vst [vmem:[%s12850_s3 + $0x1a0] sm:$0xff] %v8157_v57  ;;  %v8159_v44 = vadd.f32 %v8158_v40, %v7187_v59 }
 0x56b   :  { %7284 = vst [vmem:[%s12850_s3 + $0x1a8] sm:$0xff] %v8159_v44 }
 0x56c   :  { %v6036_v1 = vpop.f32.mrb[108].mxu1 }
 0x56d   :  { %v8160_v24 = vadd.f32 %v12503_v53, %v6036_v1  ;;  %v7192_v2 = vpop.f32.mrb[108].mxu0  ;;  %v6038_v28 = vpop.f32.mrb[109].mxu1 }
 0x56e   :  { %v7194_v5 = vpop.f32.mrb[109].mxu0  ;;  %v6039_v47 = vpop.f32.mrb[110].mxu1 }
 0x56f   :  { %v8161_v50 = vadd.f32 %v8160_v24, %v7192_v2  ;;  %v8162_v6 = vadd.f32 %v12503_v53, %v6039_v47  ;;  %v7195_v23 = vpop.f32.mrb[110].mxu0  ;;  %v6041_v35 = vpop.f32.mrb[111].mxu1 }
 0x570   :  { %v7197_v26 = vpop.f32.mrb[111].mxu0 }
 0x571   :  { %7285 = vst [vmem:[%s12850_s3 + $0x1b0] sm:$0xff] %v8161_v50  ;;  %v8163_v38 = vadd.f32 %v8162_v6, %v7195_v23 }
 0x573   :  { %7286 = vst [vmem:[%s12850_s3 + $0x1b8] sm:$0xff] %v8163_v38 }
 0x574   :  { %v6044_v9 = vpop.f32.mrb[112].mxu1 }
 0x575   :  { %v8164_v10 = vadd.f32 %v12503_v53, %v6044_v9  ;;  %v7200_v12 = vpop.f32.mrb[112].mxu0  ;;  %v6046_v13 = vpop.f32.mrb[113].mxu1 }
 0x576   :  { %v7202_v0 = vpop.f32.mrb[113].mxu0  ;;  %v6047_v45 = vpop.f32.mrb[114].mxu1 }
 0x577   :  { %v8165_v16 = vadd.f32 %v8164_v10, %v7200_v12  ;;  %v8166_v49 = vadd.f32 %v12503_v53, %v6047_v45  ;;  %v7203_v55 = vpop.f32.mrb[114].mxu0  ;;  %v6049_v19 = vpop.f32.mrb[115].mxu1 }
 0x578   :  { %v7205_v58 = vpop.f32.mrb[115].mxu0 }
 0x579   :  { %7287 = vst [vmem:[%s12850_s3 + $0x1c0] sm:$0xff] %v8165_v16  ;;  %v8167_v20 = vadd.f32 %v8166_v49, %v7203_v55 }
 0x57b   :  { %7288 = vst [vmem:[%s12850_s3 + $0x1c8] sm:$0xff] %v8167_v20 }
 0x57c   :  { %v6052_v21 = vpop.f32.mrb[116].mxu1 }
 0x57d   :  { %v8168_v56 = vadd.f32 %v12503_v53, %v6052_v21  ;;  %v7208_v22 = vpop.f32.mrb[116].mxu0  ;;  %v6054_v60 = vpop.f32.mrb[117].mxu1 }
 0x57e   :  { %v7210_v31 = vpop.f32.mrb[117].mxu0  ;;  %v6055_v34 = vpop.f32.mrb[118].mxu1 }
 0x57f   :  { %v8169_v27 = vadd.f32 %v8168_v56, %v7208_v22  ;;  %v8170_v29 = vadd.f32 %v12503_v53, %v6055_v34  ;;  %v7211_v63 = vpop.f32.mrb[118].mxu0  ;;  %v6057_v4 = vpop.f32.mrb[119].mxu1 }
 0x580   :  { %v7213_v32 = vpop.f32.mrb[119].mxu0 }
 0x581   :  { %7289 = vst [vmem:[%s12850_s3 + $0x1d0] sm:$0xff] %v8169_v27  ;;  %v8171_v7 = vadd.f32 %v8170_v29, %v7211_v63 }
 0x583   :  { %7290 = vst [vmem:[%s12850_s3 + $0x1d8] sm:$0xff] %v8171_v7 }
 0x584   :  { %v6060_v3 = vpop.f32.mrb[120].mxu1 }
 0x585   :  { %v8172_v33 = vadd.f32 %v12503_v53, %v6060_v3  ;;  %v7216_v36 = vpop.f32.mrb[120].mxu0  ;;  %v6062_v37 = vpop.f32.mrb[121].mxu1 }
 0x586   :  { %v7218_v41 = vpop.f32.mrb[121].mxu0  ;;  %v6063_v14 = vpop.f32.mrb[122].mxu1 }
 0x587   :  { %v8173_v43 = vadd.f32 %v8172_v33, %v7216_v36  ;;  %v8174_v17 = vadd.f32 %v12503_v53, %v6063_v14  ;;  %v7219_v8 = vpop.f32.mrb[122].mxu0  ;;  %v6065_v46 = vpop.f32.mrb[123].mxu1 }
 0x588   :  { %v7221_v11 = vpop.f32.mrb[123].mxu0 }
 0x589   :  { %7291 = vst [vmem:[%s12850_s3 + $0x1e0] sm:$0xff] %v8173_v43  ;;  %v8175_v48 = vadd.f32 %v8174_v17, %v7219_v8 }
 0x58b   :  { %7292 = vst [vmem:[%s12850_s3 + $0x1e8] sm:$0xff] %v8175_v48 }
 0x58c   :  { %v6068_v39 = vpop.f32.mrb[124].mxu1 }
 0x58d   :  { %v8176_v25 = vadd.f32 %v12503_v53, %v6068_v39  ;;  %v7224_v42 = vpop.f32.mrb[124].mxu0  ;;  %v6070_v30 = vpop.f32.mrb[125].mxu1 }
 0x58e   :  { %v7226_v51 = vpop.f32.mrb[125].mxu0  ;;  %v6071_v52 = vpop.f32.mrb[126].mxu1 }
 0x58f   :  { %v8177_v15 = vadd.f32 %v8176_v25, %v7224_v42  ;;  %v8178_v54 = vadd.f32 %v12503_v53, %v6071_v52  ;;  %v7227_v18 = vpop.f32.mrb[126].mxu0  ;;  %v6073_v57 = vpop.f32.mrb[127].mxu1 }
 0x590   :  { %v7229_v40 = vpop.f32.mrb[127].mxu0 }
 0x591   :  { %7293 = vst [vmem:[%s12850_s3 + $0x1f0] sm:$0xff] %v8177_v15  ;;  %v8179_v59 = vadd.f32 %v8178_v54, %v7227_v18 }
 0x593   :  { %7294 = vst [vmem:[%s12850_s3 + $0x1f8] sm:$0xff] %v8179_v59 }

</bundles_post_ra>
